<compile_context>
chip_gen: v7x
topology: tpu7x:2x2x1
jax: 0.10.0
libtpu: 0.0.40
codegen_flags: <defaults>
</compile_context>

<pallas_src>
import functools

import jax
import jax.numpy as jnp
from jax.experimental import pallas as pl
from jax.experimental.pallas import tpu as pltpu


def _round_up(x, m):
    return ((x + m - 1) // m) * m


# ----------------------------------------------------------------------------
# Generic stride-1 conv kernel: grid = (row tiles, KH taps).
# Optional fused per-(row, in-channel) scale (SE rescale) and optional
# per-row spatial-sum epilogue output (feeds the SE average pool).
# ----------------------------------------------------------------------------
def _conv_kernel(*refs, KW, oW, relu, has_scale, has_sums):
    if has_scale:
        x_ref, w_ref, shift_ref, scale_ref = refs[:4]
        refs = refs[4:]
    else:
        x_ref, w_ref, shift_ref = refs[:3]
        scale_ref = None
        refs = refs[3:]
    if has_sums:
        o_ref, sums_ref, acc_ref = refs
    else:
        (o_ref, acc_ref), sums_ref = refs, None

    kh = pl.program_id(1)

    @pl.when(kh == 0)
    def _init():
        acc_ref[...] = jnp.zeros_like(acc_ref)

    x = x_ref[0]                                      # (tr, Wp, Cin) bf16
    if has_scale:
        # SE channel rescale fused into the conv's input read.
        x = x * scale_ref[...][:, None, :]
    tr = x.shape[0]
    cin = x.shape[-1]

    # Gather the KW width-taps in VMEM (im2col never hits HBM) -> one bf16
    # MXU matmul per kh tap-row with K = KW*Cin, accumulated in f32.
    taps = [x[:, kw:kw + oW, :] for kw in range(KW)]
    patches = taps[0] if KW == 1 else jnp.concatenate(taps, axis=-1)
    patches = patches.reshape(tr * oW, KW * cin)
    acc_ref[...] += jnp.dot(patches, w_ref[0],
                            preferred_element_type=jnp.float32)

    @pl.when(kh == pl.num_programs(1) - 1)
    def _finalize():
        y = acc_ref[...] + shift_ref[...]             # f32 epilogue
        if relu:
            y = jnp.maximum(y, 0.0)
        o_ref[...] = y.astype(o_ref.dtype)
        if has_sums:
            # per-output-row spatial sum (over oW) -> SE global-average input
            sums_ref[...] = y.reshape(tr, oW, -1).sum(axis=1)


# ----------------------------------------------------------------------------
# Wrapper: padding / KH-shifted stack / specs (plain-JAX glue only).
# ----------------------------------------------------------------------------
def conv2d_pallas(x_nhwc, w_hwio, shift, padding, *, relu,
                  out_dtype=jnp.bfloat16, in_scale=None,
                  emit_row_sums=False, row_tile=256):
    """Conv2d(stride=1) + folded-BN shift (+ ReLU), Pallas-tiled.

    x_nhwc   : (N, H, W, Cin)
    w_hwio   : (KH, KW, Cin, Cout)  (any BN scale already folded in)
    shift    : (Cout,)              bias / folded-BN shift
    in_scale : optional (N*oH, Cin) per-(batch,channel) input rescale (SE)
    emit_row_sums: also return per-output-row channel sums (N*oH, Cout) f32
    """
    N, H, W, Cin = x_nhwc.shape
    KH, KW, _, Cout = w_hwio.shape
    ph, pw = padding
    oH = H + 2 * ph - KH + 1
    oW = W + 2 * pw - KW + 1
    Wp = W + 2 * pw
    M = N * oH

    xb = x_nhwc.astype(jnp.bfloat16)
    if ph or pw:
        xb = jnp.pad(xb, ((0, 0), (ph, ph), (pw, pw), (0, 0)))
    if KH == 1:
        # 1x1 conv: no im2col at all, just a reshape.
        xs = xb.reshape(1, M, Wp, Cin)
    else:
        # KH row-shifted views of the padded activation (blow-up KH, not KH*KW).
        xs = jnp.stack([xb[:, kh:kh + oH] for kh in range(KH)], axis=0)
        xs = xs.reshape(KH, M, Wp, Cin)

    tr = min(row_tile, _round_up(M, 8))
    Mp = _round_up(M, tr)
    if Mp != M:
        xs = jnp.pad(xs, ((0, 0), (0, Mp - M), (0, 0), (0, 0)))

    w3 = w_hwio.astype(jnp.bfloat16).reshape(KH, KW * Cin, Cout)
    shift2 = shift.astype(jnp.float32).reshape(1, Cout)

    inputs = [xs, w3, shift2]
    in_specs = [
        pl.BlockSpec((1, tr, Wp, Cin), lambda i, kh: (kh, i, 0, 0)),
        pl.BlockSpec((1, KW * Cin, Cout), lambda i, kh: (kh, 0, 0)),
        pl.BlockSpec((1, Cout), lambda i, kh: (0, 0)),
    ]
    has_scale = in_scale is not None
    if has_scale:
        sc = in_scale.astype(jnp.bfloat16)
        if Mp != M:
            sc = jnp.pad(sc, ((0, Mp - M), (0, 0)))
        inputs.append(sc)
        in_specs.append(pl.BlockSpec((tr, Cin), lambda i, kh: (i, 0)))

    out_shape = [jax.ShapeDtypeStruct((Mp * oW, Cout), out_dtype)]
    out_specs = [pl.BlockSpec((tr * oW, Cout), lambda i, kh: (i, 0))]
    if emit_row_sums:
        out_shape.append(jax.ShapeDtypeStruct((Mp, Cout), jnp.float32))
        out_specs.append(pl.BlockSpec((tr, Cout), lambda i, kh: (i, 0)))

    kernel = functools.partial(_conv_kernel, KW=KW, oW=oW, relu=relu,
                               has_scale=has_scale, has_sums=emit_row_sums)
    res = pl.pallas_call(
        kernel,
        grid=(Mp // tr, KH),                       # reduction (KH) axis last
        in_specs=in_specs,
        out_specs=out_specs if emit_row_sums else out_specs[0],
        out_shape=out_shape if emit_row_sums else out_shape[0],
        scratch_shapes=[pltpu.VMEM((tr * oW, Cout), jnp.float32)],
        compiler_params=pltpu.CompilerParams(
            dimension_semantics=("parallel", "arbitrary")),
    )(*inputs)

    if emit_row_sums:
        out2d, row_sums = res
    else:
        out2d, row_sums = res, None
    out = out2d[:M * oW].reshape(N, oH, oW, Cout)
    if emit_row_sums:
        return out, row_sums[:M]
    return out


# ----------------------------------------------------------------------------
# Small helpers
# ----------------------------------------------------------------------------
def _bn_fold(gamma, beta, mean, var, eps=1e-5):
    scale = gamma / jnp.sqrt(var + eps)
    shift = beta - mean * scale
    return scale, shift


def _fuse_branch_weights(w0, w1, w2):
    """Zero-pad the (3,1) and (5,5) branch kernels into the (7,5) footprint
    (centres aligned; exact because the inputs are zero-padded) and concat
    along Cout so all three branches run as ONE conv."""
    KH, KW, c, _ = w2.shape                          # (7, 5, c4, c4)
    z0 = jnp.zeros((KH, KW, c, c), w0.dtype).at[2:5, 2:3].set(w0)
    z1 = jnp.zeros((KH, KW, c, c), w1.dtype).at[1:6, 0:5].set(w1)
    return jnp.concatenate([z0, z1, w2], axis=-1)    # (7, 5, c4, 3*c4)


# ----------------------------------------------------------------------------
# Parameter init (deterministic, synthetic; matches module structure)
# ----------------------------------------------------------------------------
def init_params(key, dim_in):
    c4 = dim_in // 4
    c3 = c4 * 3
    hid = max(c3 // 16, 1)

    def kaiming(k, shape):  # HWIO, fan_in = KH*KW*Cin (kaiming_normal, relu)
        fan_in = shape[0] * shape[1] * shape[2]
        return jax.random.normal(k, shape, jnp.float32) * jnp.sqrt(2.0 / fan_in)

    ks = jax.random.split(key, 20)
    p = {}
    # self.conv = convolution(1, dim_in, dim_in//4): 1x1 conv (no bias) + BN + ReLU
    p["w_conv1"] = kaiming(ks[0], (1, 1, dim_in, c4))
    p["bn1_gamma"] = 1.0 + 0.1 * jax.random.normal(ks[1], (c4,), jnp.float32)
    p["bn1_beta"] = 0.1 * jax.random.normal(ks[2], (c4,), jnp.float32)
    p["bn1_mean"] = 0.1 * jax.random.normal(ks[3], (c4,), jnp.float32)
    p["bn1_var"] = jnp.abs(1.0 + 0.1 * jax.random.normal(ks[4], (c4,), jnp.float32))
    # branches (rot=False): Conv2d with bias, kernels (3,1)/(5,5)/(7,5), pads (1,0)/(2,2)/(3,2)
    p["w_b0"] = kaiming(ks[5], (3, 1, c4, c4))
    p["b_b0"] = 0.01 * jax.random.normal(ks[6], (c4,), jnp.float32)
    p["w_b1"] = kaiming(ks[7], (5, 5, c4, c4))
    p["b_b1"] = 0.01 * jax.random.normal(ks[8], (c4,), jnp.float32)
    p["w_b2"] = kaiming(ks[9], (7, 5, c4, c4))
    p["b_b2"] = 0.01 * jax.random.normal(ks[10], (c4,), jnp.float32)
    # fc: Linear(c3, c3//16, bias=False) -> ReLU -> Linear(c3//16, c3, bias=False) -> Sigmoid
    p["w_fc1"] = jax.random.normal(ks[11], (c3, hid), jnp.float32) * jnp.sqrt(1.0 / c3)
    p["w_fc2"] = jax.random.normal(ks[12], (hid, c3), jnp.float32) * jnp.sqrt(1.0 / hid)
    # self.out = convolution(3, c3, dim_in): 3x3 conv (no bias) + BN + ReLU
    p["w_out"] = kaiming(ks[13], (3, 3, c3, dim_in))
    p["bno_gamma"] = 1.0 + 0.1 * jax.random.normal(ks[14], (dim_in,), jnp.float32)
    p["bno_beta"] = 0.1 * jax.random.normal(ks[15], (dim_in,), jnp.float32)
    p["bno_mean"] = 0.1 * jax.random.normal(ks[16], (dim_in,), jnp.float32)
    p["bno_var"] = jnp.abs(1.0 + 0.1 * jax.random.normal(ks[17], (dim_in,), jnp.float32))
    return p


# ----------------------------------------------------------------------------
# SRM forward
# ----------------------------------------------------------------------------
def srm_forward(x_nchw, params):
    x = jnp.transpose(x_nchw, (0, 2, 3, 1))          # NCHW -> NHWC
    N = x.shape[0]

    # --- self.conv: 1x1 conv + BN + ReLU (BN scale folded into weights) -----
    s1, sh1 = _bn_fold(params["bn1_gamma"], params["bn1_beta"],
                       params["bn1_mean"], params["bn1_var"])
    x_cmp = conv2d_pallas(x, params["w_conv1"] * s1, sh1, (0, 0),
                          relu=True, out_dtype=jnp.bfloat16)

    # --- 3 branches fused into one 7x5 conv with Cout = 3*c4 ----------------
    w_br = _fuse_branch_weights(params["w_b0"], params["w_b1"], params["w_b2"])
    b_br = jnp.concatenate([params["b_b0"], params["b_b1"], params["b_b2"]])
    fea_cat, row_sums = conv2d_pallas(
        x_cmp, w_br, b_br, (3, 2), relu=False, out_dtype=jnp.bfloat16,
        emit_row_sums=True)                          # (N,H,W,3c4), (N*H,3c4) f32

    # --- squeeze-excitation: pool from kernel epilogue, tiny FCs in f32 -----
    _, oH, oW, c3 = fea_cat.shape
    pooled = row_sums.reshape(N, oH, c3).sum(axis=1) / float(oH * oW)   # (N,c3)
    h = jnp.maximum(pooled @ params["w_fc1"], 0.0)
    se = jax.nn.sigmoid(h @ params["w_fc2"])                            # (N,c3)
    se_rows = jnp.repeat(se, oH, axis=0)                                # (N*oH,c3)

    # --- self.out: 3x3 conv + BN + ReLU; SE rescale fused into its input ----
    so, sho = _bn_fold(params["bno_gamma"], params["bno_beta"],
                       params["bno_mean"], params["bno_var"])
    out = conv2d_pallas(fea_cat, params["w_out"] * so, sho, (1, 1),
                        relu=True, out_dtype=jnp.float32, in_scale=se_rows)
    return jnp.transpose(out, (0, 3, 1, 2))          # NHWC -> NCHW


# ----------------------------------------------------------------------------
if __name__ == "__main__":
    key = jax.random.PRNGKey(0)
    k_x, k_p = jax.random.split(key)

    N, dim_in, H, W = 2, 64, 16, 16
    x = jax.random.normal(k_x, (N, dim_in, H, W), jnp.float32)  # PyTorch NCHW input
    params = init_params(k_p, dim_in)

    out = jax.jit(srm_forward)(x, params)
    out = jax.block_until_ready(out)
    assert out.shape == (N, dim_in, H, W), out.shape
    assert bool(jnp.all(jnp.isfinite(out)))
    print("KERNEL_OK")
</pallas_src>

<mosaic_0001>
module attributes {stable_mosaic.version = 11 : i64} {
  func.func @_conv_kernel(%arg0: i32, %arg1: i32, %arg2: memref<1x32x16x64xbf16, #tpu.memory_space<vmem>>, %arg3: memref<1x64x16xbf16, #tpu.memory_space<vmem>>, %arg4: memref<1x16xf32, #tpu.memory_space<vmem>>, %arg5: memref<512x16xbf16, #tpu.memory_space<vmem>>, %arg6: memref<512x16xf32, #tpu.memory_space<vmem>>) attributes {dimension_semantics = [#tpu.dimension_semantics<parallel>, #tpu.dimension_semantics<arbitrary>], iteration_bounds = array<i64: 1, 1>, scalar_prefetch = 0 : i64, scratch_operands = 1 : i64, tpu.core_type = #tpu.core_type<tc>, window_params = [{transform_indices = @transform_0, window_bounds = array<i64: 1, 32, 16, 64>}, {transform_indices = @transform_1, window_bounds = array<i64: 1, 64, 16>}, {pipeline_mode = #tpu.pipeline_mode<synchronous>, transform_indices = @transform_2, window_bounds = array<i64: 1, 16>}, {transform_indices = @transform_3, window_bounds = array<i64: 512, 16>}]} {
    %c0_i32 = arith.constant 0 : i32
    %0 = arith.cmpi eq, %arg1, %c0_i32 : i32
    %1 = arith.extui %0 : i1 to i32
    %c0_i32_0 = arith.constant 0 : i32
    %2 = arith.cmpi ne, %1, %c0_i32_0 : i32
    scf.if %2 {
      %cst_13 = arith.constant 0.000000e+00 : f32
      %15 = vector.broadcast %cst_13 : f32 to vector<512x16xf32>
      %c0_14 = arith.constant 0 : index
      %c0_15 = arith.constant 0 : index
      %16 = vector.load %arg6[%c0_14, %c0_15] : memref<512x16xf32, #tpu.memory_space<vmem>>, vector<512x16xf32>
      tpu.vector_store %arg6[%c0_14, %c0_15], %15 {strides = array<i32>} : memref<512x16xf32, #tpu.memory_space<vmem>>, vector<512x16xf32>,
    } else {
    }
    %c0 = arith.constant 0 : index
    %c0_1 = arith.constant 0 : index
    %c0_2 = arith.constant 0 : index
    %c0_3 = arith.constant 0 : index
    %3 = vector.load %arg2[%c0, %c0_1, %c0_2, %c0_3] : memref<1x32x16x64xbf16, #tpu.memory_space<vmem>>, vector<1x32x16x64xbf16>
    %4 = vector.shape_cast %3 : vector<1x32x16x64xbf16> to vector<32x16x64xbf16>
    %5 = vector.shape_cast %4 : vector<32x16x64xbf16> to vector<512x64xbf16>
    %c0_4 = arith.constant 0 : index
    %c0_5 = arith.constant 0 : index
    %6 = vector.load %arg6[%c0_4, %c0_5] : memref<512x16xf32, #tpu.memory_space<vmem>>, vector<512x16xf32>
    %c0_6 = arith.constant 0 : index
    %c0_7 = arith.constant 0 : index
    %c0_8 = arith.constant 0 : index
    %7 = vector.load %arg3[%c0_6, %c0_7, %c0_8] : memref<1x64x16xbf16, #tpu.memory_space<vmem>>, vector<1x64x16xbf16>
    %8 = vector.shape_cast %7 : vector<1x64x16xbf16> to vector<64x16xbf16>
    %cst = arith.constant dense<0.000000e+00> : vector<512x16xf32>
    %9 = tpu.matmul %5, %8, %cst {dimension_numbers = #tpu.dot_dimension_numbers<[1], [0], [0], [1], [0, 0, 1, 1], [], []>} : vector<512x64xbf16>, vector<64x16xbf16>, vector<512x16xf32> -> vector<512x16xf32>
    %10 = arith.addf %6, %9 : vector<512x16xf32>
    %c0_9 = arith.constant 0 : index
    %c0_10 = arith.constant 0 : index
    %11 = vector.load %arg6[%c0_9, %c0_10] : memref<512x16xf32, #tpu.memory_space<vmem>>, vector<512x16xf32>
    tpu.vector_store %arg6[%c0_9, %c0_10], %10 {strides = array<i32>} : memref<512x16xf32, #tpu.memory_space<vmem>>, vector<512x16xf32>,
    %c0_i32_11 = arith.constant 0 : i32
    %12 = arith.cmpi eq, %arg1, %c0_i32_11 : i32
    %13 = arith.extui %12 : i1 to i32
    %c0_i32_12 = arith.constant 0 : i32
    %14 = arith.cmpi ne, %13, %c0_i32_12 : i32
    scf.if %14 {
      %c0_13 = arith.constant 0 : index
      %c0_14 = arith.constant 0 : index
      %15 = vector.load %arg6[%c0_13, %c0_14] : memref<512x16xf32, #tpu.memory_space<vmem>>, vector<512x16xf32>
      %c0_15 = arith.constant 0 : index
      %c0_16 = arith.constant 0 : index
      %16 = vector.load %arg4[%c0_15, %c0_16] : memref<1x16xf32, #tpu.memory_space<vmem>>, vector<1x16xf32>
      %17 = vector.broadcast %16 : vector<1x16xf32> to vector<512x16xf32>
      %18 = arith.addf %15, %17 : vector<512x16xf32>
      %cst_17 = arith.constant 0.000000e+00 : f32
      %19 = vector.broadcast %cst_17 : f32 to vector<512x16xf32>
      %20 = arith.maximumf %18, %19 : vector<512x16xf32>
      %21 = arith.truncf %20 : vector<512x16xf32> to vector<512x16xbf16>
      %c0_18 = arith.constant 0 : index
      %c0_19 = arith.constant 0 : index
      %22 = vector.load %arg5[%c0_18, %c0_19] : memref<512x16xbf16, #tpu.memory_space<vmem>>, vector<512x16xbf16>
      tpu.vector_store %arg5[%c0_18, %c0_19], %21 {strides = array<i32>} : memref<512x16xbf16, #tpu.memory_space<vmem>>, vector<512x16xbf16>,
    } else {
    }
    return
  }
  func.func @transform_0(%arg0: i32, %arg1: i32) -> (i32, i32, i32, i32) {
    %c0_i32 = arith.constant 0 : i32
    %c0_i32_0 = arith.constant 0 : i32
    %c0_i32_1 = arith.constant 0 : i32
    return %arg1, %arg0, %c0_i32, %c0_i32_0 : i32, i32, i32, i32
  }
  func.func @transform_1(%arg0: i32, %arg1: i32) -> (i32, i32, i32) {
    %c0_i32 = arith.constant 0 : i32
    %c0_i32_0 = arith.constant 0 : i32
    %c0_i32_1 = arith.constant 0 : i32
    return %arg1, %c0_i32, %c0_i32_0 : i32, i32, i32
  }
  func.func @transform_2(%arg0: i32, %arg1: i32) -> (i32, i32) {
    %c0_i32 = arith.constant 0 : i32
    %c0_i32_0 = arith.constant 0 : i32
    %c0_i32_1 = arith.constant 0 : i32
    return %c0_i32, %c0_i32_0 : i32, i32
  }
  func.func @transform_3(%arg0: i32, %arg1: i32) -> (i32, i32) {
    %c0_i32 = arith.constant 0 : i32
    %c0_i32_0 = arith.constant 0 : i32
    return %arg0, %c0_i32 : i32, i32
  }
}

module attributes {stable_mosaic.version = 11 : i64} {
  func.func @_conv_kernel(%arg0: i32, %arg1: i32, %arg2: memref<1x32x20x16xbf16, #tpu.memory_space<vmem>>, %arg3: memref<1x80x48xbf16, #tpu.memory_space<vmem>>, %arg4: memref<1x48xf32, #tpu.memory_space<vmem>>, %arg5: memref<512x48xbf16, #tpu.memory_space<vmem>>, %arg6: memref<32x48xf32, #tpu.memory_space<vmem>>, %arg7: memref<512x48xf32, #tpu.memory_space<vmem>>) attributes {dimension_semantics = [#tpu.dimension_semantics<parallel>, #tpu.dimension_semantics<arbitrary>], iteration_bounds = array<i64: 1, 7>, scalar_prefetch = 0 : i64, scratch_operands = 1 : i64, tpu.core_type = #tpu.core_type<tc>, window_params = [{transform_indices = @transform_0, window_bounds = array<i64: 1, 32, 20, 16>}, {transform_indices = @transform_1, window_bounds = array<i64: 1, 80, 48>}, {pipeline_mode = #tpu.pipeline_mode<synchronous>, transform_indices = @transform_2, window_bounds = array<i64: 1, 48>}, {transform_indices = @transform_3, window_bounds = array<i64: 512, 48>}, {transform_indices = @transform_4, window_bounds = array<i64: 32, 48>}]} {
    %c0_i32 = arith.constant 0 : i32
    %0 = arith.cmpi eq, %arg1, %c0_i32 : i32
    %1 = arith.extui %0 : i1 to i32
    %c0_i32_0 = arith.constant 0 : i32
    %2 = arith.cmpi ne, %1, %c0_i32_0 : i32
    scf.if %2 {
      %cst_12 = arith.constant 0.000000e+00 : f32
      %21 = vector.broadcast %cst_12 : f32 to vector<512x48xf32>
      %c0_13 = arith.constant 0 : index
      %c0_14 = arith.constant 0 : index
      %22 = vector.load %arg7[%c0_13, %c0_14] : memref<512x48xf32, #tpu.memory_space<vmem>>, vector<512x48xf32>
      tpu.vector_store %arg7[%c0_13, %c0_14], %21 {strides = array<i32>} : memref<512x48xf32, #tpu.memory_space<vmem>>, vector<512x48xf32>,
    } else {
    }
    %c0 = arith.constant 0 : index
    %c0_1 = arith.constant 0 : index
    %c0_2 = arith.constant 0 : index
    %c0_3 = arith.constant 0 : index
    %3 = vector.load %arg2[%c0, %c0_1, %c0_2, %c0_3] : memref<1x32x20x16xbf16, #tpu.memory_space<vmem>>, vector<1x32x20x16xbf16>
    %4 = vector.shape_cast %3 : vector<1x32x20x16xbf16> to vector<32x20x16xbf16>
    %5 = vector.extract_strided_slice %4 {offsets = [0, 0, 0], sizes = [32, 16, 16], strides = [1, 1, 1]} : vector<32x20x16xbf16> to vector<32x16x16xbf16>
    %6 = vector.extract_strided_slice %4 {offsets = [0, 1, 0], sizes = [32, 16, 16], strides = [1, 1, 1]} : vector<32x20x16xbf16> to vector<32x16x16xbf16>
    %7 = vector.extract_strided_slice %4 {offsets = [0, 2, 0], sizes = [32, 16, 16], strides = [1, 1, 1]} : vector<32x20x16xbf16> to vector<32x16x16xbf16>
    %8 = vector.extract_strided_slice %4 {offsets = [0, 3, 0], sizes = [32, 16, 16], strides = [1, 1, 1]} : vector<32x20x16xbf16> to vector<32x16x16xbf16>
    %9 = vector.extract_strided_slice %4 {offsets = [0, 4, 0], sizes = [32, 16, 16], strides = [1, 1, 1]} : vector<32x20x16xbf16> to vector<32x16x16xbf16>
    %10 = tpu.concatenate %5, %6, %7, %8, %9 in 2 : vector<32x16x16xbf16>, vector<32x16x16xbf16>, vector<32x16x16xbf16>, vector<32x16x16xbf16>, vector<32x16x16xbf16> -> vector<32x16x80xbf16>
    %11 = vector.shape_cast %10 : vector<32x16x80xbf16> to vector<512x80xbf16>
    %c0_4 = arith.constant 0 : index
    %c0_5 = arith.constant 0 : index
    %12 = vector.load %arg7[%c0_4, %c0_5] : memref<512x48xf32, #tpu.memory_space<vmem>>, vector<512x48xf32>
    %c0_6 = arith.constant 0 : index
    %c0_7 = arith.constant 0 : index
    %c0_8 = arith.constant 0 : index
    %13 = vector.load %arg3[%c0_6, %c0_7, %c0_8] : memref<1x80x48xbf16, #tpu.memory_space<vmem>>, vector<1x80x48xbf16>
    %14 = vector.shape_cast %13 : vector<1x80x48xbf16> to vector<80x48xbf16>
    %cst = arith.constant dense<0.000000e+00> : vector<512x48xf32>
    %15 = tpu.matmul %11, %14, %cst {dimension_numbers = #tpu.dot_dimension_numbers<[1], [0], [0], [1], [0, 0, 1, 1], [], []>} : vector<512x80xbf16>, vector<80x48xbf16>, vector<512x48xf32> -> vector<512x48xf32>
    %16 = arith.addf %12, %15 : vector<512x48xf32>
    %c0_9 = arith.constant 0 : index
    %c0_10 = arith.constant 0 : index
    %17 = vector.load %arg7[%c0_9, %c0_10] : memref<512x48xf32, #tpu.memory_space<vmem>>, vector<512x48xf32>
    tpu.vector_store %arg7[%c0_9, %c0_10], %16 {strides = array<i32>} : memref<512x48xf32, #tpu.memory_space<vmem>>, vector<512x48xf32>,
    %c6_i32 = arith.constant 6 : i32
    %18 = arith.cmpi eq, %arg1, %c6_i32 : i32
    %19 = arith.extui %18 : i1 to i32
    %c0_i32_11 = arith.constant 0 : i32
    %20 = arith.cmpi ne, %19, %c0_i32_11 : i32
    scf.if %20 {
      %c0_12 = arith.constant 0 : index
      %c0_13 = arith.constant 0 : index
      %21 = vector.load %arg7[%c0_12, %c0_13] : memref<512x48xf32, #tpu.memory_space<vmem>>, vector<512x48xf32>
      %c0_14 = arith.constant 0 : index
      %c0_15 = arith.constant 0 : index
      %22 = vector.load %arg4[%c0_14, %c0_15] : memref<1x48xf32, #tpu.memory_space<vmem>>, vector<1x48xf32>
      %23 = vector.broadcast %22 : vector<1x48xf32> to vector<512x48xf32>
      %24 = arith.addf %21, %23 : vector<512x48xf32>
      %25 = arith.truncf %24 : vector<512x48xf32> to vector<512x48xbf16>
      %c0_16 = arith.constant 0 : index
      %c0_17 = arith.constant 0 : index
      %26 = vector.load %arg5[%c0_16, %c0_17] : memref<512x48xbf16, #tpu.memory_space<vmem>>, vector<512x48xbf16>
      tpu.vector_store %arg5[%c0_16, %c0_17], %25 {strides = array<i32>} : memref<512x48xbf16, #tpu.memory_space<vmem>>, vector<512x48xbf16>,
      %27 = vector.shape_cast %24 : vector<512x48xf32> to vector<32x16x48xf32>
      %cst_18 = arith.constant dense<0.000000e+00> : vector<32x48xf32>
      %28 = vector.multi_reduction <add>, %27, %cst_18 [1] : vector<32x16x48xf32> to vector<32x48xf32>
      %c0_19 = arith.constant 0 : index
      %c0_20 = arith.constant 0 : index
      %29 = vector.load %arg6[%c0_19, %c0_20] : memref<32x48xf32, #tpu.memory_space<vmem>>, vector<32x48xf32>
      tpu.vector_store %arg6[%c0_19, %c0_20], %28 {strides = array<i32>} : memref<32x48xf32, #tpu.memory_space<vmem>>, vector<32x48xf32>,
    } else {
    }
    return
  }
  func.func @transform_0(%arg0: i32, %arg1: i32) -> (i32, i32, i32, i32) {
    %c0_i32 = arith.constant 0 : i32
    %c0_i32_0 = arith.constant 0 : i32
    %c0_i32_1 = arith.constant 0 : i32
    return %arg1, %arg0, %c0_i32, %c0_i32_0 : i32, i32, i32, i32
  }
  func.func @transform_1(%arg0: i32, %arg1: i32) -> (i32, i32, i32) {
    %c0_i32 = arith.constant 0 : i32
    %c0_i32_0 = arith.constant 0 : i32
    %c0_i32_1 = arith.constant 0 : i32
    return %arg1, %c0_i32, %c0_i32_0 : i32, i32, i32
  }
  func.func @transform_2(%arg0: i32, %arg1: i32) -> (i32, i32) {
    %c0_i32 = arith.constant 0 : i32
    %c0_i32_0 = arith.constant 0 : i32
    %c0_i32_1 = arith.constant 0 : i32
    return %c0_i32, %c0_i32_0 : i32, i32
  }
  func.func @transform_3(%arg0: i32, %arg1: i32) -> (i32, i32) {
    %c0_i32 = arith.constant 0 : i32
    %c0_i32_0 = arith.constant 0 : i32
    return %arg0, %c0_i32 : i32, i32
  }
  func.func @transform_4(%arg0: i32, %arg1: i32) -> (i32, i32) {
    %c0_i32 = arith.constant 0 : i32
    %c0_i32_0 = arith.constant 0 : i32
    return %arg0, %c0_i32 : i32, i32
  }
}

module attributes {stable_mosaic.version = 11 : i64} {
  func.func @_conv_kernel(%arg0: i32, %arg1: i32, %arg2: memref<1x32x18x48xbf16, #tpu.memory_space<vmem>>, %arg3: memref<1x144x64xbf16, #tpu.memory_space<vmem>>, %arg4: memref<1x64xf32, #tpu.memory_space<vmem>>, %arg5: memref<32x48xbf16, #tpu.memory_space<vmem>>, %arg6: memref<512x64xf32, #tpu.memory_space<vmem>>, %arg7: memref<512x64xf32, #tpu.memory_space<vmem>>) attributes {dimension_semantics = [#tpu.dimension_semantics<parallel>, #tpu.dimension_semantics<arbitrary>], iteration_bounds = array<i64: 1, 3>, scalar_prefetch = 0 : i64, scratch_operands = 1 : i64, tpu.core_type = #tpu.core_type<tc>, window_params = [{transform_indices = @transform_0, window_bounds = array<i64: 1, 32, 18, 48>}, {transform_indices = @transform_1, window_bounds = array<i64: 1, 144, 64>}, {pipeline_mode = #tpu.pipeline_mode<synchronous>, transform_indices = @transform_2, window_bounds = array<i64: 1, 64>}, {transform_indices = @transform_3, window_bounds = array<i64: 32, 48>}, {transform_indices = @transform_4, window_bounds = array<i64: 512, 64>}]} {
    %c0_i32 = arith.constant 0 : i32
    %0 = arith.cmpi eq, %arg1, %c0_i32 : i32
    %1 = arith.extui %0 : i1 to i32
    %c0_i32_0 = arith.constant 0 : i32
    %2 = arith.cmpi ne, %1, %c0_i32_0 : i32
    scf.if %2 {
      %cst_14 = arith.constant 0.000000e+00 : f32
      %23 = vector.broadcast %cst_14 : f32 to vector<512x64xf32>
      %c0_15 = arith.constant 0 : index
      %c0_16 = arith.constant 0 : index
      %24 = vector.load %arg7[%c0_15, %c0_16] : memref<512x64xf32, #tpu.memory_space<vmem>>, vector<512x64xf32>
      tpu.vector_store %arg7[%c0_15, %c0_16], %23 {strides = array<i32>} : memref<512x64xf32, #tpu.memory_space<vmem>>, vector<512x64xf32>,
    } else {
    }
    %c0 = arith.constant 0 : index
    %c0_1 = arith.constant 0 : index
    %c0_2 = arith.constant 0 : index
    %c0_3 = arith.constant 0 : index
    %3 = vector.load %arg2[%c0, %c0_1, %c0_2, %c0_3] : memref<1x32x18x48xbf16, #tpu.memory_space<vmem>>, vector<1x32x18x48xbf16>
    %4 = vector.shape_cast %3 : vector<1x32x18x48xbf16> to vector<32x18x48xbf16>
    %c0_4 = arith.constant 0 : index
    %c0_5 = arith.constant 0 : index
    %5 = vector.load %arg5[%c0_4, %c0_5] : memref<32x48xbf16, #tpu.memory_space<vmem>>, vector<32x48xbf16>
    %6 = vector.shape_cast %5 : vector<32x48xbf16> to vector<32x1x48xbf16>
    %7 = vector.broadcast %6 : vector<32x1x48xbf16> to vector<32x18x48xbf16>
    %8 = arith.mulf %4, %7 : vector<32x18x48xbf16>
    %9 = vector.extract_strided_slice %8 {offsets = [0, 0, 0], sizes = [32, 16, 48], strides = [1, 1, 1]} : vector<32x18x48xbf16> to vector<32x16x48xbf16>
    %10 = vector.extract_strided_slice %8 {offsets = [0, 1, 0], sizes = [32, 16, 48], strides = [1, 1, 1]} : vector<32x18x48xbf16> to vector<32x16x48xbf16>
    %11 = vector.extract_strided_slice %8 {offsets = [0, 2, 0], sizes = [32, 16, 48], strides = [1, 1, 1]} : vector<32x18x48xbf16> to vector<32x16x48xbf16>
    %12 = tpu.concatenate %9, %10, %11 in 2 : vector<32x16x48xbf16>, vector<32x16x48xbf16>, vector<32x16x48xbf16> -> vector<32x16x144xbf16>
    %13 = vector.shape_cast %12 : vector<32x16x144xbf16> to vector<512x144xbf16>
    %c0_6 = arith.constant 0 : index
    %c0_7 = arith.constant 0 : index
    %14 = vector.load %arg7[%c0_6, %c0_7] : memref<512x64xf32, #tpu.memory_space<vmem>>, vector<512x64xf32>
    %c0_8 = arith.constant 0 : index
    %c0_9 = arith.constant 0 : index
    %c0_10 = arith.constant 0 : index
    %15 = vector.load %arg3[%c0_8, %c0_9, %c0_10] : memref<1x144x64xbf16, #tpu.memory_space<vmem>>, vector<1x144x64xbf16>
    %16 = vector.shape_cast %15 : vector<1x144x64xbf16> to vector<144x64xbf16>
    %cst = arith.constant dense<0.000000e+00> : vector<512x64xf32>
    %17 = tpu.matmul %13, %16, %cst {dimension_numbers = #tpu.dot_dimension_numbers<[1], [0], [0], [1], [0, 0, 1, 1], [], []>} : vector<512x144xbf16>, vector<144x64xbf16>, vector<512x64xf32> -> vector<512x64xf32>
    %18 = arith.addf %14, %17 : vector<512x64xf32>
    %c0_11 = arith.constant 0 : index
    %c0_12 = arith.constant 0 : index
    %19 = vector.load %arg7[%c0_11, %c0_12] : memref<512x64xf32, #tpu.memory_space<vmem>>, vector<512x64xf32>
    tpu.vector_store %arg7[%c0_11, %c0_12], %18 {strides = array<i32>} : memref<512x64xf32, #tpu.memory_space<vmem>>, vector<512x64xf32>,
    %c2_i32 = arith.constant 2 : i32
    %20 = arith.cmpi eq, %arg1, %c2_i32 : i32
    %21 = arith.extui %20 : i1 to i32
    %c0_i32_13 = arith.constant 0 : i32
    %22 = arith.cmpi ne, %21, %c0_i32_13 : i32
    scf.if %22 {
      %c0_14 = arith.constant 0 : index
      %c0_15 = arith.constant 0 : index
      %23 = vector.load %arg7[%c0_14, %c0_15] : memref<512x64xf32, #tpu.memory_space<vmem>>, vector<512x64xf32>
      %c0_16 = arith.constant 0 : index
      %c0_17 = arith.constant 0 : index
      %24 = vector.load %arg4[%c0_16, %c0_17] : memref<1x64xf32, #tpu.memory_space<vmem>>, vector<1x64xf32>
      %25 = vector.broadcast %24 : vector<1x64xf32> to vector<512x64xf32>
      %26 = arith.addf %23, %25 : vector<512x64xf32>
      %cst_18 = arith.constant 0.000000e+00 : f32
      %27 = vector.broadcast %cst_18 : f32 to vector<512x64xf32>
      %28 = arith.maximumf %26, %27 : vector<512x64xf32>
      %c0_19 = arith.constant 0 : index
      %c0_20 = arith.constant 0 : index
      %29 = vector.load %arg6[%c0_19, %c0_20] : memref<512x64xf32, #tpu.memory_space<vmem>>, vector<512x64xf32>
      tpu.vector_store %arg6[%c0_19, %c0_20], %28 {strides = array<i32>} : memref<512x64xf32, #tpu.memory_space<vmem>>, vector<512x64xf32>,
    } else {
    }
    return
  }
  func.func @transform_0(%arg0: i32, %arg1: i32) -> (i32, i32, i32, i32) {
    %c0_i32 = arith.constant 0 : i32
    %c0_i32_0 = arith.constant 0 : i32
    %c0_i32_1 = arith.constant 0 : i32
    return %arg1, %arg0, %c0_i32, %c0_i32_0 : i32, i32, i32, i32
  }
  func.func @transform_1(%arg0: i32, %arg1: i32) -> (i32, i32, i32) {
    %c0_i32 = arith.constant 0 : i32
    %c0_i32_0 = arith.constant 0 : i32
    %c0_i32_1 = arith.constant 0 : i32
    return %arg1, %c0_i32, %c0_i32_0 : i32, i32, i32
  }
  func.func @transform_2(%arg0: i32, %arg1: i32) -> (i32, i32) {
    %c0_i32 = arith.constant 0 : i32
    %c0_i32_0 = arith.constant 0 : i32
    %c0_i32_1 = arith.constant 0 : i32
    return %c0_i32, %c0_i32_0 : i32, i32
  }
  func.func @transform_3(%arg0: i32, %arg1: i32) -> (i32, i32) {
    %c0_i32 = arith.constant 0 : i32
    %c0_i32_0 = arith.constant 0 : i32
    return %arg0, %c0_i32 : i32, i32
  }
  func.func @transform_4(%arg0: i32, %arg1: i32) -> (i32, i32) {
    %c0_i32 = arith.constant 0 : i32
    %c0_i32_0 = arith.constant 0 : i32
    return %arg0, %c0_i32 : i32, i32
  }
}

</mosaic_0001>

<bundles_post_ra>
// kernel: srm_forward.3
= control target key start
LH: loop header
LB: loop body
LE: loop exit
PB: predicated region body
PF: predicated region fallthrough
CT: control target
= control target key end

     0   :  { %vm19_vm0 = vcmask 130048   ;;  %v1797_v1 = vmov 0.0   ;;  %vm404_vm1 = vcmask 523264   ;;  %vm1377_vm2 = vcmask 125952   ;;  %s2480_s1 = inlined_call_operand.vmem [shape: bf16[1,64,16], index: 1, kind: input, shape index: {}]   ;;  %s2481_s0 = inlined_call_operand.vmem [shape: bf16[1,32,16,64], index: 0, kind: input, shape index: {}]   ;;  %s2482_s2 = inlined_call_operand.vmem [shape: f32[1,16], index: 2, kind: input, shape index: {}]   ;;  %s2483_s3 = inlined_call_operand.vmem [shape: bf16[512,16], index: 3, kind: output, shape index: {}]  }
   0x1   :  { %v1821_v0 = vld [vmem:[%s2480_s1] sm:$0xff]   ;;  %22 = vst.msk [vmem:[#allocation2 + $0x10] sm:$0xff] %vm19_vm0, %v1797_v1  ;;  %20 = vst.msk [vmem:[#allocation2] sm:$0xff] %vm19_vm0, %v1797_v1  ;;  %v1761_v2 = vld [vmem:[%s2480_s1 + $0x8] sm:$0xff]  }
   0x2   :  { %21 = vst.msk [vmem:[#allocation2 + $0x8] sm:$0xff] %vm19_vm0, %v1797_v1  ;;  %23 = vst.msk [vmem:[#allocation2 + $0x18] sm:$0xff] %vm19_vm0, %v1797_v1  ;;  %1679 = vmatprep.subr.bf16.mxu0 %v1821_v0  ;;  %1751 = vmatprep.subr.bf16.mxu1 %v1821_v0  ;;  %v1762_v3 = vld [vmem:[%s2480_s1 + $0x10] sm:$0xff]   ;;  %v1764_v4 = vld [vmem:[%s2481_s0] sm:$0xff]  }
   0x3   :  { %24 = vst.msk [vmem:[#allocation2 + $0x20] sm:$0xff] %vm19_vm0, %v1797_v1  ;;  %25 = vst.msk [vmem:[#allocation2 + $0x28] sm:$0xff] %vm19_vm0, %v1797_v1  ;;  %1680 = vmatpush3.bf16.msra.mxu0 %v1821_v0  ;;  %1755 = vmatpush3.bf16.msra.mxu1 %v1821_v0  ;;  %v1765_v5 = vld [vmem:[%s2481_s0 + $0x80] sm:$0xff]   ;;  %v1763_v6 = vld [vmem:[%s2480_s1 + $0x18] sm:$0xff]  }
   0x4   :  { %26 = vst.msk [vmem:[#allocation2 + $0x30] sm:$0xff] %vm19_vm0, %v1797_v1  ;;  %27 = vst.msk [vmem:[#allocation2 + $0x38] sm:$0xff] %vm19_vm0, %v1797_v1  ;;  %1681 = vmatprep.subr.bf16.mxu0 %v1761_v2  ;;  %1752 = vmatprep.subr.bf16.mxu1 %v1761_v2  ;;  %v1766_v7 = vld [vmem:[%s2481_s0 + $0x8] sm:$0xff]   ;;  %v1768_v9 = vld [vmem:[%s2481_s0 + $0x10] sm:$0xff]  }
   0x5   :  { %28 = vst.msk [vmem:[#allocation2 + $0x40] sm:$0xff] %vm19_vm0, %v1797_v1  ;;  %29 = vst.msk [vmem:[#allocation2 + $0x48] sm:$0xff] %vm19_vm0, %v1797_v1  ;;  %1687 = vmatprep.mubr.msk.bf16.mxu0 %vm404_vm1, %v1764_v4  ;;  %1719 = vmatprep.mubr.msk.bf16.mxu1 %vm404_vm1, %v1765_v5  ;;  %v1767_v8 = vld [vmem:[%s2481_s0 + $0x88] sm:$0xff]   ;;  %v1769_v10 = vld [vmem:[%s2481_s0 + $0x90] sm:$0xff]  }
   0x6   :  { %30 = vst.msk [vmem:[#allocation2 + $0x50] sm:$0xff] %vm19_vm0, %v1797_v1  ;;  %31 = vst.msk [vmem:[#allocation2 + $0x58] sm:$0xff] %vm19_vm0, %v1797_v1  ;;  %v1770_v11 = vld [vmem:[%s2481_s0 + $0x18] sm:$0xff]   ;;  %v1772_v13 = vld [vmem:[%s2481_s0 + $0x20] sm:$0xff]  }
   0x7   :  { %32 = vst.msk [vmem:[#allocation2 + $0x60] sm:$0xff] %vm19_vm0, %v1797_v1  ;;  %33 = vst.msk [vmem:[#allocation2 + $0x68] sm:$0xff] %vm19_vm0, %v1797_v1  ;;  %1682 = vmatpush3.bf16.msra.mxu0 %v1761_v2  ;;  %1756 = vmatpush3.bf16.msra.mxu1 %v1761_v2  ;;  %v1771_v12 = vld [vmem:[%s2481_s0 + $0x98] sm:$0xff]   ;;  %v1773_v14 = vld [vmem:[%s2481_s0 + $0xa0] sm:$0xff]  }
   0x8   :  { %34 = vst.msk [vmem:[#allocation2 + $0x70] sm:$0xff] %vm19_vm0, %v1797_v1  ;;  %35 = vst.msk [vmem:[#allocation2 + $0x78] sm:$0xff] %vm19_vm0, %v1797_v1  ;;  %1683 = vmatprep.subr.bf16.mxu0 %v1762_v3  ;;  %1753 = vmatprep.subr.bf16.mxu1 %v1762_v3  ;;  %v1774_v15 = vld [vmem:[%s2481_s0 + $0x28] sm:$0xff]   ;;  %v1776_v17 = vld [vmem:[%s2481_s0 + $0x30] sm:$0xff]  }
   0x9   :  { %36 = vst.msk [vmem:[#allocation2 + $0x80] sm:$0xff] %vm19_vm0, %v1797_v1  ;;  %37 = vst.msk [vmem:[#allocation2 + $0x88] sm:$0xff] %vm19_vm0, %v1797_v1  ;;  %v1775_v16 = vld [vmem:[%s2481_s0 + $0xa8] sm:$0xff]   ;;  %v1777_v18 = vld [vmem:[%s2481_s0 + $0xb0] sm:$0xff]  }
   0xa   :  { %38 = vst.msk [vmem:[#allocation2 + $0x90] sm:$0xff] %vm19_vm0, %v1797_v1  ;;  %39 = vst.msk [vmem:[#allocation2 + $0x98] sm:$0xff] %vm19_vm0, %v1797_v1  ;;  %v1778_v19 = vld [vmem:[%s2481_s0 + $0x38] sm:$0xff]   ;;  %v1780_v21 = vld [vmem:[%s2481_s0 + $0x40] sm:$0xff]  }
   0xb   :  { %40 = vst.msk [vmem:[#allocation2 + $0xa0] sm:$0xff] %vm19_vm0, %v1797_v1  ;;  %41 = vst.msk [vmem:[#allocation2 + $0xa8] sm:$0xff] %vm19_vm0, %v1797_v1  ;;  %1684 = vmatpush3.bf16.msra.mxu0 %v1762_v3  ;;  %1757 = vmatpush3.bf16.msra.mxu1 %v1762_v3  ;;  %v1779_v20 = vld [vmem:[%s2481_s0 + $0xb8] sm:$0xff]   ;;  %v1781_v22 = vld [vmem:[%s2481_s0 + $0xc0] sm:$0xff]  }
   0xc   :  { %42 = vst.msk [vmem:[#allocation2 + $0xb0] sm:$0xff] %vm19_vm0, %v1797_v1  ;;  %43 = vst.msk [vmem:[#allocation2 + $0xb8] sm:$0xff] %vm19_vm0, %v1797_v1  ;;  %1685 = vmatprep.subr.bf16.mxu0 %v1763_v6  ;;  %1754 = vmatprep.subr.bf16.mxu1 %v1763_v6  ;;  %v1782_v23 = vld [vmem:[%s2481_s0 + $0x48] sm:$0xff]   ;;  %v1784_v25 = vld [vmem:[%s2481_s0 + $0x50] sm:$0xff]  }
   0xd   :  { %44 = vst.msk [vmem:[#allocation2 + $0xc0] sm:$0xff] %vm19_vm0, %v1797_v1  ;;  %45 = vst.msk [vmem:[#allocation2 + $0xc8] sm:$0xff] %vm19_vm0, %v1797_v1  ;;  %v1783_v24 = vld [vmem:[%s2481_s0 + $0xc8] sm:$0xff]   ;;  %v1785_v26 = vld [vmem:[%s2481_s0 + $0xd0] sm:$0xff]  }
   0xe   :  { %46 = vst.msk [vmem:[#allocation2 + $0xd0] sm:$0xff] %vm19_vm0, %v1797_v1  ;;  %47 = vst.msk [vmem:[#allocation2 + $0xd8] sm:$0xff] %vm19_vm0, %v1797_v1  ;;  %v1786_v27 = vld [vmem:[%s2481_s0 + $0x58] sm:$0xff]   ;;  %v1788_v29 = vld [vmem:[%s2481_s0 + $0x60] sm:$0xff]  }
   0xf   :  { %48 = vst.msk [vmem:[#allocation2 + $0xe0] sm:$0xff] %vm19_vm0, %v1797_v1  ;;  %49 = vst.msk [vmem:[#allocation2 + $0xe8] sm:$0xff] %vm19_vm0, %v1797_v1  ;;  %1686 = vmatpush3.bf16.msra.mxu0 %v1763_v6  ;;  %1758 = vmatpush3.bf16.msra.mxu1 %v1763_v6  ;;  %v1787_v28 = vld [vmem:[%s2481_s0 + $0xd8] sm:$0xff]   ;;  %v1789_v30 = vld [vmem:[%s2481_s0 + $0xe0] sm:$0xff]  }
  0x10   :  { %50 = vst.msk [vmem:[#allocation2 + $0xf0] sm:$0xff] %vm19_vm0, %v1797_v1  ;;  %51 = vst.msk [vmem:[#allocation2 + $0xf8] sm:$0xff] %vm19_vm0, %v1797_v1  ;;  %v1790_v31 = vld [vmem:[%s2481_s0 + $0x68] sm:$0xff]   ;;  %v1792_v33 = vld [vmem:[%s2481_s0 + $0x70] sm:$0xff]  }
  0x11   :  { %52 = vst.msk [vmem:[#allocation2 + $0x100] sm:$0xff] %vm19_vm0, %v1797_v1  ;;  %53 = vst.msk [vmem:[#allocation2 + $0x108] sm:$0xff] %vm19_vm0, %v1797_v1  ;;  %v1791_v32 = vld [vmem:[%s2481_s0 + $0xe8] sm:$0xff]   ;;  %v1793_v34 = vld [vmem:[%s2481_s0 + $0xf0] sm:$0xff]  }
  0x12   :  { %54 = vst.msk [vmem:[#allocation2 + $0x110] sm:$0xff] %vm19_vm0, %v1797_v1  ;;  %55 = vst.msk [vmem:[#allocation2 + $0x118] sm:$0xff] %vm19_vm0, %v1797_v1  ;;  %1688 = vmatmul.mubr.msk.bf16.vlgmr.msra.gmra.mrb[0].mxu0 %vm404_vm1, %v1766_v7  ;;  %1720 = vmatmul.mubr.msk.bf16.vlgmr.msra.gmra.mrb[0].mxu1 %vm404_vm1, %v1767_v8  ;;  %v1794_v35 = vld [vmem:[%s2481_s0 + $0x78] sm:$0xff]   ;;  %v150_v37 = vld [vmem:[#allocation2 + $0x10] sm:$0xff] }
  0x13   :  { %56 = vst.msk [vmem:[#allocation2 + $0x120] sm:$0xff] %vm19_vm0, %v1797_v1  ;;  %57 = vst.msk [vmem:[#allocation2 + $0x128] sm:$0xff] %vm19_vm0, %v1797_v1  ;;  %1691 = vmatprep.mubr.msk.bf16.mxu0 %vm404_vm1, %v1768_v9  ;;  %1723 = vmatprep.mubr.msk.bf16.mxu1 %vm404_vm1, %v1769_v10  ;;  %v1795_v36 = vld [vmem:[%s2481_s0 + $0xf8] sm:$0xff]   ;;  %v148_v39 = vld [vmem:[#allocation2] sm:$0xff] }
  0x14   :  { %58 = vst.msk [vmem:[#allocation2 + $0x130] sm:$0xff] %vm19_vm0, %v1797_v1  ;;  %59 = vst.msk [vmem:[#allocation2 + $0x138] sm:$0xff] %vm19_vm0, %v1797_v1  ;;  %v151_v43 = vld [vmem:[#allocation2 + $0x18] sm:$0xff]  ;;  %v149_v49 = vld [vmem:[#allocation2 + $0x8] sm:$0xff] }
  0x15   :  { %60 = vst.msk [vmem:[#allocation2 + $0x140] sm:$0xff] %vm19_vm0, %v1797_v1  ;;  %61 = vst.msk [vmem:[#allocation2 + $0x148] sm:$0xff] %vm19_vm0, %v1797_v1  ;;  %v154_v61 = vld [vmem:[#allocation2 + $0x30] sm:$0xff]  ;;  %v152_v63 = vld [vmem:[#allocation2 + $0x20] sm:$0xff] }
  0x16   :  { %62 = vst.msk [vmem:[#allocation2 + $0x150] sm:$0xff] %vm19_vm0, %v1797_v1  ;;  %63 = vst.msk [vmem:[#allocation2 + $0x158] sm:$0xff] %vm19_vm0, %v1797_v1  ;;  %v155_v4 = vld [vmem:[#allocation2 + $0x38] sm:$0xff]  ;;  %v153_v10 = vld [vmem:[#allocation2 + $0x28] sm:$0xff] }
  0x17   :  { %64 = vst.msk [vmem:[#allocation2 + $0x160] sm:$0xff] %vm19_vm0, %v1797_v1  ;;  %65 = vst.msk [vmem:[#allocation2 + $0x168] sm:$0xff] %vm19_vm0, %v1797_v1 }
  0x18   :  { %66 = vst.msk [vmem:[#allocation2 + $0x170] sm:$0xff] %vm19_vm0, %v1797_v1  ;;  %67 = vst.msk [vmem:[#allocation2 + $0x178] sm:$0xff] %vm19_vm0, %v1797_v1  ;;  %v180_v40 = vld [vmem:[#allocation2 + $0x100] sm:$0xff]  ;;  %v181_v50 = vld [vmem:[#allocation2 + $0x108] sm:$0xff] }
  0x19   :  { %68 = vst.msk [vmem:[#allocation2 + $0x180] sm:$0xff] %vm19_vm0, %v1797_v1  ;;  %69 = vst.msk [vmem:[#allocation2 + $0x188] sm:$0xff] %vm19_vm0, %v1797_v1  ;;  %v182_v38 = vld [vmem:[#allocation2 + $0x110] sm:$0xff]  ;;  %v183_v44 = vld [vmem:[#allocation2 + $0x118] sm:$0xff] }
  0x1a   :  { %70 = vst.msk [vmem:[#allocation2 + $0x190] sm:$0xff] %vm19_vm0, %v1797_v1  ;;  %71 = vst.msk [vmem:[#allocation2 + $0x198] sm:$0xff] %vm19_vm0, %v1797_v1  ;;  %1692 = vmatmul.mubr.msk.bf16.gmra.mrb[4].mxu0 %vm404_vm1, %v1770_v11  ;;  %1724 = vmatmul.mubr.msk.bf16.gmra.mrb[4].mxu1 %vm404_vm1, %v1771_v12  ;;  %v184_v0 = vld [vmem:[#allocation2 + $0x120] sm:$0xff]  ;;  %v185_v11 = vld [vmem:[#allocation2 + $0x128] sm:$0xff] }
  0x1b   :  { %72 = vst.msk [vmem:[#allocation2 + $0x1a0] sm:$0xff] %vm19_vm0, %v1797_v1  ;;  %73 = vst.msk [vmem:[#allocation2 + $0x1a8] sm:$0xff] %vm19_vm0, %v1797_v1  ;;  %1695 = vmatprep.mubr.msk.bf16.mxu0 %vm404_vm1, %v1772_v13  ;;  %1727 = vmatprep.mubr.msk.bf16.mxu1 %vm404_vm1, %v1773_v14  ;;  %v186_v62 = vld [vmem:[#allocation2 + $0x130] sm:$0xff]  ;;  %v187_v5 = vld [vmem:[#allocation2 + $0x138] sm:$0xff] }
  0x1c   :  { %74 = vst.msk [vmem:[#allocation2 + $0x1b0] sm:$0xff] %vm19_vm0, %v1797_v1  ;;  %75 = vst.msk [vmem:[#allocation2 + $0x1b8] sm:$0xff] %vm19_vm0, %v1797_v1 }
  0x1d   :  { %76 = vst.msk [vmem:[#allocation2 + $0x1c0] sm:$0xff] %vm19_vm0, %v1797_v1  ;;  %77 = vst.msk [vmem:[#allocation2 + $0x1c8] sm:$0xff] %vm19_vm0, %v1797_v1 }
  0x1e   :  { %78 = vst.msk [vmem:[#allocation2 + $0x1d0] sm:$0xff] %vm19_vm0, %v1797_v1  ;;  %79 = vst.msk [vmem:[#allocation2 + $0x1d8] sm:$0xff] %vm19_vm0, %v1797_v1 }
  0x1f   :  { %80 = vst.msk [vmem:[#allocation2 + $0x1e0] sm:$0xff] %vm19_vm0, %v1797_v1  ;;  %81 = vst.msk [vmem:[#allocation2 + $0x1e8] sm:$0xff] %vm19_vm0, %v1797_v1 }
  0x20   :  { %82 = vst.msk [vmem:[#allocation2 + $0x1f0] sm:$0xff] %vm19_vm0, %v1797_v1  ;;  %83 = vst.msk [vmem:[#allocation2 + $0x1f8] sm:$0xff] %vm19_vm0, %v1797_v1  ;;  %v2103_v1 = vld [vmem:[%s2482_s2] ss:$0 sm:$0xff] }
  0x22   :  { %1696 = vmatmul.mubr.msk.bf16.gmra.mrb[8].mxu0 %vm404_vm1, %v1774_v15  ;;  %1728 = vmatmul.mubr.msk.bf16.gmra.mrb[8].mxu1 %vm404_vm1, %v1775_v16 }
  0x23   :  { %1699 = vmatprep.mubr.msk.bf16.mxu0 %vm404_vm1, %v1776_v17  ;;  %1731 = vmatprep.mubr.msk.bf16.mxu1 %vm404_vm1, %v1777_v18 }
  0x2a   :  { %1700 = vmatmul.mubr.msk.bf16.gmra.mrb[12].mxu0 %vm404_vm1, %v1778_v19  ;;  %1732 = vmatmul.mubr.msk.bf16.gmra.mrb[12].mxu1 %vm404_vm1, %v1779_v20 }
  0x2b   :  { %1703 = vmatprep.mubr.msk.bf16.mxu0 %vm404_vm1, %v1780_v21  ;;  %1735 = vmatprep.mubr.msk.bf16.mxu1 %vm404_vm1, %v1781_v22 }
  0x32   :  { %1704 = vmatmul.mubr.msk.bf16.gmra.mrb[16].mxu0 %vm404_vm1, %v1782_v23  ;;  %1736 = vmatmul.mubr.msk.bf16.gmra.mrb[16].mxu1 %vm404_vm1, %v1783_v24 }
  0x33   :  { %1707 = vmatprep.mubr.msk.bf16.mxu0 %vm404_vm1, %v1784_v25  ;;  %1739 = vmatprep.mubr.msk.bf16.mxu1 %vm404_vm1, %v1785_v26 }
  0x3a   :  { %1708 = vmatmul.mubr.msk.bf16.gmra.mrb[20].mxu0 %vm404_vm1, %v1786_v27  ;;  %1740 = vmatmul.mubr.msk.bf16.gmra.mrb[20].mxu1 %vm404_vm1, %v1787_v28 }
  0x3b   :  { %1711 = vmatprep.mubr.msk.bf16.mxu0 %vm404_vm1, %v1788_v29  ;;  %1743 = vmatprep.mubr.msk.bf16.mxu1 %vm404_vm1, %v1789_v30 }
  0x42   :  { %1712 = vmatmul.mubr.msk.bf16.gmra.mrb[24].mxu0 %vm404_vm1, %v1790_v31  ;;  %1744 = vmatmul.mubr.msk.bf16.gmra.mrb[24].mxu1 %vm404_vm1, %v1791_v32 }
  0x43   :  { %1715 = vmatprep.mubr.msk.bf16.mxu0 %vm404_vm1, %v1792_v33  ;;  %1747 = vmatprep.mubr.msk.bf16.mxu1 %vm404_vm1, %v1793_v34 }
  0x4a   :  { %1716 = vmatmul.mubr.msk.bf16.gmra.mrb[28].mxu0 %vm404_vm1, %v1794_v35  ;;  %1748 = vmatmul.mubr.msk.bf16.gmra.mrb[28].mxu1 %vm404_vm1, %v1795_v36 }
  0xe5   :  { %v1689_v41 = vpop.f32.mrb[0].mxu0  ;;  %v1721_v42 = vpop.f32.mrb[0].mxu1 }
  0xe6   :  { %v792_v45 = vadd.f32 %v1689_v41, %v150_v37  ;;  %v824_v46 = vadd.f32 %v1721_v42, %v182_v38  ;;  %v535_v47 = vpop.f32.mrb[1].mxu0  ;;  %v663_v48 = vpop.f32.mrb[1].mxu1  ;;  %v158_v42 = vld [vmem:[#allocation2 + $0x50] sm:$0xff] }
  0xe7   :  { %v790_v51 = vadd.f32 %v535_v47, %v148_v39  ;;  %v822_v52 = vadd.f32 %v663_v48, %v180_v40  ;;  %v1690_v53 = vpop.f32.mrb[2].mxu0  ;;  %v1722_v54 = vpop.f32.mrb[2].mxu1  ;;  %v156_v48 = vld [vmem:[#allocation2 + $0x40] sm:$0xff] }
  0xe8   :  { %857 = vst.msk [vmem:[#allocation2 + $0x10] sm:$0xff] %vm19_vm0, %v792_v45  ;;  %889 = vst.msk [vmem:[#allocation2 + $0x110] sm:$0xff] %vm19_vm0, %v824_v46  ;;  %v793_v55 = vadd.f32 %v1690_v53, %v151_v43  ;;  %v825_v56 = vadd.f32 %v1722_v54, %v183_v44  ;;  %v538_v57 = vpop.f32.mrb[3].mxu0  ;;  %v666_v58 = vpop.f32.mrb[3].mxu1  ;;  %v190_v43 = vld [vmem:[#allocation2 + $0x150] sm:$0xff] }
  0xe9   :  { %855 = vst.msk [vmem:[#allocation2] sm:$0xff] %vm19_vm0, %v790_v51  ;;  %887 = vst.msk [vmem:[#allocation2 + $0x100] sm:$0xff] %vm19_vm0, %v822_v52  ;;  %v791_v59 = vadd.f32 %v538_v57, %v149_v49  ;;  %v823_v60 = vadd.f32 %v666_v58, %v181_v50  ;;  %v188_v49 = vld [vmem:[#allocation2 + $0x140] sm:$0xff]  ;;  %v191_v57 = vld [vmem:[#allocation2 + $0x158] sm:$0xff] }
  0xea   :  { %858 = vst.msk [vmem:[#allocation2 + $0x18] sm:$0xff] %vm19_vm0, %v793_v55  ;;  %890 = vst.msk [vmem:[#allocation2 + $0x118] sm:$0xff] %vm19_vm0, %v825_v56  ;;  %v159_v56 = vld [vmem:[#allocation2 + $0x58] sm:$0xff] }
  0xeb   :  { %856 = vst.msk [vmem:[#allocation2 + $0x8] sm:$0xff] %vm19_vm0, %v791_v59  ;;  %888 = vst.msk [vmem:[#allocation2 + $0x108] sm:$0xff] %vm19_vm0, %v823_v60 }
  0xed   :  { %v1693_v2 = vpop.f32.mrb[4].mxu0  ;;  %v1725_v3 = vpop.f32.mrb[4].mxu1 }
  0xee   :  { %v796_v6 = vadd.f32 %v1693_v2, %v154_v61  ;;  %v828_v7 = vadd.f32 %v1725_v3, %v186_v62  ;;  %v551_v8 = vpop.f32.mrb[5].mxu0  ;;  %v679_v9 = vpop.f32.mrb[5].mxu1  ;;  %v189_v2 = vld [vmem:[#allocation2 + $0x148] sm:$0xff] }
  0xef   :  { %v924_v12 = vld [vmem:[#allocation2 + $0x10] sm:$0xff]  ;;  %v794_v14 = vadd.f32 %v551_v8, %v152_v63  ;;  %v826_v15 = vadd.f32 %v679_v9, %v184_v0  ;;  %v1694_v16 = vpop.f32.mrb[6].mxu0  ;;  %v1726_v17 = vpop.f32.mrb[6].mxu1  ;;  %v157_v0 = vld [vmem:[#allocation2 + $0x48] sm:$0xff] }
  0xf0   :  { %v956_v13 = vld [vmem:[#allocation2 + $0x110] sm:$0xff]  ;;  %v995_v18 = vadd.f32 %v2103_v1, %v924_v12  ;;  %v922_v20 = vld [vmem:[#allocation2] sm:$0xff]  ;;  %861 = vst.msk [vmem:[#allocation2 + $0x30] sm:$0xff] %vm19_vm0, %v796_v6  ;;  %893 = vst.msk [vmem:[#allocation2 + $0x130] sm:$0xff] %vm19_vm0, %v828_v7  ;;  %v797_v22 = vadd.f32 %v1694_v16, %v155_v4  ;;  %v829_v23 = vadd.f32 %v1726_v17, %v187_v5  ;;  %v554_v24 = vpop.f32.mrb[7].mxu0  ;;  %v682_v25 = vpop.f32.mrb[7].mxu1 }
  0xf1   :  { %v1027_v19 = vadd.f32 %v2103_v1, %v956_v13  ;;  %v954_v21 = vld [vmem:[#allocation2 + $0x100] sm:$0xff]  ;;  %v993_v26 = vadd.f32 %v2103_v1, %v922_v20  ;;  %v925_v28 = vld [vmem:[#allocation2 + $0x18] sm:$0xff]  ;;  %859 = vst.msk [vmem:[#allocation2 + $0x20] sm:$0xff] %vm19_vm0, %v794_v14  ;;  %891 = vst.msk [vmem:[#allocation2 + $0x120] sm:$0xff] %vm19_vm0, %v826_v15  ;;  %v795_v30 = vadd.f32 %v554_v24, %v153_v10 }
  0xf2   :  { %v1025_v27 = vadd.f32 %v2103_v1, %v954_v21  ;;  %v957_v29 = vld [vmem:[#allocation2 + $0x118] sm:$0xff]  ;;  %v827_v31 = vadd.f32 %v682_v25, %v185_v11  ;;  %v1059_v32 = vmax.f32 %v995_v18, 0.0  ;;  %v996_v34 = vadd.f32 %v2103_v1, %v925_v28  ;;  %v923_v36 = vld [vmem:[#allocation2 + $0x8] sm:$0xff]  ;;  %862 = vst.msk [vmem:[#allocation2 + $0x38] sm:$0xff] %vm19_vm0, %v797_v22  ;;  %894 = vst.msk [vmem:[#allocation2 + $0x138] sm:$0xff] %vm19_vm0, %v829_v23 }
  0xf3   :  { %v1091_v33 = vmax.f32 %v1027_v19, 0.0  ;;  %v1028_v35 = vadd.f32 %v2103_v1, %v957_v29  ;;  %v955_v37 = vld [vmem:[#allocation2 + $0x108] sm:$0xff]  ;;  %v1057_v38 = vmax.f32 %v993_v26, 0.0  ;;  %v994_v40 = vadd.f32 %v2103_v1, %v923_v36  ;;  %860 = vst.msk [vmem:[#allocation2 + $0x28] sm:$0xff] %vm19_vm0, %v795_v30  ;;  %v194_v36 = vld [vmem:[#allocation2 + $0x170] sm:$0xff] }
  0xf4   :  { %v1089_v39 = vmax.f32 %v1025_v27, 0.0  ;;  %v1026_v41 = vadd.f32 %v2103_v1, %v955_v37  ;;  %892 = vst.msk [vmem:[#allocation2 + $0x128] sm:$0xff] %vm19_vm0, %v827_v31  ;;  %v1581_v44 = vpack.c.bf16 %v1059_v32, %v1059_v32  ;;  %v1060_v46 = vmax.f32 %v996_v34, 0.0 }
  0xf5   :  { %v1613_v45 = vpack.c.bf16 %v1091_v33, %v1091_v33  ;;  %v1092_v47 = vmax.f32 %v1028_v35, 0.0  ;;  %v1579_v50 = vpack.c.bf16 %v1057_v38, %v1057_v38  ;;  %v1058_v52 = vmax.f32 %v994_v40, 0.0  ;;  %v1697_v54 = vpop.f32.mrb[8].mxu0  ;;  %v1729_v55 = vpop.f32.mrb[8].mxu1  ;;  %v162_v35 = vld [vmem:[#allocation2 + $0x70] sm:$0xff] }
  0xf6   :  { %v1611_v51 = vpack.c.bf16 %v1089_v39, %v1089_v39  ;;  %v1090_v53 = vmax.f32 %v1026_v41, 0.0  ;;  %1380 = vst.msk [vmem:[%s2483_s3 + $0x8] sm:$0xf] %vm1377_vm2, %v1581_v44  ;;  %v1582_v58 = vpack.c.bf16 %v1060_v46, %v1060_v46  ;;  %v800_v60 = vadd.f32 %v1697_v54, %v158_v42  ;;  %v567_v62 = vpop.f32.mrb[9].mxu0  ;;  %v695_v63 = vpop.f32.mrb[9].mxu1  ;;  %v160_v41 = vld [vmem:[#allocation2 + $0x60] sm:$0xff] }
  0xf7   :  { %1412 = vst.msk [vmem:[%s2483_s3 + $0x88] sm:$0xf] %vm1377_vm2, %v1613_v45  ;;  %v1614_v59 = vpack.c.bf16 %v1092_v47, %v1092_v47  ;;  %v832_v61 = vadd.f32 %v1729_v55, %v190_v43  ;;  %1378 = vst.msk [vmem:[%s2483_s3] sm:$0xf] %vm1377_vm2, %v1579_v50  ;;  %v1580_v3 = vpack.c.bf16 %v1058_v52, %v1058_v52  ;;  %v928_v5 = vld [vmem:[#allocation2 + $0x30] sm:$0xff]  ;;  %v1698_v9 = vpop.f32.mrb[10].mxu0 }
  0xf8   :  { %1410 = vst.msk [vmem:[%s2483_s3 + $0x80] sm:$0xf] %vm1377_vm2, %v1611_v51  ;;  %v1612_v4 = vpack.c.bf16 %v1090_v53, %v1090_v53  ;;  %v960_v6 = vld [vmem:[#allocation2 + $0x130] sm:$0xff]  ;;  %v798_v7 = vadd.f32 %v567_v62, %v156_v48  ;;  %v830_v8 = vadd.f32 %v695_v63, %v188_v49  ;;  %v1730_v10 = vpop.f32.mrb[10].mxu1  ;;  %1381 = vst.msk [vmem:[%s2483_s3 + $0xc] sm:$0xf] %vm1377_vm2, %v1582_v58 }
  0xf9   :  { %1413 = vst.msk [vmem:[%s2483_s3 + $0x8c] sm:$0xf] %vm1377_vm2, %v1614_v59  ;;  %v999_v11 = vadd.f32 %v2103_v1, %v928_v5  ;;  %v1031_v12 = vadd.f32 %v2103_v1, %v960_v6  ;;  %v926_v13 = vld [vmem:[#allocation2 + $0x20] sm:$0xff]  ;;  %v801_v15 = vadd.f32 %v1698_v9, %v159_v56  ;;  %v833_v16 = vadd.f32 %v1730_v10, %v191_v57  ;;  %v570_v17 = vpop.f32.mrb[11].mxu0  ;;  %v698_v18 = vpop.f32.mrb[11].mxu1  ;;  %v929_v21 = vld [vmem:[#allocation2 + $0x38] sm:$0xff] }
  0xfa   :  { %v958_v14 = vld [vmem:[#allocation2 + $0x120] sm:$0xff]  ;;  %865 = vst.msk [vmem:[#allocation2 + $0x50] sm:$0xff] %vm19_vm0, %v800_v60  ;;  %897 = vst.msk [vmem:[#allocation2 + $0x150] sm:$0xff] %vm19_vm0, %v832_v61  ;;  %v997_v19 = vadd.f32 %v2103_v1, %v926_v13  ;;  %v961_v22 = vld [vmem:[#allocation2 + $0x138] sm:$0xff]  ;;  %v799_v23 = vadd.f32 %v570_v17, %v157_v0  ;;  %v831_v24 = vadd.f32 %v698_v18, %v189_v2 }
  0xfb   :  { %1379 = vst.msk [vmem:[%s2483_s3 + $0x4] sm:$0xf] %vm1377_vm2, %v1580_v3  ;;  %1411 = vst.msk [vmem:[%s2483_s3 + $0x84] sm:$0xf] %vm1377_vm2, %v1612_v4  ;;  %v1029_v20 = vadd.f32 %v2103_v1, %v958_v14  ;;  %v1063_v25 = vmax.f32 %v999_v11, 0.0  ;;  %v1095_v26 = vmax.f32 %v1031_v12, 0.0  ;;  %v1000_v27 = vadd.f32 %v2103_v1, %v929_v21 }
  0xfc   :  { %863 = vst.msk [vmem:[#allocation2 + $0x40] sm:$0xff] %vm19_vm0, %v798_v7  ;;  %895 = vst.msk [vmem:[#allocation2 + $0x140] sm:$0xff] %vm19_vm0, %v830_v8  ;;  %v1032_v28 = vadd.f32 %v2103_v1, %v961_v22  ;;  %v927_v29 = vld [vmem:[#allocation2 + $0x28] sm:$0xff]  ;;  %v1061_v31 = vmax.f32 %v997_v19, 0.0  ;;  %v192_v42 = vld [vmem:[#allocation2 + $0x160] sm:$0xff] }
  0xfd   :  { %v959_v30 = vld [vmem:[#allocation2 + $0x128] sm:$0xff]  ;;  %866 = vst.msk [vmem:[#allocation2 + $0x58] sm:$0xff] %vm19_vm0, %v801_v15  ;;  %898 = vst.msk [vmem:[#allocation2 + $0x158] sm:$0xff] %vm19_vm0, %v833_v16  ;;  %v1093_v32 = vmax.f32 %v1029_v20, 0.0  ;;  %v998_v33 = vadd.f32 %v2103_v1, %v927_v29  ;;  %v1585_v37 = vpack.c.bf16 %v1063_v25, %v1063_v25  ;;  %v1617_v38 = vpack.c.bf16 %v1095_v26, %v1095_v26  ;;  %v1701_v47 = vpop.f32.mrb[12].mxu0  ;;  %v1733_v48 = vpop.f32.mrb[12].mxu1 }
  0xfe   :  { %v1030_v34 = vadd.f32 %v2103_v1, %v959_v30  ;;  %864 = vst.msk [vmem:[#allocation2 + $0x48] sm:$0xff] %vm19_vm0, %v799_v23  ;;  %896 = vst.msk [vmem:[#allocation2 + $0x148] sm:$0xff] %vm19_vm0, %v831_v24  ;;  %v1064_v39 = vmax.f32 %v1000_v27, 0.0  ;;  %v1096_v40 = vmax.f32 %v1032_v28, 0.0  ;;  %v1583_v43 = vpack.c.bf16 %v1061_v31, %v1061_v31  ;;  %v163_v49 = vld [vmem:[#allocation2 + $0x78] sm:$0xff]  ;;  %v583_v55 = vpop.f32.mrb[13].mxu0 }
  0xff   :  { %v1615_v44 = vpack.c.bf16 %v1093_v32, %v1093_v32  ;;  %v1062_v45 = vmax.f32 %v998_v33, 0.0  ;;  %v195_v50 = vld [vmem:[#allocation2 + $0x178] sm:$0xff]  ;;  %1384 = vst.msk [vmem:[%s2483_s3 + $0x18] sm:$0xf] %vm1377_vm2, %v1585_v37  ;;  %1416 = vst.msk [vmem:[%s2483_s3 + $0x98] sm:$0xf] %vm1377_vm2, %v1617_v38  ;;  %v804_v53 = vadd.f32 %v1701_v47, %v162_v35  ;;  %v836_v54 = vadd.f32 %v1733_v48, %v194_v36 }
 0x100   :  { %v1094_v46 = vmax.f32 %v1030_v34, 0.0  ;;  %v1586_v51 = vpack.c.bf16 %v1064_v39, %v1064_v39  ;;  %v1618_v52 = vpack.c.bf16 %v1096_v40, %v1096_v40  ;;  %v711_v56 = vpop.f32.mrb[13].mxu1  ;;  %v161_v57 = vld [vmem:[#allocation2 + $0x68] sm:$0xff]  ;;  %1382 = vst.msk [vmem:[%s2483_s3 + $0x10] sm:$0xf] %vm1377_vm2, %v1583_v43  ;;  %v802_v63 = vadd.f32 %v583_v55, %v160_v41  ;;  %v1702_v2 = vpop.f32.mrb[14].mxu0 }
 0x101   :  { %v193_v58 = vld [vmem:[#allocation2 + $0x168] sm:$0xff]  ;;  %1414 = vst.msk [vmem:[%s2483_s3 + $0x90] sm:$0xf] %vm1377_vm2, %v1615_v44  ;;  %v1584_v59 = vpack.c.bf16 %v1062_v45, %v1062_v45  ;;  %v932_v61 = vld [vmem:[#allocation2 + $0x50] sm:$0xff]  ;;  %v834_v0 = vadd.f32 %v711_v56, %v192_v42  ;;  %v1734_v3 = vpop.f32.mrb[14].mxu1  ;;  %v805_v8 = vadd.f32 %v1702_v2, %v163_v49  ;;  %v586_v10 = vpop.f32.mrb[15].mxu0 }
 0x102   :  { %v1616_v60 = vpack.c.bf16 %v1094_v46, %v1094_v46  ;;  %v964_v62 = vld [vmem:[#allocation2 + $0x150] sm:$0xff]  ;;  %1385 = vst.msk [vmem:[%s2483_s3 + $0x1c] sm:$0xf] %vm1377_vm2, %v1586_v51  ;;  %1417 = vst.msk [vmem:[%s2483_s3 + $0x9c] sm:$0xf] %vm1377_vm2, %v1618_v52  ;;  %v1003_v4 = vadd.f32 %v2103_v1, %v932_v61  ;;  %v837_v9 = vadd.f32 %v1734_v3, %v195_v50  ;;  %v714_v11 = vpop.f32.mrb[15].mxu1 }
 0x103   :  { %v1035_v5 = vadd.f32 %v2103_v1, %v964_v62  ;;  %v930_v6 = vld [vmem:[#allocation2 + $0x40] sm:$0xff]  ;;  %869 = vst.msk [vmem:[#allocation2 + $0x70] sm:$0xff] %vm19_vm0, %v804_v53  ;;  %901 = vst.msk [vmem:[#allocation2 + $0x170] sm:$0xff] %vm19_vm0, %v836_v54  ;;  %v803_v16 = vadd.f32 %v586_v10, %v161_v57  ;;  %v835_v17 = vadd.f32 %v714_v11, %v193_v58  ;;  %v166_v28 = vld [vmem:[#allocation2 + $0x90] sm:$0xff] }
 0x104   :  { %v962_v7 = vld [vmem:[#allocation2 + $0x140] sm:$0xff]  ;;  %1383 = vst.msk [vmem:[%s2483_s3 + $0x14] sm:$0xf] %vm1377_vm2, %v1584_v59  ;;  %1415 = vst.msk [vmem:[%s2483_s3 + $0x94] sm:$0xf] %vm1377_vm2, %v1616_v60  ;;  %v1001_v12 = vadd.f32 %v2103_v1, %v930_v6  ;;  %v933_v14 = vld [vmem:[#allocation2 + $0x58] sm:$0xff] }
 0x105   :  { %v1033_v13 = vadd.f32 %v2103_v1, %v962_v7  ;;  %v965_v15 = vld [vmem:[#allocation2 + $0x158] sm:$0xff]  ;;  %867 = vst.msk [vmem:[#allocation2 + $0x60] sm:$0xff] %vm19_vm0, %v802_v63  ;;  %899 = vst.msk [vmem:[#allocation2 + $0x160] sm:$0xff] %vm19_vm0, %v834_v0  ;;  %v1067_v18 = vmax.f32 %v1003_v4, 0.0  ;;  %v1099_v19 = vmax.f32 %v1035_v5, 0.0  ;;  %v1004_v20 = vadd.f32 %v2103_v1, %v933_v14  ;;  %v931_v22 = vld [vmem:[#allocation2 + $0x48] sm:$0xff] }
 0x106   :  { %v1036_v21 = vadd.f32 %v2103_v1, %v965_v15  ;;  %v963_v23 = vld [vmem:[#allocation2 + $0x148] sm:$0xff]  ;;  %870 = vst.msk [vmem:[#allocation2 + $0x78] sm:$0xff] %vm19_vm0, %v805_v8  ;;  %902 = vst.msk [vmem:[#allocation2 + $0x178] sm:$0xff] %vm19_vm0, %v837_v9  ;;  %v1065_v24 = vmax.f32 %v1001_v12, 0.0  ;;  %v1002_v26 = vadd.f32 %v2103_v1, %v931_v22  ;;  %v198_v29 = vld [vmem:[#allocation2 + $0x190] sm:$0xff]  ;;  %v1705_v40 = vpop.f32.mrb[16].mxu0 }
 0x107   :  { %v1097_v25 = vmax.f32 %v1033_v13, 0.0  ;;  %v1034_v27 = vadd.f32 %v2103_v1, %v963_v23  ;;  %868 = vst.msk [vmem:[#allocation2 + $0x68] sm:$0xff] %vm19_vm0, %v803_v16  ;;  %900 = vst.msk [vmem:[#allocation2 + $0x168] sm:$0xff] %vm19_vm0, %v835_v17  ;;  %v1589_v30 = vpack.c.bf16 %v1067_v18, %v1067_v18  ;;  %v1621_v31 = vpack.c.bf16 %v1099_v19, %v1099_v19  ;;  %v164_v34 = vld [vmem:[#allocation2 + $0x80] sm:$0xff]  ;;  %v1737_v41 = vpop.f32.mrb[16].mxu1  ;;  %v167_v42 = vld [vmem:[#allocation2 + $0x98] sm:$0xff] }
 0x108   :  { %v1068_v32 = vmax.f32 %v1004_v20, 0.0  ;;  %v1100_v33 = vmax.f32 %v1036_v21, 0.0  ;;  %v196_v35 = vld [vmem:[#allocation2 + $0x180] sm:$0xff]  ;;  %v1587_v36 = vpack.c.bf16 %v1065_v24, %v1065_v24  ;;  %v1066_v38 = vmax.f32 %v1002_v26, 0.0  ;;  %v199_v43 = vld [vmem:[#allocation2 + $0x198] sm:$0xff]  ;;  %v599_v48 = vpop.f32.mrb[17].mxu0 }
 0x109   :  { %v1619_v37 = vpack.c.bf16 %v1097_v25, %v1097_v25  ;;  %v1098_v39 = vmax.f32 %v1034_v27, 0.0  ;;  %1388 = vst.msk [vmem:[%s2483_s3 + $0x28] sm:$0xf] %vm1377_vm2, %v1589_v30  ;;  %1420 = vst.msk [vmem:[%s2483_s3 + $0xa8] sm:$0xf] %vm1377_vm2, %v1621_v31  ;;  %v808_v46 = vadd.f32 %v1705_v40, %v166_v28  ;;  %v840_v47 = vadd.f32 %v1737_v41, %v198_v29  ;;  %v727_v49 = vpop.f32.mrb[17].mxu1 }
 0x10a   :  { %v1590_v44 = vpack.c.bf16 %v1068_v32, %v1068_v32  ;;  %v1622_v45 = vpack.c.bf16 %v1100_v33, %v1100_v33  ;;  %v165_v50 = vld [vmem:[#allocation2 + $0x88] sm:$0xff]  ;;  %1386 = vst.msk [vmem:[%s2483_s3 + $0x20] sm:$0xf] %vm1377_vm2, %v1587_v36  ;;  %v1588_v52 = vpack.c.bf16 %v1066_v38, %v1066_v38  ;;  %v936_v54 = vld [vmem:[#allocation2 + $0x70] sm:$0xff]  ;;  %v806_v56 = vadd.f32 %v599_v48, %v164_v34  ;;  %v1706_v58 = vpop.f32.mrb[18].mxu0  ;;  %v1738_v59 = vpop.f32.mrb[18].mxu1 }
 0x10b   :  { %v197_v51 = vld [vmem:[#allocation2 + $0x188] sm:$0xff]  ;;  %1418 = vst.msk [vmem:[%s2483_s3 + $0xa0] sm:$0xf] %vm1377_vm2, %v1619_v37  ;;  %v1620_v53 = vpack.c.bf16 %v1098_v39, %v1098_v39  ;;  %v968_v55 = vld [vmem:[#allocation2 + $0x170] sm:$0xff]  ;;  %v838_v57 = vadd.f32 %v727_v49, %v196_v35  ;;  %v1007_v60 = vadd.f32 %v2103_v1, %v936_v54  ;;  %v809_v0 = vadd.f32 %v1706_v58, %v167_v42  ;;  %v602_v3 = vpop.f32.mrb[19].mxu0  ;;  %v730_v4 = vpop.f32.mrb[19].mxu1 }
 0x10c   :  { %1389 = vst.msk [vmem:[%s2483_s3 + $0x2c] sm:$0xf] %vm1377_vm2, %v1590_v44  ;;  %1421 = vst.msk [vmem:[%s2483_s3 + $0xac] sm:$0xf] %vm1377_vm2, %v1622_v45  ;;  %v1039_v61 = vadd.f32 %v2103_v1, %v968_v55  ;;  %v934_v62 = vld [vmem:[#allocation2 + $0x60] sm:$0xff]  ;;  %v841_v2 = vadd.f32 %v1738_v59, %v199_v43  ;;  %v807_v9 = vadd.f32 %v602_v3, %v165_v50  ;;  %v170_v21 = vld [vmem:[#allocation2 + $0xb0] sm:$0xff] }
 0x10d   :  { %v966_v63 = vld [vmem:[#allocation2 + $0x160] sm:$0xff]  ;;  %873 = vst.msk [vmem:[#allocation2 + $0x90] sm:$0xff] %vm19_vm0, %v808_v46  ;;  %905 = vst.msk [vmem:[#allocation2 + $0x190] sm:$0xff] %vm19_vm0, %v840_v47  ;;  %v1005_v5 = vadd.f32 %v2103_v1, %v934_v62  ;;  %v937_v7 = vld [vmem:[#allocation2 + $0x78] sm:$0xff]  ;;  %v839_v10 = vadd.f32 %v730_v4, %v197_v51  ;;  %v1071_v11 = vmax.f32 %v1007_v60, 0.0  ;;  %v1709_v33 = vpop.f32.mrb[20].mxu0 }
 0x10e   :  { %1387 = vst.msk [vmem:[%s2483_s3 + $0x24] sm:$0xf] %vm1377_vm2, %v1588_v52  ;;  %1419 = vst.msk [vmem:[%s2483_s3 + $0xa4] sm:$0xf] %vm1377_vm2, %v1620_v53  ;;  %v1037_v6 = vadd.f32 %v2103_v1, %v966_v63  ;;  %v969_v8 = vld [vmem:[#allocation2 + $0x178] sm:$0xff]  ;;  %v1103_v12 = vmax.f32 %v1039_v61, 0.0  ;;  %v1008_v13 = vadd.f32 %v2103_v1, %v937_v7  ;;  %v812_v39 = vadd.f32 %v1709_v33, %v170_v21 }
 0x10f   :  { %871 = vst.msk [vmem:[#allocation2 + $0x80] sm:$0xff] %vm19_vm0, %v806_v56  ;;  %903 = vst.msk [vmem:[#allocation2 + $0x180] sm:$0xff] %vm19_vm0, %v838_v57  ;;  %v1040_v14 = vadd.f32 %v2103_v1, %v969_v8  ;;  %v935_v15 = vld [vmem:[#allocation2 + $0x68] sm:$0xff]  ;;  %v1069_v17 = vmax.f32 %v1005_v5, 0.0  ;;  %v202_v22 = vld [vmem:[#allocation2 + $0x1b0] sm:$0xff]  ;;  %v1593_v23 = vpack.c.bf16 %v1071_v11, %v1071_v11  ;;  %v1741_v34 = vpop.f32.mrb[20].mxu1 }
 0x110   :  { %v967_v16 = vld [vmem:[#allocation2 + $0x168] sm:$0xff]  ;;  %874 = vst.msk [vmem:[#allocation2 + $0x98] sm:$0xff] %vm19_vm0, %v809_v0  ;;  %906 = vst.msk [vmem:[#allocation2 + $0x198] sm:$0xff] %vm19_vm0, %v841_v2  ;;  %v1101_v18 = vmax.f32 %v1037_v6, 0.0  ;;  %v1006_v19 = vadd.f32 %v2103_v1, %v935_v15  ;;  %v1625_v24 = vpack.c.bf16 %v1103_v12, %v1103_v12  ;;  %v1072_v25 = vmax.f32 %v1008_v13, 0.0  ;;  %v168_v27 = vld [vmem:[#allocation2 + $0xa0] sm:$0xff] }
 0x111   :  { %v1038_v20 = vadd.f32 %v2103_v1, %v967_v16  ;;  %872 = vst.msk [vmem:[#allocation2 + $0x88] sm:$0xff] %vm19_vm0, %v807_v9  ;;  %904 = vst.msk [vmem:[#allocation2 + $0x188] sm:$0xff] %vm19_vm0, %v839_v10  ;;  %v1104_v26 = vmax.f32 %v1040_v14, 0.0  ;;  %v200_v28 = vld [vmem:[#allocation2 + $0x1a0] sm:$0xff]  ;;  %v1591_v29 = vpack.c.bf16 %v1069_v17, %v1069_v17  ;;  %v171_v35 = vld [vmem:[#allocation2 + $0xb8] sm:$0xff]  ;;  %v844_v40 = vadd.f32 %v1741_v34, %v202_v22  ;;  %v615_v41 = vpop.f32.mrb[21].mxu0 }
 0x112   :  { %v1623_v30 = vpack.c.bf16 %v1101_v18, %v1101_v18  ;;  %v1070_v31 = vmax.f32 %v1006_v19, 0.0  ;;  %v203_v36 = vld [vmem:[#allocation2 + $0x1b8] sm:$0xff]  ;;  %1392 = vst.msk [vmem:[%s2483_s3 + $0x38] sm:$0xf] %vm1377_vm2, %v1593_v23  ;;  %1424 = vst.msk [vmem:[%s2483_s3 + $0xb8] sm:$0xf] %vm1377_vm2, %v1625_v24  ;;  %v1594_v37 = vpack.c.bf16 %v1072_v25, %v1072_v25  ;;  %v810_v49 = vadd.f32 %v615_v41, %v168_v27 }
 0x113   :  { %v1102_v32 = vmax.f32 %v1038_v20, 0.0  ;;  %v1626_v38 = vpack.c.bf16 %v1104_v26, %v1104_v26  ;;  %v743_v42 = vpop.f32.mrb[21].mxu1  ;;  %v169_v43 = vld [vmem:[#allocation2 + $0xa8] sm:$0xff]  ;;  %1390 = vst.msk [vmem:[%s2483_s3 + $0x30] sm:$0xf] %vm1377_vm2, %v1591_v29  ;;  %v1710_v51 = vpop.f32.mrb[22].mxu0 }
 0x114   :  { %v201_v44 = vld [vmem:[#allocation2 + $0x1a8] sm:$0xff]  ;;  %1422 = vst.msk [vmem:[%s2483_s3 + $0xb0] sm:$0xf] %vm1377_vm2, %v1623_v30  ;;  %v1592_v45 = vpack.c.bf16 %v1070_v31, %v1070_v31  ;;  %v940_v47 = vld [vmem:[#allocation2 + $0x90] sm:$0xff]  ;;  %v842_v50 = vadd.f32 %v743_v42, %v200_v28  ;;  %v1742_v52 = vpop.f32.mrb[22].mxu1  ;;  %v813_v57 = vadd.f32 %v1710_v51, %v171_v35  ;;  %v618_v59 = vpop.f32.mrb[23].mxu0 }
 0x115   :  { %v1624_v46 = vpack.c.bf16 %v1102_v32, %v1102_v32  ;;  %v972_v48 = vld [vmem:[#allocation2 + $0x190] sm:$0xff]  ;;  %1393 = vst.msk [vmem:[%s2483_s3 + $0x3c] sm:$0xf] %vm1377_vm2, %v1594_v37  ;;  %1425 = vst.msk [vmem:[%s2483_s3 + $0xbc] sm:$0xf] %vm1377_vm2, %v1626_v38  ;;  %v1011_v53 = vadd.f32 %v2103_v1, %v940_v47  ;;  %v845_v58 = vadd.f32 %v1742_v52, %v203_v36  ;;  %v746_v60 = vpop.f32.mrb[23].mxu1 }
 0x116   :  { %v1043_v54 = vadd.f32 %v2103_v1, %v972_v48  ;;  %v938_v55 = vld [vmem:[#allocation2 + $0x80] sm:$0xff]  ;;  %877 = vst.msk [vmem:[#allocation2 + $0xb0] sm:$0xff] %vm19_vm0, %v812_v39  ;;  %909 = vst.msk [vmem:[#allocation2 + $0x1b0] sm:$0xff] %vm19_vm0, %v844_v40  ;;  %v811_v2 = vadd.f32 %v618_v59, %v169_v43  ;;  %v843_v3 = vadd.f32 %v746_v60, %v201_v44  ;;  %v174_v14 = vld [vmem:[#allocation2 + $0xd0] sm:$0xff]  ;;  %v1713_v26 = vpop.f32.mrb[24].mxu0  ;;  %v1745_v27 = vpop.f32.mrb[24].mxu1 }
 0x117   :  { %v970_v56 = vld [vmem:[#allocation2 + $0x180] sm:$0xff]  ;;  %1391 = vst.msk [vmem:[%s2483_s3 + $0x34] sm:$0xf] %vm1377_vm2, %v1592_v45  ;;  %1423 = vst.msk [vmem:[%s2483_s3 + $0xb4] sm:$0xf] %vm1377_vm2, %v1624_v46  ;;  %v1009_v61 = vadd.f32 %v2103_v1, %v938_v55  ;;  %v941_v63 = vld [vmem:[#allocation2 + $0x98] sm:$0xff]  ;;  %v816_v32 = vadd.f32 %v1713_v26, %v174_v14 }
 0x118   :  { %v1041_v62 = vadd.f32 %v2103_v1, %v970_v56  ;;  %v973_v0 = vld [vmem:[#allocation2 + $0x198] sm:$0xff]  ;;  %875 = vst.msk [vmem:[#allocation2 + $0xa0] sm:$0xff] %vm19_vm0, %v810_v49  ;;  %907 = vst.msk [vmem:[#allocation2 + $0x1a0] sm:$0xff] %vm19_vm0, %v842_v50  ;;  %v1075_v4 = vmax.f32 %v1011_v53, 0.0  ;;  %v1107_v5 = vmax.f32 %v1043_v54, 0.0  ;;  %v1012_v6 = vadd.f32 %v2103_v1, %v941_v63  ;;  %v939_v8 = vld [vmem:[#allocation2 + $0x88] sm:$0xff] }
 0x119   :  { %v1044_v7 = vadd.f32 %v2103_v1, %v973_v0  ;;  %v971_v9 = vld [vmem:[#allocation2 + $0x188] sm:$0xff]  ;;  %878 = vst.msk [vmem:[#allocation2 + $0xb8] sm:$0xff] %vm19_vm0, %v813_v57  ;;  %910 = vst.msk [vmem:[#allocation2 + $0x1b8] sm:$0xff] %vm19_vm0, %v845_v58  ;;  %v1073_v10 = vmax.f32 %v1009_v61, 0.0  ;;  %v1010_v12 = vadd.f32 %v2103_v1, %v939_v8  ;;  %v206_v15 = vld [vmem:[#allocation2 + $0x1d0] sm:$0xff]  ;;  %v631_v34 = vpop.f32.mrb[25].mxu0 }
 0x11a   :  { %v1105_v11 = vmax.f32 %v1041_v62, 0.0  ;;  %v1042_v13 = vadd.f32 %v2103_v1, %v971_v9  ;;  %876 = vst.msk [vmem:[#allocation2 + $0xa8] sm:$0xff] %vm19_vm0, %v811_v2  ;;  %908 = vst.msk [vmem:[#allocation2 + $0x1a8] sm:$0xff] %vm19_vm0, %v843_v3  ;;  %v1597_v16 = vpack.c.bf16 %v1075_v4, %v1075_v4  ;;  %v1629_v17 = vpack.c.bf16 %v1107_v5, %v1107_v5  ;;  %v172_v20 = vld [vmem:[#allocation2 + $0xc0] sm:$0xff]  ;;  %v175_v28 = vld [vmem:[#allocation2 + $0xd8] sm:$0xff]  ;;  %v759_v35 = vpop.f32.mrb[25].mxu1 }
 0x11b   :  { %v1076_v18 = vmax.f32 %v1012_v6, 0.0  ;;  %v1108_v19 = vmax.f32 %v1044_v7, 0.0  ;;  %v204_v21 = vld [vmem:[#allocation2 + $0x1c0] sm:$0xff]  ;;  %v1595_v22 = vpack.c.bf16 %v1073_v10, %v1073_v10  ;;  %v1074_v24 = vmax.f32 %v1010_v12, 0.0  ;;  %v207_v29 = vld [vmem:[#allocation2 + $0x1d8] sm:$0xff]  ;;  %v173_v36 = vld [vmem:[#allocation2 + $0xc8] sm:$0xff] }
 0x11c   :  { %v1627_v23 = vpack.c.bf16 %v1105_v11, %v1105_v11  ;;  %v1106_v25 = vmax.f32 %v1042_v13, 0.0  ;;  %1396 = vst.msk [vmem:[%s2483_s3 + $0x48] sm:$0xf] %vm1377_vm2, %v1597_v16  ;;  %1428 = vst.msk [vmem:[%s2483_s3 + $0xc8] sm:$0xf] %vm1377_vm2, %v1629_v17  ;;  %v848_v33 = vadd.f32 %v1745_v27, %v206_v15  ;;  %v205_v37 = vld [vmem:[#allocation2 + $0x1c8] sm:$0xff]  ;;  %v814_v42 = vadd.f32 %v631_v34, %v172_v20 }
 0x11d   :  { %v1598_v30 = vpack.c.bf16 %v1076_v18, %v1076_v18  ;;  %v1630_v31 = vpack.c.bf16 %v1108_v19, %v1108_v19  ;;  %1394 = vst.msk [vmem:[%s2483_s3 + $0x40] sm:$0xf] %vm1377_vm2, %v1595_v22  ;;  %v1596_v38 = vpack.c.bf16 %v1074_v24, %v1074_v24  ;;  %v944_v40 = vld [vmem:[#allocation2 + $0xb0] sm:$0xff]  ;;  %v846_v43 = vadd.f32 %v759_v35, %v204_v21  ;;  %v1714_v44 = vpop.f32.mrb[26].mxu0  ;;  %v1746_v45 = vpop.f32.mrb[26].mxu1  ;;  %v176_v13 = vld [vmem:[#allocation2 + $0xe0] sm:$0xff] }
 0x11e   :  { %1426 = vst.msk [vmem:[%s2483_s3 + $0xc0] sm:$0xf] %vm1377_vm2, %v1627_v23  ;;  %v1628_v39 = vpack.c.bf16 %v1106_v25, %v1106_v25  ;;  %v976_v41 = vld [vmem:[#allocation2 + $0x1b0] sm:$0xff]  ;;  %v1015_v46 = vadd.f32 %v2103_v1, %v944_v40  ;;  %v817_v50 = vadd.f32 %v1714_v44, %v175_v28  ;;  %v849_v51 = vadd.f32 %v1746_v45, %v207_v29  ;;  %v634_v52 = vpop.f32.mrb[27].mxu0  ;;  %v762_v53 = vpop.f32.mrb[27].mxu1  ;;  %v208_v14 = vld [vmem:[#allocation2 + $0x1e0] sm:$0xff] }
 0x11f   :  { %1397 = vst.msk [vmem:[%s2483_s3 + $0x4c] sm:$0xf] %vm1377_vm2, %v1598_v30  ;;  %1429 = vst.msk [vmem:[%s2483_s3 + $0xcc] sm:$0xf] %vm1377_vm2, %v1630_v31  ;;  %v1047_v47 = vadd.f32 %v2103_v1, %v976_v41  ;;  %v942_v48 = vld [vmem:[#allocation2 + $0xa0] sm:$0xff]  ;;  %v815_v58 = vadd.f32 %v634_v52, %v173_v36  ;;  %v847_v59 = vadd.f32 %v762_v53, %v205_v37  ;;  %v178_v7 = vld [vmem:[#allocation2 + $0xf0] sm:$0xff] }
 0x120   :  { %v974_v49 = vld [vmem:[#allocation2 + $0x1a0] sm:$0xff]  ;;  %881 = vst.msk [vmem:[#allocation2 + $0xd0] sm:$0xff] %vm19_vm0, %v816_v32  ;;  %913 = vst.msk [vmem:[#allocation2 + $0x1d0] sm:$0xff] %vm19_vm0, %v848_v33  ;;  %v1013_v54 = vadd.f32 %v2103_v1, %v942_v48  ;;  %v945_v56 = vld [vmem:[#allocation2 + $0xb8] sm:$0xff]  ;;  %v1079_v60 = vmax.f32 %v1015_v46, 0.0  ;;  %v1717_v19 = vpop.f32.mrb[28].mxu0 }
 0x121   :  { %1395 = vst.msk [vmem:[%s2483_s3 + $0x44] sm:$0xf] %vm1377_vm2, %v1596_v38  ;;  %1427 = vst.msk [vmem:[%s2483_s3 + $0xc4] sm:$0xf] %vm1377_vm2, %v1628_v39  ;;  %v1045_v55 = vadd.f32 %v2103_v1, %v974_v49  ;;  %v977_v57 = vld [vmem:[#allocation2 + $0x1b8] sm:$0xff]  ;;  %v1111_v61 = vmax.f32 %v1047_v47, 0.0  ;;  %v1016_v62 = vadd.f32 %v2103_v1, %v945_v56  ;;  %v820_v25 = vadd.f32 %v1717_v19, %v178_v7 }
 0x122   :  { %879 = vst.msk [vmem:[#allocation2 + $0xc0] sm:$0xff] %vm19_vm0, %v814_v42  ;;  %911 = vst.msk [vmem:[#allocation2 + $0x1c0] sm:$0xff] %vm19_vm0, %v846_v43  ;;  %v1048_v63 = vadd.f32 %v2103_v1, %v977_v57  ;;  %v943_v0 = vld [vmem:[#allocation2 + $0xa8] sm:$0xff]  ;;  %v1077_v3 = vmax.f32 %v1013_v54, 0.0  ;;  %v210_v8 = vld [vmem:[#allocation2 + $0x1f0] sm:$0xff]  ;;  %v1601_v9 = vpack.c.bf16 %v1079_v60, %v1079_v60  ;;  %v1749_v20 = vpop.f32.mrb[28].mxu1 }
 0x123   :  { %v975_v2 = vld [vmem:[#allocation2 + $0x1a8] sm:$0xff]  ;;  %882 = vst.msk [vmem:[#allocation2 + $0xd8] sm:$0xff] %vm19_vm0, %v817_v50  ;;  %914 = vst.msk [vmem:[#allocation2 + $0x1d8] sm:$0xff] %vm19_vm0, %v849_v51  ;;  %v1109_v4 = vmax.f32 %v1045_v55, 0.0  ;;  %v1014_v5 = vadd.f32 %v2103_v1, %v943_v0  ;;  %v1633_v10 = vpack.c.bf16 %v1111_v61, %v1111_v61  ;;  %v1080_v11 = vmax.f32 %v1016_v62, 0.0  ;;  %v179_v21 = vld [vmem:[#allocation2 + $0xf8] sm:$0xff] }
 0x124   :  { %v1046_v6 = vadd.f32 %v2103_v1, %v975_v2  ;;  %880 = vst.msk [vmem:[#allocation2 + $0xc8] sm:$0xff] %vm19_vm0, %v815_v58  ;;  %912 = vst.msk [vmem:[#allocation2 + $0x1c8] sm:$0xff] %vm19_vm0, %v847_v59  ;;  %v1112_v12 = vmax.f32 %v1048_v63, 0.0  ;;  %v1599_v15 = vpack.c.bf16 %v1077_v3, %v1077_v3  ;;  %v211_v22 = vld [vmem:[#allocation2 + $0x1f8] sm:$0xff]  ;;  %v852_v26 = vadd.f32 %v1749_v20, %v210_v8  ;;  %v647_v27 = vpop.f32.mrb[29].mxu0  ;;  %v775_v28 = vpop.f32.mrb[29].mxu1 }
 0x125   :  { %v1631_v16 = vpack.c.bf16 %v1109_v4, %v1109_v4  ;;  %v1078_v17 = vmax.f32 %v1014_v5, 0.0  ;;  %1400 = vst.msk [vmem:[%s2483_s3 + $0x58] sm:$0xf] %vm1377_vm2, %v1601_v9  ;;  %1432 = vst.msk [vmem:[%s2483_s3 + $0xd8] sm:$0xf] %vm1377_vm2, %v1633_v10  ;;  %v1602_v23 = vpack.c.bf16 %v1080_v11, %v1080_v11  ;;  %v177_v29 = vld [vmem:[#allocation2 + $0xe8] sm:$0xff]  ;;  %v818_v35 = vadd.f32 %v647_v27, %v176_v13 }
 0x126   :  { %v1110_v18 = vmax.f32 %v1046_v6, 0.0  ;;  %v1634_v24 = vpack.c.bf16 %v1112_v12, %v1112_v12  ;;  %v209_v30 = vld [vmem:[#allocation2 + $0x1e8] sm:$0xff]  ;;  %1398 = vst.msk [vmem:[%s2483_s3 + $0x50] sm:$0xf] %vm1377_vm2, %v1599_v15  ;;  %v850_v36 = vadd.f32 %v775_v28, %v208_v14  ;;  %v1718_v37 = vpop.f32.mrb[30].mxu0  ;;  %v1750_v38 = vpop.f32.mrb[30].mxu1 }
 0x127   :  { %1430 = vst.msk [vmem:[%s2483_s3 + $0xd0] sm:$0xf] %vm1377_vm2, %v1631_v16  ;;  %v1600_v31 = vpack.c.bf16 %v1078_v17, %v1078_v17  ;;  %v948_v33 = vld [vmem:[#allocation2 + $0xd0] sm:$0xff]  ;;  %1401 = vst.msk [vmem:[%s2483_s3 + $0x5c] sm:$0xf] %vm1377_vm2, %v1602_v23  ;;  %v821_v43 = vadd.f32 %v1718_v37, %v179_v21  ;;  %v853_v44 = vadd.f32 %v1750_v38, %v211_v22  ;;  %v650_v45 = vpop.f32.mrb[31].mxu0 }
 0x128   :  { %v1632_v32 = vpack.c.bf16 %v1110_v18, %v1110_v18  ;;  %v980_v34 = vld [vmem:[#allocation2 + $0x1d0] sm:$0xff]  ;;  %1433 = vst.msk [vmem:[%s2483_s3 + $0xdc] sm:$0xf] %vm1377_vm2, %v1634_v24  ;;  %v1019_v39 = vadd.f32 %v2103_v1, %v948_v33  ;;  %v778_v46 = vpop.f32.mrb[31].mxu1  ;;  %v819_v51 = vadd.f32 %v650_v45, %v177_v29  ;;  %v1796_v24 = vld [vmem:[%s2482_s2] ss:$0 sm:$0xff] }
 0x129   :  { %v1051_v40 = vadd.f32 %v2103_v1, %v980_v34  ;;  %v946_v41 = vld [vmem:[#allocation2 + $0xc0] sm:$0xff]  ;;  %885 = vst.msk [vmem:[#allocation2 + $0xf0] sm:$0xff] %vm19_vm0, %v820_v25  ;;  %917 = vst.msk [vmem:[#allocation2 + $0x1f0] sm:$0xff] %vm19_vm0, %v852_v26  ;;  %v851_v52 = vadd.f32 %v778_v46, %v209_v30 }
 0x12a   :  { %v978_v42 = vld [vmem:[#allocation2 + $0x1c0] sm:$0xff]  ;;  %1399 = vst.msk [vmem:[%s2483_s3 + $0x54] sm:$0xf] %vm1377_vm2, %v1600_v31  ;;  %1431 = vst.msk [vmem:[%s2483_s3 + $0xd4] sm:$0xf] %vm1377_vm2, %v1632_v32  ;;  %v1017_v47 = vadd.f32 %v2103_v1, %v946_v41  ;;  %v949_v49 = vld [vmem:[#allocation2 + $0xd8] sm:$0xff] }
 0x12b   :  { %v1049_v48 = vadd.f32 %v2103_v1, %v978_v42  ;;  %v981_v50 = vld [vmem:[#allocation2 + $0x1d8] sm:$0xff]  ;;  %883 = vst.msk [vmem:[#allocation2 + $0xe0] sm:$0xff] %vm19_vm0, %v818_v35  ;;  %915 = vst.msk [vmem:[#allocation2 + $0x1e0] sm:$0xff] %vm19_vm0, %v850_v36  ;;  %v1083_v53 = vmax.f32 %v1019_v39, 0.0  ;;  %v1115_v54 = vmax.f32 %v1051_v40, 0.0  ;;  %v1020_v55 = vadd.f32 %v2103_v1, %v949_v49  ;;  %v947_v57 = vld [vmem:[#allocation2 + $0xc8] sm:$0xff] }
 0x12c   :  { %v1052_v56 = vadd.f32 %v2103_v1, %v981_v50  ;;  %v979_v58 = vld [vmem:[#allocation2 + $0x1c8] sm:$0xff]  ;;  %886 = vst.msk [vmem:[#allocation2 + $0xf8] sm:$0xff] %vm19_vm0, %v821_v43  ;;  %918 = vst.msk [vmem:[#allocation2 + $0x1f8] sm:$0xff] %vm19_vm0, %v853_v44  ;;  %v1081_v59 = vmax.f32 %v1017_v47, 0.0  ;;  %v1018_v61 = vadd.f32 %v2103_v1, %v947_v57 }
 0x12d   :  { %v1113_v60 = vmax.f32 %v1049_v48, 0.0  ;;  %v1050_v62 = vadd.f32 %v2103_v1, %v979_v58  ;;  %884 = vst.msk [vmem:[#allocation2 + $0xe8] sm:$0xff] %vm19_vm0, %v819_v51  ;;  %916 = vst.msk [vmem:[#allocation2 + $0x1e8] sm:$0xff] %vm19_vm0, %v851_v52  ;;  %v1605_v63 = vpack.c.bf16 %v1083_v53, %v1083_v53  ;;  %v1637_v0 = vpack.c.bf16 %v1115_v54, %v1115_v54 }
 0x12e   :  { %v1084_v2 = vmax.f32 %v1020_v55, 0.0  ;;  %v1116_v3 = vmax.f32 %v1052_v56, 0.0  ;;  %v1603_v4 = vpack.c.bf16 %v1081_v59, %v1081_v59  ;;  %v1082_v6 = vmax.f32 %v1018_v61, 0.0 }
 0x12f   :  { %v1635_v5 = vpack.c.bf16 %v1113_v60, %v1113_v60  ;;  %v1114_v7 = vmax.f32 %v1050_v62, 0.0  ;;  %1404 = vst.msk [vmem:[%s2483_s3 + $0x68] sm:$0xf] %vm1377_vm2, %v1605_v63  ;;  %1436 = vst.msk [vmem:[%s2483_s3 + $0xe8] sm:$0xf] %vm1377_vm2, %v1637_v0 }
 0x130   :  { %v1606_v8 = vpack.c.bf16 %v1084_v2, %v1084_v2  ;;  %v1638_v9 = vpack.c.bf16 %v1116_v3, %v1116_v3  ;;  %1402 = vst.msk [vmem:[%s2483_s3 + $0x60] sm:$0xf] %vm1377_vm2, %v1603_v4  ;;  %v1604_v10 = vpack.c.bf16 %v1082_v6, %v1082_v6  ;;  %v952_v12 = vld [vmem:[#allocation2 + $0xf0] sm:$0xff] }
 0x131   :  { %1434 = vst.msk [vmem:[%s2483_s3 + $0xe0] sm:$0xf] %vm1377_vm2, %v1635_v5  ;;  %v1636_v11 = vpack.c.bf16 %v1114_v7, %v1114_v7  ;;  %v984_v13 = vld [vmem:[#allocation2 + $0x1f0] sm:$0xff]  ;;  %v1023_v14 = vadd.f32 %v2103_v1, %v952_v12 }
 0x132   :  { %1405 = vst.msk [vmem:[%s2483_s3 + $0x6c] sm:$0xf] %vm1377_vm2, %v1606_v8  ;;  %1437 = vst.msk [vmem:[%s2483_s3 + $0xec] sm:$0xf] %vm1377_vm2, %v1638_v9  ;;  %v1055_v15 = vadd.f32 %v2103_v1, %v984_v13  ;;  %v950_v16 = vld [vmem:[#allocation2 + $0xe0] sm:$0xff] }
 0x133   :  { %v982_v17 = vld [vmem:[#allocation2 + $0x1e0] sm:$0xff]  ;;  %1403 = vst.msk [vmem:[%s2483_s3 + $0x64] sm:$0xf] %vm1377_vm2, %v1604_v10  ;;  %1435 = vst.msk [vmem:[%s2483_s3 + $0xe4] sm:$0xf] %vm1377_vm2, %v1636_v11  ;;  %v1021_v18 = vadd.f32 %v2103_v1, %v950_v16  ;;  %v953_v20 = vld [vmem:[#allocation2 + $0xf8] sm:$0xff] }
 0x134   :  { %v1053_v19 = vadd.f32 %v2103_v1, %v982_v17  ;;  %v985_v21 = vld [vmem:[#allocation2 + $0x1f8] sm:$0xff]  ;;  %v1087_v22 = vmax.f32 %v1023_v14, 0.0  ;;  %v1119_v23 = vmax.f32 %v1055_v15, 0.0  ;;  %v1024_v25 = vadd.f32 %v1796_v24, %v953_v20  ;;  %v951_v27 = vld [vmem:[#allocation2 + $0xe8] sm:$0xff] }
 0x135   :  { %v1056_v26 = vadd.f32 %v1796_v24, %v985_v21  ;;  %v983_v28 = vld [vmem:[#allocation2 + $0x1e8] sm:$0xff]  ;;  %v1085_v29 = vmax.f32 %v1021_v18, 0.0  ;;  %v1022_v31 = vadd.f32 %v1796_v24, %v951_v27 }
 0x136   :  { %v1117_v30 = vmax.f32 %v1053_v19, 0.0  ;;  %v1054_v32 = vadd.f32 %v1796_v24, %v983_v28  ;;  %v1609_v33 = vpack.c.bf16 %v1087_v22, %v1087_v22  ;;  %v1641_v34 = vpack.c.bf16 %v1119_v23, %v1119_v23 }
 0x137   :  { %v1088_v35 = vmax.f32 %v1024_v25, 0.0  ;;  %v1120_v1 = vmax.f32 %v1056_v26, 0.0  ;;  %v1607_v36 = vpack.c.bf16 %v1085_v29, %v1085_v29  ;;  %v1086_v38 = vmax.f32 %v1022_v31, 0.0 }
 0x138   :  { %v1639_v37 = vpack.c.bf16 %v1117_v30, %v1117_v30  ;;  %v1118_v39 = vmax.f32 %v1054_v32, 0.0  ;;  %1408 = vst.msk [vmem:[%s2483_s3 + $0x78] sm:$0xf] %vm1377_vm2, %v1609_v33  ;;  %1440 = vst.msk [vmem:[%s2483_s3 + $0xf8] sm:$0xf] %vm1377_vm2, %v1641_v34 }
 0x139   :  { %v1610_v40 = vpack.c.bf16 %v1088_v35, %v1088_v35  ;;  %v1642_v41 = vpack.c.bf16 %v1120_v1, %v1120_v1  ;;  %1406 = vst.msk [vmem:[%s2483_s3 + $0x70] sm:$0xf] %vm1377_vm2, %v1607_v36  ;;  %v1608_v42 = vpack.c.bf16 %v1086_v38, %v1086_v38 }
 0x13a   :  { %1438 = vst.msk [vmem:[%s2483_s3 + $0xf0] sm:$0xf] %vm1377_vm2, %v1639_v37  ;;  %v1640_v43 = vpack.c.bf16 %v1118_v39, %v1118_v39 }
 0x13b   :  { %1409 = vst.msk [vmem:[%s2483_s3 + $0x7c] sm:$0xf] %vm1377_vm2, %v1610_v40  ;;  %1441 = vst.msk [vmem:[%s2483_s3 + $0xfc] sm:$0xf] %vm1377_vm2, %v1642_v41 }
 0x13c   :  { %1407 = vst.msk [vmem:[%s2483_s3 + $0x74] sm:$0xf] %vm1377_vm2, %v1608_v42  ;;  %1439 = vst.msk [vmem:[%s2483_s3 + $0xf4] sm:$0xf] %vm1377_vm2, %v1640_v43 }

// kernel: srm_forward.4
= control target key start
LH: loop header
LB: loop body
LE: loop exit
PB: predicated region body
PF: predicated region fallthrough
CT: control target
= control target key end

     0   :  { %s4133_s15 = smov 0   ;;  %s4135_s16 = smov 0   ;;  %s6105_s0 = inlined_call_operand.vmem [shape: bf16[7,32,20,16], index: 0, kind: input, shape index: {}]   ;;  %s6106_s1 = inlined_call_operand.vmem [shape: bf16[7,80,48], index: 1, kind: input, shape index: {}]   ;;  %s6107_s2 = inlined_call_operand.vmem [shape: f32[1,48], index: 2, kind: input, shape index: {}]   ;;  %s6108_s3 = inlined_call_operand.vmem [shape: bf16[512,48], index: 3, kind: output, shape index: {0}]   ;;  %s6109_s4 = inlined_call_operand.vmem [shape: f32[32,48], index: 4, kind: output, shape index: {1}]  }
   0x1   :  { %s4137_s17 = smov 0  }
   0x2 LB: > { %s24_s18 = sadd.s32 1, %s4097_s16  ;;  %p3596_p0 = scmp.ge.s32.totalorder %s4101_s17, 1  ;;  %s4101_s17 = sphi %s4137_s17, %s15_s17   ;;  %s4097_s16 = sphi %s4135_s16, %s6111_s16   ;;  %s4093_s15 = sphi %s4133_s15, %s6110_s15  }
   0x3   : > { %p25_p1 = scmp.ge.s32.totalorder %s24_s18, 7  ;;  %p195_p2 = scmp.lt.s32.totalorder %s4101_s17, 8 }
   0x5   : > { %s6113_s18 = smov (%p25_p1, %s24_s18), 0  ;;  %p196_p3 = pnand %p3596_p0, %p195_p2 }
   0x6   : > { %p237_p4 = scmp.lt.s32.totalorder (!%p196_p3), %s4093_s15, 6  ;;  %p3599_p5 = scmp.ne.s32.totalorder (!%p196_p3), %s4093_s15, 0 }
   0x7   : > { %199 = sbr.rel (%p196_p3) target bundleno = 746 (0x2ea), region = 32 }
   0xe   : > { %s238_s19 = scalar_select %p237_p4, %s4093_s15, 6 }
   0xf   : > { %268 = sbr.rel (%p3599_p5) target bundleno = 48 (0x30), region = 36  ;;  %vm269_vm0 = vcmask (!%p3599_p5), 392192   ;;  %v4103_v0 = vmov (!%p3599_p5), 0.0  }
  0x10   : > { %s3958_s20 = smul.u32 384, %s238_s19  ;;  %270 = vst.msk [vmem:[#allocation2] sm:$0xff] (!%p3599_p5), %vm269_vm0, %v4103_v0  ;;  %271 = vst.msk [vmem:[#allocation2 + $0x8] sm:$0xff] (!%p3599_p5), %vm269_vm0, %v4103_v0 }
  0x11   : > { %s3959_s21 = smul.u32 40, %s238_s19  ;;  %272 = vst.msk [vmem:[#allocation2 + $0x10] sm:$0xff] (!%p3599_p5), %vm269_vm0, %v4103_v0  ;;  %273 = vst.msk [vmem:[#allocation2 + $0x18] sm:$0xff] (!%p3599_p5), %vm269_vm0, %v4103_v0 }
  0x12   : > { %s4158_s24 = scalar_lea.vmem %s6105_s0, %s3958_s20  ;;  %274 = vst.msk [vmem:[#allocation2 + $0x20] sm:$0xff] (!%p3599_p5), %vm269_vm0, %v4103_v0  ;;  %275 = vst.msk [vmem:[#allocation2 + $0x28] sm:$0xff] (!%p3599_p5), %vm269_vm0, %v4103_v0 }
  0x13   : > { %s4163_s27 = scalar_lea.vmem %s6106_s1, %s3959_s21  ;;  %276 = vst.msk [vmem:[#allocation2 + $0x30] sm:$0xff] (!%p3599_p5), %vm269_vm0, %v4103_v0  ;;  %277 = vst.msk [vmem:[#allocation2 + $0x38] sm:$0xff] (!%p3599_p5), %vm269_vm0, %v4103_v0 }
  0x14   : > { %278 = vst.msk [vmem:[#allocation2 + $0x40] sm:$0xff] (!%p3599_p5), %vm269_vm0, %v4103_v0  ;;  %279 = vst.msk [vmem:[#allocation2 + $0x48] sm:$0xff] (!%p3599_p5), %vm269_vm0, %v4103_v0 }
  0x15   : > { %280 = vst.msk [vmem:[#allocation2 + $0x50] sm:$0xff] (!%p3599_p5), %vm269_vm0, %v4103_v0  ;;  %281 = vst.msk [vmem:[#allocation2 + $0x58] sm:$0xff] (!%p3599_p5), %vm269_vm0, %v4103_v0 }
  0x16   : > { %282 = vst.msk [vmem:[#allocation2 + $0x60] sm:$0xff] %vm269_vm0, %v4103_v0  ;;  %283 = vst.msk [vmem:[#allocation2 + $0x68] sm:$0xff] %vm269_vm0, %v4103_v0 }
  0x17   : > { %284 = vst.msk [vmem:[#allocation2 + $0x70] sm:$0xff] %vm269_vm0, %v4103_v0  ;;  %285 = vst.msk [vmem:[#allocation2 + $0x78] sm:$0xff] %vm269_vm0, %v4103_v0 }
  0x18   : > { %286 = vst.msk [vmem:[#allocation2 + $0x80] sm:$0xff] %vm269_vm0, %v4103_v0  ;;  %287 = vst.msk [vmem:[#allocation2 + $0x88] sm:$0xff] %vm269_vm0, %v4103_v0 }
  0x19   : > { %288 = vst.msk [vmem:[#allocation2 + $0x90] sm:$0xff] %vm269_vm0, %v4103_v0  ;;  %289 = vst.msk [vmem:[#allocation2 + $0x98] sm:$0xff] %vm269_vm0, %v4103_v0 }
  0x1a   : > { %290 = vst.msk [vmem:[#allocation2 + $0xa0] sm:$0xff] %vm269_vm0, %v4103_v0  ;;  %291 = vst.msk [vmem:[#allocation2 + $0xa8] sm:$0xff] %vm269_vm0, %v4103_v0 }
  0x1b   : > { %292 = vst.msk [vmem:[#allocation2 + $0xb0] sm:$0xff] %vm269_vm0, %v4103_v0  ;;  %293 = vst.msk [vmem:[#allocation2 + $0xb8] sm:$0xff] %vm269_vm0, %v4103_v0 }
  0x1c   : > { %294 = vst.msk [vmem:[#allocation2 + $0xc0] sm:$0xff] %vm269_vm0, %v4103_v0  ;;  %295 = vst.msk [vmem:[#allocation2 + $0xc8] sm:$0xff] %vm269_vm0, %v4103_v0 }
  0x1d   : > { %296 = vst.msk [vmem:[#allocation2 + $0xd0] sm:$0xff] %vm269_vm0, %v4103_v0  ;;  %297 = vst.msk [vmem:[#allocation2 + $0xd8] sm:$0xff] %vm269_vm0, %v4103_v0 }
  0x1e   : > { %298 = vst.msk [vmem:[#allocation2 + $0xe0] sm:$0xff] %vm269_vm0, %v4103_v0  ;;  %299 = vst.msk [vmem:[#allocation2 + $0xe8] sm:$0xff] %vm269_vm0, %v4103_v0 }
  0x1f   : > { %300 = vst.msk [vmem:[#allocation2 + $0xf0] sm:$0xff] %vm269_vm0, %v4103_v0  ;;  %301 = vst.msk [vmem:[#allocation2 + $0xf8] sm:$0xff] %vm269_vm0, %v4103_v0 }
  0x20   : > { %302 = vst.msk [vmem:[#allocation2 + $0x100] sm:$0xff] %vm269_vm0, %v4103_v0  ;;  %303 = vst.msk [vmem:[#allocation2 + $0x108] sm:$0xff] %vm269_vm0, %v4103_v0 }
  0x21   : > { %304 = vst.msk [vmem:[#allocation2 + $0x110] sm:$0xff] %vm269_vm0, %v4103_v0  ;;  %305 = vst.msk [vmem:[#allocation2 + $0x118] sm:$0xff] %vm269_vm0, %v4103_v0 }
  0x22   : > { %306 = vst.msk [vmem:[#allocation2 + $0x120] sm:$0xff] %vm269_vm0, %v4103_v0  ;;  %307 = vst.msk [vmem:[#allocation2 + $0x128] sm:$0xff] %vm269_vm0, %v4103_v0 }
  0x23   : > { %308 = vst.msk [vmem:[#allocation2 + $0x130] sm:$0xff] %vm269_vm0, %v4103_v0  ;;  %309 = vst.msk [vmem:[#allocation2 + $0x138] sm:$0xff] %vm269_vm0, %v4103_v0 }
  0x24   : > { %310 = vst.msk [vmem:[#allocation2 + $0x140] sm:$0xff] %vm269_vm0, %v4103_v0  ;;  %311 = vst.msk [vmem:[#allocation2 + $0x148] sm:$0xff] %vm269_vm0, %v4103_v0 }
  0x25   : > { %312 = vst.msk [vmem:[#allocation2 + $0x150] sm:$0xff] %vm269_vm0, %v4103_v0  ;;  %313 = vst.msk [vmem:[#allocation2 + $0x158] sm:$0xff] %vm269_vm0, %v4103_v0 }
  0x26   : > { %314 = vst.msk [vmem:[#allocation2 + $0x160] sm:$0xff] %vm269_vm0, %v4103_v0  ;;  %315 = vst.msk [vmem:[#allocation2 + $0x168] sm:$0xff] %vm269_vm0, %v4103_v0 }
  0x27   : > { %316 = vst.msk [vmem:[#allocation2 + $0x170] sm:$0xff] %vm269_vm0, %v4103_v0  ;;  %317 = vst.msk [vmem:[#allocation2 + $0x178] sm:$0xff] %vm269_vm0, %v4103_v0 }
  0x28   : > { %318 = vst.msk [vmem:[#allocation2 + $0x180] sm:$0xff] %vm269_vm0, %v4103_v0  ;;  %319 = vst.msk [vmem:[#allocation2 + $0x188] sm:$0xff] %vm269_vm0, %v4103_v0 }
  0x29   : > { %320 = vst.msk [vmem:[#allocation2 + $0x190] sm:$0xff] %vm269_vm0, %v4103_v0  ;;  %321 = vst.msk [vmem:[#allocation2 + $0x198] sm:$0xff] %vm269_vm0, %v4103_v0 }
  0x2a   : > { %322 = vst.msk [vmem:[#allocation2 + $0x1a0] sm:$0xff] %vm269_vm0, %v4103_v0  ;;  %323 = vst.msk [vmem:[#allocation2 + $0x1a8] sm:$0xff] %vm269_vm0, %v4103_v0 }
  0x2b   : > { %324 = vst.msk [vmem:[#allocation2 + $0x1b0] sm:$0xff] %vm269_vm0, %v4103_v0  ;;  %325 = vst.msk [vmem:[#allocation2 + $0x1b8] sm:$0xff] %vm269_vm0, %v4103_v0 }
  0x2c   : > { %326 = vst.msk [vmem:[#allocation2 + $0x1c0] sm:$0xff] %vm269_vm0, %v4103_v0  ;;  %327 = vst.msk [vmem:[#allocation2 + $0x1c8] sm:$0xff] %vm269_vm0, %v4103_v0 }
  0x2d   : > { %328 = vst.msk [vmem:[#allocation2 + $0x1d0] sm:$0xff] %vm269_vm0, %v4103_v0  ;;  %329 = vst.msk [vmem:[#allocation2 + $0x1d8] sm:$0xff] %vm269_vm0, %v4103_v0 }
  0x2e   : > { %330 = vst.msk [vmem:[#allocation2 + $0x1e0] sm:$0xff] %vm269_vm0, %v4103_v0  ;;  %331 = vst.msk [vmem:[#allocation2 + $0x1e8] sm:$0xff] %vm269_vm0, %v4103_v0 }
  0x2f   : > { %332 = vst.msk [vmem:[#allocation2 + $0x1f0] sm:$0xff] %vm269_vm0, %v4103_v0  ;;  %333 = vst.msk [vmem:[#allocation2 + $0x1f8] sm:$0xff] %vm269_vm0, %v4103_v0 }
  0x30 PF: > { %v4295_v1 = vld [vmem:[%s4158_s24 + $0xc0] sm:$0xff]   ;;  %v4298_v2 = vld [vmem:[%s4158_s24 + $0xc8] ss:$0 sps:$4 sm:$0x33]   ;;  %vm1135_vm1 = vcmask 1046528   ;;  %v4312_v10 = vld [vmem:[%s4158_s24 + $0xc] sm:$0xff]  }
  0x31   : > { %v1184_v3 = vrot.slane %v4295_v1, 1  ;;  %v1185_v4 = vrot.slane %v4298_v2, 1  ;;  %v4303_v5 = vld [vmem:[%s4158_s24] sm:$0xff]   ;;  %v4306_v6 = vld [vmem:[%s4158_s24 + $0x8] ss:$0 sps:$4 sm:$0x33]  }
  0x32   : > { %v1136_v8 = vrot.slane %v4303_v5, 1  ;;  %v1137_v9 = vrot.slane %v4306_v6, 1  ;;  %v4315_v11 = vld [vmem:[%s4158_s24 + $0x14] ss:$0 sps:$4 sm:$0x33]   ;;  %s4104_s28 = smov 32  }
  0x33   : > { %v1186_v7 = vsel %vm1135_vm1, %v1184_v3, %v1185_v4  ;;  %vm686_vm2 = vsmask.f32 7424  ;;  %v688_v12 = vshrl.u32 %v4303_v5, 16  ;;  %v690_v13 = vshll.u32 %v4303_v5, 16  ;;  %v4326_v19 = vld [vmem:[%s4158_s24 + $0xcc] sm:$0xff]   ;;  %s4105_s29 = smov 16  }
  0x34   : > { %1264 = vrot.lane.b32.xlu1 %v1186_v7, %s4104_s28  ;;  %v695_v14 = vshll.u32 %v4306_v6, 16  ;;  %v1138_v15 = vsel %vm1135_vm1, %v1136_v8, %v1137_v9  ;;  %v700_v16 = vshrl.u32 %v4312_v10, 16  ;;  %v702_v17 = vshll.u32 %v4312_v10, 16  ;;  %v4330_v24 = vld [vmem:[%s4158_s24 + $0xd4] ss:$0 sps:$4 sm:$0x33]  }
  0x35   : > { %v707_v18 = vshll.u32 %v4315_v11, 16  ;;  %1232 = vrot.lane.b32.xlu0 %v1138_v15, %s4104_s28  ;;  %v692_v20 = vrot.slane %v690_v13, 1  ;;  %v892_v25 = vshrl.u32 %v4326_v19, 16  ;;  %v894_v27 = vshll.u32 %v4326_v19, 16  ;;  %s4106_s30 = smov 48   ;;  %s4107_s5 = smov 64  }
  0x36   : > { %v697_v21 = vrot.slane %v695_v14, 1  ;;  %v704_v22 = vrot.slane %v702_v17, 1  ;;  %v880_v28 = vshrl.u32 %v4295_v1, 16  ;;  %v882_v29 = vshll.u32 %v4295_v1, 16  ;;  %p3701_p6 = scmp.ne.s32.totalorder %s4093_s15, 6 }
  0x37   : > { %v709_v23 = vrot.slane %v707_v18, 1  ;;  %v693_v26 = vor.u32 %v692_v20, %v688_v12  ;;  %v899_v31 = vshll.u32 %v4330_v24, 16  ;;  %v887_v32 = vshll.u32 %v4298_v2, 16 }
  0x38   : > { %v705_v30 = vor.u32 %v704_v22, %v700_v16  ;;  %v1187_v33 = vrot.slane %v4326_v19, 1  ;;  %v896_v35 = vrot.slane %v894_v27, 1  ;;  %v884_v36 = vrot.slane %v882_v29, 1 }
  0x39   : > { %v698_v34 = vsel %vm686_vm2, %v693_v26, %v697_v21  ;;  %v1188_v37 = vrot.slane %v4330_v24, 1  ;;  %v901_v39 = vrot.slane %v899_v31, 1  ;;  %v889_v40 = vrot.slane %v887_v32, 1 }
  0x3a   : > { %v710_v38 = vsel %vm686_vm2, %v705_v30, %v709_v23  ;;  %1071 = vrot.lane.b32.xlu0 %v698_v34, %s4105_s29  ;;  %v1139_v41 = vrot.slane %v4312_v10, 1  ;;  %v897_v42 = vor.u32 %v896_v35, %v892_v25  ;;  %v885_v43 = vor.u32 %v884_v36, %v880_v28  ;;  %v4364_v23 = vld [vmem:[%s4158_s24 + $0x18] sm:$0xff]   ;;  %v4376_v30 = vld [vmem:[%s4158_s24 + $0xe4] sm:$0xff]   ;;  %v4384_v34 = vld [vmem:[%s4158_s24 + $0xe0] ss:$0 sps:$4 sm:$0x33]  }
  0x3b   : > { %1073 = vrot.lane.b32.xlu1 %v710_v38, %s4105_s29  ;;  %v1140_v44 = vrot.slane %v4315_v11, 1  ;;  %vm1296_vm3 = vsmask.f32 6400  ;;  %v1441_v45 = vrot.slane %v880_v28, 1  ;;  %v1442_v46 = vrot.slane %v882_v29, 2 }
  0x3c   : > { %v1444_v47 = vshrl.u32 %v4298_v2, 16  ;;  %v902_v48 = vsel %vm686_vm2, %v897_v42, %v901_v39  ;;  %v890_v49 = vsel %vm686_vm2, %v885_v43, %v889_v40  ;;  %v1189_v50 = vsel %vm1135_vm1, %v1187_v33, %v1188_v37  ;;  %v4399_v40 = vld [vmem:[%s4158_s24 + $0xec] ss:$0 sps:$4 sm:$0x33]  }
  0x3d   : > { %v1447_v51 = vrot.slane %v887_v32, 2  ;;  %v1141_v52 = vsel %vm1135_vm1, %v1139_v41, %v1140_v44  ;;  %v1297_v54 = vrot.slane %v688_v12, 1  ;;  %v1298_v55 = vrot.slane %v690_v13, 2 }
  0x3e   : > { %1103 = vrot.lane.b32.xlu0 %v890_v49, %s4105_s29  ;;  %v1446_v53 = vrot.slane %v1444_v47, 1  ;;  %v1300_v56 = vshrl.u32 %v4306_v6, 16  ;;  %v1303_v57 = vrot.slane %v695_v14, 2  ;;  %v1450_v58 = vrot.slane %v892_v25, 1 }
  0x3f   : > { %1105 = vrot.lane.b32.xlu1 %v902_v48, %s4105_s29  ;;  %v1451_v59 = vrot.slane %v894_v27, 2  ;;  %v1443_v60 = vor.u32 %v1442_v46, %v1441_v45  ;;  %v1453_v62 = vshrl.u32 %v4330_v24, 16  ;;  %v1456_v63 = vrot.slane %v899_v31, 2  ;;  %v4367_v25 = vld [vmem:[%s4158_s24 + $0x20] ss:$0 sps:$4 sm:$0x33]  }
  0x40   : > { %v1448_v61 = vor.u32 %v1447_v51, %v1446_v53  ;;  %v1299_v0 = vor.u32 %v1298_v55, %v1297_v54  ;;  %v1302_v3 = vrot.slane %v1300_v56, 1  ;;  %v1306_v4 = vrot.slane %v700_v16, 1  ;;  %v4360_v16 = vld [vmem:[%s4158_s24 + $0xd8] sm:$0xff]   ;;  %v4379_v31 = vld [vmem:[%s4158_s24 + $0x24] sm:$0xff]  }
  0x41   : > { %v1307_v7 = vrot.slane %v702_v17, 2  ;;  %v1455_v8 = vrot.slane %v1453_v62, 1  ;;  %v1309_v9 = vshrl.u32 %v4315_v11, 16  ;;  %v1312_v12 = vrot.slane %v707_v18, 2  ;;  %v4021_v45 = vld [vmem:[%s4163_s27] sm:$0xff]   ;;  %v4027_v62 = vld [vmem:[%s4163_s27 + $0x10] sm:$0xff]  }
  0x42   : > { %1234 = vrot.lane.b32.xlu0 %v1141_v52, %s4104_s28  ;;  %v1304_v13 = vor.u32 %v1303_v57, %v1302_v3  ;;  %v1452_v14 = vor.u32 %v1451_v59, %v1450_v58  ;;  %v1449_v15 = vsel %vm1296_vm3, %v1443_v60, %v1448_v61  ;;  %v1698_v26 = vrot.slane %v4295_v1, 2  ;;  %3874 = vmatprep.subr.bf16.mxu0 %v4021_v45  ;;  %v4022_v58 = vld [vmem:[%s4163_s27 + $0x8] sm:$0xff]  }
  0x43   : > { %1266 = vrot.lane.b32.xlu1 %v1189_v50, %s4104_s28  ;;  %v1457_v20 = vor.u32 %v1456_v63, %v1455_v8  ;;  %v1308_v21 = vor.u32 %v1307_v7, %v1306_v4  ;;  %v1311_v22 = vrot.slane %v1309_v9, 1  ;;  %v1699_v27 = vrot.slane %v4298_v2, 2  ;;  %3948 = vmatprep.subr.bf16.mxu1 %v4021_v45 }
  0x44   : > { %v1305_v17 = vsel %vm1296_vm3, %v1299_v0, %v1304_v13  ;;  %vm1649_vm4 = vcmask 1045504   ;;  %v1650_v28 = vrot.slane %v4303_v5, 2  ;;  %v1651_v29 = vrot.slane %v4306_v6, 2  ;;  %v4391_v6 = vld [vmem:[%s4158_s24 + $0x2c] ss:$0 sps:$4 sm:$0x33]   ;;  %3875 = vmatpush3.bf16.msra.mxu0 %v4021_v45  ;;  %3953 = vmatpush3.bf16.msra.mxu1 %v4021_v45 }
  0x45   : > { %v1313_v18 = vor.u32 %v1312_v12, %v1311_v22  ;;  %v1458_v32 = vsel %vm1296_vm3, %v1452_v14, %v1457_v20  ;;  %v906_v1 = vshll.u32 %v4360_v16, 16  ;;  %v1701_v2 = vrot.slane %v4326_v19, 2  ;;  %3876 = vmatprep.subr.bf16.mxu0 %v4022_v58  ;;  %3949 = vmatprep.subr.bf16.mxu1 %v4022_v58  ;;  %v4032_v22 = vld [vmem:[%s4163_s27 + $0x18] sm:$0xff]  }
  0x46   : > { %1585 = vrot.lane.b32.xlu0 %v1305_v17, %s4106_s30  ;;  %v1702_v35 = vrot.slane %v4330_v24, 2  ;;  %v714_v5 = vshll.u32 %v4364_v23, 16  ;;  %v1700_v36 = vsel %vm1649_vm4, %v1698_v26, %v1699_v27  ;;  %v1653_v37 = vrot.slane %v4312_v10, 2 }
  0x47   : > { %1617 = vrot.lane.b32.xlu1 %v1449_v15, %s4106_s30  ;;  %v1314_v33 = vsel %vm1296_vm3, %v1308_v21, %v1313_v18  ;;  %v1654_v38 = vrot.slane %v4315_v11, 2  ;;  %v719_v39 = vshll.u32 %v4367_v25, 16  ;;  %v1652_v19 = vsel %vm1649_vm4, %v1650_v28, %v1651_v29 }
  0x48   : > { %v712_v24 = vshrl.u32 %v4364_v23, 16  ;;  %v716_v41 = vrot.slane %v714_v5, 1  ;;  %v726_v42 = vshll.u32 %v4379_v31, 16  ;;  %v904_v43 = vshrl.u32 %v4360_v16, 16  ;;  %3877 = vmatpush3.bf16.msra.mxu0 %v4022_v58  ;;  %3954 = vmatpush3.bf16.msra.mxu1 %v4022_v58 }
  0x49   : > { %v908_v10 = vrot.slane %v906_v1, 1  ;;  %v911_v11 = vshll.u32 %v4384_v34, 16  ;;  %v918_v44 = vshll.u32 %v4376_v30, 16  ;;  %v1703_v46 = vsel %vm1649_vm4, %v1701_v2, %v1702_v35  ;;  %3878 = vmatprep.subr.bf16.mxu0 %v4027_v62  ;;  %3950 = vmatprep.subr.bf16.mxu1 %v4027_v62  ;;  %v4500_v58 = vld [vmem:[%s4158_s24 + $0x38] ss:$0 sps:$4 sm:$0x33]  }
  0x4a   : > { %1587 = vrot.lane.b32.xlu0 %v1314_v33, %s4106_s30  ;;  %v1655_v47 = vsel %vm1649_vm4, %v1653_v37, %v1654_v38  ;;  %v721_v48 = vrot.slane %v719_v39, 1  ;;  %v916_v49 = vshrl.u32 %v4376_v30, 16  ;;  %v717_v50 = vor.u32 %v716_v41, %v712_v24 }
  0x4b   : > { %1619 = vrot.lane.b32.xlu1 %v1458_v32, %s4106_s30  ;;  %v724_v51 = vshrl.u32 %v4379_v31, 16  ;;  %v728_v52 = vrot.slane %v726_v42, 1  ;;  %v731_v53 = vshll.u32 %v4391_v6, 16  ;;  %v909_v54 = vor.u32 %v908_v10, %v904_v43  ;;  %v4033_v10 = vld [vmem:[%s4163_s27 + $0x20] sm:$0xff]  }
  0x4c   : > { %v913_v55 = vrot.slane %v911_v11, 1  ;;  %v920_v56 = vrot.slane %v918_v44, 1  ;;  %v923_v57 = vshll.u32 %v4399_v40, 16  ;;  %v722_v59 = vsel %vm686_vm2, %v717_v50, %v721_v48  ;;  %3879 = vmatpush3.bf16.msra.mxu0 %v4027_v62  ;;  %3955 = vmatpush3.bf16.msra.mxu1 %v4027_v62 }
  0x4d   : > { %v729_v60 = vor.u32 %v728_v52, %v724_v51  ;;  %v733_v61 = vrot.slane %v731_v53, 1  ;;  %v1142_v4 = vrot.slane %v4364_v23, 1  ;;  %v1143_v7 = vrot.slane %v4367_v25, 1  ;;  %3880 = vmatprep.subr.bf16.mxu0 %v4032_v22  ;;  %3951 = vmatprep.subr.bf16.mxu1 %v4032_v22 }
  0x4e   : > { %1746 = vrot.lane.b32.xlu0 %v1652_v19, %s4107_s5  ;;  %v914_v63 = vsel %vm686_vm2, %v909_v54, %v913_v55  ;;  %v921_v0 = vor.u32 %v920_v56, %v916_v49  ;;  %v925_v3 = vrot.slane %v923_v57, 1  ;;  %v1190_v8 = vrot.slane %v4360_v16, 1 }
  0x4f   : > { %1778 = vrot.lane.b32.xlu1 %v1700_v36, %s4107_s5  ;;  %v734_v9 = vsel %vm686_vm2, %v729_v60, %v733_v61  ;;  %v1191_v12 = vrot.slane %v4384_v34, 1  ;;  %v1318_v13 = vshrl.u32 %v4367_v25, 16  ;;  %v1193_v15 = vrot.slane %v4376_v30, 1 }
  0x50   : > { %v926_v14 = vsel %vm686_vm2, %v921_v0, %v925_v3  ;;  %v1194_v20 = vrot.slane %v4399_v40, 1  ;;  %v1462_v21 = vshrl.u32 %v4384_v34, 16  ;;  %v1144_v17 = vsel %vm1135_vm1, %v1142_v4, %v1143_v7  ;;  %3881 = vmatpush3.bf16.msra.mxu0 %v4032_v22  ;;  %3956 = vmatpush3.bf16.msra.mxu1 %v4032_v22  ;;  %v4511_v3 = vld [vmem:[%s4158_s24 + $0xfc] sm:$0xff]  }
  0x51   : > { %v1145_v18 = vrot.slane %v4379_v31, 1  ;;  %v1146_v26 = vrot.slane %v4391_v6, 1  ;;  %v1459_v27 = vrot.slane %v904_v43, 1  ;;  %v1460_v28 = vrot.slane %v906_v1, 2  ;;  %3882 = vmatprep.subr.bf16.mxu0 %v4033_v10  ;;  %3952 = vmatprep.subr.bf16.mxu1 %v4033_v10  ;;  %v4514_v4 = vld [vmem:[%s4158_s24 + $0x3c] sm:$0xff]  }
  0x52   : > { %1748 = vrot.lane.b32.xlu0 %v1655_v47, %s4107_s5  ;;  %v1315_v29 = vrot.slane %v712_v24, 1  ;;  %v1316_v32 = vrot.slane %v714_v5, 2  ;;  %v1465_v33 = vrot.slane %v911_v11, 2  ;;  %v1320_v2 = vrot.slane %v1318_v13, 1 }
  0x53   : > { %1780 = vrot.lane.b32.xlu1 %v1703_v46, %s4107_s5  ;;  %v1321_v35 = vrot.slane %v719_v39, 2  ;;  %v1327_v36 = vshrl.u32 %v4391_v6, 16  ;;  %v1192_v1 = vsel %vm1135_vm1, %v1190_v8, %v1191_v12  ;;  %v1464_v37 = vrot.slane %v1462_v21, 1 }
  0x54   : > { %v1471_v38 = vshrl.u32 %v4399_v40, 16  ;;  %v1195_v5 = vsel %vm1135_vm1, %v1193_v15, %v1194_v20  ;;  %v1147_v19 = vsel %vm1135_vm1, %v1145_v18, %v1146_v26  ;;  %v1461_v24 = vor.u32 %v1460_v28, %v1459_v27  ;;  %3883 = vmatpush3.bf16.msra.mxu0 %v4033_v10  ;;  %3957 = vmatpush3.bf16.msra.mxu1 %v4033_v10  ;;  %v4532_v15 = vld [vmem:[%s4158_s24 + $0x104] ss:$0 sps:$4 sm:$0x33]  }
  0x55   : > { %v1317_v41 = vor.u32 %v1316_v32, %v1315_v29  ;;  %v1468_v39 = vrot.slane %v916_v49, 1  ;;  %v1324_v43 = vrot.slane %v724_v51, 1  ;;  %v1322_v11 = vor.u32 %v1321_v35, %v1320_v2 }
  0x56   : > { %1075 = vrot.lane.b32.xlu0 %v722_v59, %s4105_s29  ;;  %v1325_v45 = vrot.slane %v726_v42, 2  ;;  %v1329_v46 = vrot.slane %v1327_v36, 1  ;;  %v1330_v47 = vrot.slane %v731_v53, 2  ;;  %v1466_v48 = vor.u32 %v1465_v33, %v1464_v37 }
  0x57   : > { %1107 = vrot.lane.b32.xlu1 %v914_v63, %s4105_s29  ;;  %v1469_v50 = vrot.slane %v918_v44, 2  ;;  %v1473_v49 = vrot.slane %v1471_v38, 1  ;;  %v1474_v51 = vrot.slane %v923_v57, 2  ;;  %v1323_v42 = vsel %vm1296_vm3, %v1317_v41, %v1322_v11  ;;  %v4493_v44 = vld [vmem:[%s4158_s24 + $0x30] sm:$0xff]  }
  0x58   : > { %v1326_v52 = vor.u32 %v1325_v45, %v1324_v43  ;;  %v1331_v53 = vor.u32 %v1330_v47, %v1329_v46  ;;  %v1467_v54 = vsel %vm1296_vm3, %v1461_v24, %v1466_v48  ;;  %v4497_v57 = vld [vmem:[%s4158_s24 + $0xf0] sm:$0xff]   ;;  %v1704_v59 = vrot.slane %v4360_v16, 2  ;;  %v4518_v16 = vld [vmem:[%s4158_s24 + $0xf8] ss:$0 sps:$4 sm:$0x33]  }
  0x59   : > { %v1470_v55 = vor.u32 %v1469_v50, %v1468_v39  ;;  %v1475_v56 = vor.u32 %v1474_v51, %v1473_v49  ;;  %v1705_v60 = vrot.slane %v4384_v34, 2  ;;  %v1656_v62 = vrot.slane %v4364_v23, 2  ;;  %v4524_v23 = vld [vmem:[%s4158_s24 + $0x44] ss:$0 sps:$4 sm:$0x33]  }
  0x5a   : > { %1077 = vrot.lane.b32.xlu0 %v734_v9, %s4105_s29  ;;  %v1332_v61 = vsel %vm1296_vm3, %v1326_v52, %v1331_v53  ;;  %v1657_v63 = vrot.slane %v4367_v25, 2  ;;  %v738_v0 = vshll.u32 %v4493_v44, 16  ;;  %v930_v34 = vshll.u32 %v4497_v57, 16 }
  0x5b   : > { %1109 = vrot.lane.b32.xlu1 %v926_v14, %s4105_s29  ;;  %v1476_v7 = vsel %vm1296_vm3, %v1470_v55, %v1475_v56  ;;  %v1707_v8 = vrot.slane %v4376_v30, 2  ;;  %v1708_v9 = vrot.slane %v4399_v40, 2  ;;  %v1706_v25 = vsel %vm1649_vm4, %v1704_v59, %v1705_v60 }
  0x5c   : > { %v1659_v12 = vrot.slane %v4379_v31, 2  ;;  %v1660_v13 = vrot.slane %v4391_v6, 2  ;;  %v743_v14 = vshll.u32 %v4500_v58, 16  ;;  %v1658_v30 = vsel %vm1649_vm4, %v1656_v62, %v1657_v63 }
  0x5d   : > { %v736_v40 = vshrl.u32 %v4493_v44, 16  ;;  %v740_v20 = vrot.slane %v738_v0, 1  ;;  %v750_v21 = vshll.u32 %v4514_v4, 16  ;;  %v928_v22 = vshrl.u32 %v4497_v57, 16 }
  0x5e   : > { %1236 = vrot.lane.b32.xlu0 %v1144_v17, %s4104_s28  ;;  %v932_v31 = vrot.slane %v930_v34, 1  ;;  %v935_v6 = vshll.u32 %v4518_v16, 16  ;;  %v942_v17 = vshll.u32 %v4511_v3, 16  ;;  %v1709_v18 = vsel %vm1649_vm4, %v1707_v8, %v1708_v9 }
  0x5f   : > { %1268 = vrot.lane.b32.xlu1 %v1192_v1, %s4104_s28  ;;  %v1661_v26 = vsel %vm1649_vm4, %v1659_v12, %v1660_v13  ;;  %v745_v27 = vrot.slane %v743_v14, 1  ;;  %v940_v28 = vshrl.u32 %v4511_v3, 16  ;;  %v741_v29 = vor.u32 %v740_v20, %v736_v40 }
  0x60   : > { %v748_v32 = vshrl.u32 %v4514_v4, 16  ;;  %v752_v33 = vrot.slane %v750_v21, 1  ;;  %v755_v2 = vshll.u32 %v4524_v23, 16  ;;  %v933_v35 = vor.u32 %v932_v31, %v928_v22 }
  0x61   : > { %v937_v36 = vrot.slane %v935_v6, 1  ;;  %v944_v1 = vrot.slane %v942_v17, 1  ;;  %v947_v37 = vshll.u32 %v4532_v15, 16  ;;  %v746_v38 = vsel %vm686_vm2, %v741_v29, %v745_v27 }
  0x62   : > { %1238 = vrot.lane.b32.xlu0 %v1147_v19, %s4104_s28  ;;  %v757_v19 = vrot.slane %v755_v2, 1  ;;  %v1196_v43 = vrot.slane %v4497_v57, 1  ;;  %v1197_v10 = vrot.slane %v4518_v16, 1  ;;  %v1148_v45 = vrot.slane %v4493_v44, 1 }
  0x63   : > { %1270 = vrot.lane.b32.xlu1 %v1195_v5, %s4104_s28  ;;  %v753_v5 = vor.u32 %v752_v33, %v748_v32  ;;  %v938_v24 = vsel %vm686_vm2, %v933_v35, %v937_v36  ;;  %v945_v41 = vor.u32 %v944_v1, %v940_v28  ;;  %v949_v39 = vrot.slane %v947_v37, 1  ;;  %v4602_v1 = vld [vmem:[%s4158_s24 + $0x50] ss:$0 sps:$4 sm:$0x33]  }
  0x64   : > { %v1149_v46 = vrot.slane %v4500_v58, 1  ;;  %v1336_v47 = vshrl.u32 %v4500_v58, 16  ;;  %v1199_v50 = vrot.slane %v4511_v3, 1  ;;  %v1200_v49 = vrot.slane %v4532_v15, 1 }
  0x65   : > { %v758_v11 = vsel %vm686_vm2, %v753_v5, %v757_v19  ;;  %v950_v48 = vsel %vm686_vm2, %v945_v41, %v949_v39  ;;  %v1480_v51 = vshrl.u32 %v4518_v16, 16  ;;  %v1152_v52 = vrot.slane %v4524_v23, 1  ;;  %v4619_v39 = vld [vmem:[%s4158_s24 + $0x114] sm:$0xff]  }
  0x66   : > { %1589 = vrot.lane.b32.xlu0 %v1323_v42, %s4106_s30  ;;  %v1151_v42 = vrot.slane %v4514_v4, 1  ;;  %v1477_v53 = vrot.slane %v928_v22, 1  ;;  %v1333_v55 = vrot.slane %v736_v40, 1  ;;  %v1334_v56 = vrot.slane %v738_v0, 2 }
  0x67   : > { %1621 = vrot.lane.b32.xlu1 %v1467_v54, %s4106_s30  ;;  %v1478_v54 = vrot.slane %v930_v34, 2  ;;  %v1150_v59 = vsel %vm1135_vm1, %v1148_v45, %v1149_v46  ;;  %v1338_v60 = vrot.slane %v1336_v47, 1  ;;  %v1345_v62 = vshrl.u32 %v4524_v23, 16  ;;  %v4632_v47 = vld [vmem:[%s4158_s24 + $0x11c] ss:$0 sps:$4 sm:$0x33]  }
  0x68   : > { %v1198_v63 = vsel %vm1135_vm1, %v1196_v43, %v1197_v10  ;;  %v1483_v8 = vrot.slane %v935_v6, 2  ;;  %v1489_v9 = vshrl.u32 %v4532_v15, 16  ;;  %v1201_v34 = vsel %vm1135_vm1, %v1199_v50, %v1200_v49  ;;  %v4624_v43 = vld [vmem:[%s4158_s24 + $0x5c] ss:$0 sps:$4 sm:$0x33]  }
  0x69   : > { %v1479_v0 = vor.u32 %v1478_v54, %v1477_v53  ;;  %v1335_v12 = vor.u32 %v1334_v56, %v1333_v55  ;;  %v1486_v13 = vrot.slane %v940_v28, 1  ;;  %v1343_v40 = vrot.slane %v750_v21, 2  ;;  %v4593_v21 = vld [vmem:[%s4158_s24 + $0x48] sm:$0xff]  }
  0x6a   : > { %1591 = vrot.lane.b32.xlu0 %v1332_v61, %s4106_s30  ;;  %v1339_v61 = vrot.slane %v743_v14, 2  ;;  %v1347_v20 = vrot.slane %v1345_v62, 1  ;;  %v1348_v22 = vrot.slane %v755_v2, 2  ;;  %v1487_v6 = vrot.slane %v942_v17, 2  ;;  %v4597_v17 = vld [vmem:[%s4158_s24 + $0x108] sm:$0xff]  }
  0x6b   : > { %1623 = vrot.lane.b32.xlu1 %v1476_v7, %s4106_s30  ;;  %v1482_v7 = vrot.slane %v1480_v51, 1  ;;  %v1710_v35 = vrot.slane %v4497_v57, 2  ;;  %v1711_v36 = vrot.slane %v4518_v16, 2  ;;  %v762_v19 = vshll.u32 %v4593_v21, 16 }
  0x6c   : > { %v1340_v14 = vor.u32 %v1339_v61, %v1338_v60  ;;  %v1349_v29 = vor.u32 %v1348_v22, %v1347_v20  ;;  %v1488_v33 = vor.u32 %v1487_v6, %v1486_v13  ;;  %v4615_v16 = vld [vmem:[%s4158_s24 + $0x110] ss:$0 sps:$4 sm:$0x33]   ;;  %v954_v41 = vshll.u32 %v4597_v17, 16 }
  0x6d   : > { %v1484_v31 = vor.u32 %v1483_v8, %v1482_v7  ;;  %v1712_v10 = vsel %vm1649_vm4, %v1710_v35, %v1711_v36  ;;  %v1665_v45 = vrot.slane %v4514_v4, 2  ;;  %v767_v46 = vshll.u32 %v4602_v1, 16 }
  0x6e   : > { %1750 = vrot.lane.b32.xlu0 %v1658_v30, %s4107_s5  ;;  %v1342_v30 = vrot.slane %v748_v32, 1  ;;  %v1341_v27 = vsel %vm1296_vm3, %v1335_v12, %v1340_v14  ;;  %v952_v49 = vshrl.u32 %v4597_v17, 16  ;;  %v956_v51 = vrot.slane %v954_v41, 1 }
  0x6f   : > { %1782 = vrot.lane.b32.xlu1 %v1706_v25, %s4107_s5  ;;  %v1153_v25 = vsel %vm1135_vm1, %v1151_v42, %v1152_v52  ;;  %v1485_v32 = vsel %vm1296_vm3, %v1479_v0, %v1484_v31  ;;  %v959_v4 = vshll.u32 %v4615_v16, 16  ;;  %v966_v42 = vshll.u32 %v4619_v39, 16 }
  0x70   : > { %v1344_v28 = vor.u32 %v1343_v40, %v1342_v30  ;;  %v769_v53 = vrot.slane %v767_v46, 1  ;;  %v779_v60 = vshll.u32 %v4624_v43, 16  ;;  %v957_v61 = vor.u32 %v956_v51, %v952_v49 }
  0x71   : > { %v961_v62 = vrot.slane %v959_v4, 1  ;;  %v971_v7 = vshll.u32 %v4632_v47, 16  ;;  %v1154_v13 = vrot.slane %v4593_v21, 1  ;;  %v1155_v14 = vrot.slane %v4602_v1, 1 }
  0x72   : > { %1752 = vrot.lane.b32.xlu0 %v1661_v26, %s4107_s5  ;;  %v1492_v26 = vrot.slane %v947_v37, 2  ;;  %v1662_v37 = vrot.slane %v4493_v44, 2  ;;  %v1350_v5 = vsel %vm1296_vm3, %v1344_v28, %v1349_v29  ;;  %v1713_v44 = vrot.slane %v4511_v3, 2 }
  0x73   : > { %1784 = vrot.lane.b32.xlu1 %v1709_v18, %s4107_s5  ;;  %v1491_v18 = vrot.slane %v1489_v9, 1  ;;  %v1666_v3 = vrot.slane %v4524_v23, 2  ;;  %v964_v23 = vshrl.u32 %v4619_v39, 16  ;;  %v973_v12 = vrot.slane %v971_v7, 1 }
  0x74   : > { %v1354_v40 = vshrl.u32 %v4602_v1, 16  ;;  %v1202_v22 = vrot.slane %v4597_v17, 1  ;;  %v1203_v31 = vrot.slane %v4615_v16, 1  ;;  %v1498_v6 = vshrl.u32 %v4615_v16, 16 }
  0x75   : > { %v1493_v2 = vor.u32 %v1492_v26, %v1491_v18  ;;  %v1667_v55 = vsel %vm1649_vm4, %v1665_v45, %v1666_v3  ;;  %v1205_v18 = vrot.slane %v4619_v39, 1  ;;  %v1206_v26 = vrot.slane %v4632_v47, 1 }
  0x76   : > { %1079 = vrot.lane.b32.xlu0 %v746_v38, %s4105_s29  ;;  %v1663_v38 = vrot.slane %v4500_v58, 2  ;;  %v1714_v58 = vrot.slane %v4532_v15, 2  ;;  %v760_v15 = vshrl.u32 %v4593_v21, 16  ;;  %v1158_v28 = vrot.slane %v4624_v43, 1 }
  0x77   : > { %1111 = vrot.lane.b32.xlu1 %v938_v24, %s4105_s29  ;;  %v4611_v24 = vld [vmem:[%s4158_s24 + $0x54] sm:$0xff]   ;;  %v1494_v57 = vsel %vm1296_vm3, %v1488_v33, %v1493_v2  ;;  %v1495_v29 = vrot.slane %v952_v49, 1  ;;  %v1352_v2 = vrot.slane %v762_v19, 2  ;;  %v1156_v35 = vsel %vm1135_vm1, %v1154_v13, %v1155_v14 }
  0x78   : > { %v774_v50 = vshll.u32 %v4611_v24, 16  ;;  %v1715_v52 = vsel %vm1649_vm4, %v1713_v44, %v1714_v58  ;;  %v772_v54 = vshrl.u32 %v4611_v24, 16  ;;  %v1351_v33 = vrot.slane %v760_v15, 1 }
  0x79   : > { %v1356_v36 = vrot.slane %v1354_v40, 1  ;;  %v1501_v44 = vrot.slane %v959_v4, 2  ;;  %v1507_v58 = vshrl.u32 %v4632_v47, 16  ;;  %v1504_v45 = vrot.slane %v964_v23, 1 }
  0x7a   : > { %1081 = vrot.lane.b32.xlu0 %v758_v11, %s4105_s29  ;;  %v1664_v11 = vsel %vm1649_vm4, %v1662_v37, %v1663_v38  ;;  %v1357_v37 = vrot.slane %v767_v46, 2  ;;  %v1363_v38 = vshrl.u32 %v4624_v43, 16  ;;  %v1360_v3 = vrot.slane %v772_v54, 1 }
  0x7b   : > { %1113 = vrot.lane.b32.xlu1 %v950_v48, %s4105_s29  ;;  %v764_v48 = vrot.slane %v762_v19, 1  ;;  %v1366_v49 = vrot.slane %v779_v60, 2  ;;  %v1505_v4 = vrot.slane %v966_v42, 2  ;;  %v1719_v14 = vrot.slane %v4619_v39, 2 }
  0x7c   : > { %v1358_v46 = vor.u32 %v1357_v37, %v1356_v36  ;;  %v1720_v40 = vrot.slane %v4632_v47, 2  ;;  %vm1810_vm5 = vcmask 130048   ;;  %vm1875_vm6 = vcmask 261120  }
  0x7d   : > { %v765_v56 = vor.u32 %v764_v48, %v760_v15  ;;  %v1361_v15 = vrot.slane %v774_v50, 2  ;;  %v1365_v48 = vrot.slane %v1363_v38, 1  ;;  %vm1940_vm7 = vcmask 392192  }
  0x7e   : > { %1240 = vrot.lane.b32.xlu0 %v1150_v59, %s4104_s28  ;;  %v776_v59 = vrot.slane %v774_v50, 1  ;;  %vm2005_vm8 = vcmask 523264   ;;  %vm2174_vm9 = vcmask 654336   ;;  %vm3051_vm10 = vcmask (!%p3701_p6), 388096  }
  0x7f   : > { %1272 = vrot.lane.b32.xlu1 %v1198_v63, %s4104_s28  ;;  %v968_v63 = vrot.slane %v966_v42, 1  ;;  %v770_v8 = vsel %vm686_vm2, %v765_v56, %v769_v53  ;;  %v1510_v53 = vrot.slane %v971_v7, 2  ;;  %v4693_v56 = vld [vmem:[%s4158_s24 + $0x60] sm:$0xff]   ;;  %vm3436_vm11 = vcmask (!%p3701_p6), 1041409  }
  0x80   : > { %v777_v9 = vor.u32 %v776_v59, %v772_v54  ;;  %v1362_v54 = vor.u32 %v1361_v15, %v1360_v3  ;;  %v1506_v59 = vor.u32 %v1505_v4, %v1504_v45  ;;  %v4697_v42 = vld [vmem:[%s4158_s24 + $0x120] sm:$0xff]   ;;  %v784_v39 = vshrl.u32 %v4693_v56, 16 }
  0x81   : > { %v969_v0 = vor.u32 %v968_v63, %v964_v23  ;;  %v4703_v63 = vld [vmem:[%s4158_s24 + $0x68] ss:$0 sps:$4 sm:$0x33]   ;;  %v978_v13 = vshll.u32 %v4697_v42, 16  ;;  %v1208_v45 = vrot.slane %v4697_v42, 1  ;;  %vm3438_vm12 = vcmask (!%p3701_p6), 1042434  }
  0x82   : > { %1242 = vrot.lane.b32.xlu0 %v1153_v25, %s4104_s28  ;;  %v962_v25 = vsel %vm686_vm2, %v957_v61, %v961_v62  ;;  %v1716_v61 = vrot.slane %v4597_v17, 2  ;;  %v1717_v62 = vrot.slane %v4615_v16, 2  ;;  %v4715_v17 = vld [vmem:[%s4158_s24 + $0x6c] sm:$0xff]   ;;  %vm3440_vm13 = vcmask (!%p3701_p6), 1043459  }
  0x83   : > { %1274 = vrot.lane.b32.xlu1 %v1201_v34, %s4104_s28  ;;  %v781_v34 = vrot.slane %v779_v60, 1  ;;  %v974_v20 = vsel %vm686_vm2, %v969_v0, %v973_v12  ;;  %v786_v0 = vshll.u32 %v4693_v56, 16  ;;  %v4719_v12 = vld [vmem:[%s4158_s24 + $0x128] ss:$0 sps:$4 sm:$0x33]   ;;  %v796_v38 = vshrl.u32 %v4715_v17, 16 }
  0x84   : > { %vm3442_vm14 = vcmask (!%p3701_p6), 1044484   ;;  %vm3444_vm15 = vcmask (!%p3701_p6), 1045509   ;;  %vm3446_vm0 = vcmask (!%p3701_p6), 1046534  }
  0x85   : > { %v782_v30 = vsel %vm686_vm2, %v777_v9, %v781_v34  ;;  %v1668_v34 = vrot.slane %v4593_v21, 2  ;;  %v1718_v21 = vsel %vm1649_vm4, %v1716_v61, %v1717_v62  ;;  %v788_v47 = vrot.slane %v786_v0, 1 }
  0x86   : > { %1593 = vrot.lane.b32.xlu0 %v1341_v27, %s4106_s30  ;;  %v1157_v27 = vrot.slane %v4611_v24, 1 }
  0x87   : > { %1625 = vrot.lane.b32.xlu1 %v1485_v32, %s4106_s30  ;;  %v1496_v32 = vrot.slane %v954_v41, 2  ;;  %v1207_v41 = vsel %vm1135_vm1, %v1205_v18, %v1206_v26  ;;  %v4741_v18 = vld [vmem:[%s4158_s24 + $0x74] ss:$0 sps:$4 sm:$0x33]   ;;  %v798_v26 = vshll.u32 %v4715_v17, 16  ;;  %v789_v37 = vor.u32 %v788_v47, %v784_v39 }
  0x89   : > { %v1497_v19 = vor.u32 %v1496_v32, %v1495_v29 }
  0x8a   : > { %1595 = vrot.lane.b32.xlu0 %v1350_v5, %s4106_s30  ;;  %v1204_v5 = vsel %vm1135_vm1, %v1202_v22, %v1203_v31  ;;  %v791_v22 = vshll.u32 %v4703_v63, 16  ;;  %v4733_v31 = vld [vmem:[%s4158_s24 + $0x134] ss:$0 sps:$4 sm:$0x33]  }
  0x8b   : > { %1627 = vrot.lane.b32.xlu1 %v1494_v57, %s4106_s30  ;;  %v1500_v57 = vrot.slane %v1498_v6, 1  ;;  %v1212_v61 = vrot.slane %v4733_v31, 1 }
  0x8d   : > { %v1502_v51 = vor.u32 %v1501_v44, %v1500_v57  ;;  %v803_v57 = vshll.u32 %v4741_v18, 16 }
  0x8e   : > { %1754 = vrot.lane.b32.xlu0 %v1664_v11, %s4107_s5  ;;  %v1353_v11 = vor.u32 %v1352_v2, %v1351_v33  ;;  %v1721_v33 = vsel %vm1649_vm4, %v1719_v14, %v1720_v40 }
  0x8f   : > { %1786 = vrot.lane.b32.xlu1 %v1712_v10, %s4107_s5  ;;  %v1159_v10 = vsel %vm1135_vm1, %v1157_v27, %v1158_v28  ;;  %v1503_v50 = vsel %vm1296_vm3, %v1497_v19, %v1502_v51  ;;  %v980_v27 = vrot.slane %v978_v13, 1  ;;  %v983_v28 = vshll.u32 %v4719_v12, 16 }
  0x90   : > { %v1359_v23 = vsel %vm1296_vm3, %v1353_v11, %v1358_v46  ;;  %v995_v19 = vshll.u32 %v4733_v31, 16  ;;  %v805_v15 = vrot.slane %v803_v57, 1 }
  0x92   : > { %1756 = vrot.lane.b32.xlu0 %v1667_v55, %s4107_s5  ;;  %v1367_v55 = vor.u32 %v1366_v49, %v1365_v48  ;;  %v1209_v48 = vrot.slane %v4719_v12, 1 }
  0x93   : > { %1788 = vrot.lane.b32.xlu1 %v1715_v52, %s4107_s5  ;;  %v1509_v52 = vrot.slane %v1507_v58, 1 }
  0x94   : > { %v1368_v9 = vsel %vm1296_vm3, %v1362_v54, %v1367_v55  ;;  %v1161_v54 = vrot.slane %v4703_v63, 1  ;;  %v1372_v55 = vshrl.u32 %v4703_v63, 16 }
  0x95   : > { %v1511_v60 = vor.u32 %v1510_v53, %v1509_v52  ;;  %v997_v52 = vrot.slane %v995_v19, 1 }
  0x96   : > { %1083 = vrot.lane.b32.xlu0 %v770_v8, %s4105_s29  ;;  %v1374_v47 = vrot.slane %v1372_v55, 1 }
  0x97   : > { %1115 = vrot.lane.b32.xlu1 %v962_v25, %s4105_s29  ;;  %v1669_v25 = vrot.slane %v4602_v1, 2  ;;  %v1512_v16 = vsel %vm1296_vm3, %v1506_v59, %v1511_v60  ;;  %v1671_v1 = vrot.slane %v4611_v24, 2  ;;  %v1210_v59 = vsel %vm1135_vm1, %v1208_v45, %v1209_v48 }
  0x98   : > { %v1379_v45 = vrot.slane %v798_v26, 2 }
  0x99   : > { %v1670_v6 = vsel %vm1649_vm4, %v1668_v34, %v1669_v25  ;;  %v1163_v34 = vrot.slane %v4715_v17, 1  ;;  %v1164_v25 = vrot.slane %v4741_v18, 1 }
  0x9a   : > { %1085 = vrot.lane.b32.xlu0 %v782_v30, %s4105_s29  ;;  %v4723_v30 = vld [vmem:[%s4158_s24 + $0x12c] sm:$0xff]  }
  0x9b   : > { %1117 = vrot.lane.b32.xlu1 %v974_v20, %s4105_s29  ;;  %v1672_v20 = vrot.slane %v4624_v43, 2  ;;  %v976_v43 = vshrl.u32 %v4697_v42, 16  ;;  %v990_v29 = vshll.u32 %v4723_v30, 16  ;;  %v988_v36 = vshrl.u32 %v4723_v30, 16 }
  0x9c   : > { %v1211_v60 = vrot.slane %v4723_v30, 1 }
  0x9d   : > { %v1673_v2 = vsel %vm1649_vm4, %v1671_v1, %v1672_v20  ;;  %v981_v58 = vor.u32 %v980_v27, %v976_v43  ;;  %v1514_v1 = vrot.slane %v978_v13, 2  ;;  %v1369_v20 = vrot.slane %v784_v39, 1  ;;  %v4058_v13 = vld [vmem:[%s4158_s24] sm:$0xff]  }
  0x9e   : > { %1244 = vrot.lane.b32.xlu0 %v1156_v35, %s4104_s28  ;;  %v793_v35 = vrot.slane %v791_v22, 1  ;;  %v1375_v27 = vrot.slane %v791_v22, 2 }
  0x9f   : > { %1276 = vrot.lane.b32.xlu1 %v1204_v5, %s4104_s28  ;;  %v800_v5 = vrot.slane %v798_v26, 1  ;;  %v1384_v26 = vrot.slane %v803_v57, 2 }
  0xa0   : > { %v794_v3 = vsel %vm686_vm2, %v789_v37, %v793_v35 }
  0xa1   : > { %v801_v46 = vor.u32 %v800_v5, %v796_v38  ;;  %v4810_v5 = vrot.slane %v988_v36, 1 }
  0xa2   : > { %1246 = vrot.lane.b32.xlu0 %v1159_v10, %s4104_s28  ;;  %v992_v10 = vrot.slane %v990_v29, 1 }
  0xa3   : > { %1278 = vrot.lane.b32.xlu1 %v1207_v41, %s4104_s28  ;;  %v985_v41 = vrot.slane %v983_v28, 1 }
  0xa4   : > { %v993_v4 = vor.u32 %v992_v10, %v988_v36  ;;  %v1523_v10 = vrot.slane %v990_v29, 2  ;;  %v1528_v29 = vrot.slane %v995_v19, 2 }
  0xa5   : > { %v986_v51 = vsel %vm686_vm2, %v981_v58, %v985_v41  ;;  %v4059_v58 = vld [vmem:[%s4158_s24 + $0xc0] sm:$0xff]  }
  0xa6   : > { %1597 = vrot.lane.b32.xlu0 %v1359_v23, %s4106_s30  ;;  %v4706_v7 = vpop.permute.xlu1 %1264  ;;  %v1160_v23 = vrot.slane %v4693_v56, 1  ;;  %v1524_v19 = vor.u32 %v1523_v10, %v4810_v5  ;;  %v1678_v5 = vrot.slane %v4741_v18, 2 }
  0xa7   : > { %1629 = vrot.lane.b32.xlu1 %v1503_v50, %s4106_s30  ;;  %v4708_v8 = vpop.permute.xlu0 %1232  ;;  %v806_v50 = vsel %vm686_vm2, %v801_v46, %v805_v15  ;;  %v1376_v46 = vor.u32 %v1375_v27, %v1374_v47  ;;  %v1674_v47 = vrot.slane %v4693_v56, 2  ;;  %v1675_v27 = vrot.slane %v4703_v63, 2  ;;  %v4884_v63 = vld [vmem:[%s4158_s24 + $0x140] ss:$0 sps:$4 sm:$0x33]  }
  0xa8   : > { %v1162_v40 = vsel %vm1135_vm1, %v1160_v23, %v1161_v54 }
  0xaa   : > { %1599 = vrot.lane.b32.xlu0 %v1368_v9, %s4106_s30  ;;  %v998_v9 = vsel %vm686_vm2, %v993_v4, %v997_v52 }
  0xab   : > { %1631 = vrot.lane.b32.xlu1 %v1512_v16, %s4106_s30  ;;  %v1516_v16 = vshrl.u32 %v4719_v12, 16 }
  0xac   : > { %v4744_v24 = vpop.permute.xlu0 %1071 }
  0xad   : > { %v4751_v32 = vpop.permute.xlu1 %1073  ;;  %v1812_v35 = vsel %vm1810_vm5, %v4058_v13, %v4744_v24  ;;  %v1518_v37 = vrot.slane %v1516_v16, 1  ;;  %v1165_v24 = vsel %vm1135_vm1, %v1163_v34, %v1164_v25  ;;  %v4878_v13 = vld [vmem:[%s4158_s24 + $0x84] sm:$0xff]  }
  0xae   : > { %1758 = vrot.lane.b32.xlu0 %v1670_v6, %s4107_s5  ;;  %v1370_v6 = vrot.slane %v786_v0, 2  ;;  %v1525_v0 = vshrl.u32 %v4733_v31, 16  ;;  %v1877_v15 = vsel %vm1875_vm6, %v1812_v35, %v4708_v8 }
  0xaf   : > { %1790 = vrot.lane.b32.xlu1 %v1718_v21, %s4107_s5  ;;  %v1513_v21 = vrot.slane %v976_v43, 1  ;;  %v1519_v43 = vrot.slane %v983_v28, 2  ;;  %v1378_v28 = vrot.slane %v796_v38, 1 }
  0xb0   : > { %v1104_v44 = vpop.permute.xlu0 %1103  ;;  %v1371_v36 = vor.u32 %v1370_v6, %v1369_v20  ;;  %v1527_v52 = vrot.slane %v1525_v0, 1  ;;  %v1722_v20 = vrot.slane %v4697_v42, 2  ;;  %v1723_v6 = vrot.slane %v4719_v12, 2  ;;  %v4892_v0 = vld [vmem:[%s4158_s24 + $0x14c] ss:$0 sps:$4 sm:$0x33]  }
  0xb1   : > { %v4767_v11 = vpop.permute.xlu1 %1105  ;;  %v1844_v22 = vsel %vm1810_vm5, %v4059_v58, %v1104_v44  ;;  %v1520_v4 = vor.u32 %v1519_v43, %v1518_v37  ;;  %v1380_v55 = vor.u32 %v1379_v45, %v1378_v28  ;;  %v1677_v37 = vrot.slane %v4715_v17, 2  ;;  %v4900_v28 = vld [vmem:[%s4158_s24 + $0x8c] ss:$0 sps:$4 sm:$0x33]  }
  0xb2   : > { %1760 = vrot.lane.b32.xlu0 %v1673_v2, %s4107_s5  ;;  %v1381_v2 = vshrl.u32 %v4741_v18, 16  ;;  %v1909_v44 = vsel %vm1875_vm6, %v1844_v22, %v4706_v7  ;;  %v1724_v58 = vsel %vm1649_vm4, %v1722_v20, %v1723_v6  ;;  %v1676_v22 = vsel %vm1649_vm4, %v1674_v47, %v1675_v27 }
  0xb3   : > { %1792 = vrot.lane.b32.xlu1 %v1721_v33, %s4107_s5  ;;  %v1213_v33 = vsel %vm1135_vm1, %v1211_v60, %v1212_v61  ;;  %v4061_v60 = vld [vmem:[%s4158_s24 + $0xcc] sm:$0xff]   ;;  %v1218_v6 = vrot.slane %v4892_v0, 1  ;;  %v1169_v27 = vrot.slane %v4878_v13, 1 }
  0xb4   : > { %v4776_v49 = vpop.permute.xlu0 %1234  ;;  %v1383_v38 = vrot.slane %v1381_v2, 1  ;;  %v1846_v61 = vsel %vm1810_vm5, %v4061_v60, %v4767_v11  ;;  %v1529_v11 = vor.u32 %v1528_v29, %v1527_v52  ;;  %v4875_v2 = vld [vmem:[%s4158_s24 + $0x144] sm:$0xff]  }
  0xb5   : > { %v4781_v53 = vpop.permute.xlu1 %1266  ;;  %v1014_v45 = vshll.u32 %v4875_v2, 16 }
  0xb6   : > { %1087 = vrot.lane.b32.xlu0 %v794_v3, %s4105_s29  ;;  %v1515_v3 = vor.u32 %v1514_v1, %v1513_v21  ;;  %v1911_v34 = vsel %vm1875_vm6, %v1846_v61, %v4781_v53  ;;  %v1530_v56 = vsel %vm1296_vm3, %v1524_v19, %v1529_v11 }
  0xb7   : > { %1119 = vrot.lane.b32.xlu1 %v986_v51, %s4105_s29 }
  0xb8   : > { %v1586_v62 = vpop.permute.xlu0 %1585 }
  0xb9   : > { %v1618_v14 = vpop.permute.xlu1 %1617  ;;  %v1942_v48 = vsel %vm1940_vm7, %v1877_v15, %v1586_v62  ;;  %v1007_v15 = vshll.u32 %v4884_v63, 16 }
  0xba   : > { %1089 = vrot.lane.b32.xlu0 %v806_v50, %s4105_s29  ;;  %v1974_v8 = vsel %vm1940_vm7, %v1909_v44, %v1618_v14  ;;  %v4060_v50 = vld [vmem:[%s4158_s24 + $0xc] sm:$0xff]   ;;  %v1521_v14 = vsel %vm1296_vm3, %v1515_v3, %v1520_v4  ;;  %v1012_v44 = vshrl.u32 %v4875_v2, 16  ;;  %v1016_v4 = vrot.slane %v1014_v45, 1 }
  0xbb   : > { %1121 = vrot.lane.b32.xlu1 %v998_v9, %s4105_s29  ;;  %v1814_v57 = vsel %vm1810_vm5, %v4060_v50, %v4751_v32  ;;  %v1385_v32 = vor.u32 %v1384_v26, %v1383_v38  ;;  %v4849_v9 = vld [vmem:[%s4158_s24 + $0x78] sm:$0xff]   ;;  %v1679_v38 = vsel %vm1649_vm4, %v1677_v37, %v1678_v5 }
  0xbc   : > { %v1588_v39 = vpop.permute.xlu0 %1587  ;;  %v1879_v62 = vsel %vm1875_vm6, %v1814_v57, %v4776_v49  ;;  %v810_v43 = vshll.u32 %v4849_v9, 16  ;;  %v808_v17 = vshrl.u32 %v4849_v9, 16 }
  0xbd   : > { %v1620_v41 = vpop.permute.xlu1 %1619  ;;  %v1944_v25 = vsel %vm1940_vm7, %v1879_v62, %v1588_v39  ;;  %v1386_v42 = vsel %vm1296_vm3, %v1380_v55, %v1385_v32  ;;  %v1009_v55 = vrot.slane %v1007_v15, 1 }
  0xbe   : > { %1248 = vrot.lane.b32.xlu0 %v1162_v40, %s4104_s28  ;;  %v4856_v40 = vld [vmem:[%s4158_s24 + $0x138] sm:$0xff]   ;;  %v1976_v49 = vsel %vm1940_vm7, %v1911_v34, %v1620_v41  ;;  %v1725_v41 = vrot.slane %v4723_v30, 2  ;;  %v812_v18 = vrot.slane %v810_v43, 1 }
  0xbf   : > { %1280 = vrot.lane.b32.xlu1 %v1210_v59, %s4104_s28  ;;  %v1377_v59 = vsel %vm1296_vm3, %v1371_v36, %v1376_v46  ;;  %v1002_v35 = vshll.u32 %v4856_v40, 16  ;;  %v1726_v36 = vrot.slane %v4733_v31, 2  ;;  %v1000_v30 = vshrl.u32 %v4856_v40, 16 }
  0xc0   : > { %v1747_v51 = vpop.permute.xlu0 %1746  ;;  %v820_v31 = vshrl.u32 %v4878_v13, 16 }
  0xc1   : > { %v1779_v23 = vpop.permute.xlu1 %1778  ;;  %v2007_v54 = vsel %vm2005_vm8, %v1942_v48, %v1747_v51  ;;  %v1004_v46 = vrot.slane %v1002_v35, 1  ;;  %v1019_v48 = vshll.u32 %v4892_v0, 16  ;;  %v813_v51 = vor.u32 %v812_v18, %v808_v17 }
  0xc2   : > { %1250 = vrot.lane.b32.xlu0 %v1165_v24, %s4104_s28  ;;  %3884 = vmatprep.mubr.msk.bf16.mxu0 %vm2174_vm9, %v2007_v54  ;;  %v2039_v7 = vsel %vm2005_vm8, %v1974_v8, %v1779_v23  ;;  %v822_v24 = vshll.u32 %v4878_v13, 16  ;;  %v827_v8 = vshll.u32 %v4900_v28, 16  ;;  %v1727_v54 = vsel %vm1649_vm4, %v1725_v41, %v1726_v36 }
  0xc3   : > { %1282 = vrot.lane.b32.xlu1 %v1213_v33, %s4104_s28  ;;  %3916 = vmatprep.mubr.msk.bf16.mxu1 %vm2174_vm9, %v2039_v7  ;;  %v4868_v33 = vld [vmem:[%s4158_s24 + $0x80] ss:$0 sps:$4 sm:$0x33]   ;;  %v1005_v19 = vor.u32 %v1004_v46, %v1000_v30  ;;  %v1021_v57 = vrot.slane %v1019_v48, 1  ;;  %v4963_v37 = vrot.slane %v1002_v35, 2  ;;  %v1388_v18 = vrot.slane %v810_v43, 2 }
  0xc4   : > { %v1749_v16 = vpop.permute.xlu0 %1748  ;;  %v815_v10 = vshll.u32 %v4868_v33, 16  ;;  %v824_v52 = vrot.slane %v822_v24, 1  ;;  %v829_v61 = vrot.slane %v827_v8, 1  ;;  %v1167_v11 = vrot.slane %v4868_v33, 1 }
  0xc5   : > { %v1781_v21 = vpop.permute.xlu1 %1780  ;;  %v2009_v1 = vsel %vm2005_vm8, %v1944_v25, %v1749_v16  ;;  %v1010_v32 = vsel %vm686_vm2, %v1005_v19, %v1009_v55  ;;  %v1214_v25 = vrot.slane %v4856_v40, 1  ;;  %v1215_v16 = vrot.slane %v4884_v63, 1  ;;  %v4062_v55 = vld [vmem:[%s4158_s24 + $0x18] sm:$0xff]  }
  0xc6   : > { %v2041_v53 = vsel %vm2005_vm8, %v1976_v49, %v1781_v21  ;;  %1601 = vrot.lane.b32.xlu0 %v1377_v59, %s4106_s30  ;;  %3885 = vmatmul.mubr.msk.bf16.vlgmr.msra.gmra.mrb[0].mxu0 %vm2174_vm9, %v2009_v1  ;;  %v817_v26 = vrot.slane %v815_v10, 1  ;;  %v1017_v59 = vor.u32 %v1016_v4, %v1012_v44  ;;  %v825_v60 = vor.u32 %v824_v52, %v820_v31 }
  0xc7   : > { %1633 = vrot.lane.b32.xlu1 %v1521_v14, %s4106_s30  ;;  %3917 = vmatmul.mubr.msk.bf16.vlgmr.msra.gmra.mrb[0].mxu1 %vm2174_vm9, %v2041_v53  ;;  %v1166_v14 = vrot.slane %v4849_v9, 1  ;;  %v1534_v49 = vshrl.u32 %v4884_v63, 16  ;;  %v1390_v21 = vshrl.u32 %v4868_v33, 16  ;;  %v1217_v53 = vrot.slane %v4875_v2, 1 }
  0xc8   : > { %v4880_v12 = vpop.permute.xlu0 %1075  ;;  %v818_v7 = vsel %vm686_vm2, %v813_v51, %v817_v26  ;;  %v1022_v1 = vsel %vm686_vm2, %v1017_v59, %v1021_v57  ;;  %v830_v20 = vsel %vm686_vm2, %v825_v60, %v829_v61  ;;  %v1393_v46 = vrot.slane %v815_v10, 2  ;;  %v4063_v61 = vld [vmem:[%s4158_s24 + $0xd8] sm:$0xff]  }
  0xc9   : > { %v4887_v39 = vpop.permute.xlu1 %1107  ;;  %v1536_v41 = vrot.slane %v1534_v49, 1  ;;  %v1392_v36 = vrot.slane %v1390_v21, 1  ;;  %v1399_v35 = vshrl.u32 %v4900_v28, 16  ;;  %v1543_v51 = vshrl.u32 %v4892_v0, 16  ;;  %v4064_v21 = vld [vmem:[%s4158_s24 + $0x24] sm:$0xff]  }
  0xca   : > { %1603 = vrot.lane.b32.xlu0 %v1386_v42, %s4106_s30  ;;  %v1170_v42 = vrot.slane %v4900_v28, 1  ;;  %v4977_v4 = vrot.slane %v1012_v44, 1  ;;  %v4981_v52 = vrot.slane %v1014_v45, 2  ;;  %v1397_v19 = vrot.slane %v822_v24, 2 }
  0xcb   : > { %1635 = vrot.lane.b32.xlu1 %v1530_v56, %s4106_s30  ;;  %v4959_v56 = vrot.slane %v1000_v30, 1  ;;  %v1216_v30 = vsel %vm1135_vm1, %v1214_v25, %v1215_v16  ;;  %v1816_v57 = vsel %vm1810_vm5, %v4062_v55, %v4880_v12  ;;  %v1394_v60 = vor.u32 %v1393_v46, %v1392_v36 }
  0xcc   : > { %v4908_v3 = vpop.permute.xlu0 %1077  ;;  %v1848_v44 = vsel %vm1810_vm5, %v4063_v61, %v4887_v39  ;;  %v1401_v24 = vrot.slane %v1399_v35, 1  ;;  %v1545_v16 = vrot.slane %v1543_v51, 1  ;;  %v1546_v39 = vrot.slane %v1019_v48, 2 }
  0xcd   : > { %v4915_v29 = vpop.permute.xlu1 %1109  ;;  %v1533_v43 = vor.u32 %v4963_v37, %v4959_v56  ;;  %v1680_v36 = vrot.slane %v4849_v9, 2  ;;  %v1681_v46 = vrot.slane %v4868_v33, 2  ;;  %v5056_v33 = vld [vmem:[%s4158_s24 + $0x158] ss:$0 sps:$4 sm:$0x33]   ;;  %v1683_v51 = vrot.slane %v4878_v13, 2 }
  0xce   : > { %1762 = vrot.lane.b32.xlu0 %v1676_v22, %s4107_s5  ;;  %v1387_v22 = vrot.slane %v808_v17, 1  ;;  %v1219_v17 = vsel %vm1135_vm1, %v1217_v53, %v1218_v6 }
  0xcf   : > { %1794 = vrot.lane.b32.xlu1 %v1724_v58, %s4107_s5  ;;  %v1537_v58 = vrot.slane %v1007_v15, 2  ;;  %v1171_v15 = vsel %vm1135_vm1, %v1169_v27, %v1170_v42 }
  0xd0   : > { %v4928_v23 = vpop.permute.xlu0 %1236  ;;  %v1389_v59 = vor.u32 %v1388_v18, %v1387_v22  ;;  %v1729_v18 = vrot.slane %v4884_v63, 2 }
  0xd1   : > { %v4931_v50 = vpop.permute.xlu1 %1268  ;;  %v1881_v45 = vsel %vm1875_vm6, %v1816_v57, %v4928_v23  ;;  %v5072_v57 = vld [vmem:[%s4158_s24 + $0xa4] ss:$0 sps:$4 sm:$0x33]  }
  0xd2   : > { %1764 = vrot.lane.b32.xlu0 %v1679_v38, %s4107_s5  ;;  %v1168_v38 = vsel %vm1135_vm1, %v1166_v14, %v1167_v11  ;;  %v1913_v12 = vsel %vm1875_vm6, %v1848_v44, %v4931_v50  ;;  %v1818_v50 = vsel %vm1810_vm5, %v4064_v21, %v4908_v3  ;;  %v1395_v48 = vsel %vm1296_vm3, %v1389_v59, %v1394_v60 }
  0xd3   : > { %1796 = vrot.lane.b32.xlu1 %v1727_v54, %s4107_s5  ;;  %v1396_v54 = vrot.slane %v820_v31, 1  ;;  %v1402_v31 = vrot.slane %v827_v8, 2  ;;  %v1542_v8 = vor.u32 %v4981_v52, %v4977_v4  ;;  %v5064_v4 = vld [vmem:[%s4158_s24 + $0x164] ss:$0 sps:$4 sm:$0x33]   ;;  %v1732_v44 = vrot.slane %v4892_v0, 2 }
  0xd4   : > { %v4940_v62 = vpop.permute.xlu0 %1238 }
  0xd5   : > { %v4943_v34 = vpop.permute.xlu1 %1270  ;;  %v1398_v49 = vor.u32 %v1397_v19, %v1396_v54  ;;  %v1883_v6 = vsel %vm1875_vm6, %v1818_v50, %v4940_v62  ;;  %v1403_v3 = vor.u32 %v1402_v31, %v1401_v24  ;;  %v1682_v54 = vsel %vm1649_vm4, %v1680_v36, %v1681_v46 }
  0xd6   : > { %1091 = vrot.lane.b32.xlu0 %v818_v7, %s4105_s29  ;;  %v1538_v7 = vor.u32 %v1537_v58, %v1536_v41  ;;  %v1728_v41 = vrot.slane %v4856_v40, 2  ;;  %v1731_v19 = vrot.slane %v4875_v2, 2  ;;  %v1031_v31 = vshll.u32 %v5056_v33, 16 }
  0xd7   : > { %1123 = vrot.lane.b32.xlu1 %v1010_v32, %s4105_s29  ;;  %v1224_v36 = vrot.slane %v5064_v4, 1 }
  0xd8   : > { %v1590_v47 = vpop.permute.xlu0 %1589  ;;  %v1539_v37 = vsel %vm1296_vm3, %v1533_v43, %v1538_v7  ;;  %v1730_v52 = vsel %vm1649_vm4, %v1728_v41, %v1729_v18  ;;  %v1733_v21 = vsel %vm1649_vm4, %v1731_v19, %v1732_v44  ;;  %v1555_v19 = vrot.slane %v1031_v31, 2 }
  0xd9   : > { %v1622_v5 = vpop.permute.xlu1 %1621  ;;  %v1946_v32 = vsel %vm1940_vm7, %v1881_v45, %v1590_v47  ;;  %v5021_v47 = vld [vmem:[%s4158_s24 + $0x90] sm:$0xff]  }
  0xda   : > { %1093 = vrot.lane.b32.xlu0 %v830_v20, %s4105_s29  ;;  %v1978_v14 = vsel %vm1940_vm7, %v1913_v12, %v1622_v5  ;;  %v4065_v20 = vld [vmem:[%s4158_s24 + $0xe4] sm:$0xff]   ;;  %v5028_v5 = vld [vmem:[%s4158_s24 + $0x150] sm:$0xff]   ;;  %v834_v35 = vshll.u32 %v5021_v47, 16  ;;  %v832_v7 = vshrl.u32 %v5021_v47, 16  ;;  %v1172_v41 = vrot.slane %v5021_v47, 1 }
  0xdb   : > { %1125 = vrot.lane.b32.xlu1 %v1022_v1, %s4105_s29  ;;  %v1850_v53 = vsel %vm1810_vm5, %v4065_v20, %v4915_v29  ;;  %v1547_v29 = vor.u32 %v1546_v39, %v1545_v16  ;;  %v1024_v45 = vshrl.u32 %v5028_v5, 16  ;;  %v1043_v39 = vshll.u32 %v5064_v4, 16 }
  0xdc   : > { %v1592_v26 = vpop.permute.xlu0 %1591  ;;  %v1915_v27 = vsel %vm1875_vm6, %v1850_v53, %v4943_v34 }
  0xdd   : > { %v1624_v10 = vpop.permute.xlu1 %1623  ;;  %v1948_v42 = vsel %vm1940_vm7, %v1883_v6, %v1592_v26  ;;  %v5047_v26 = vld [vmem:[%s4158_s24 + $0x15c] sm:$0xff]   ;;  %v1548_v9 = vsel %vm1296_vm3, %v1542_v8, %v1547_v29  ;;  %v851_v8 = vshll.u32 %v5072_v57, 16  ;;  %v1045_v20 = vrot.slane %v1043_v39, 1 }
  0xde   : > { %1252 = vrot.lane.b32.xlu0 %v1168_v38, %s4104_s28  ;;  %v1980_v62 = vsel %vm1940_vm7, %v1915_v27, %v1624_v10  ;;  %v1404_v38 = vsel %vm1296_vm3, %v1398_v49, %v1403_v3  ;;  %v1684_v10 = vrot.slane %v4900_v28, 2  ;;  %v836_v28 = vrot.slane %v834_v35, 1 }
  0xdf   : > { %1284 = vrot.lane.b32.xlu1 %v1216_v30, %s4104_s28  ;;  %v5040_v30 = vld [vmem:[%s4158_s24 + $0x98] ss:$0 sps:$4 sm:$0x33]   ;;  %v1038_v59 = vshll.u32 %v5047_v26, 16  ;;  %v1036_v16 = vshrl.u32 %v5047_v26, 16  ;;  %v853_v27 = vrot.slane %v851_v8, 1 }
  0xe0   : > { %v1751_v25 = vpop.permute.xlu0 %1750  ;;  %v839_v55 = vshll.u32 %v5040_v30, 16  ;;  %v1220_v29 = vrot.slane %v5028_v5, 1  ;;  %v1223_v18 = vrot.slane %v5047_v26, 1 }
  0xe1   : > { %v1783_v23 = vpop.permute.xlu1 %1782  ;;  %v2011_v11 = vsel %vm2005_vm8, %v1946_v32, %v1751_v25  ;;  %v1685_v32 = vsel %vm1649_vm4, %v1683_v51, %v1684_v10  ;;  %v1176_v51 = vrot.slane %v5072_v57, 1 }
  0xe2   : > { %v2043_v1 = vsel %vm2005_vm8, %v1978_v14, %v1783_v23  ;;  %1254 = vrot.lane.b32.xlu0 %v1171_v15, %s4104_s28  ;;  %3888 = vmatprep.mubr.msk.bf16.mxu0 %vm2174_vm9, %v2011_v11  ;;  %v1026_v15 = vshll.u32 %v5028_v5, 16  ;;  %v841_v25 = vrot.slane %v839_v55, 1  ;;  %v837_v14 = vor.u32 %v836_v28, %v832_v7 }
  0xe3   : > { %1286 = vrot.lane.b32.xlu1 %v1219_v17, %s4104_s28  ;;  %3920 = vmatprep.mubr.msk.bf16.mxu1 %vm2174_vm9, %v2043_v1  ;;  %v5050_v17 = vld [vmem:[%s4158_s24 + $0x9c] sm:$0xff]   ;;  %v1040_v23 = vrot.slane %v1038_v59, 1  ;;  %v1033_v1 = vrot.slane %v1031_v31, 1  ;;  %v1405_v28 = vrot.slane %v832_v7, 1  ;;  %v1225_v7 = vsel %vm1135_vm1, %v1223_v18, %v1224_v36 }
  0xe4   : > { %v1753_v56 = vpop.permute.xlu0 %1752  ;;  %v846_v60 = vshll.u32 %v5050_v17, 16  ;;  %v1028_v24 = vrot.slane %v1026_v15, 1  ;;  %v844_v0 = vshrl.u32 %v5050_v17, 16  ;;  %v842_v53 = vsel %vm686_vm2, %v837_v14, %v841_v25 }
  0xe5   : > { %v1785_v58 = vpop.permute.xlu1 %1784  ;;  %v2013_v22 = vsel %vm2005_vm8, %v1948_v42, %v1753_v56  ;;  %v1041_v6 = vor.u32 %v1040_v23, %v1036_v16  ;;  %v1411_v14 = vrot.slane %v839_v55, 2  ;;  %v1561_v55 = vshrl.u32 %v5064_v4, 16 }
  0xe6   : > { %v2045_v34 = vsel %vm2005_vm8, %v1980_v62, %v1785_v58  ;;  %1605 = vrot.lane.b32.xlu0 %v1395_v48, %s4106_s30  ;;  %3889 = vmatmul.mubr.msk.bf16.gmra.mrb[4].mxu0 %vm2174_vm9, %v2013_v22  ;;  %v848_v11 = vrot.slane %v846_v60, 1  ;;  %v1029_v50 = vor.u32 %v1028_v24, %v1024_v45  ;;  %v1221_v62 = vrot.slane %v5056_v33, 1 }
  0xe7   : > { %1637 = vrot.lane.b32.xlu1 %v1539_v37, %s4106_s30  ;;  %3921 = vmatmul.mubr.msk.bf16.gmra.mrb[4].mxu1 %vm2174_vm9, %v2045_v34  ;;  %v1552_v58 = vshrl.u32 %v5056_v33, 16  ;;  %v1408_v22 = vshrl.u32 %v5040_v30, 16  ;;  %v1173_v34 = vrot.slane %v5040_v30, 1  ;;  %v1046_v46 = vsel %vm686_vm2, %v1041_v6, %v1045_v20  ;;  %v4066_v6 = vld [vmem:[%s4158_s24 + $0x30] sm:$0xff]  }
  0xe8   : > { %v5052_v63 = vpop.permute.xlu0 %1079  ;;  %v849_v3 = vor.u32 %v848_v11, %v844_v0  ;;  %v1034_v56 = vsel %vm686_vm2, %v1029_v50, %v1033_v1  ;;  %v1222_v23 = vsel %vm1135_vm1, %v1220_v29, %v1221_v62  ;;  %v1415_v29 = vrot.slane %v846_v60, 2  ;;  %v4067_v62 = vld [vmem:[%s4158_s24 + $0xf0] sm:$0xff]  }
  0xe9   : > { %v5059_v43 = vpop.permute.xlu1 %1111  ;;  %v1554_v24 = vrot.slane %v1552_v58, 1  ;;  %v1410_v25 = vrot.slane %v1408_v22, 1 }
  0xea   : > { %1607 = vrot.lane.b32.xlu0 %v1404_v38, %s4106_s30  ;;  %v854_v38 = vsel %vm686_vm2, %v849_v3, %v853_v27  ;;  %v1820_v3 = vsel %vm1810_vm5, %v4066_v6, %v5052_v63  ;;  %v1559_v27 = vrot.slane %v1038_v59, 2  ;;  %v1420_v59 = vrot.slane %v851_v8, 2 }
  0xeb   : > { %1639 = vrot.lane.b32.xlu1 %v1548_v9, %s4106_s30  ;;  %v1175_v9 = vrot.slane %v5050_v17, 1  ;;  %v1556_v50 = vor.u32 %v1555_v19, %v1554_v24  ;;  %v1412_v20 = vor.u32 %v1411_v14, %v1410_v25  ;;  %v1690_v6 = vrot.slane %v5072_v57, 2 }
  0xec   : > { %v5080_v61 = vpop.permute.xlu0 %1081 }
  0xed   : > { %v5087_v12 = vpop.permute.xlu1 %1113  ;;  %v1177_v11 = vsel %vm1135_vm1, %v1175_v9, %v1176_v51  ;;  %v5179_v9 = vld [vmem:[%s4158_s24 + $0xa8] sm:$0xff]   ;;  %v4069_v51 = vld [vmem:[%s4158_s24 + $0xfc] sm:$0xff]  }
  0xee   : > { %1766 = vrot.lane.b32.xlu0 %v1682_v54, %s4107_s5  ;;  %v1550_v54 = vrot.slane %v1026_v15, 2  ;;  %v1417_v15 = vshrl.u32 %v5072_v57, 16 }
  0xef   : > { %1798 = vrot.lane.b32.xlu1 %v1730_v52, %s4107_s5  ;;  %v1549_v52 = vrot.slane %v1024_v45, 1  ;;  %v1174_v45 = vsel %vm1135_vm1, %v1172_v41, %v1173_v34  ;;  %v1563_v41 = vrot.slane %v1561_v55, 1  ;;  %v5214_v55 = vld [vmem:[%s4158_s24 + $0xb4] sm:$0xff]  }
  0xf0   : > { %v5100_v49 = vpop.permute.xlu0 %1240  ;;  %v1419_v63 = vrot.slane %v1417_v15, 1 }
  0xf1   : > { %v5103_v48 = vpop.permute.xlu1 %1272  ;;  %v1885_v58 = vsel %vm1875_vm6, %v1820_v3, %v5100_v49  ;;  %v1737_v3 = vrot.slane %v5047_v26, 2 }
  0xf2   : > { %1768 = vrot.lane.b32.xlu0 %v1685_v32, %s4107_s5  ;;  %v1406_v32 = vrot.slane %v834_v35, 2  ;;  %v1551_v35 = vor.u32 %v1550_v54, %v1549_v52 }
  0xf3   : > { %1800 = vrot.lane.b32.xlu1 %v1733_v21, %s4107_s5 }
  0xf4   : > { %v5114_v42 = vpop.permute.xlu0 %1242  ;;  %v1407_v1 = vor.u32 %v1406_v32, %v1405_v28  ;;  %v1557_v36 = vsel %vm1296_vm3, %v1551_v35, %v1556_v50  ;;  %v5192_v32 = vld [vmem:[%s4158_s24 + $0x168] sm:$0xff]   ;;  %v5211_v35 = vld [vmem:[%s4158_s24 + $0x174] sm:$0xff]  }
  0xf5   : > { %v5117_v37 = vpop.permute.xlu1 %1274  ;;  %v1062_v57 = vshll.u32 %v5211_v35, 16 }
  0xf6   : > { %1095 = vrot.lane.b32.xlu0 %v842_v53, %s4105_s29  ;;  %v1558_v53 = vrot.slane %v1036_v16, 1  ;;  %v1852_v16 = vsel %vm1810_vm5, %v4067_v62, %v5059_v43  ;;  %v1564_v43 = vrot.slane %v1043_v39, 2  ;;  %v1413_v8 = vsel %vm1296_vm3, %v1407_v1, %v1412_v20  ;;  %v5220_v1 = vld [vmem:[%s4158_s24 + $0x170] ss:$0 sps:$4 sm:$0x33]  }
  0xf7   : > { %1127 = vrot.lane.b32.xlu1 %v1034_v56, %s4105_s29  ;;  %v1414_v56 = vrot.slane %v844_v0, 1  ;;  %v1917_v0 = vsel %vm1875_vm6, %v1852_v16, %v5103_v48  ;;  %v1050_v20 = vshll.u32 %v5192_v32, 16 }
  0xf8   : > { %v1594_v10 = vpop.permute.xlu0 %1593  ;;  %v1565_v24 = vor.u32 %v1564_v43, %v1563_v41  ;;  %v1055_v41 = vshll.u32 %v5220_v1, 16 }
  0xf9   : > { %v1626_v44 = vpop.permute.xlu1 %1625  ;;  %v1950_v60 = vsel %vm1940_vm7, %v1885_v58, %v1594_v10  ;;  %v1416_v39 = vor.u32 %v1415_v29, %v1414_v56  ;;  %v1854_v10 = vsel %vm1810_vm5, %v4069_v51, %v5087_v12  ;;  %v5241_v58 = vld [vmem:[%s4158_s24 + $0xbc] ss:$0 sps:$4 sm:$0x33]  }
  0xfa   : > { %1097 = vrot.lane.b32.xlu0 %v854_v38, %s4105_s29  ;;  %v1982_v49 = vsel %vm1940_vm7, %v1917_v0, %v1626_v44  ;;  %v1919_v54 = vsel %vm1875_vm6, %v1854_v10, %v5117_v37  ;;  %v1560_v44 = vor.u32 %v1559_v27, %v1558_v53  ;;  %v1734_v37 = vrot.slane %v5028_v5, 2 }
  0xfb   : > { %1129 = vrot.lane.b32.xlu1 %v1046_v46, %s4105_s29  ;;  %v4068_v46 = vld [vmem:[%s4158_s24 + $0x3c] sm:$0xff]   ;;  %v856_v27 = vshrl.u32 %v5179_v9, 16  ;;  %v1738_v0 = vrot.slane %v5064_v4, 2  ;;  %v1064_v4 = vrot.slane %v1062_v57, 1 }
  0xfc   : > { %v1596_v31 = vpop.permute.xlu0 %1595  ;;  %v1822_v48 = vsel %vm1810_vm5, %v4068_v46, %v5080_v61  ;;  %v1421_v61 = vor.u32 %v1420_v59, %v1419_v63  ;;  %v1566_v50 = vsel %vm1296_vm3, %v1560_v44, %v1565_v24  ;;  %v870_v63 = vshll.u32 %v5214_v55, 16 }
  0xfd   : > { %v1628_v21 = vpop.permute.xlu1 %1627  ;;  %v1887_v52 = vsel %vm1875_vm6, %v1822_v48, %v5114_v42  ;;  %v868_v46 = vshrl.u32 %v5214_v55, 16  ;;  %v1739_v51 = vsel %vm1649_vm4, %v1737_v3, %v1738_v0 }
  0xfe   : > { %1256 = vrot.lane.b32.xlu0 %v1174_v45, %s4104_s28  ;;  %v1952_v19 = vsel %vm1940_vm7, %v1887_v52, %v1596_v31  ;;  %v1984_v12 = vsel %vm1940_vm7, %v1919_v54, %v1628_v21  ;;  %v858_v45 = vshll.u32 %v5179_v9, 16  ;;  %v1422_v15 = vsel %vm1296_vm3, %v1416_v39, %v1421_v61 }
  0xff   : > { %1288 = vrot.lane.b32.xlu1 %v1222_v23, %s4104_s28  ;;  %v5201_v23 = vld [vmem:[%s4158_s24 + $0xb0] ss:$0 sps:$4 sm:$0x33]   ;;  %v1735_v31 = vrot.slane %v5056_v33, 2  ;;  %v1689_v33 = vrot.slane %v5050_v17, 2  ;;  %v872_v48 = vrot.slane %v870_v63, 1 }
 0x100   : > { %v1755_v22 = vpop.permute.xlu0 %1754  ;;  %v860_v56 = vrot.slane %v858_v45, 1  ;;  %v863_v29 = vshll.u32 %v5201_v23, 16  ;;  %v1057_v52 = vrot.slane %v1055_v41, 1 }
 0x101   : > { %v1787_v34 = vpop.permute.xlu1 %1786  ;;  %v2015_v18 = vsel %vm2005_vm8, %v1950_v60, %v1755_v22  ;;  %v1736_v62 = vsel %vm1649_vm4, %v1734_v37, %v1735_v31  ;;  %v1048_v60 = vshrl.u32 %v5192_v32, 16  ;;  %v1052_v22 = vrot.slane %v1050_v20, 1 }
 0x102   : > { %v2047_v38 = vsel %vm2005_vm8, %v1982_v49, %v1787_v34  ;;  %1258 = vrot.lane.b32.xlu0 %v1177_v11, %s4104_s28  ;;  %3892 = vmatprep.mubr.msk.bf16.mxu0 %vm2174_vm9, %v2015_v18  ;;  %v1687_v11 = vrot.slane %v5040_v30, 2  ;;  %v5228_v30 = vld [vmem:[%s4158_s24 + $0x17c] ss:$0 sps:$4 sm:$0x33]   ;;  %v1691_v49 = vsel %vm1649_vm4, %v1689_v33, %v1690_v6  ;;  %v861_v34 = vor.u32 %v860_v56, %v856_v27 }
 0x103   : > { %1290 = vrot.lane.b32.xlu1 %v1225_v7, %s4104_s28  ;;  %3924 = vmatprep.mubr.msk.bf16.mxu1 %vm2174_vm9, %v2047_v38  ;;  %v1686_v7 = vrot.slane %v5021_v47, 2  ;;  %v865_v18 = vrot.slane %v863_v29, 1  ;;  %v875_v38 = vshll.u32 %v5241_v58, 16  ;;  %v1053_v10 = vor.u32 %v1052_v22, %v1048_v60 }
 0x104   : > { %v1757_v28 = vpop.permute.xlu0 %1756  ;;  %v873_v44 = vor.u32 %v872_v48, %v868_v46  ;;  %v1227_v37 = vrot.slane %v5220_v1, 1  ;;  %v1426_v31 = vshrl.u32 %v5201_v23, 16  ;;  %v1230_v33 = vrot.slane %v5228_v30, 1 }
 0x105   : > { %v1789_v42 = vpop.permute.xlu1 %1788  ;;  %v2017_v25 = vsel %vm2005_vm8, %v1952_v19, %v1757_v28  ;;  %v1688_v16 = vsel %vm1649_vm4, %v1686_v7, %v1687_v11  ;;  %v866_v19 = vsel %vm686_vm2, %v861_v34, %v865_v18  ;;  %v877_v24 = vrot.slane %v875_v38, 1 }
 0x106   : > { %v2049_v14 = vsel %vm2005_vm8, %v1984_v12, %v1789_v42  ;;  %1609 = vrot.lane.b32.xlu0 %v1413_v8, %s4106_s30  ;;  %3893 = vmatmul.mubr.msk.bf16.gmra.mrb[8].mxu0 %vm2174_vm9, %v2017_v25  ;;  %v1067_v8 = vshll.u32 %v5228_v30, 16  ;;  %v1058_v42 = vsel %vm686_vm2, %v1053_v10, %v1057_v52  ;;  %v1178_v7 = vrot.slane %v5179_v9, 1 }
 0x107   : > { %1641 = vrot.lane.b32.xlu1 %v1557_v36, %s4106_s30  ;;  %3925 = vmatmul.mubr.msk.bf16.gmra.mrb[8].mxu1 %vm2174_vm9, %v2049_v14  ;;  %v1060_v36 = vshrl.u32 %v5211_v35, 16  ;;  %v1226_v14 = vrot.slane %v5192_v32, 1  ;;  %v1179_v11 = vrot.slane %v5201_v23, 1  ;;  %v878_v3 = vsel %vm686_vm2, %v873_v44, %v877_v24 }
 0x108   : > { %v5216_v21 = vpop.permute.xlu0 %1083  ;;  %v1069_v54 = vrot.slane %v1067_v8, 1  ;;  %v1181_v56 = vrot.slane %v5214_v55, 1  ;;  %v1567_v0 = vrot.slane %v1048_v60, 1  ;;  %v1568_v22 = vrot.slane %v1050_v20, 2 }
 0x109   : > { %v5223_v53 = vpop.permute.xlu1 %1115  ;;  %v1065_v28 = vor.u32 %v1064_v4, %v1060_v36  ;;  %v1423_v34 = vrot.slane %v856_v27, 1  ;;  %v1424_v48 = vrot.slane %v858_v45, 2  ;;  %v1429_v10 = vrot.slane %v863_v29, 2 }
 0x10a   : > { %1611 = vrot.lane.b32.xlu0 %v1422_v15, %s4106_s30  ;;  %v1570_v15 = vshrl.u32 %v5220_v1, 16  ;;  %v1228_v52 = vsel %vm1135_vm1, %v1226_v14, %v1227_v37  ;;  %v1180_v60 = vsel %vm1135_vm1, %v1178_v7, %v1179_v11  ;;  %v1435_v20 = vshrl.u32 %v5241_v58, 16  ;;  %v4071_v11 = vld [vmem:[%s4158_s24 + $0x108] sm:$0xff]  }
 0x10b   : > { %1643 = vrot.lane.b32.xlu1 %v1566_v50, %s4106_s30  ;;  %v1229_v50 = vrot.slane %v5211_v35, 1  ;;  %v1070_v6 = vsel %vm686_vm2, %v1065_v28, %v1069_v54  ;;  %v1569_v45 = vor.u32 %v1568_v22, %v1567_v0  ;;  %v1579_v29 = vshrl.u32 %v5228_v30, 16  ;;  %v4072_v0 = vld [vmem:[%s4158_s24 + $0x54] sm:$0xff]  }
 0x10c   : > { %v5244_v59 = vpop.permute.xlu0 %1085  ;;  %v1572_v4 = vrot.slane %v1570_v15, 1  ;;  %v1425_v44 = vor.u32 %v1424_v48, %v1423_v34  ;;  %v4070_v15 = vld [vmem:[%s4158_s24 + $0x48] sm:$0xff]   ;;  %v1577_v37 = vrot.slane %v1062_v57, 2  ;;  %v1433_v7 = vrot.slane %v870_v63, 2  ;;  %v4073_v22 = vld [vmem:[%s4158_s24 + $0x114] sm:$0xff]  }
 0x10d   : > { %v5251_v43 = vpop.permute.xlu1 %1117  ;;  %v1231_v27 = vsel %vm1135_vm1, %v1229_v50, %v1230_v33  ;;  %v1824_v14 = vsel %vm1810_vm5, %v4070_v15, %v5216_v21  ;;  %v1856_v50 = vsel %vm1810_vm5, %v4071_v11, %v5223_v53  ;;  %v1437_v21 = vrot.slane %v1435_v20, 1 }
 0x10e   : > { %1770 = vrot.lane.b32.xlu0 %v1688_v16, %s4107_s5  ;;  %v1438_v33 = vrot.slane %v875_v38, 2  ;;  %v1582_v53 = vrot.slane %v1067_v8, 2  ;;  %v1692_v20 = vrot.slane %v5179_v9, 2  ;;  %v1743_v15 = vrot.slane %v5211_v35, 2 }
 0x10f   : > { %1802 = vrot.lane.b32.xlu1 %v1736_v62, %s4107_s5  ;;  %v1182_v62 = vrot.slane %v5241_v58, 1 }
 0x110   : > { %v5264_v39 = vpop.permute.xlu0 %1244 }
 0x111   : > { %v5267_v61 = vpop.permute.xlu1 %1276  ;;  %v1183_v54 = vsel %vm1135_vm1, %v1181_v56, %v1182_v62  ;;  %vm3448_vm1 = vcmask (!%p3701_p6), 1047559  }
 0x112   : > { %1772 = vrot.lane.b32.xlu0 %v1691_v49, %s4107_s5  ;;  %v1573_v49 = vrot.slane %v1055_v41, 2  ;;  %v1921_v57 = vsel %vm1875_vm6, %v1856_v50, %v5267_v61  ;;  %v1826_v61 = vsel %vm1810_vm5, %v4072_v0, %v5244_v59 }
 0x113   : > { %1804 = vrot.lane.b32.xlu1 %v1739_v51, %s4107_s5  ;;  %v1428_v51 = vrot.slane %v1426_v31, 1  ;;  %v1432_v31 = vrot.slane %v868_v46, 1 }
 0x114   : > { %v5276_v12 = vpop.permute.xlu0 %1246  ;;  %v1574_v28 = vor.u32 %v1573_v49, %v1572_v4  ;;  %v1858_v49 = vsel %vm1810_vm5, %v4073_v22, %v5251_v43  ;;  %v4077_v22 = vld [vmem:[%s4158_s24 + $0x12c] sm:$0xff]  }
 0x115   : > { %v5279_v25 = vpop.permute.xlu1 %1278  ;;  %v1430_v24 = vor.u32 %v1429_v10, %v1428_v51  ;;  %v1434_v8 = vor.u32 %v1433_v7, %v1432_v31  ;;  %v1891_v34 = vsel %vm1875_vm6, %v1826_v61, %v5276_v12  ;;  %v4076_v61 = vld [vmem:[%s4158_s24 + $0x6c] sm:$0xff]  }
 0x116   : > { %1099 = vrot.lane.b32.xlu0 %v866_v19, %s4105_s29  ;;  %v1575_v62 = vsel %vm1296_vm3, %v1569_v45, %v1574_v28  ;;  %v1923_v59 = vsel %vm1875_vm6, %v1858_v49, %v5279_v25  ;;  %v1740_v45 = vrot.slane %v5192_v32, 2 }
 0x117   : > { %1131 = vrot.lane.b32.xlu1 %v1058_v42, %s4105_s29  ;;  %v1576_v42 = vrot.slane %v1060_v36, 1  ;;  %v1889_v36 = vsel %vm1875_vm6, %v1824_v14, %v5264_v39  ;;  %v1431_v38 = vsel %vm1296_vm3, %v1425_v44, %v1430_v24  ;;  %v1695_v44 = vrot.slane %v5214_v55, 2 }
 0x118   : > { %v1598_v16 = vpop.permute.xlu0 %1597  ;;  %v1696_v24 = vrot.slane %v5241_v58, 2  ;;  %v1744_v14 = vrot.slane %v5228_v30, 2 }
 0x119   : > { %v1630_v18 = vpop.permute.xlu1 %1629  ;;  %v1954_v63 = vsel %vm1940_vm7, %v1889_v36, %v1598_v16  ;;  %v1578_v51 = vor.u32 %v1577_v37, %v1576_v42 }
 0x11a   : > { %1101 = vrot.lane.b32.xlu0 %v878_v3, %s4105_s29  ;;  %v1986_v3 = vsel %vm1940_vm7, %v1921_v57, %v1630_v18  ;;  %v1439_v18 = vor.u32 %v1438_v33, %v1437_v21  ;;  %v1697_v37 = vsel %vm1649_vm4, %v1695_v44, %v1696_v24  ;;  %v1745_v7 = vsel %vm1649_vm4, %v1743_v15, %v1744_v14  ;;  %v4074_v57 = vld [vmem:[%s4158_s24 + $0x60] sm:$0xff]   ;;  %v4078_v44 = vld [vmem:[%s4158_s24 + $0x78] sm:$0xff]  }
 0x11b   : > { %1133 = vrot.lane.b32.xlu1 %v1070_v6, %s4105_s29  ;;  %v1581_v6 = vrot.slane %v1579_v29, 1  ;;  %v1741_v29 = vrot.slane %v5220_v1, 2 }
 0x11c   : > { %v1600_v41 = vpop.permute.xlu0 %1599  ;;  %v1440_v25 = vsel %vm1296_vm3, %v1434_v8, %v1439_v18 }
 0x11d   : > { %v1632_v19 = vpop.permute.xlu1 %1631  ;;  %v1956_v4 = vsel %vm1940_vm7, %v1891_v34, %v1600_v41  ;;  %v1583_v10 = vor.u32 %v1582_v53, %v1581_v6  ;;  %v1693_v41 = vrot.slane %v5201_v23, 2  ;;  %v1742_v23 = vsel %vm1649_vm4, %v1740_v45, %v1741_v29 }
 0x11e   : > { %1260 = vrot.lane.b32.xlu0 %v1180_v60, %s4104_s28 }
 0x11f   : > { %1292 = vrot.lane.b32.xlu1 %v1228_v52, %s4104_s28  ;;  %v1988_v52 = vsel %vm1940_vm7, %v1923_v59, %v1632_v19  ;;  %v1694_v28 = vsel %vm1649_vm4, %v1692_v20, %v1693_v41 }
 0x120   : > { %v1759_v46 = vpop.permute.xlu0 %1758 }
 0x121   : > { %v1791_v39 = vpop.permute.xlu1 %1790  ;;  %v2019_v56 = vsel %vm2005_vm8, %v1954_v63, %v1759_v46  ;;  %v4075_v46 = vld [vmem:[%s4158_s24 + $0x120] sm:$0xff]  }
 0x122   : > { %v2051_v16 = vsel %vm2005_vm8, %v1986_v3, %v1791_v39  ;;  %1262 = vrot.lane.b32.xlu0 %v1183_v54, %s4104_s28  ;;  %3896 = vmatprep.mubr.msk.bf16.mxu0 %vm2174_vm9, %v2019_v56  ;;  %v1584_v54 = vsel %vm1296_vm3, %v1578_v51, %v1583_v10 }
 0x123   : > { %1294 = vrot.lane.b32.xlu1 %v1231_v27, %s4104_s28  ;;  %3928 = vmatprep.mubr.msk.bf16.mxu1 %vm2174_vm9, %v2051_v16 }
 0x124   : > { %v1761_v48 = vpop.permute.xlu0 %1760 }
 0x125   : > { %v1793_v60 = vpop.permute.xlu1 %1792  ;;  %v2021_v43 = vsel %vm2005_vm8, %v1956_v4, %v1761_v48 }
 0x126   : > { %v2053_v12 = vsel %vm2005_vm8, %v1988_v52, %v1793_v60  ;;  %1613 = vrot.lane.b32.xlu0 %v1431_v38, %s4106_s30  ;;  %3897 = vmatmul.mubr.msk.bf16.gmra.mrb[12].mxu0 %vm2174_vm9, %v2021_v43 }
 0x127   : > { %1645 = vrot.lane.b32.xlu1 %v1575_v62, %s4106_s30  ;;  %3929 = vmatmul.mubr.msk.bf16.gmra.mrb[12].mxu1 %vm2174_vm9, %v2053_v12 }
 0x128   : > { %v1088_v27 = vpop.permute.xlu0 %1087 }
 0x129   : > { %v1120_v19 = vpop.permute.xlu1 %1119  ;;  %v1828_v63 = vsel %vm1810_vm5, %v4074_v57, %v1088_v27 }
 0x12a   : > { %1615 = vrot.lane.b32.xlu0 %v1440_v25, %s4106_s30  ;;  %v1860_v6 = vsel %vm1810_vm5, %v4075_v46, %v1120_v19 }
 0x12b   : > { %1647 = vrot.lane.b32.xlu1 %v1584_v54, %s4106_s30 }
 0x12c   : > { %v1090_v42 = vpop.permute.xlu0 %1089 }
 0x12d   : > { %v1122_v1 = vpop.permute.xlu1 %1121  ;;  %v1830_v16 = vsel %vm1810_vm5, %v4076_v61, %v1090_v42 }
 0x12e   : > { %1774 = vrot.lane.b32.xlu0 %v1694_v28, %s4107_s5  ;;  %v1862_v49 = vsel %vm1810_vm5, %v4077_v22, %v1122_v1 }
 0x12f   : > { %1806 = vrot.lane.b32.xlu1 %v1742_v23, %s4107_s5 }
 0x130   : > { %v1249_v31 = vpop.permute.xlu0 %1248 }
 0x131   : > { %v1281_v58 = vpop.permute.xlu1 %1280  ;;  %v1893_v53 = vsel %vm1875_vm6, %v1828_v63, %v1249_v31 }
 0x132   : > { %1776 = vrot.lane.b32.xlu0 %v1697_v37, %s4107_s5  ;;  %v1925_v3 = vsel %vm1875_vm6, %v1860_v6, %v1281_v58 }
 0x133   : > { %1808 = vrot.lane.b32.xlu1 %v1745_v7, %s4107_s5 }
 0x134   : > { %v1251_v11 = vpop.permute.xlu0 %1250 }
 0x135   : > { %v1283_v50 = vpop.permute.xlu1 %1282  ;;  %v1895_v34 = vsel %vm1875_vm6, %v1830_v16, %v1251_v11 }
 0x136   : > { %v1927_v18 = vsel %vm1875_vm6, %v1862_v49, %v1283_v50 }
 0x138   : > { %v1602_v30 = vpop.permute.xlu0 %1601 }
 0x139   : > { %v1634_v36 = vpop.permute.xlu1 %1633  ;;  %v1958_v39 = vsel %vm1940_vm7, %v1893_v53, %v1602_v30 }
 0x13a   : > { %v1990_v62 = vsel %vm1940_vm7, %v1925_v3, %v1634_v36 }
 0x13c   : > { %v1604_v21 = vpop.permute.xlu0 %1603 }
 0x13d   : > { %v1636_v33 = vpop.permute.xlu1 %1635  ;;  %v1960_v59 = vsel %vm1940_vm7, %v1895_v34, %v1604_v21 }
 0x13e   : > { %v1992_v48 = vsel %vm1940_vm7, %v1927_v18, %v1636_v33 }
 0x140   : > { %v1763_v56 = vpop.permute.xlu0 %1762 }
 0x141   : > { %v1795_v38 = vpop.permute.xlu1 %1794  ;;  %v2023_v0 = vsel %vm2005_vm8, %v1958_v39, %v1763_v56 }
 0x142   : > { %v2055_v8 = vsel %vm2005_vm8, %v1990_v62, %v1795_v38  ;;  %3900 = vmatprep.mubr.msk.bf16.mxu0 %vm2174_vm9, %v2023_v0 }
 0x143   : > { %3932 = vmatprep.mubr.msk.bf16.mxu1 %vm2174_vm9, %v2055_v8 }
 0x144   : > { %v1765_v4 = vpop.permute.xlu0 %1764 }
 0x145   : > { %v1797_v51 = vpop.permute.xlu1 %1796  ;;  %v2025_v10 = vsel %vm2005_vm8, %v1960_v59, %v1765_v4 }
 0x146   : > { %v2057_v52 = vsel %vm2005_vm8, %v1992_v48, %v1797_v51  ;;  %3901 = vmatmul.mubr.msk.bf16.gmra.mrb[16].mxu0 %vm2174_vm9, %v2025_v10 }
 0x147   : > { %3933 = vmatmul.mubr.msk.bf16.gmra.mrb[16].mxu1 %vm2174_vm9, %v2057_v52 }
 0x148   : > { %v1092_v60 = vpop.permute.xlu0 %1091 }
 0x149   : > { %v1124_v43 = vpop.permute.xlu1 %1123  ;;  %v1832_v24 = vsel %vm1810_vm5, %v4078_v44, %v1092_v60 }
 0x14a   : > { %v1864_v42 = vsel %vm1810_vm5, %v4856_v40, %v1124_v43 }
 0x14c   : > { %v1094_v12 = vpop.permute.xlu0 %1093 }
 0x14d   : > { %v1126_v25 = vpop.permute.xlu1 %1125  ;;  %v1834_v58 = vsel %vm1810_vm5, %v4878_v13, %v1094_v12 }
 0x14e   : > { %v1866_v40 = vsel %vm1810_vm5, %v4875_v2, %v1126_v25 }
 0x150   : > { %v1253_v20 = vpop.permute.xlu0 %1252 }
 0x151   : > { %v1285_v41 = vpop.permute.xlu1 %1284  ;;  %v1897_v23 = vsel %vm1875_vm6, %v1832_v24, %v1253_v20  ;;  %v2072_v24 = vld [vmem:[#allocation2 + $0x10] sm:$0xff] }
 0x152   : > { %v1929_v15 = vsel %vm1875_vm6, %v1864_v42, %v1285_v41 }
 0x154   : > { %v1255_v27 = vpop.permute.xlu0 %1254 }
 0x155   : > { %v1287_v54 = vpop.permute.xlu1 %1286  ;;  %v1899_v50 = vsel %vm1875_vm6, %v1834_v58, %v1255_v27 }
 0x156   : > { %v1931_v30 = vsel %vm1875_vm6, %v1866_v40, %v1287_v54  ;;  %v2105_v40 = vld [vmem:[#allocation2 + $0x118] sm:$0xff] }
 0x158   : > { %v1606_v45 = vpop.permute.xlu0 %1605 }
 0x159   : > { %v1638_v29 = vpop.permute.xlu1 %1637  ;;  %v1962_v14 = vsel %vm1940_vm7, %v1897_v23, %v1606_v45  ;;  %v2104_v23 = vld [vmem:[#allocation2 + $0x110] sm:$0xff] }
 0x15a   : > { %v1994_v37 = vsel %vm1940_vm7, %v1929_v15, %v1638_v29  ;;  %v2070_v15 = vld [vmem:[#allocation2] sm:$0xff] }
 0x15c   : > { %v1608_v19 = vpop.permute.xlu0 %1607 }
 0x15d   : > { %v1640_v28 = vpop.permute.xlu1 %1639  ;;  %v1964_v36 = vsel %vm1940_vm7, %v1899_v50, %v1608_v19  ;;  %v2071_v50 = vld [vmem:[#allocation2 + $0x8] sm:$0xff] }
 0x15e   : > { %v1996_v33 = vsel %vm1940_vm7, %v1931_v30, %v1640_v28 }
 0x160   : > { %v1767_v1 = vpop.permute.xlu0 %1766 }
 0x161   : > { %v1799_v31 = vpop.permute.xlu1 %1798  ;;  %v2027_v7 = vsel %vm2005_vm8, %v1962_v14, %v1767_v1 }
 0x162   : > { %v2059_v11 = vsel %vm2005_vm8, %v1994_v37, %v1799_v31  ;;  %3904 = vmatprep.mubr.msk.bf16.mxu0 %vm2174_vm9, %v2027_v7  ;;  %v2102_v37 = vld [vmem:[#allocation2 + $0x100] sm:$0xff]  ;;  %v2073_v31 = vld [vmem:[#allocation2 + $0x18] sm:$0xff] }
 0x163   : > { %3936 = vmatprep.mubr.msk.bf16.mxu1 %vm2174_vm9, %v2059_v11 }
 0x164   : > { %v1769_v21 = vpop.permute.xlu0 %1768 }
 0x165   : > { %v1801_v57 = vpop.permute.xlu1 %1800  ;;  %v2029_v13 = vsel %vm2005_vm8, %v1964_v36, %v1769_v21 }
 0x166   : > { %v2061_v63 = vsel %vm2005_vm8, %v1996_v33, %v1801_v57  ;;  %3905 = vmatmul.mubr.msk.bf16.gmra.mrb[20].mxu0 %vm2174_vm9, %v2029_v13  ;;  %v2103_v57 = vld [vmem:[#allocation2 + $0x108] sm:$0xff] }
 0x167   : > { %3937 = vmatmul.mubr.msk.bf16.gmra.mrb[20].mxu1 %vm2174_vm9, %v2061_v63 }
 0x168   : > { %v1096_v2 = vpop.permute.xlu0 %1095 }
 0x169   : > { %v1128_v46 = vpop.permute.xlu1 %1127  ;;  %v1836_v8 = vsel %vm1810_vm5, %v5021_v47, %v1096_v2 }
 0x16a   : > { %v1868_v22 = vsel %vm1810_vm5, %v5028_v5, %v1128_v46 }
 0x16c   : > { %v1098_v6 = vpop.permute.xlu0 %1097 }
 0x16d   : > { %v1130_v53 = vpop.permute.xlu1 %1129  ;;  %v1838_v10 = vsel %vm1810_vm5, %v5050_v17, %v1098_v6 }
 0x16e   : > { %v1870_v5 = vsel %vm1810_vm5, %v5047_v26, %v1130_v53 }
 0x170   : > { %v1257_v3 = vpop.permute.xlu0 %1256 }
 0x171   : > { %v1289_v39 = vpop.permute.xlu1 %1288  ;;  %v1901_v49 = vsel %vm1875_vm6, %v1836_v8, %v1257_v3 }
 0x172   : > { %v1933_v34 = vsel %vm1875_vm6, %v1868_v22, %v1289_v39 }
 0x174   : > { %v1259_v56 = vpop.permute.xlu0 %1258 }
 0x175   : > { %v1291_v62 = vpop.permute.xlu1 %1290  ;;  %v1903_v52 = vsel %vm1875_vm6, %v1838_v10, %v1259_v56 }
 0x176   : > { %v1935_v60 = vsel %vm1875_vm6, %v1870_v5, %v1291_v62 }
 0x178   : > { %v1610_v38 = vpop.permute.xlu0 %1609 }
 0x179   : > { %v1642_v0 = vpop.permute.xlu1 %1641  ;;  %v1966_v18 = vsel %vm1940_vm7, %v1901_v49, %v1610_v38 }
 0x17a   : > { %v1998_v4 = vsel %vm1940_vm7, %v1933_v34, %v1642_v0 }
 0x17c   : > { %v1612_v61 = vpop.permute.xlu0 %1611 }
 0x17d   : > { %v1644_v16 = vpop.permute.xlu1 %1643  ;;  %v1968_v43 = vsel %vm1940_vm7, %v1903_v52, %v1612_v61 }
 0x17e   : > { %v2000_v25 = vsel %vm1940_vm7, %v1935_v60, %v1644_v16  ;;  %v2108_v60 = vld [vmem:[#allocation2 + $0x130] sm:$0xff] }
 0x180   : > { %v1771_v59 = vpop.permute.xlu0 %1770 }
 0x181   : > { %v1803_v48 = vpop.permute.xlu1 %1802  ;;  %v2031_v51 = vsel %vm2005_vm8, %v1966_v18, %v1771_v59 }
 0x182   : > { %v2063_v47 = vsel %vm2005_vm8, %v1998_v4, %v1803_v48  ;;  %3908 = vmatprep.mubr.msk.bf16.mxu0 %vm2174_vm9, %v2031_v51 }
 0x183   : > { %3940 = vmatprep.mubr.msk.bf16.mxu1 %vm2174_vm9, %v2063_v47 }
 0x184   : > { %v1773_v12 = vpop.permute.xlu0 %1772 }
 0x185   : > { %v1805_v20 = vpop.permute.xlu1 %1804  ;;  %v2033_v17 = vsel %vm2005_vm8, %v1968_v43, %v1773_v12  ;;  %v2074_v43 = vld [vmem:[#allocation2 + $0x20] sm:$0xff] }
 0x186   : > { %v2065_v41 = vsel %vm2005_vm8, %v2000_v25, %v1805_v20  ;;  %3909 = vmatmul.mubr.msk.bf16.gmra.mrb[24].mxu0 %vm2174_vm9, %v2033_v17  ;;  %v2106_v25 = vld [vmem:[#allocation2 + $0x120] sm:$0xff]  ;;  %v2077_v20 = vld [vmem:[#allocation2 + $0x38] sm:$0xff] }
 0x187   : > { %3941 = vmatmul.mubr.msk.bf16.gmra.mrb[24].mxu1 %vm2174_vm9, %v2065_v41 }
 0x188   : > { %v1100_v26 = vpop.permute.xlu0 %1099 }
 0x189   : > { %v1132_v27 = vpop.permute.xlu1 %1131  ;;  %v1840_v0 = vsel %vm1810_vm5, %v5179_v9, %v1100_v26 }
 0x18a   : > { %v1872_v38 = vsel %vm1810_vm5, %v5192_v32, %v1132_v27  ;;  %v2109_v27 = vld [vmem:[#allocation2 + $0x138] sm:$0xff] }
 0x18c   : > { %v1102_v54 = vpop.permute.xlu0 %1101 }
 0x18d   : > { %v1134_v45 = vpop.permute.xlu1 %1133  ;;  %v1842_v9 = vsel %vm1810_vm5, %v5214_v55, %v1102_v54  ;;  %v2076_v55 = vld [vmem:[#allocation2 + $0x30] sm:$0xff]  ;;  %v2075_v54 = vld [vmem:[#allocation2 + $0x28] sm:$0xff] }
 0x18e   : > { %v1874_v18 = vsel %vm1810_vm5, %v5211_v35, %v1134_v45 }
 0x190   : > { %v1261_v29 = vpop.permute.xlu0 %1260 }
 0x191   : > { %v1293_v19 = vpop.permute.xlu1 %1292  ;;  %v1905_v16 = vsel %vm1875_vm6, %v1840_v0, %v1261_v29 }
 0x192   : > { %v1937_v61 = vsel %vm1875_vm6, %v1872_v38, %v1293_v19 }
 0x194   : > { %v1263_v28 = vpop.permute.xlu0 %1262 }
 0x195   : > { %v1295_v44 = vpop.permute.xlu1 %1294  ;;  %v1907_v48 = vsel %vm1875_vm6, %v1842_v9, %v1263_v28 }
 0x196   : > { %v1939_v4 = vsel %vm1875_vm6, %v1874_v18, %v1295_v44  ;;  %v2107_v44 = vld [vmem:[#allocation2 + $0x128] sm:$0xff]  ;;  %v2085_v18 = vld [vmem:[#allocation2 + $0x78] sm:$0xff] }
 0x198   : > { %v1614_v42 = vpop.permute.xlu0 %1613 }
 0x199   : > { %v1646_v14 = vpop.permute.xlu1 %1645  ;;  %v3886_v1 = vpop.f32.mrb[0].mxu0  ;;  %v1970_v49 = vsel %vm1940_vm7, %v1905_v16, %v1614_v42 }
 0x19a   : > { %v2530_v7 = vadd.f32 %v3886_v1, %v2072_v24  ;;  %v3918_v58 = vpop.f32.mrb[0].mxu1  ;;  %v2273_v11 = vpop.f32.mrb[1].mxu0  ;;  %v2002_v8 = vsel %vm1940_vm7, %v1937_v61, %v1646_v14 }
 0x19b   : > { %v2562_v30 = vadd.f32 %v3918_v58, %v2104_v23  ;;  %v2528_v36 = vadd.f32 %v2273_v11, %v2070_v15  ;;  %v2401_v21 = vpop.f32.mrb[1].mxu1  ;;  %v3887_v33 = vpop.f32.mrb[2].mxu0  ;;  %v2112_v58 = vld [vmem:[#allocation2 + $0x150] sm:$0xff]  ;;  %v2078_v11 = vld [vmem:[#allocation2 + $0x40] sm:$0xff] }
 0x19c   : > { %2594 = vst.msk [vmem:[#allocation2 + $0x10] sm:$0xff] %vm1940_vm7, %v2530_v7  ;;  %v2560_v13 = vadd.f32 %v2401_v21, %v2102_v37  ;;  %v2531_v63 = vadd.f32 %v3887_v33, %v2073_v31  ;;  %v3919_v2 = vpop.f32.mrb[2].mxu1  ;;  %v2276_v46 = vpop.f32.mrb[3].mxu0  ;;  %v2080_v7 = vld [vmem:[#allocation2 + $0x50] sm:$0xff] }
 0x19d   : > { %2626 = vst.msk [vmem:[#allocation2 + $0x110] sm:$0xff] %vm1940_vm7, %v2562_v30  ;;  %2592 = vst.msk [vmem:[#allocation2] sm:$0xff] %vm1940_vm7, %v2528_v36  ;;  %v2563_v6 = vadd.f32 %v3919_v2, %v2105_v40  ;;  %v1648_v53 = vpop.permute.xlu1 %1647  ;;  %v2529_v3 = vadd.f32 %v2276_v46, %v2071_v50  ;;  %v2404_v39 = vpop.f32.mrb[3].mxu1  ;;  %v2110_v50 = vld [vmem:[#allocation2 + $0x140] sm:$0xff]  ;;  %v2081_v30 = vld [vmem:[#allocation2 + $0x58] sm:$0xff] }
 0x19e   : > { %2624 = vst.msk [vmem:[#allocation2 + $0x100] sm:$0xff] %vm1940_vm7, %v2560_v13  ;;  %2595 = vst.msk [vmem:[#allocation2 + $0x18] sm:$0xff] %vm1940_vm7, %v2531_v63  ;;  %v2561_v56 = vadd.f32 %v2404_v39, %v2103_v57  ;;  %v1616_v62 = vpop.permute.xlu0 %1615  ;;  %v2004_v51 = vsel %vm1940_vm7, %v1939_v4, %v1648_v53  ;;  %v2113_v57 = vld [vmem:[#allocation2 + $0x158] sm:$0xff]  ;;  %v2079_v13 = vld [vmem:[#allocation2 + $0x48] sm:$0xff] }
 0x19f   : > { %2627 = vst.msk [vmem:[#allocation2 + $0x118] sm:$0xff] %vm1940_vm7, %v2563_v6  ;;  %2593 = vst.msk [vmem:[#allocation2 + $0x8] sm:$0xff] %vm1940_vm7, %v2529_v3  ;;  %v1972_v47 = vsel %vm1940_vm7, %v1907_v48, %v1616_v62  ;;  %v2111_v53 = vld [vmem:[#allocation2 + $0x148] sm:$0xff]  ;;  %v2117_v48 = vld [vmem:[#allocation2 + $0x178] sm:$0xff] }
 0x1a0   : > { %2625 = vst.msk [vmem:[#allocation2 + $0x108] sm:$0xff] %vm1940_vm7, %v2561_v56 }
 0x1a1   : > { %v1807_v22 = vpop.permute.xlu1 %1806 }
 0x1a2   : > { %v2067_v32 = vsel %vm2005_vm8, %v2002_v8, %v1807_v22  ;;  %v1775_v34 = vpop.permute.xlu0 %1774  ;;  %v2084_v8 = vld [vmem:[#allocation2 + $0x70] sm:$0xff] }
 0x1a3   : > { %v2035_v59 = vsel %vm2005_vm8, %v1970_v49, %v1775_v34  ;;  %3944 = vmatprep.mubr.msk.bf16.mxu1 %vm2174_vm9, %v2067_v32  ;;  %v2116_v22 = vld [vmem:[#allocation2 + $0x170] sm:$0xff]  ;;  %v2082_v49 = vld [vmem:[#allocation2 + $0x60] sm:$0xff] }
 0x1a4   : > { %3912 = vmatprep.mubr.msk.bf16.mxu0 %vm2174_vm9, %v2035_v59  ;;  %v2114_v34 = vld [vmem:[#allocation2 + $0x160] sm:$0xff] }
 0x1a5   : > { %v1809_v10 = vpop.permute.xlu1 %1808 }
 0x1a6   : > { %v2069_v35 = vsel %vm2005_vm8, %v2004_v51, %v1809_v10  ;;  %v1777_v5 = vpop.permute.xlu0 %1776  ;;  %v2083_v51 = vld [vmem:[#allocation2 + $0x68] sm:$0xff] }
 0x1a7   : > { %v2037_v52 = vsel %vm2005_vm8, %v1972_v47, %v1777_v5  ;;  %3945 = vmatmul.mubr.msk.bf16.gmra.mrb[28].mxu1 %vm2174_vm9, %v2069_v35 }
 0x1a8   : > { %3913 = vmatmul.mubr.msk.bf16.gmra.mrb[28].mxu0 %vm2174_vm9, %v2037_v52  ;;  %v2115_v52 = vld [vmem:[#allocation2 + $0x168] sm:$0xff] }
 0x1b9   : > { %v3890_v12 = vpop.f32.mrb[4].mxu0 }
 0x1ba   : > { %v2534_v17 = vadd.f32 %v3890_v12, %v2076_v55  ;;  %v3922_v41 = vpop.f32.mrb[4].mxu1  ;;  %v2289_v26 = vpop.f32.mrb[5].mxu0 }
 0x1bb   : > { %v2566_v45 = vadd.f32 %v3922_v41, %v2108_v60  ;;  %v2532_v29 = vadd.f32 %v2289_v26, %v2074_v43  ;;  %v2417_v19 = vpop.f32.mrb[5].mxu1  ;;  %v3891_v28 = vpop.f32.mrb[6].mxu0  ;;  %v2088_v26 = vld [vmem:[#allocation2 + $0x90] sm:$0xff] }
 0x1bc   : > { %2598 = vst.msk [vmem:[#allocation2 + $0x30] sm:$0xff] %vm1940_vm7, %v2534_v17  ;;  %v2564_v24 = vadd.f32 %v2417_v19, %v2106_v25  ;;  %v2535_v42 = vadd.f32 %v3891_v28, %v2077_v20  ;;  %v3923_v23 = vpop.f32.mrb[6].mxu1  ;;  %v2292_v15 = vpop.f32.mrb[7].mxu0  ;;  %v2089_v19 = vld [vmem:[#allocation2 + $0x98] sm:$0xff] }
 0x1bd   : > { %2630 = vst.msk [vmem:[#allocation2 + $0x130] sm:$0xff] %vm1940_vm7, %v2566_v45  ;;  %2596 = vst.msk [vmem:[#allocation2 + $0x20] sm:$0xff] %vm1940_vm7, %v2532_v29  ;;  %v2567_v14 = vadd.f32 %v3923_v23, %v2109_v27  ;;  %v2533_v1 = vadd.f32 %v2292_v15, %v2075_v54  ;;  %v2420_v37 = vpop.f32.mrb[7].mxu1  ;;  %v2120_v27 = vld [vmem:[#allocation2 + $0x190] sm:$0xff]  ;;  %v2086_v54 = vld [vmem:[#allocation2 + $0x80] sm:$0xff] }
 0x1be   : > { %2628 = vst.msk [vmem:[#allocation2 + $0x120] sm:$0xff] %vm1940_vm7, %v2564_v24  ;;  %2599 = vst.msk [vmem:[#allocation2 + $0x38] sm:$0xff] %vm1940_vm7, %v2535_v42  ;;  %v2565_v31 = vadd.f32 %v2420_v37, %v2107_v44  ;;  %v2118_v29 = vld [vmem:[#allocation2 + $0x180] sm:$0xff]  ;;  %v2121_v42 = vld [vmem:[#allocation2 + $0x198] sm:$0xff] }
 0x1bf   : > { %2631 = vst.msk [vmem:[#allocation2 + $0x138] sm:$0xff] %vm1940_vm7, %v2567_v14  ;;  %2597 = vst.msk [vmem:[#allocation2 + $0x28] sm:$0xff] %vm1940_vm7, %v2533_v1  ;;  %v2087_v23 = vld [vmem:[#allocation2 + $0x88] sm:$0xff] }
 0x1c0   : > { %2629 = vst.msk [vmem:[#allocation2 + $0x128] sm:$0xff] %vm1940_vm7, %v2565_v31  ;;  %v2119_v31 = vld [vmem:[#allocation2 + $0x188] sm:$0xff] }
 0x1d9   : > { %v3894_v40 = vpop.f32.mrb[8].mxu0 }
 0x1da   : > { %v2538_v36 = vadd.f32 %v3894_v40, %v2080_v7  ;;  %v3926_v21 = vpop.f32.mrb[8].mxu1  ;;  %v2305_v33 = vpop.f32.mrb[9].mxu0 }
 0x1db   : > { %v2570_v63 = vadd.f32 %v3926_v21, %v2112_v58  ;;  %v2536_v2 = vadd.f32 %v2305_v33, %v2078_v11  ;;  %v2433_v46 = vpop.f32.mrb[9].mxu1  ;;  %v3895_v6 = vpop.f32.mrb[10].mxu0  ;;  %v2092_v33 = vld [vmem:[#allocation2 + $0xb0] sm:$0xff] }
 0x1dc   : > { %2602 = vst.msk [vmem:[#allocation2 + $0x50] sm:$0xff] %vm1940_vm7, %v2538_v36  ;;  %v2568_v3 = vadd.f32 %v2433_v46, %v2110_v50  ;;  %v2539_v39 = vadd.f32 %v3895_v6, %v2081_v30  ;;  %v3927_v56 = vpop.f32.mrb[10].mxu1  ;;  %v2308_v62 = vpop.f32.mrb[11].mxu0  ;;  %v2093_v46 = vld [vmem:[#allocation2 + $0xb8] sm:$0xff] }
 0x1dd   : > { %2634 = vst.msk [vmem:[#allocation2 + $0x150] sm:$0xff] %vm1940_vm7, %v2570_v63  ;;  %2600 = vst.msk [vmem:[#allocation2 + $0x40] sm:$0xff] %vm1940_vm7, %v2536_v2  ;;  %v2571_v38 = vadd.f32 %v3927_v56, %v2113_v57  ;;  %v2537_v0 = vadd.f32 %v2308_v62, %v2079_v13  ;;  %v2436_v61 = vpop.f32.mrb[11].mxu1  ;;  %v2124_v57 = vld [vmem:[#allocation2 + $0x1b0] sm:$0xff]  ;;  %v2090_v13 = vld [vmem:[#allocation2 + $0xa0] sm:$0xff] }
 0x1de   : > { %2632 = vst.msk [vmem:[#allocation2 + $0x140] sm:$0xff] %vm1940_vm7, %v2568_v3  ;;  %2603 = vst.msk [vmem:[#allocation2 + $0x58] sm:$0xff] %vm1940_vm7, %v2539_v39  ;;  %v2569_v16 = vadd.f32 %v2436_v61, %v2111_v53  ;;  %v2122_v2 = vld [vmem:[#allocation2 + $0x1a0] sm:$0xff]  ;;  %v2125_v39 = vld [vmem:[#allocation2 + $0x1b8] sm:$0xff] }
 0x1df   : > { %2635 = vst.msk [vmem:[#allocation2 + $0x158] sm:$0xff] %vm1940_vm7, %v2571_v38  ;;  %2601 = vst.msk [vmem:[#allocation2 + $0x48] sm:$0xff] %vm1940_vm7, %v2537_v0  ;;  %v2091_v56 = vld [vmem:[#allocation2 + $0xa8] sm:$0xff] }
 0x1e0   : > { %2633 = vst.msk [vmem:[#allocation2 + $0x148] sm:$0xff] %vm1940_vm7, %v2569_v16  ;;  %v2123_v16 = vld [vmem:[#allocation2 + $0x1a8] sm:$0xff] }
 0x1f9   : > { %v3898_v32 = vpop.f32.mrb[12].mxu0 }
 0x1fa   : > { %v2542_v59 = vadd.f32 %v3898_v32, %v2084_v8  ;;  %v3930_v9 = vpop.f32.mrb[12].mxu1  ;;  %v2321_v4 = vpop.f32.mrb[13].mxu0 }
 0x1fb   : > { %v2574_v10 = vadd.f32 %v3930_v9, %v2116_v22  ;;  %v2540_v47 = vadd.f32 %v2321_v4, %v2082_v49  ;;  %v2449_v35 = vpop.f32.mrb[13].mxu1  ;;  %v3899_v5 = vpop.f32.mrb[14].mxu0  ;;  %v2096_v4 = vld [vmem:[#allocation2 + $0xd0] sm:$0xff] }
 0x1fc   : > { %2606 = vst.msk [vmem:[#allocation2 + $0x70] sm:$0xff] %vm1940_vm7, %v2542_v59  ;;  %v2572_v55 = vadd.f32 %v2449_v35, %v2114_v34  ;;  %v2543_v60 = vadd.f32 %v3899_v5, %v2085_v18  ;;  %v3931_v43 = vpop.f32.mrb[14].mxu1  ;;  %v2324_v12 = vpop.f32.mrb[15].mxu0  ;;  %v2097_v35 = vld [vmem:[#allocation2 + $0xd8] sm:$0xff] }
 0x1fd   : > { %2638 = vst.msk [vmem:[#allocation2 + $0x170] sm:$0xff] %vm1940_vm7, %v2574_v10  ;;  %2604 = vst.msk [vmem:[#allocation2 + $0x60] sm:$0xff] %vm1940_vm7, %v2540_v47  ;;  %v2575_v25 = vadd.f32 %v3931_v43, %v2117_v48  ;;  %v2541_v20 = vadd.f32 %v2324_v12, %v2083_v51  ;;  %v2452_v17 = vpop.f32.mrb[15].mxu1  ;;  %v2128_v48 = vld [vmem:[#allocation2 + $0x1d0] sm:$0xff]  ;;  %v2094_v51 = vld [vmem:[#allocation2 + $0xc0] sm:$0xff] }
 0x1fe   : > { %2636 = vst.msk [vmem:[#allocation2 + $0x160] sm:$0xff] %vm1940_vm7, %v2572_v55  ;;  %2607 = vst.msk [vmem:[#allocation2 + $0x78] sm:$0xff] %vm1940_vm7, %v2543_v60  ;;  %v2573_v41 = vadd.f32 %v2452_v17, %v2115_v52  ;;  %v2126_v47 = vld [vmem:[#allocation2 + $0x1c0] sm:$0xff]  ;;  %v2129_v60 = vld [vmem:[#allocation2 + $0x1d8] sm:$0xff] }
 0x1ff   : > { %2639 = vst.msk [vmem:[#allocation2 + $0x178] sm:$0xff] %vm1940_vm7, %v2575_v25  ;;  %2605 = vst.msk [vmem:[#allocation2 + $0x68] sm:$0xff] %vm1940_vm7, %v2541_v20  ;;  %v2095_v43 = vld [vmem:[#allocation2 + $0xc8] sm:$0xff] }
 0x200   : > { %2637 = vst.msk [vmem:[#allocation2 + $0x168] sm:$0xff] %vm1940_vm7, %v2573_v41  ;;  %v2127_v41 = vld [vmem:[#allocation2 + $0x1c8] sm:$0xff] }
 0x219   : > { %v3902_v45 = vpop.f32.mrb[16].mxu0 }
 0x21a   : > { %v2546_v28 = vadd.f32 %v3902_v45, %v2088_v26  ;;  %v3934_v44 = vpop.f32.mrb[16].mxu1  ;;  %v2337_v24 = vpop.f32.mrb[17].mxu0 }
 0x21b   : > { %v2578_v15 = vadd.f32 %v3934_v44, %v2120_v27  ;;  %v2544_v14 = vadd.f32 %v2337_v24, %v2086_v54  ;;  %v2465_v1 = vpop.f32.mrb[17].mxu1  ;;  %v3903_v37 = vpop.f32.mrb[18].mxu0  ;;  %v2132_v24 = vld [vmem:[#allocation2 + $0x1f0] sm:$0xff] }
 0x21c   : > { %2610 = vst.msk [vmem:[#allocation2 + $0x90] sm:$0xff] %vm1940_vm7, %v2546_v28  ;;  %v2576_v7 = vadd.f32 %v2465_v1, %v2118_v29  ;;  %v2547_v58 = vadd.f32 %v3903_v37, %v2089_v19  ;;  %v3935_v11 = vpop.f32.mrb[18].mxu1  ;;  %v2340_v40 = vpop.f32.mrb[19].mxu0  ;;  %v2133_v1 = vld [vmem:[#allocation2 + $0x1f8] sm:$0xff] }
 0x21d   : > { %2642 = vst.msk [vmem:[#allocation2 + $0x190] sm:$0xff] %vm1940_vm7, %v2578_v15  ;;  %2608 = vst.msk [vmem:[#allocation2 + $0x80] sm:$0xff] %vm1940_vm7, %v2544_v14  ;;  %v2579_v50 = vadd.f32 %v3935_v11, %v2121_v42  ;;  %v2545_v30 = vadd.f32 %v2340_v40, %v2087_v23  ;;  %v2468_v36 = vpop.f32.mrb[19].mxu1  ;;  %v2100_v42 = vld [vmem:[#allocation2 + $0xf0] sm:$0xff]  ;;  %v2130_v23 = vld [vmem:[#allocation2 + $0x1e0] sm:$0xff] }
 0x21e   : > { %2640 = vst.msk [vmem:[#allocation2 + $0x180] sm:$0xff] %vm1940_vm7, %v2576_v7  ;;  %2611 = vst.msk [vmem:[#allocation2 + $0x98] sm:$0xff] %vm1940_vm7, %v2547_v58  ;;  %v2577_v21 = vadd.f32 %v2468_v36, %v2119_v31  ;;  %v2098_v14 = vld [vmem:[#allocation2 + $0xe0] sm:$0xff]  ;;  %v2101_v58 = vld [vmem:[#allocation2 + $0xf8] sm:$0xff] }
 0x21f   : > { %2643 = vst.msk [vmem:[#allocation2 + $0x198] sm:$0xff] %vm1940_vm7, %v2579_v50  ;;  %2609 = vst.msk [vmem:[#allocation2 + $0x88] sm:$0xff] %vm1940_vm7, %v2545_v30  ;;  %v2131_v11 = vld [vmem:[#allocation2 + $0x1e8] sm:$0xff] }
 0x220   : > { %2641 = vst.msk [vmem:[#allocation2 + $0x188] sm:$0xff] %vm1940_vm7, %v2577_v21  ;;  %v2099_v21 = vld [vmem:[#allocation2 + $0xe8] sm:$0xff] }
 0x239   : > { %v3906_v63 = vpop.f32.mrb[20].mxu0 }
 0x23a   : > { %v2550_v6 = vadd.f32 %v3906_v63, %v2092_v33  ;;  %v3938_v53 = vpop.f32.mrb[20].mxu1  ;;  %v2353_v3 = vpop.f32.mrb[21].mxu0 }
 0x23b   : > { %v2582_v62 = vadd.f32 %v3938_v53, %v2124_v57  ;;  %v2548_v38 = vadd.f32 %v2353_v3, %v2090_v13  ;;  %v2481_v0 = vpop.f32.mrb[21].mxu1  ;;  %v3907_v61 = vpop.f32.mrb[22].mxu0  ;;  %v2660_v3 = vld [vmem:[#allocation2] sm:$0xff] (!%p3701_p6) }
 0x23c   : > { %2614 = vst.msk [vmem:[#allocation2 + $0xb0] sm:$0xff] %vm1940_vm7, %v2550_v6  ;;  %v2580_v8 = vadd.f32 %v2481_v0, %v2122_v2  ;;  %v2551_v22 = vadd.f32 %v3907_v61, %v2093_v46  ;;  %v3939_v49 = vpop.f32.mrb[22].mxu1  ;;  %v2356_v32 = vpop.f32.mrb[23].mxu0  ;;  %v2662_v0 = vld [vmem:[#allocation2 + $0x10] sm:$0xff] (!%p3701_p6)  ;;  %v2663_v61 = vld [vmem:[#allocation2 + $0x18] sm:$0xff] (!%p3701_p6) }
 0x23d   : > { %2646 = vst.msk [vmem:[#allocation2 + $0x1b0] sm:$0xff] %vm1940_vm7, %v2582_v62  ;;  %2612 = vst.msk [vmem:[#allocation2 + $0xa0] sm:$0xff] %vm1940_vm7, %v2548_v38  ;;  %v2583_v34 = vadd.f32 %v3939_v49, %v2125_v39  ;;  %v2549_v18 = vadd.f32 %v2356_v32, %v2091_v56  ;;  %v2484_v59 = vpop.f32.mrb[23].mxu1  ;;  %v5539_v39 = vld [vmem:[%s6107_s2] ss:$0 sm:$0xff] (!%p3701_p6)  ;;  %v2661_v56 = vld [vmem:[#allocation2 + $0x8] sm:$0xff] (!%p3701_p6) }
 0x23e   : > { %2644 = vst.msk [vmem:[#allocation2 + $0x1a0] sm:$0xff] %vm1940_vm7, %v2580_v8  ;;  %2615 = vst.msk [vmem:[#allocation2 + $0xb8] sm:$0xff] %vm1940_vm7, %v2551_v22  ;;  %v2581_v9 = vadd.f32 %v2484_v59, %v2123_v16  ;;  %v2731_v62 = vadd.f32 (!%p3701_p6), %v5539_v39, %v2660_v3  ;;  %v2732_v38 = vadd.f32 (!%p3701_p6), %v5539_v39, %v2661_v56  ;;  %v2664_v16 = vld [vmem:[#allocation2 + $0x20] sm:$0xff] (!%p3701_p6)  ;;  %v2665_v32 = vld [vmem:[#allocation2 + $0x28] sm:$0xff] (!%p3701_p6) }
 0x23f   : > { %2647 = vst.msk [vmem:[#allocation2 + $0x1b8] sm:$0xff] %vm1940_vm7, %v2583_v34  ;;  %2613 = vst.msk [vmem:[#allocation2 + $0xa8] sm:$0xff] %vm1940_vm7, %v2549_v18  ;;  %v2733_v8 = vadd.f32 (!%p3701_p6), %v5539_v39, %v2662_v0  ;;  %v2734_v22 = vadd.f32 (!%p3701_p6), %v5539_v39, %v2663_v61  ;;  %v2735_v49 = vadd.f32 (!%p3701_p6), %v5539_v39, %v2664_v16 }
 0x240   : > { %2645 = vst.msk [vmem:[#allocation2 + $0x1a8] sm:$0xff] %vm1940_vm7, %v2581_v9  ;;  %v3773_v34 = vpack.c.bf16 (!%p3701_p6), %v2731_v62, %v2731_v62  ;;  %v3116_v18 = vsel (!%p3701_p6), %vm1940_vm7, %v2731_v62, 0.0  ;;  %v3774_v59 = vpack.c.bf16 (!%p3701_p6), %v2732_v38, %v2732_v38  ;;  %v3117_v9 = vsel (!%p3701_p6), %vm1940_vm7, %v2732_v38, 0.0 }
 0x242   : > { %3052 = vst.msk [vmem:[%s6108_s3] sm:$0xf] (!%p3701_p6), %vm3051_vm10, %v3773_v34  ;;  %3053 = vst.msk [vmem:[%s6108_s3 + $0x4] sm:$0xf] (!%p3701_p6), %vm3051_vm10, %v3774_v59  ;;  %v2674_v34 = vld [vmem:[#allocation2 + $0x70] sm:$0xff] (!%p3701_p6) }
 0x259   : > { %v3910_v10 = vpop.f32.mrb[24].mxu0 }
 0x25a   : > { %v2554_v5 = vadd.f32 %v3910_v10, %v2096_v4  ;;  %v3942_v52 = vpop.f32.mrb[24].mxu1  ;;  %v2369_v55 = vpop.f32.mrb[25].mxu0  ;;  %v2666_v4 = vld [vmem:[#allocation2 + $0x30] sm:$0xff] (!%p3701_p6)  ;;  %v3775_v10 = vpack.c.bf16 (!%p3701_p6), %v2733_v8, %v2733_v8 }
 0x25b   : > { %v2586_v12 = vadd.f32 %v3942_v52, %v2128_v48  ;;  %v2552_v25 = vadd.f32 %v2369_v55, %v2094_v51  ;;  %v2497_v20 = vpop.f32.mrb[25].mxu1  ;;  %v3911_v17 = vpop.f32.mrb[26].mxu0  ;;  %v2667_v48 = vld [vmem:[#allocation2 + $0x38] sm:$0xff] (!%p3701_p6)  ;;  %v3118_v51 = vadd.f32 (!%p3701_p6), %v3117_v9, %v3116_v18  ;;  %v2669_v52 = vld [vmem:[#allocation2 + $0x48] sm:$0xff] (!%p3701_p6)  ;;  %v3126_v55 = vsel (!%p3701_p6), %vm1940_vm7, %v2734_v22, 0.0 }
 0x25c   : > { %2618 = vst.msk [vmem:[#allocation2 + $0xd0] sm:$0xff] %vm1940_vm7, %v2554_v5  ;;  %v2584_v26 = vadd.f32 %v2497_v20, %v2126_v47  ;;  %v2555_v27 = vadd.f32 %v3911_v17, %v2097_v35  ;;  %v3943_v54 = vpop.f32.mrb[26].mxu1  ;;  %v2372_v45 = vpop.f32.mrb[27].mxu0  ;;  %v3125_v47 = vsel (!%p3701_p6), %vm1940_vm7, %v2733_v8, 0.0  ;;  %v3776_v35 = vpack.c.bf16 (!%p3701_p6), %v2734_v22, %v2734_v22  ;;  %v2668_v5 = vld [vmem:[#allocation2 + $0x40] sm:$0xff] (!%p3701_p6)  ;;  %v2673_v8 = vld [vmem:[#allocation2 + $0x68] sm:$0xff] (!%p3701_p6) }
 0x25d   : > { %2650 = vst.msk [vmem:[#allocation2 + $0x1d0] sm:$0xff] %vm1940_vm7, %v2586_v12  ;;  %2616 = vst.msk [vmem:[#allocation2 + $0xc0] sm:$0xff] %vm1940_vm7, %v2552_v25  ;;  %v2587_v29 = vadd.f32 %v3943_v54, %v2129_v60  ;;  %v2553_v19 = vadd.f32 %v2372_v45, %v2095_v43  ;;  %v2500_v28 = vpop.f32.mrb[27].mxu1  ;;  %v3777_v60 = vpack.c.bf16 (!%p3701_p6), %v2735_v49, %v2735_v49  ;;  %v3134_v43 = vsel (!%p3701_p6), %vm1940_vm7, %v2735_v49, 0.0  ;;  %v2675_v18 = vld [vmem:[#allocation2 + $0x78] sm:$0xff] (!%p3701_p6) }
 0x25e   : > { %2648 = vst.msk [vmem:[#allocation2 + $0x1c0] sm:$0xff] %vm1940_vm7, %v2584_v26  ;;  %2619 = vst.msk [vmem:[#allocation2 + $0xd8] sm:$0xff] %vm1940_vm7, %v2555_v27  ;;  %v2585_v44 = vadd.f32 %v2500_v28, %v2127_v41  ;;  %v2736_v12 = vadd.f32 (!%p3701_p6), %v5539_v39, %v2665_v32  ;;  %v3119_v25 = vrot.slane (!%p3701_p6), %v3118_v51, 4  ;;  %v3127_v20 = vadd.f32 (!%p3701_p6), %v3126_v55, %v3125_v47 }
 0x25f   : > { %2651 = vst.msk [vmem:[#allocation2 + $0x1d8] sm:$0xff] %vm1940_vm7, %v2587_v29  ;;  %2617 = vst.msk [vmem:[#allocation2 + $0xc8] sm:$0xff] %vm1940_vm7, %v2553_v19  ;;  %v2737_v17 = vadd.f32 (!%p3701_p6), %v5539_v39, %v2666_v4  ;;  %v2738_v41 = vadd.f32 (!%p3701_p6), %v5539_v39, %v2667_v48  ;;  %v2739_v54 = vadd.f32 (!%p3701_p6), %v5539_v39, %v2668_v5 }
 0x260   : > { %2649 = vst.msk [vmem:[#allocation2 + $0x1c8] sm:$0xff] %vm1940_vm7, %v2585_v44  ;;  %v3778_v26 = vpack.c.bf16 (!%p3701_p6), %v2736_v12, %v2736_v12  ;;  %v3135_v27 = vsel (!%p3701_p6), %vm1940_vm7, %v2736_v12, 0.0  ;;  %v2740_v45 = vadd.f32 (!%p3701_p6), %v5539_v39, %v2669_v52  ;;  %v3120_v29 = vadd.f32 (!%p3701_p6), %v3119_v25, %v3118_v51 }
 0x261   : > { %3054 = vst.msk [vmem:[%s6108_s3 + $0x8] sm:$0xf] (!%p3701_p6), %vm3051_vm10, %v3775_v10  ;;  %3055 = vst.msk [vmem:[%s6108_s3 + $0xc] sm:$0xf] (!%p3701_p6), %vm3051_vm10, %v3776_v35  ;;  %v3128_v19 = vrot.slane (!%p3701_p6), %v3127_v20, 4  ;;  %v3136_v28 = vadd.f32 (!%p3701_p6), %v3135_v27, %v3134_v43  ;;  %v3779_v44 = vpack.c.bf16 (!%p3701_p6), %v2737_v17, %v2737_v17  ;;  %v2744_v35 = vadd.f32 (!%p3701_p6), %v5539_v39, %v2673_v8 }
 0x262   : > { %3056 = vst.msk [vmem:[%s6108_s3 + $0x10] sm:$0xf] (!%p3701_p6), %vm3051_vm10, %v3777_v60  ;;  %3057 = vst.msk [vmem:[%s6108_s3 + $0x14] sm:$0xf] (!%p3701_p6), %vm3051_vm10, %v3778_v26  ;;  %v2745_v55 = vadd.f32 (!%p3701_p6), %v5539_v39, %v2674_v34  ;;  %v2746_v60 = vadd.f32 (!%p3701_p6), %v5539_v39, %v2675_v18 }
 0x263   : > { %3058 = vst.msk [vmem:[%s6108_s3 + $0x18] sm:$0xf] (!%p3701_p6), %vm3051_vm10, %v3779_v44  ;;  %v3786_v25 = vpack.c.bf16 (!%p3701_p6), %v2744_v35, %v2744_v35 }
 0x264   : > { %v3179_v44 = vsel (!%p3701_p6), %vm1940_vm7, %v2745_v55, 0.0 }
 0x265   : > { %3065 = vst.msk [vmem:[%s6108_s3 + $0x34] sm:$0xf] (!%p3701_p6), %vm3051_vm10, %v3786_v25 }
 0x27a   : > { %v3946_v15 = vpop.f32.mrb[28].mxu1 }
 0x27b   : > { %v3914_v37 = vpop.f32.mrb[28].mxu0  ;;  %v2590_v31 = vadd.f32 %v3946_v15, %v2132_v24  ;;  %v2513_v7 = vpop.f32.mrb[29].mxu1  ;;  %2659 = sbr.rel (%p3701_p6) target bundleno = 746 (0x2ea), region = 40  ;;  %v2670_v24 = vld [vmem:[#allocation2 + $0x50] sm:$0xff] (!%p3701_p6)  ;;  %v3144_v15 = vsel (!%p3701_p6), %vm1940_vm7, %v2738_v41, 0.0 }
 0x27c   : > { %v2558_v40 = vadd.f32 %v3914_v37, %v2100_v42  ;;  %v2385_v50 = vpop.f32.mrb[29].mxu0  ;;  %v2588_v30 = vadd.f32 %v2513_v7, %v2130_v23  ;;  %v3947_v36 = vpop.f32.mrb[30].mxu1  ;;  %v3143_v42 = vsel (!%p3701_p6), %vm1940_vm7, %v2737_v17, 0.0  ;;  %v3780_v23 = vpack.c.bf16 (!%p3701_p6), %v2738_v41, %v2738_v41  ;;  %v2676_v17 = vld [vmem:[#allocation2 + $0x80] sm:$0xff] (!%p3701_p6) }
 0x27d   : > { %2654 = vst.msk [vmem:[#allocation2 + $0x1f0] sm:$0xff] %vm1940_vm7, %v2590_v31  ;;  %v2556_v33 = vadd.f32 %v2385_v50, %v2098_v14  ;;  %v3915_v57 = vpop.f32.mrb[30].mxu0  ;;  %v2591_v13 = vadd.f32 %v3947_v36, %v2133_v1  ;;  %v2516_v63 = vpop.f32.mrb[31].mxu1  ;;  %v3781_v14 = vpack.c.bf16 (!%p3701_p6), %v2739_v54, %v2739_v54  ;;  %v3121_v1 = vrot.slane (!%p3701_p6), %v3120_v29, 2 }
 0x27e   : > { %2622 = vst.msk [vmem:[#allocation2 + $0xf0] sm:$0xff] %vm1940_vm7, %v2558_v40  ;;  %2652 = vst.msk [vmem:[#allocation2 + $0x1e0] sm:$0xff] %vm1940_vm7, %v2588_v30  ;;  %v2559_v2 = vadd.f32 %v3915_v57, %v2101_v58  ;;  %v2388_v46 = vpop.f32.mrb[31].mxu0  ;;  %v2589_v6 = vadd.f32 %v2516_v63, %v2131_v11  ;;  %v3129_v37 = vadd.f32 (!%p3701_p6), %v3128_v19, %v3127_v20  ;;  %v3137_v31 = vrot.slane (!%p3701_p6), %v3136_v28, 4  ;;  %v2671_v58 = vld [vmem:[#allocation2 + $0x58] sm:$0xff] (!%p3701_p6) }
 0x27f   : > { %2620 = vst.msk [vmem:[#allocation2 + $0xe0] sm:$0xff] %vm1940_vm7, %v2556_v33  ;;  %2655 = vst.msk [vmem:[#allocation2 + $0x1f8] sm:$0xff] %vm1940_vm7, %v2591_v13  ;;  %v2557_v53 = vadd.f32 %v2388_v46, %v2099_v21  ;;  %v3145_v7 = vadd.f32 (!%p3701_p6), %v3144_v15, %v3143_v42  ;;  %v3152_v11 = vsel (!%p3701_p6), %vm1940_vm7, %v2739_v54, 0.0  ;;  %v3782_v40 = vpack.c.bf16 (!%p3701_p6), %v2740_v45, %v2740_v45  ;;  %v2672_v13 = vld [vmem:[#allocation2 + $0x60] sm:$0xff] (!%p3701_p6)  ;;  %v2679_v19 = vld [vmem:[#allocation2 + $0x98] sm:$0xff] (!%p3701_p6) }
 0x280   : > { %2623 = vst.msk [vmem:[#allocation2 + $0xf8] sm:$0xff] %vm1940_vm7, %v2559_v2  ;;  %2653 = vst.msk [vmem:[#allocation2 + $0x1e8] sm:$0xff] %vm1940_vm7, %v2589_v6  ;;  %v3153_v50 = vsel (!%p3701_p6), %vm1940_vm7, %v2740_v45, 0.0  ;;  %v2741_v30 = vadd.f32 (!%p3701_p6), %v5539_v39, %v2670_v24  ;;  %v3122_v36 = vadd.f32 (!%p3701_p6), %v3121_v1, %v3120_v29  ;;  %v3130_v21 = vrot.slane (!%p3701_p6), %v3129_v37, 2  ;;  %v2677_v45 = vld [vmem:[#allocation2 + $0x88] sm:$0xff] (!%p3701_p6)  ;;  %v2678_v29 = vld [vmem:[#allocation2 + $0x90] sm:$0xff] (!%p3701_p6) }
 0x281   : > { %2621 = vst.msk [vmem:[#allocation2 + $0xe8] sm:$0xff] %vm1940_vm7, %v2557_v53  ;;  %v3138_v33 = vadd.f32 (!%p3701_p6), %v3137_v31, %v3136_v28  ;;  %v3146_v57 = vrot.slane (!%p3701_p6), %v3145_v7, 4  ;;  %v3154_v63 = vadd.f32 (!%p3701_p6), %v3153_v50, %v3152_v11  ;;  %v2742_v6 = vadd.f32 (!%p3701_p6), %v5539_v39, %v2671_v58 }
 0x282   : > { %3059 = vst.msk [vmem:[%s6108_s3 + $0x1c] sm:$0xf] %vm3051_vm10, %v3780_v23  ;;  %3060 = vst.msk [vmem:[%s6108_s3 + $0x20] sm:$0xf] %vm3051_vm10, %v3781_v14  ;;  %v3783_v2 = vpack.c.bf16 %v2741_v30, %v2741_v30  ;;  %v3161_v46 = vsel %vm1940_vm7, %v2741_v30, 0.0  ;;  %v3123_v53 = vrot.slane %v3122_v36, 1  ;;  %v3131_v3 = vadd.f32 %v3130_v21, %v3129_v37 }
 0x283   : > { %3061 = vst.msk [vmem:[%s6108_s3 + $0x24] sm:$0xf] %vm3051_vm10, %v3782_v40  ;;  %v3139_v56 = vrot.slane %v3138_v33, 2  ;;  %v3147_v62 = vadd.f32 %v3146_v57, %v3145_v7  ;;  %v3155_v38 = vrot.slane %v3154_v63, 4  ;;  %v3784_v0 = vpack.c.bf16 %v2742_v6, %v2742_v6  ;;  %v2680_v23 = vld [vmem:[#allocation2 + $0xa0] sm:$0xff]  ;;  %v2681_v21 = vld [vmem:[#allocation2 + $0xa8] sm:$0xff] }
 0x284   : > { %3062 = vst.msk [vmem:[%s6108_s3 + $0x28] sm:$0xf] %vm3051_vm10, %v3783_v2  ;;  %v3162_v61 = vsel %vm1940_vm7, %v2742_v6, 0.0  ;;  %v2743_v16 = vadd.f32 %v5539_v39, %v2672_v13  ;;  %v3132_v22 = vrot.slane %v3131_v3, 1  ;;  %v5610_v59 = vadd.f32 %v3123_v53, %v3122_v36  ;;  %v2682_v2 = vld [vmem:[#allocation2 + $0xb0] sm:$0xff] }
 0x285   : > { %v3140_v49 = vadd.f32 %v3139_v56, %v3138_v33  ;;  %v3148_v32 = vrot.slane %v3147_v62, 2  ;;  %v3156_v9 = vadd.f32 %v3155_v38, %v3154_v63  ;;  %3063 = vst.msk [vmem:[%s6108_s3 + $0x2c] sm:$0xf] %vm3051_vm10, %v3784_v0  ;;  %v3163_v4 = vadd.f32 %v3162_v61, %v3161_v46  ;;  %v2683_v46 = vld [vmem:[#allocation2 + $0xb8] sm:$0xff]  ;;  %v2685_v38 = vld [vmem:[#allocation2 + $0xc8] sm:$0xff] }
 0x286   : > { %v3785_v48 = vpack.c.bf16 %v2743_v16, %v2743_v16  ;;  %v3170_v47 = vsel %vm1940_vm7, %v2743_v16, 0.0  ;;  %v5624_v43 = vadd.f32 %v3132_v22, %v3131_v3  ;;  %v3171_v20 = vsel %vm1940_vm7, %v2744_v35, 0.0 }
 0x287   : > { %v3141_v51 = vrot.slane %v3140_v49, 1  ;;  %v3149_v10 = vadd.f32 %v3148_v32, %v3147_v62  ;;  %v3157_v5 = vrot.slane %v3156_v9, 2  ;;  %v3164_v52 = vrot.slane %v3163_v4, 4  ;;  %v2684_v62 = vld [vmem:[#allocation2 + $0xc0] sm:$0xff] }
 0x288   : > { %3064 = vst.msk [vmem:[%s6108_s3 + $0x30] sm:$0xf] %vm3051_vm10, %v3785_v48  ;;  %v3172_v27 = vadd.f32 %v3171_v20, %v3170_v47  ;;  %v3787_v54 = vpack.c.bf16 %v2745_v55, %v2745_v55  ;;  %v3788_v24 = vpack.c.bf16 %v2746_v60, %v2746_v60  ;;  %v3180_v42 = vsel %vm1940_vm7, %v2746_v60, 0.0 }
 0x289   : > { %v3150_v12 = vrot.slane %v3149_v10, 1  ;;  %v5627_v41 = vadd.f32 %v3157_v5, %v3156_v9  ;;  %v3165_v26 = vadd.f32 %v3164_v52, %v3163_v4  ;;  %v5629_v28 = vadd.f32 %v3141_v51, %v3140_v49  ;;  %v2686_v5 = vld [vmem:[#allocation2 + $0xd0] sm:$0xff] }
 0x28a   : > { %v3173_v1 = vrot.slane %v3172_v27, 4  ;;  %3066 = vst.msk [vmem:[%s6108_s3 + $0x38] sm:$0xf] %vm3051_vm10, %v3787_v54  ;;  %v5643_v37 = vadd.f32 %v3180_v42, %v3179_v44  ;;  %3067 = vst.msk [vmem:[%s6108_s3 + $0x3c] sm:$0xf] %vm3051_vm10, %v3788_v24  ;;  %v2747_v31 = vadd.f32 %v5539_v39, %v2676_v17  ;;  %v2748_v7 = vadd.f32 %v5539_v39, %v2677_v45 }
 0x28b   : > { %v5637_v15 = vadd.f32 %v3150_v12, %v3149_v10  ;;  %v3166_v14 = vrot.slane %v3165_v26, 2  ;;  %v2749_v58 = vadd.f32 %v5539_v39, %v2678_v29  ;;  %v2750_v11 = vadd.f32 %v5539_v39, %v2679_v19 }
 0x28c   : > { %v3159_v40 = vrot.slane %v5627_v41, 1  ;;  %v5656_v30 = vadd.f32 %v3173_v1, %v3172_v27  ;;  %v2751_v36 = vadd.f32 %v5539_v39, %v2680_v23  ;;  %v3789_v33 = vpack.c.bf16 %v2747_v31, %v2747_v31  ;;  %v2687_v27 = vld [vmem:[#allocation2 + $0xd8] sm:$0xff] }
 0x28d   : > { %v5654_v50 = vadd.f32 %v3166_v14, %v3165_v26  ;;  %v3188_v57 = vsel %vm1940_vm7, %v2747_v31, 0.0  ;;  %v3790_v13 = vpack.c.bf16 %v2748_v7, %v2748_v7  ;;  %v3189_v63 = vsel %vm1940_vm7, %v2748_v7, 0.0  ;;  %v2688_v14 = vld [vmem:[#allocation2 + $0xe0] sm:$0xff] }
 0x28e   : > { %v3190_v6 = vadd.f32 %v3189_v63, %v3188_v57  ;;  %v3791_v53 = vpack.c.bf16 %v2749_v58, %v2749_v58  ;;  %v3197_v3 = vsel %vm1940_vm7, %v2749_v58, 0.0  ;;  %v3792_v56 = vpack.c.bf16 %v2750_v11, %v2750_v11  ;;  %3068 = vst.msk [vmem:[%s6108_s3 + $0x40] sm:$0xf] %vm3051_vm10, %v3789_v33 }
 0x28f   : > { %3069 = vst.msk [vmem:[%s6108_s3 + $0x44] sm:$0xf] %vm3051_vm10, %v3790_v13  ;;  %v3198_v0 = vsel %vm1940_vm7, %v2750_v11, 0.0  ;;  %v3793_v61 = vpack.c.bf16 %v2751_v36, %v2751_v36  ;;  %v3206_v16 = vsel %vm1940_vm7, %v2751_v36, 0.0  ;;  %v2752_v8 = vadd.f32 %v5539_v39, %v2681_v21 }
 0x290   : > { %v3191_v22 = vrot.slane %v3190_v6, 4  ;;  %3070 = vst.msk [vmem:[%s6108_s3 + $0x48] sm:$0xf] %vm3051_vm10, %v3791_v53  ;;  %3071 = vst.msk [vmem:[%s6108_s3 + $0x4c] sm:$0xf] %vm3051_vm10, %v3792_v56  ;;  %v3199_v49 = vadd.f32 %v3198_v0, %v3197_v3  ;;  %v2753_v32 = vadd.f32 %v5539_v39, %v2682_v2  ;;  %v2754_v34 = vadd.f32 %v5539_v39, %v2683_v46  ;;  %v2689_v46 = vld [vmem:[#allocation2 + $0xe8] sm:$0xff] }
 0x291   : > { %3072 = vst.msk [vmem:[%s6108_s3 + $0x50] sm:$0xf] %vm3051_vm10, %v3793_v61  ;;  %v3794_v18 = vpack.c.bf16 %v2752_v8, %v2752_v8  ;;  %v3207_v9 = vsel %vm1940_vm7, %v2752_v8, 0.0  ;;  %v2755_v4 = vadd.f32 %v5539_v39, %v2684_v62  ;;  %v2756_v48 = vadd.f32 %v5539_v39, %v2685_v38  ;;  %v2690_v62 = vld [vmem:[#allocation2 + $0xf0] sm:$0xff]  ;;  %v2691_v38 = vld [vmem:[#allocation2 + $0xf8] sm:$0xff] }
 0x292   : > { %v3192_v51 = vadd.f32 %v3191_v22, %v3190_v6  ;;  %v3200_v10 = vrot.slane %v3199_v49, 4  ;;  %v3208_v47 = vadd.f32 %v3207_v9, %v3206_v16  ;;  %v3795_v35 = vpack.c.bf16 %v2753_v32, %v2753_v32 }
 0x293   : > { %3073 = vst.msk [vmem:[%s6108_s3 + $0x54] sm:$0xf] %vm3051_vm10, %v3794_v18  ;;  %v3215_v52 = vsel %vm1940_vm7, %v2753_v32, 0.0  ;;  %v3796_v55 = vpack.c.bf16 %v2754_v34, %v2754_v34  ;;  %v3216_v60 = vsel %vm1940_vm7, %v2754_v34, 0.0  ;;  %v3797_v12 = vpack.c.bf16 %v2755_v4, %v2755_v4 }
 0x294   : > { %v3193_v25 = vrot.slane %v3192_v51, 2  ;;  %v3201_v20 = vadd.f32 %v3200_v10, %v3199_v49  ;;  %v3209_v17 = vrot.slane %v3208_v47, 4  ;;  %3074 = vst.msk [vmem:[%s6108_s3 + $0x58] sm:$0xf] %vm3051_vm10, %v3795_v35  ;;  %v3217_v26 = vadd.f32 %v3216_v60, %v3215_v52 }
 0x295   : > { %3075 = vst.msk [vmem:[%s6108_s3 + $0x5c] sm:$0xf] %vm3051_vm10, %v3796_v55  ;;  %3076 = vst.msk [vmem:[%s6108_s3 + $0x60] sm:$0xf] %vm3051_vm10, %v3797_v12  ;;  %v3224_v54 = vsel %vm1940_vm7, %v2755_v4, 0.0  ;;  %v3798_v45 = vpack.c.bf16 %v2756_v48, %v2756_v48  ;;  %v3225_v29 = vsel %vm1940_vm7, %v2756_v48, 0.0  ;;  %v2757_v19 = vadd.f32 %v5539_v39, %v2686_v5 }
 0x296   : > { %v3194_v44 = vadd.f32 %v3193_v25, %v3192_v51  ;;  %v3202_v24 = vrot.slane %v3201_v20, 2  ;;  %v3210_v42 = vadd.f32 %v3209_v17, %v3208_v47  ;;  %v3218_v23 = vrot.slane %v3217_v26, 4  ;;  %v2692_v5 = vld [vmem:[#allocation2 + $0x100] sm:$0xff]  ;;  %v2693_v25 = vld [vmem:[#allocation2 + $0x108] sm:$0xff]  ;;  %v2695_v17 = vld [vmem:[#allocation2 + $0x118] sm:$0xff] }
 0x297   : > { %3077 = vst.msk [vmem:[%s6108_s3 + $0x64] sm:$0xf] %vm3051_vm10, %v3798_v45  ;;  %v3226_v1 = vadd.f32 %v3225_v29, %v3224_v54  ;;  %v3799_v31 = vpack.c.bf16 %v2757_v19, %v2757_v19  ;;  %v3233_v7 = vsel %vm1940_vm7, %v2757_v19, 0.0  ;;  %v2758_v58 = vadd.f32 %v5539_v39, %v2687_v27  ;;  %v2696_v29 = vld [vmem:[#allocation2 + $0x120] sm:$0xff] }
 0x298   : > { %v3195_v11 = vrot.slane %v3194_v44, 1  ;;  %v3203_v36 = vadd.f32 %v3202_v24, %v3201_v20  ;;  %v3211_v21 = vrot.slane %v3210_v42, 2  ;;  %v3219_v33 = vadd.f32 %v3218_v23, %v3217_v26  ;;  %v2694_v20 = vld [vmem:[#allocation2 + $0x110] sm:$0xff] }
 0x299   : > { %v3227_v57 = vrot.slane %v3226_v1, 4  ;;  %3078 = vst.msk [vmem:[%s6108_s3 + $0x68] sm:$0xf] %vm3051_vm10, %v3799_v31  ;;  %v3800_v13 = vpack.c.bf16 %v2758_v58, %v2758_v58  ;;  %v3234_v63 = vsel %vm1940_vm7, %v2758_v58, 0.0  ;;  %v2759_v2 = vadd.f32 %v5539_v39, %v2688_v14 }
 0x29a   : > { %v3182_v6 = vrot.slane %v5643_v37, 4  ;;  %v3204_v53 = vrot.slane %v3203_v36, 1  ;;  %v3212_v3 = vadd.f32 %v3211_v21, %v3210_v42  ;;  %v3220_v56 = vrot.slane %v3219_v33, 2  ;;  %v2697_v21 = vld [vmem:[#allocation2 + $0x128] sm:$0xff] }
 0x29b   : > { %v5724_v0 = vadd.f32 %v3195_v11, %v3194_v44  ;;  %v3228_v61 = vadd.f32 %v3227_v57, %v3226_v1  ;;  %3079 = vst.msk [vmem:[%s6108_s3 + $0x6c] sm:$0xf] %vm3051_vm10, %v3800_v13  ;;  %v3235_v16 = vadd.f32 %v3234_v63, %v3233_v7  ;;  %v3801_v8 = vpack.c.bf16 %v2759_v2, %v2759_v2 }
 0x29c   : > { %v3213_v22 = vrot.slane %v3212_v3, 1  ;;  %v3221_v49 = vadd.f32 %v3220_v56, %v3219_v33  ;;  %v3242_v32 = vsel %vm1940_vm7, %v2759_v2, 0.0  ;;  %v2760_v34 = vadd.f32 %v5539_v39, %v2689_v46  ;;  %v2698_v2 = vld [vmem:[#allocation2 + $0x130] sm:$0xff]  ;;  %v2699_v46 = vld [vmem:[#allocation2 + $0x138] sm:$0xff] }
 0x29d   : > { %v3229_v18 = vrot.slane %v3228_v61, 2  ;;  %v3236_v9 = vrot.slane %v3235_v16, 4  ;;  %3080 = vst.msk [vmem:[%s6108_s3 + $0x70] sm:$0xf] %vm3051_vm10, %v3801_v8  ;;  %v2761_v4 = vadd.f32 %v5539_v39, %v2690_v62  ;;  %v2762_v48 = vadd.f32 %v5539_v39, %v2691_v38  ;;  %v2700_v38 = vld [vmem:[#allocation2 + $0x140] sm:$0xff] }
 0x29e   : > { %v5738_v51 = vadd.f32 %v3204_v53, %v3203_v36  ;;  %v3222_v10 = vrot.slane %v3221_v49, 1  ;;  %v3802_v47 = vpack.c.bf16 %v2760_v34, %v2760_v34  ;;  %v3243_v35 = vsel %vm1940_vm7, %v2760_v34, 0.0 }
 0x29f   : > { %v5741_v52 = vadd.f32 %v3229_v18, %v3228_v61  ;;  %v3237_v55 = vadd.f32 %v3236_v9, %v3235_v16  ;;  %v3244_v60 = vadd.f32 %v3243_v35, %v3242_v32  ;;  %v3803_v12 = vpack.c.bf16 %v2761_v4, %v2761_v4  ;;  %v2701_v61 = vld [vmem:[#allocation2 + $0x148] sm:$0xff] }
 0x2a0   : > { %v5743_v26 = vadd.f32 %v3213_v22, %v3212_v3  ;;  %3081 = vst.msk [vmem:[%s6108_s3 + $0x74] sm:$0xf] %vm3051_vm10, %v3802_v47  ;;  %v3251_v27 = vsel %vm1940_vm7, %v2761_v4, 0.0  ;;  %v3804_v54 = vpack.c.bf16 %v2762_v48, %v2762_v48  ;;  %v3252_v45 = vsel %vm1940_vm7, %v2762_v48, 0.0 }
 0x2a1   : > { %v5751_v19 = vadd.f32 %v3222_v10, %v3221_v49  ;;  %v3231_v44 = vrot.slane %v5741_v52, 1  ;;  %v3238_v24 = vrot.slane %v3237_v55, 2  ;;  %v3245_v42 = vrot.slane %v3244_v60, 4  ;;  %3082 = vst.msk [vmem:[%s6108_s3 + $0x78] sm:$0xf] %vm3051_vm10, %v3803_v12  ;;  %v2702_v12 = vld [vmem:[#allocation2 + $0x150] sm:$0xff] }
 0x2a2   : > { %3083 = vst.msk [vmem:[%s6108_s3 + $0x7c] sm:$0xf] %vm3051_vm10, %v3804_v54  ;;  %v2763_v23 = vadd.f32 %v5539_v39, %v2692_v5  ;;  %v2764_v14 = vadd.f32 %v5539_v39, %v2693_v25  ;;  %v2765_v1 = vadd.f32 %v5539_v39, %v2694_v20  ;;  %v2766_v31 = vadd.f32 %v5539_v39, %v2695_v17 }
 0x2a3   : > { %v5766_v7 = vadd.f32 %v3238_v24, %v3237_v55  ;;  %v5768_v58 = vadd.f32 %v3245_v42, %v3244_v60  ;;  %v5770_v11 = vadd.f32 %v3252_v45, %v3251_v27  ;;  %v2767_v36 = vadd.f32 %v5539_v39, %v2696_v29  ;;  %v2703_v42 = vld [vmem:[#allocation2 + $0x158] sm:$0xff] }
 0x2a4   : > { %v3805_v33 = vpack.c.bf16 %v2763_v23, %v2763_v23  ;;  %v3260_v57 = vsel %vm1940_vm7, %v2763_v23, 0.0  ;;  %v3806_v13 = vpack.c.bf16 %v2764_v14, %v2764_v14  ;;  %v3261_v63 = vsel %vm1940_vm7, %v2764_v14, 0.0 }
 0x2a5   : > { %v3262_v53 = vadd.f32 %v3261_v63, %v3260_v57  ;;  %v3807_v3 = vpack.c.bf16 %v2765_v1, %v2765_v1  ;;  %v3269_v56 = vsel %vm1940_vm7, %v2765_v1, 0.0  ;;  %v3808_v62 = vpack.c.bf16 %v2766_v31, %v2766_v31 }
 0x2a6   : > { %3084 = vst.msk [vmem:[%s6108_s3 + $0x80] sm:$0xf] %vm3051_vm10, %v3805_v33  ;;  %3085 = vst.msk [vmem:[%s6108_s3 + $0x84] sm:$0xf] %vm3051_vm10, %v3806_v13  ;;  %v3270_v16 = vsel %vm1940_vm7, %v2766_v31, 0.0  ;;  %v3809_v8 = vpack.c.bf16 %v2767_v36, %v2767_v36  ;;  %v3278_v22 = vsel %vm1940_vm7, %v2767_v36, 0.0  ;;  %v2768_v49 = vadd.f32 %v5539_v39, %v2697_v21 }
 0x2a7   : > { %v3263_v32 = vrot.slane %v3262_v53, 4  ;;  %3086 = vst.msk [vmem:[%s6108_s3 + $0x88] sm:$0xf] %vm3051_vm10, %v3807_v3  ;;  %3087 = vst.msk [vmem:[%s6108_s3 + $0x8c] sm:$0xf] %vm3051_vm10, %v3808_v62  ;;  %v3271_v34 = vadd.f32 %v3270_v16, %v3269_v56  ;;  %v2769_v18 = vadd.f32 %v5539_v39, %v2698_v2  ;;  %v2770_v9 = vadd.f32 %v5539_v39, %v2699_v46  ;;  %v2704_v13 = vld [vmem:[#allocation2 + $0x160] sm:$0xff] }
 0x2a8   : > { %3088 = vst.msk [vmem:[%s6108_s3 + $0x90] sm:$0xf] %vm3051_vm10, %v3809_v8  ;;  %v3810_v4 = vpack.c.bf16 %v2768_v49, %v2768_v49  ;;  %v3279_v48 = vsel %vm1940_vm7, %v2768_v49, 0.0  ;;  %v2771_v10 = vadd.f32 %v5539_v39, %v2700_v38  ;;  %v2772_v47 = vadd.f32 %v5539_v39, %v2701_v61  ;;  %v2705_v49 = vld [vmem:[#allocation2 + $0x168] sm:$0xff] }
 0x2a9   : > { %v3264_v35 = vadd.f32 %v3263_v32, %v3262_v53  ;;  %v3272_v5 = vrot.slane %v3271_v34, 4  ;;  %v3280_v55 = vadd.f32 %v3279_v48, %v3278_v22  ;;  %v3811_v60 = vpack.c.bf16 %v2769_v18, %v2769_v18  ;;  %v2707_v48 = vld [vmem:[#allocation2 + $0x178] sm:$0xff] }
 0x2aa   : > { %3089 = vst.msk [vmem:[%s6108_s3 + $0x94] sm:$0xf] %vm3051_vm10, %v3810_v4  ;;  %v3287_v25 = vsel %vm1940_vm7, %v2769_v18, 0.0  ;;  %v3812_v20 = vpack.c.bf16 %v2770_v9, %v2770_v9  ;;  %v3288_v17 = vsel %vm1940_vm7, %v2770_v9, 0.0  ;;  %v3813_v27 = vpack.c.bf16 %v2771_v10, %v2771_v10  ;;  %v2706_v4 = vld [vmem:[#allocation2 + $0x170] sm:$0xff] }
 0x2ab   : > { %v3265_v54 = vrot.slane %v3264_v35, 2  ;;  %v3273_v45 = vadd.f32 %v3272_v5, %v3271_v34  ;;  %v3281_v29 = vrot.slane %v3280_v55, 4  ;;  %3090 = vst.msk [vmem:[%s6108_s3 + $0x98] sm:$0xf] %vm3051_vm10, %v3811_v60  ;;  %v3289_v24 = vadd.f32 %v3288_v17, %v3287_v25 }
 0x2ac   : > { %3091 = vst.msk [vmem:[%s6108_s3 + $0x9c] sm:$0xf] %vm3051_vm10, %v3812_v20  ;;  %3092 = vst.msk [vmem:[%s6108_s3 + $0xa0] sm:$0xf] %vm3051_vm10, %v3813_v27  ;;  %v3296_v23 = vsel %vm1940_vm7, %v2771_v10, 0.0  ;;  %v3814_v14 = vpack.c.bf16 %v2772_v47, %v2772_v47  ;;  %v3297_v1 = vsel %vm1940_vm7, %v2772_v47, 0.0  ;;  %v2773_v31 = vadd.f32 %v5539_v39, %v2702_v12 }
 0x2ad   : > { %v3266_v36 = vadd.f32 %v3265_v54, %v3264_v35  ;;  %v3274_v21 = vrot.slane %v3273_v45, 2  ;;  %v3282_v33 = vadd.f32 %v3281_v29, %v3280_v55  ;;  %v3290_v57 = vrot.slane %v3289_v24, 4 }
 0x2ae   : > { %3093 = vst.msk [vmem:[%s6108_s3 + $0xa4] sm:$0xf] %vm3051_vm10, %v3814_v14  ;;  %v3298_v63 = vadd.f32 %v3297_v1, %v3296_v23  ;;  %v3815_v2 = vpack.c.bf16 %v2773_v31, %v2773_v31  ;;  %v3305_v46 = vsel %vm1940_vm7, %v2773_v31, 0.0  ;;  %v2774_v53 = vadd.f32 %v5539_v39, %v2703_v42  ;;  %v2708_v23 = vld [vmem:[#allocation2 + $0x180] sm:$0xff] }
 0x2af   : > { %v3267_v3 = vrot.slane %v3266_v36, 1  ;;  %v3275_v56 = vadd.f32 %v3274_v21, %v3273_v45  ;;  %v3283_v62 = vrot.slane %v3282_v33, 2  ;;  %v3291_v38 = vadd.f32 %v3290_v57, %v3289_v24  ;;  %v2709_v21 = vld [vmem:[#allocation2 + $0x188] sm:$0xff]  ;;  %v2711_v57 = vld [vmem:[#allocation2 + $0x198] sm:$0xff] }
 0x2b0   : > { %v3299_v61 = vrot.slane %v3298_v63, 4  ;;  %3094 = vst.msk [vmem:[%s6108_s3 + $0xa8] sm:$0xf] %vm3051_vm10, %v3815_v2  ;;  %v3816_v16 = vpack.c.bf16 %v2774_v53, %v2774_v53  ;;  %v3306_v8 = vsel %vm1940_vm7, %v2774_v53, 0.0  ;;  %v2775_v22 = vadd.f32 %v5539_v39, %v2704_v13  ;;  %v2712_v53 = vld [vmem:[#allocation2 + $0x1a0] sm:$0xff] }
 0x2b1   : > { %v3254_v32 = vrot.slane %v5770_v11, 4  ;;  %v3276_v34 = vrot.slane %v3275_v56, 1  ;;  %v3284_v18 = vadd.f32 %v3283_v62, %v3282_v33  ;;  %v3292_v9 = vrot.slane %v3291_v38, 2  ;;  %v2710_v33 = vld [vmem:[#allocation2 + $0x190] sm:$0xff] }
 0x2b2   : > { %v5838_v10 = vadd.f32 %v3267_v3, %v3266_v36  ;;  %v3300_v47 = vadd.f32 %v3299_v61, %v3298_v63  ;;  %3095 = vst.msk [vmem:[%s6108_s3 + $0xac] sm:$0xf] %vm3051_vm10, %v3816_v16  ;;  %v3307_v35 = vadd.f32 %v3306_v8, %v3305_v46  ;;  %v3817_v5 = vpack.c.bf16 %v2775_v22, %v2775_v22 }
 0x2b3   : > { %v3285_v55 = vrot.slane %v3284_v18, 1  ;;  %v3293_v60 = vadd.f32 %v3292_v9, %v3291_v38  ;;  %v3314_v12 = vsel %vm1940_vm7, %v2775_v22, 0.0  ;;  %v2776_v25 = vadd.f32 %v5539_v39, %v2705_v49 }
 0x2b4   : > { %v3301_v20 = vrot.slane %v3300_v47, 2  ;;  %v3308_v17 = vrot.slane %v3307_v35, 4  ;;  %3096 = vst.msk [vmem:[%s6108_s3 + $0xb0] sm:$0xf] %vm3051_vm10, %v3817_v5  ;;  %v2777_v27 = vadd.f32 %v5539_v39, %v2706_v4  ;;  %v2778_v54 = vadd.f32 %v5539_v39, %v2707_v48  ;;  %v2713_v4 = vld [vmem:[#allocation2 + $0x1a8] sm:$0xff] }
 0x2b5   : > { %v5852_v45 = vadd.f32 %v3276_v34, %v3275_v56  ;;  %v3294_v29 = vrot.slane %v3293_v60, 1  ;;  %v3818_v24 = vpack.c.bf16 %v2776_v25, %v2776_v25  ;;  %v3315_v42 = vsel %vm1940_vm7, %v2776_v25, 0.0 }
 0x2b6   : > { %v5855_v14 = vadd.f32 %v3301_v20, %v3300_v47  ;;  %v3309_v1 = vadd.f32 %v3308_v17, %v3307_v35  ;;  %v3316_v31 = vadd.f32 %v3315_v42, %v3314_v12  ;;  %v3819_v36 = vpack.c.bf16 %v2777_v27, %v2777_v27 }
 0x2b7   : > { %v5857_v13 = vadd.f32 %v3285_v55, %v3284_v18  ;;  %3097 = vst.msk [vmem:[%s6108_s3 + $0xb4] sm:$0xf] %vm3051_vm10, %v3818_v24  ;;  %v3323_v63 = vsel %vm1940_vm7, %v2777_v27, 0.0  ;;  %v3820_v2 = vpack.c.bf16 %v2778_v54, %v2778_v54  ;;  %v3324_v46 = vsel %vm1940_vm7, %v2778_v54, 0.0  ;;  %v2714_v55 = vld [vmem:[#allocation2 + $0x1b0] sm:$0xff]  ;;  %v2716_v27 = vld [vmem:[#allocation2 + $0x1c0] sm:$0xff] }
 0x2b8   : > { %v5865_v3 = vadd.f32 %v3294_v29, %v3293_v60  ;;  %v3303_v56 = vrot.slane %v5855_v14, 1  ;;  %v3310_v62 = vrot.slane %v3309_v1, 2  ;;  %v3317_v38 = vrot.slane %v3316_v31, 4  ;;  %3098 = vst.msk [vmem:[%s6108_s3 + $0xb8] sm:$0xf] %vm3051_vm10, %v3819_v36  ;;  %v2715_v60 = vld [vmem:[#allocation2 + $0x1b8] sm:$0xff] }
 0x2b9   : > { %3099 = vst.msk [vmem:[%s6108_s3 + $0xbc] sm:$0xf] %vm3051_vm10, %v3820_v2  ;;  %v2779_v61 = vadd.f32 %v5539_v39, %v2708_v23  ;;  %v2780_v16 = vadd.f32 %v5539_v39, %v2709_v21  ;;  %v2781_v8 = vadd.f32 %v5539_v39, %v2710_v33  ;;  %v2782_v22 = vadd.f32 %v5539_v39, %v2711_v57  ;;  %v2717_v54 = vld [vmem:[#allocation2 + $0x1c8] sm:$0xff] }
 0x2ba   : > { %v5880_v49 = vadd.f32 %v3310_v62, %v3309_v1  ;;  %v5882_v34 = vadd.f32 %v3317_v38, %v3316_v31  ;;  %v5884_v18 = vadd.f32 %v3324_v46, %v3323_v63  ;;  %v2783_v9 = vadd.f32 %v5539_v39, %v2712_v53 }
 0x2bb   : > { %v3821_v48 = vpack.c.bf16 %v2779_v61, %v2779_v61  ;;  %v3332_v47 = vsel %vm1940_vm7, %v2779_v61, 0.0  ;;  %v3822_v35 = vpack.c.bf16 %v2780_v16, %v2780_v16  ;;  %v3333_v5 = vsel %vm1940_vm7, %v2780_v16, 0.0  ;;  %v2718_v61 = vld [vmem:[#allocation2 + $0x1d0] sm:$0xff] }
 0x2bc   : > { %v3334_v12 = vadd.f32 %v3333_v5, %v3332_v47  ;;  %v3823_v25 = vpack.c.bf16 %v2781_v8, %v2781_v8  ;;  %v3341_v20 = vsel %vm1940_vm7, %v2781_v8, 0.0  ;;  %v3824_v17 = vpack.c.bf16 %v2782_v22, %v2782_v22  ;;  %v2719_v5 = vld [vmem:[#allocation2 + $0x1d8] sm:$0xff] }
 0x2bd   : > { %3100 = vst.msk [vmem:[%s6108_s3 + $0xc0] sm:$0xf] %vm3051_vm10, %v3821_v48  ;;  %3101 = vst.msk [vmem:[%s6108_s3 + $0xc4] sm:$0xf] %vm3051_vm10, %v3822_v35  ;;  %v3342_v29 = vsel %vm1940_vm7, %v2782_v22, 0.0  ;;  %v3825_v24 = vpack.c.bf16 %v2783_v9, %v2783_v9  ;;  %v3350_v42 = vsel %vm1940_vm7, %v2783_v9, 0.0  ;;  %v2784_v23 = vadd.f32 %v5539_v39, %v2713_v4 }
 0x2be   : > { %v3335_v1 = vrot.slane %v3334_v12, 4  ;;  %3102 = vst.msk [vmem:[%s6108_s3 + $0xc8] sm:$0xf] %vm3051_vm10, %v3823_v25  ;;  %3103 = vst.msk [vmem:[%s6108_s3 + $0xcc] sm:$0xf] %vm3051_vm10, %v3824_v17  ;;  %v3343_v31 = vadd.f32 %v3342_v29, %v3341_v20  ;;  %v2785_v36 = vadd.f32 %v5539_v39, %v2714_v55  ;;  %v2786_v21 = vadd.f32 %v5539_v39, %v2715_v60  ;;  %v2720_v29 = vld [vmem:[#allocation2 + $0x1e0] sm:$0xff] }
 0x2bf   : > { %3104 = vst.msk [vmem:[%s6108_s3 + $0xd0] sm:$0xf] %vm3051_vm10, %v3825_v24  ;;  %v3826_v33 = vpack.c.bf16 %v2784_v23, %v2784_v23  ;;  %v3351_v57 = vsel %vm1940_vm7, %v2784_v23, 0.0  ;;  %v2787_v63 = vadd.f32 %v5539_v39, %v2716_v27  ;;  %v2788_v2 = vadd.f32 %v5539_v39, %v2717_v54 }
 0x2c0   : > { %v3336_v46 = vadd.f32 %v3335_v1, %v3334_v12  ;;  %v3344_v53 = vrot.slane %v3343_v31, 4  ;;  %v3352_v62 = vadd.f32 %v3351_v57, %v3350_v42  ;;  %v3827_v38 = vpack.c.bf16 %v2785_v36, %v2785_v36 }
 0x2c1   : > { %3105 = vst.msk [vmem:[%s6108_s3 + $0xd4] sm:$0xf] %vm3051_vm10, %v3826_v33  ;;  %v3359_v16 = vsel %vm1940_vm7, %v2785_v36, 0.0  ;;  %v3828_v8 = vpack.c.bf16 %v2786_v21, %v2786_v21  ;;  %v3360_v22 = vsel %vm1940_vm7, %v2786_v21, 0.0  ;;  %v3829_v9 = vpack.c.bf16 %v2787_v63, %v2787_v63 }
 0x2c2   : > { %v3337_v4 = vrot.slane %v3336_v46, 2  ;;  %v3345_v48 = vadd.f32 %v3344_v53, %v3343_v31  ;;  %v3353_v47 = vrot.slane %v3352_v62, 4  ;;  %3106 = vst.msk [vmem:[%s6108_s3 + $0xd8] sm:$0xf] %vm3051_vm10, %v3827_v38  ;;  %v3361_v35 = vadd.f32 %v3360_v22, %v3359_v16  ;;  %v2721_v53 = vld [vmem:[#allocation2 + $0x1e8] sm:$0xff]  ;;  %v2723_v22 = vld [vmem:[#allocation2 + $0x1f8] sm:$0xff] }
 0x2c3   : > { %3107 = vst.msk [vmem:[%s6108_s3 + $0xdc] sm:$0xf] %vm3051_vm10, %v3828_v8  ;;  %3108 = vst.msk [vmem:[%s6108_s3 + $0xe0] sm:$0xf] %vm3051_vm10, %v3829_v9  ;;  %v3368_v55 = vsel %vm1940_vm7, %v2787_v63, 0.0  ;;  %v3830_v60 = vpack.c.bf16 %v2788_v2, %v2788_v2  ;;  %v3369_v12 = vsel %vm1940_vm7, %v2788_v2, 0.0  ;;  %v2789_v25 = vadd.f32 %v5539_v39, %v2718_v61 }
 0x2c4   : > { %v3338_v20 = vadd.f32 %v3337_v4, %v3336_v46  ;;  %v3346_v17 = vrot.slane %v3345_v48, 2  ;;  %v3354_v27 = vadd.f32 %v3353_v47, %v3352_v62  ;;  %v3362_v54 = vrot.slane %v3361_v35, 4  ;;  %v2722_v8 = vld [vmem:[#allocation2 + $0x1f0] sm:$0xff] }
 0x2c5   : > { %3109 = vst.msk [vmem:[%s6108_s3 + $0xe4] sm:$0xf] %vm3051_vm10, %v3830_v60  ;;  %v3370_v24 = vadd.f32 %v3369_v12, %v3368_v55  ;;  %v3831_v42 = vpack.c.bf16 %v2789_v25, %v2789_v25  ;;  %v3377_v23 = vsel %vm1940_vm7, %v2789_v25, 0.0  ;;  %v2790_v1 = vadd.f32 %v5539_v39, %v2719_v5 }
 0x2c6   : > { %v3339_v31 = vrot.slane %v3338_v20, 1  ;;  %v3347_v36 = vadd.f32 %v3346_v17, %v3345_v48  ;;  %v3355_v21 = vrot.slane %v3354_v27, 2  ;;  %v3363_v33 = vadd.f32 %v3362_v54, %v3361_v35 }
 0x2c7   : > { %v3371_v57 = vrot.slane %v3370_v24, 4  ;;  %3110 = vst.msk [vmem:[%s6108_s3 + $0xe8] sm:$0xf] %vm3051_vm10, %v3831_v42  ;;  %v3832_v63 = vpack.c.bf16 %v2790_v1, %v2790_v1  ;;  %v3378_v2 = vsel %vm1940_vm7, %v2790_v1, 0.0  ;;  %v2791_v46 = vadd.f32 %v5539_v39, %v2720_v29 }
 0x2c8   : > { %v3326_v62 = vrot.slane %v5884_v18, 4  ;;  %v3348_v38 = vrot.slane %v3347_v36, 1  ;;  %v3356_v61 = vadd.f32 %v3355_v21, %v3354_v27  ;;  %v3364_v16 = vrot.slane %v3363_v33, 2 }
 0x2c9   : > { %v5952_v9 = vadd.f32 %v3339_v31, %v3338_v20  ;;  %v3372_v4 = vadd.f32 %v3371_v57, %v3370_v24  ;;  %3111 = vst.msk [vmem:[%s6108_s3 + $0xec] sm:$0xf] %vm3051_vm10, %v3832_v63  ;;  %v3379_v48 = vadd.f32 %v3378_v2, %v3377_v23  ;;  %v3833_v47 = vpack.c.bf16 %v2791_v46, %v2791_v46 }
 0x2ca   : > { %v3357_v35 = vrot.slane %v3356_v61, 1  ;;  %v5958_v5 = vadd.f32 %v3364_v16, %v3363_v33  ;;  %v3386_v55 = vsel %vm1940_vm7, %v2791_v46, 0.0  ;;  %v2792_v60 = vadd.f32 %v5539_v39, %v2721_v53 }
 0x2cb   : > { %v3373_v12 = vrot.slane %v3372_v4, 2  ;;  %v3380_v25 = vrot.slane %v3379_v48, 4  ;;  %3112 = vst.msk [vmem:[%s6108_s3 + $0xf0] sm:$0xf] %vm3051_vm10, %v3833_v47  ;;  %v2793_v20 = vadd.f32 %v5539_v39, %v2722_v8  ;;  %v2794_v17 = vadd.f32 %v5539_v39, %v2723_v22 }
 0x2cc   : > { %v5968_v27 = vadd.f32 %v3348_v38, %v3347_v36  ;;  %v5970_v54 = vadd.f32 %v3357_v35, %v3356_v61  ;;  %v3834_v29 = vpack.c.bf16 %v2792_v60, %v2792_v60  ;;  %v3387_v24 = vsel %vm1940_vm7, %v2792_v60, 0.0 }
 0x2cd   : > { %v5973_v42 = vadd.f32 %v3373_v12, %v3372_v4  ;;  %v3381_v23 = vadd.f32 %v3380_v25, %v3379_v48  ;;  %v3388_v1 = vadd.f32 %v3387_v24, %v3386_v55  ;;  %v3835_v31 = vpack.c.bf16 %v2793_v20, %v2793_v20 }
 0x2ce   : > { %v3366_v21 = vrot.slane %v5958_v5, 1  ;;  %3113 = vst.msk [vmem:[%s6108_s3 + $0xf4] sm:$0xf] %vm3051_vm10, %v3834_v29  ;;  %v3395_v39 = vsel %vm1940_vm7, %v2793_v20, 0.0  ;;  %v3836_v36 = vpack.c.bf16 %v2794_v17, %v2794_v17  ;;  %v3396_v33 = vsel %vm1940_vm7, %v2794_v17, 0.0 }
 0x2cf   : > { %v3375_v57 = vrot.slane %v5973_v42, 1  ;;  %v3382_v63 = vrot.slane %v3381_v23, 2  ;;  %v3389_v2 = vrot.slane %v3388_v1, 4  ;;  %3114 = vst.msk [vmem:[%s6108_s3 + $0xf8] sm:$0xf] %vm3051_vm10, %v3835_v31  ;;  %v5987_v46 = vadd.f32 %v3396_v33, %v3395_v39 }
 0x2d0   : > { %3115 = vst.msk [vmem:[%s6108_s3 + $0xfc] sm:$0xf] %vm3051_vm10, %v3836_v36  ;;  %v3160_v53 = vadd.f32 %v3159_v40, %v5627_v41  ;;  %v3168_v38 = vrot.slane %v5654_v50, 1  ;;  %v3175_v61 = vrot.slane %v5656_v30, 2  ;;  %v3183_v16 = vadd.f32 %v3182_v6, %v5643_v37 }
 0x2d1   : > { %v6001_v8 = vadd.f32 %v3382_v63, %v3381_v23  ;;  %v6003_v22 = vadd.f32 %v3389_v2, %v3388_v1  ;;  %v3398_v4 = vrot.slane %v5987_v46, 4  ;;  %v3437_v48 = vsel %vm3436_vm11, %v5624_v43, %v5610_v59 }
 0x2d2   : > { %v3169_v41 = vadd.f32 %v3168_v38, %v5654_v50  ;;  %v3176_v40 = vadd.f32 %v3175_v61, %v5656_v30  ;;  %v3184_v47 = vrot.slane %v3183_v16, 2  ;;  %v3439_v35 = vsel %vm3438_vm12, %v5629_v28, %v3437_v48 }
 0x2d3   : > { %v3441_v37 = vsel %vm3440_vm13, %v5637_v15, %v3439_v35  ;;  %v3232_v59 = vadd.f32 %v3231_v44, %v5741_v52  ;;  %v3240_v50 = vrot.slane %v5766_v7, 1  ;;  %v3247_v28 = vrot.slane %v5768_v58, 2 }
 0x2d4   : > { %v3177_v6 = vrot.slane %v3176_v40, 1  ;;  %v3185_v55 = vadd.f32 %v3184_v47, %v3183_v16  ;;  %v3443_v60 = vsel %vm3442_vm14, %v3160_v53, %v3441_v37  ;;  %v3255_v15 = vadd.f32 %v3254_v32, %v5770_v11 }
 0x2d5   : > { %v3445_v43 = vsel %vm3444_vm15, %v3169_v41, %v3443_v60  ;;  %v3450_v25 = vsel %vm3436_vm11, %v5738_v51, %v5724_v0  ;;  %v3304_v52 = vadd.f32 %v3303_v56, %v5855_v14  ;;  %v3241_v44 = vadd.f32 %v3240_v50, %v5766_v7 }
 0x2d6   : > { %v3178_v30 = vadd.f32 %v3177_v6, %v3176_v40  ;;  %v3186_v12 = vrot.slane %v3185_v55, 1  ;;  %v3248_v20 = vadd.f32 %v3247_v28, %v5768_v58  ;;  %v3256_v17 = vrot.slane %v3255_v15, 2 }
 0x2d7   : > { %v3451_v29 = vsel %vm3438_vm12, %v5743_v26, %v3450_v25  ;;  %v3312_v0 = vrot.slane %v5880_v49, 1  ;;  %v3319_v7 = vrot.slane %v5882_v34, 2  ;;  %v3327_v1 = vadd.f32 %v3326_v62, %v5884_v18 }
 0x2d8   : > { %v3187_v24 = vadd.f32 %v3186_v12, %v3185_v55  ;;  %v3447_v11 = vsel %vm3446_vm0, %v3178_v30, %v3445_v43  ;;  %v3452_v32 = vsel %vm3440_vm13, %v5751_v19, %v3451_v29  ;;  %v3249_v51 = vrot.slane %v3248_v20, 1 }
 0x2d9   : > { %v3257_v23 = vadd.f32 %v3256_v17, %v3255_v15  ;;  %v3453_v14 = vsel %vm3442_vm14, %v3232_v59, %v3452_v32  ;;  %v3313_v26 = vadd.f32 %v3312_v0, %v5880_v49  ;;  %v3320_v39 = vadd.f32 %v3319_v7, %v5882_v34 }
 0x2da   : > { %v3449_v58 = vsel %vm3448_vm1, %v3187_v24, %v3447_v11  ;;  %v3454_v56 = vsel %vm3444_vm15, %v3241_v44, %v3453_v14  ;;  %v3250_v19 = vadd.f32 %v3249_v51, %v3248_v20  ;;  %v3457_v36 = vsel %vm3436_vm11, %v5852_v45, %v5838_v10 }
 0x2db   : > { %3475 = vst.msk [vmem:[%s6109_s4] sm:$0xff] %vm1940_vm7, %v3449_v58  ;;  %v3258_v31 = vrot.slane %v3257_v23, 1  ;;  %v3367_v33 = vadd.f32 %v3366_v21, %v5958_v5  ;;  %v3328_v49 = vrot.slane %v3327_v1, 2  ;;  %v3458_v63 = vsel %vm3438_vm12, %v5857_v13, %v3457_v36 }
 0x2dc   : > { %v3384_v18 = vrot.slane %v6001_v8, 1  ;;  %v3455_v2 = vsel %vm3446_vm0, %v3250_v19, %v3454_v56  ;;  %v3321_v53 = vrot.slane %v3320_v39, 1  ;;  %v3459_v38 = vsel %vm3440_vm13, %v5865_v3, %v3458_v63 }
 0x2dd   : > { %v3259_v62 = vadd.f32 %v3258_v31, %v3257_v23  ;;  %v3329_v34 = vadd.f32 %v3328_v49, %v3327_v1  ;;  %v3460_v61 = vsel %vm3442_vm14, %v3304_v52, %v3459_v38  ;;  %v3376_v10 = vadd.f32 %v3375_v57, %v5973_v42 }
 0x2de   : > { %v3391_v45 = vrot.slane %v6003_v22, 2  ;;  %v3322_v5 = vadd.f32 %v3321_v53, %v3320_v39  ;;  %v3461_v21 = vsel %vm3444_vm15, %v3313_v26, %v3460_v61  ;;  %v3399_v16 = vadd.f32 %v3398_v4, %v5987_v46 }
 0x2df   : > { %v3456_v13 = vsel %vm3448_vm1, %v3259_v62, %v3455_v2  ;;  %v3330_v3 = vrot.slane %v3329_v34, 1  ;;  %v3385_v48 = vadd.f32 %v3384_v18, %v6001_v8  ;;  %v3464_v42 = vsel %vm3436_vm11, %v5968_v27, %v5952_v9 }
 0x2e0   : > { %3476 = vst.msk [vmem:[%s6109_s4 + $0x8] sm:$0xff] %vm1940_vm7, %v3456_v13  ;;  %v3392_v41 = vadd.f32 %v3391_v45, %v6003_v22  ;;  %v3462_v57 = vsel %vm3446_vm0, %v3322_v5, %v3461_v21  ;;  %v3400_v40 = vrot.slane %v3399_v16, 2  ;;  %v3465_v46 = vsel %vm3438_vm12, %v5970_v54, %v3464_v42 }
 0x2e1   : > { %v3331_v4 = vadd.f32 %v3330_v3, %v3329_v34  ;;  %v3466_v35 = vsel %vm3440_vm13, %v3367_v33, %v3465_v46 }
 0x2e2   : > { %v3393_v47 = vrot.slane %v3392_v41, 1  ;;  %v3401_v37 = vadd.f32 %v3400_v40, %v3399_v16  ;;  %v3467_v6 = vsel %vm3442_vm14, %v3376_v10, %v3466_v35 }
 0x2e3   : > { %v3463_v8 = vsel %vm3448_vm1, %v3331_v4, %v3462_v57  ;;  %v3468_v55 = vsel %vm3444_vm15, %v3385_v48, %v3467_v6 }
 0x2e4   : > { %v3394_v22 = vadd.f32 %v3393_v47, %v3392_v41  ;;  %3477 = vst.msk [vmem:[%s6109_s4 + $0x10] sm:$0xff] %vm1940_vm7, %v3463_v8  ;;  %v3402_v9 = vrot.slane %v3401_v37, 1 }
 0x2e6   : > { %v3469_v27 = vsel %vm3446_vm0, %v3394_v22, %v3468_v55  ;;  %v3403_v54 = vadd.f32 %v3402_v9, %v3401_v37 }
 0x2e8   : > { %v3470_v60 = vsel %vm3448_vm1, %v3403_v54, %v3469_v27 }
 0x2e9   : > { %3478 = vst.msk [vmem:[%s6109_s4 + $0x18] sm:$0xff] %vm1940_vm7, %v3470_v60 }
 0x2ea PF: > { %s15_s17 = sadd.s32 1, %s4101_s17   ;;  %s6110_s15 = smov %s4097_s16 }
 0x2eb   : > { %p12_p7 = scmp.ge.s32.totalorder %s15_s17, 9   ;;  %s6111_s16 = smov %s6113_s18 }
 0x2ed   :  { %14 = sbr.rel (!%p12_p7) target bundleno = 2 (0x2), region = 85 }

// kernel: srm_forward.5
= control target key start
LH: loop header
LB: loop body
LE: loop exit
PB: predicated region body
PF: predicated region fallthrough
CT: control target
= control target key end

     0   :  { %9 = vsyncpa [#allocation4], 0  ;;  %s3510_s15 = smov 0   ;;  %s3512_s16 = smov 0   ;;  %s4707_s0 = inlined_call_operand.vmem [shape: bf16[3,32,18,48], index: 0, kind: input, shape index: {}]   ;;  %s4708_s1 = inlined_call_operand.vmem [shape: bf16[3,144,64], index: 1, kind: input, shape index: {}]   ;;  %s4709_s2 = inlined_call_operand.vmem [shape: f32[1,64], index: 2, kind: input, shape index: {}]   ;;  %s4710_s3 = inlined_call_operand.vmem [shape: bf16[32,48], index: 3, kind: input, shape index: {}]   ;;  %s4711_s4 = inlined_call_operand.hbm [shape: f32[512,64], index: 4, kind: output, shape index: {}]  }
   0x1   :  { %s3514_s17 = smov 0  }
   0x2 LB: > { %s3185_s18 = sadd.s32 4294967295, %s3475_s17   ;;  %s24_s19 = sadd.s32 1, %s3471_s16  ;;  %s3475_s17 = sphi %s3514_s17, %s15_s17   ;;  %s3471_s16 = sphi %s3512_s16, %s4714_s16   ;;  %s3467_s15 = sphi %s3510_s15, %s4713_s15  }
   0x3   : > { %p25_p0 = scmp.ge.s32.totalorder %s24_s19, 3  ;;  %p3189_p1 = scmp.ge.s32.totalorder %s3475_s17, 1 }
   0x4   : > { %p204_p2 = scmp.lt.s32.totalorder %s3475_s17, 4 }
   0x5   : > { %s4716_s19 = smov (%p25_p0, %s24_s19), 0 }
   0x6   : > { %p205_p3 = pnand %p3189_p1, %p204_p2 }
   0x7   : > { %p241_p4 = scmp.lt.s32.totalorder (!%p205_p3), %s3467_s15, 2  ;;  %p3192_p5 = scmp.ne.s32.totalorder (!%p205_p3), %s3467_s15, 0 }
   0x8   : > { %208 = sbr.rel (%p205_p3) target bundleno = 622 (0x26e), region = 36 }
   0xf   : > { %s242_s20 = scalar_select %p241_p4, %s3467_s15, 2 }
  0x10   : > { %267 = sbr.rel (%p3192_p5) target bundleno = 49 (0x31), region = 40  ;;  %vm268_vm0 = vcmask (!%p3192_p5), 523264   ;;  %v3477_v0 = vmov (!%p3192_p5), 0.0  }
  0x11   : > { %s3374_s21 = smul.u32 384, %s242_s20  ;;  %269 = vst.msk [vmem:[#allocation2] sm:$0xff] (!%p3192_p5), %vm268_vm0, %v3477_v0  ;;  %270 = vst.msk [vmem:[#allocation2 + $0x8] sm:$0xff] (!%p3192_p5), %vm268_vm0, %v3477_v0 }
  0x12   : > { %s3375_s22 = smul.u32 72, %s242_s20  ;;  %271 = vst.msk [vmem:[#allocation2 + $0x10] sm:$0xff] (!%p3192_p5), %vm268_vm0, %v3477_v0  ;;  %272 = vst.msk [vmem:[#allocation2 + $0x18] sm:$0xff] (!%p3192_p5), %vm268_vm0, %v3477_v0 }
  0x13   : > { %s3536_s25 = scalar_lea.vmem %s4707_s0, %s3374_s21  ;;  %273 = vst.msk [vmem:[#allocation2 + $0x20] sm:$0xff] (!%p3192_p5), %vm268_vm0, %v3477_v0  ;;  %274 = vst.msk [vmem:[#allocation2 + $0x28] sm:$0xff] (!%p3192_p5), %vm268_vm0, %v3477_v0 }
  0x14   : > { %s3541_s28 = scalar_lea.vmem %s4708_s1, %s3375_s22  ;;  %275 = vst.msk [vmem:[#allocation2 + $0x30] sm:$0xff] (!%p3192_p5), %vm268_vm0, %v3477_v0  ;;  %276 = vst.msk [vmem:[#allocation2 + $0x38] sm:$0xff] (!%p3192_p5), %vm268_vm0, %v3477_v0 }
  0x15   : > { %277 = vst.msk [vmem:[#allocation2 + $0x40] sm:$0xff] (!%p3192_p5), %vm268_vm0, %v3477_v0  ;;  %278 = vst.msk [vmem:[#allocation2 + $0x48] sm:$0xff] (!%p3192_p5), %vm268_vm0, %v3477_v0 }
  0x16   : > { %279 = vst.msk [vmem:[#allocation2 + $0x50] sm:$0xff] (!%p3192_p5), %vm268_vm0, %v3477_v0  ;;  %280 = vst.msk [vmem:[#allocation2 + $0x58] sm:$0xff] (!%p3192_p5), %vm268_vm0, %v3477_v0 }
  0x17   : > { %281 = vst.msk [vmem:[#allocation2 + $0x60] sm:$0xff] %vm268_vm0, %v3477_v0  ;;  %282 = vst.msk [vmem:[#allocation2 + $0x68] sm:$0xff] %vm268_vm0, %v3477_v0 }
  0x18   : > { %283 = vst.msk [vmem:[#allocation2 + $0x70] sm:$0xff] %vm268_vm0, %v3477_v0  ;;  %284 = vst.msk [vmem:[#allocation2 + $0x78] sm:$0xff] %vm268_vm0, %v3477_v0 }
  0x19   : > { %285 = vst.msk [vmem:[#allocation2 + $0x80] sm:$0xff] %vm268_vm0, %v3477_v0  ;;  %286 = vst.msk [vmem:[#allocation2 + $0x88] sm:$0xff] %vm268_vm0, %v3477_v0 }
  0x1a   : > { %287 = vst.msk [vmem:[#allocation2 + $0x90] sm:$0xff] %vm268_vm0, %v3477_v0  ;;  %288 = vst.msk [vmem:[#allocation2 + $0x98] sm:$0xff] %vm268_vm0, %v3477_v0 }
  0x1b   : > { %289 = vst.msk [vmem:[#allocation2 + $0xa0] sm:$0xff] %vm268_vm0, %v3477_v0  ;;  %290 = vst.msk [vmem:[#allocation2 + $0xa8] sm:$0xff] %vm268_vm0, %v3477_v0 }
  0x1c   : > { %291 = vst.msk [vmem:[#allocation2 + $0xb0] sm:$0xff] %vm268_vm0, %v3477_v0  ;;  %292 = vst.msk [vmem:[#allocation2 + $0xb8] sm:$0xff] %vm268_vm0, %v3477_v0 }
  0x1d   : > { %293 = vst.msk [vmem:[#allocation2 + $0xc0] sm:$0xff] %vm268_vm0, %v3477_v0  ;;  %294 = vst.msk [vmem:[#allocation2 + $0xc8] sm:$0xff] %vm268_vm0, %v3477_v0 }
  0x1e   : > { %295 = vst.msk [vmem:[#allocation2 + $0xd0] sm:$0xff] %vm268_vm0, %v3477_v0  ;;  %296 = vst.msk [vmem:[#allocation2 + $0xd8] sm:$0xff] %vm268_vm0, %v3477_v0 }
  0x1f   : > { %297 = vst.msk [vmem:[#allocation2 + $0xe0] sm:$0xff] %vm268_vm0, %v3477_v0  ;;  %298 = vst.msk [vmem:[#allocation2 + $0xe8] sm:$0xff] %vm268_vm0, %v3477_v0 }
  0x20   : > { %299 = vst.msk [vmem:[#allocation2 + $0xf0] sm:$0xff] %vm268_vm0, %v3477_v0  ;;  %300 = vst.msk [vmem:[#allocation2 + $0xf8] sm:$0xff] %vm268_vm0, %v3477_v0 }
  0x21   : > { %301 = vst.msk [vmem:[#allocation2 + $0x100] sm:$0xff] %vm268_vm0, %v3477_v0  ;;  %302 = vst.msk [vmem:[#allocation2 + $0x108] sm:$0xff] %vm268_vm0, %v3477_v0 }
  0x22   : > { %303 = vst.msk [vmem:[#allocation2 + $0x110] sm:$0xff] %vm268_vm0, %v3477_v0  ;;  %304 = vst.msk [vmem:[#allocation2 + $0x118] sm:$0xff] %vm268_vm0, %v3477_v0 }
  0x23   : > { %305 = vst.msk [vmem:[#allocation2 + $0x120] sm:$0xff] %vm268_vm0, %v3477_v0  ;;  %306 = vst.msk [vmem:[#allocation2 + $0x128] sm:$0xff] %vm268_vm0, %v3477_v0 }
  0x24   : > { %307 = vst.msk [vmem:[#allocation2 + $0x130] sm:$0xff] %vm268_vm0, %v3477_v0  ;;  %308 = vst.msk [vmem:[#allocation2 + $0x138] sm:$0xff] %vm268_vm0, %v3477_v0 }
  0x25   : > { %309 = vst.msk [vmem:[#allocation2 + $0x140] sm:$0xff] %vm268_vm0, %v3477_v0  ;;  %310 = vst.msk [vmem:[#allocation2 + $0x148] sm:$0xff] %vm268_vm0, %v3477_v0 }
  0x26   : > { %311 = vst.msk [vmem:[#allocation2 + $0x150] sm:$0xff] %vm268_vm0, %v3477_v0  ;;  %312 = vst.msk [vmem:[#allocation2 + $0x158] sm:$0xff] %vm268_vm0, %v3477_v0 }
  0x27   : > { %313 = vst.msk [vmem:[#allocation2 + $0x160] sm:$0xff] %vm268_vm0, %v3477_v0  ;;  %314 = vst.msk [vmem:[#allocation2 + $0x168] sm:$0xff] %vm268_vm0, %v3477_v0 }
  0x28   : > { %315 = vst.msk [vmem:[#allocation2 + $0x170] sm:$0xff] %vm268_vm0, %v3477_v0  ;;  %316 = vst.msk [vmem:[#allocation2 + $0x178] sm:$0xff] %vm268_vm0, %v3477_v0 }
  0x29   : > { %317 = vst.msk [vmem:[#allocation2 + $0x180] sm:$0xff] %vm268_vm0, %v3477_v0  ;;  %318 = vst.msk [vmem:[#allocation2 + $0x188] sm:$0xff] %vm268_vm0, %v3477_v0 }
  0x2a   : > { %319 = vst.msk [vmem:[#allocation2 + $0x190] sm:$0xff] %vm268_vm0, %v3477_v0  ;;  %320 = vst.msk [vmem:[#allocation2 + $0x198] sm:$0xff] %vm268_vm0, %v3477_v0 }
  0x2b   : > { %321 = vst.msk [vmem:[#allocation2 + $0x1a0] sm:$0xff] %vm268_vm0, %v3477_v0  ;;  %322 = vst.msk [vmem:[#allocation2 + $0x1a8] sm:$0xff] %vm268_vm0, %v3477_v0 }
  0x2c   : > { %323 = vst.msk [vmem:[#allocation2 + $0x1b0] sm:$0xff] %vm268_vm0, %v3477_v0  ;;  %324 = vst.msk [vmem:[#allocation2 + $0x1b8] sm:$0xff] %vm268_vm0, %v3477_v0 }
  0x2d   : > { %325 = vst.msk [vmem:[#allocation2 + $0x1c0] sm:$0xff] %vm268_vm0, %v3477_v0  ;;  %326 = vst.msk [vmem:[#allocation2 + $0x1c8] sm:$0xff] %vm268_vm0, %v3477_v0 }
  0x2e   : > { %327 = vst.msk [vmem:[#allocation2 + $0x1d0] sm:$0xff] %vm268_vm0, %v3477_v0  ;;  %328 = vst.msk [vmem:[#allocation2 + $0x1d8] sm:$0xff] %vm268_vm0, %v3477_v0 }
  0x2f   : > { %329 = vst.msk [vmem:[#allocation2 + $0x1e0] sm:$0xff] %vm268_vm0, %v3477_v0  ;;  %330 = vst.msk [vmem:[#allocation2 + $0x1e8] sm:$0xff] %vm268_vm0, %v3477_v0 }
  0x30   : > { %331 = vst.msk [vmem:[#allocation2 + $0x1f0] sm:$0xff] %vm268_vm0, %v3477_v0  ;;  %332 = vst.msk [vmem:[#allocation2 + $0x1f8] sm:$0xff] %vm268_vm0, %v3477_v0 }
  0x31 PF: > { %v448_v1 = vlaneseq  ;;  %v3478_v2 = vmov 1966171168   ;;  %v3193_v5 = vld.sshfl [vmem:[%s4710_s3] sm:$0x33 pattern:$0x75316420] }
  0x32   : > { %v446_v3 = vunpack.c.l.s4 %v3478_v2  ;;  %v444_v6 = vcombine.high %v3193_v5, %v3193_v5  ;;  %v3195_v8 = vld.sshfl [vmem:[%s4710_s3 + $0x8] sm:$0x33 pattern:$0x75316420]  ;;  %vm1878_vm1 = vcmask 1046528   ;;  %s3479_s7 = smov 96  }
  0x33   : > { %v449_v4 = vshrl.u32 %v448_v1, 7  ;;  %v492_v9 = vcombine.high %v3195_v8, %v3195_v8  ;;  %v333_v40 = vld [vmem:[%s3536_s25] sm:$0xf]  ;;  %v334_v45 = vld [vmem:[%s3536_s25 + $0x4] sm:$0xf]  ;;  %s3480_s8 = smov 48  }
  0x34   : > { %v447_v7 = vunpack.c.0.s8 %v446_v3  ;;  %v335_v46 = vld [vmem:[%s3536_s25 + $0x8] sm:$0x1]  ;;  %v381_v47 = vld [vmem:[%s3536_s25 + $0xc0] sm:$0xf]  ;;  %v382_v53 = vld [vmem:[%s3536_s25 + $0xc4] sm:$0xf] }
  0x35   : > { %v3680_v11 = vsub.s32 0, %v449_v4  ;;  %v383_v54 = vld [vmem:[%s3536_s25 + $0xc8] sm:$0x1]  ;;  %vm1429_vm2 = vsmask.f32 7424  ;;  %vm2039_vm3 = vcmask 392192  }
  0x36   : > { %v3678_v10 = vsub.s32 %v447_v7, %v449_v4  ;;  %v3727_v58 = vld [vmem:[%s3536_s25 + $0xd8] sm:$0xf]  ;;  %v3730_v59 = vld [vmem:[%s3536_s25 + $0xdc] sm:$0xf]  ;;  %v384_v4 = vld [vmem:[%s3536_s25 + $0xcc] sm:$0xf] }
  0x37   : > { %vm2337_vm4 = vcmask 130048   ;;  %vm2104_vm5 = vcmask 785408   ;;  %vm2755_vm6 = vcmask 523264   ;;  %p3350_p6 = scmp.ne.s32.totalorder %s3467_s15, 2 }
  0x38   : > { %v3683_v12 = vrot.slane %v3193_v5, %v3678_v10  ;;  %v3686_v13 = vrot.slane %v3195_v8, %v3678_v10  ;;  %v3689_v14 = vrot.slane %v492_v9, %v3678_v10  ;;  %v3692_v15 = vrot.slane %v444_v6, %v3678_v10  ;;  %v385_v5 = vld [vmem:[%s3536_s25 + $0xd0] sm:$0xf] }
  0x3a   : > { %v3197_v16 = vpack.i.b16 %v3683_v12, %v3683_v12  ;;  %v3205_v17 = vpack.i.b16 %v3686_v13, %v3686_v13  ;;  %v550_v18 = vunpack.i.h.s16 %v3686_v13  ;;  %v534_v19 = vunpack.i.h.s16 %v3683_v12 }
  0x3b   : > { %v3206_v20 = vpack.i.b16 %v3689_v14, %v3689_v14  ;;  %v3198_v21 = vpack.i.b16 %v3692_v15, %v3692_v15  ;;  %v552_v22 = vunpack.i.h.s16 %v3689_v14  ;;  %v536_v23 = vunpack.i.h.s16 %v3692_v15 }
  0x3c   : > { %v600_v24 = vrot.slane %v3197_v16, %v3680_v11  ;;  %v664_v25 = vrot.slane %v3205_v17, %v3680_v11  ;;  %v582_v26 = vpack.i.b16 %v550_v18, %v550_v18  ;;  %v566_v27 = vpack.i.b16 %v534_v19, %v534_v19 }
  0x3d   : > { %v672_v28 = vrot.slane %v3206_v20, %v3680_v11  ;;  %v608_v29 = vrot.slane %v3198_v21, %v3680_v11  ;;  %v584_v30 = vpack.i.b16 %v552_v22, %v552_v22  ;;  %v568_v31 = vpack.i.b16 %v536_v23, %v536_v23 }
  0x3e   : > { %v726_v32 = vpack.i.b16 %v600_v24, %v600_v24  ;;  %v838_v33 = vpack.i.b16 %v664_v25, %v664_v25  ;;  %v668_v34 = vrot.slane %v582_v26, %v3680_v11  ;;  %v604_v35 = vrot.slane %v566_v27, %v3680_v11 }
  0x3f   : > { %v852_v36 = vpack.i.b16 %v672_v28, %v672_v28  ;;  %v740_v37 = vpack.i.b16 %v608_v29, %v608_v29  ;;  %v676_v38 = vrot.slane %v584_v30, %v3680_v11  ;;  %v612_v39 = vrot.slane %v568_v31, %v3680_v11  ;;  %v386_v28 = vld [vmem:[%s3536_s25 + $0xd4] sm:$0x1] }
  0x40   : > { %v731_v41 = vrot.slane %v726_v32, %v3680_v11  ;;  %v843_v42 = vrot.slane %v838_v33, %v3680_v11  ;;  %v845_v43 = vpack.i.b16 %v668_v34, %v668_v34  ;;  %v733_v44 = vpack.i.b16 %v604_v35, %v604_v35  ;;  %v336_v33 = vld [vmem:[%s3536_s25 + $0xc] sm:$0xf] }
  0x41   : > { %v857_v48 = vrot.slane %v852_v36, %v3680_v11  ;;  %v745_v49 = vrot.slane %v740_v37, %v3680_v11  ;;  %v859_v50 = vpack.i.b16 %v676_v38, %v676_v38  ;;  %v747_v51 = vpack.i.b16 %v612_v39, %v612_v39  ;;  %v337_v38 = vld [vmem:[%s3536_s25 + $0x10] sm:$0xf] }
  0x42   : > { %v3213_v52 = vcombine.low %v731_v41, %v731_v41  ;;  %v3229_v55 = vcombine.low %v843_v42, %v843_v42  ;;  %v850_v56 = vrot.slane %v845_v43, %v3680_v11  ;;  %v738_v57 = vrot.slane %v733_v44, %v3680_v11  ;;  %v338_v43 = vld [vmem:[%s3536_s25 + $0x14] sm:$0x1] }
  0x43   : > { %v3732_v60 = vcombine.low %v857_v48, %v857_v48  ;;  %v3734_v61 = vcombine.low %v745_v49, %v745_v49  ;;  %v3737_v62 = vrot.slane %v859_v50, %v3680_v11  ;;  %v3740_v63 = vrot.slane %v747_v51, %v3680_v11  ;;  %v389_v48 = vld [vmem:[%s3536_s25 + $0xe0] sm:$0x1] }
  0x44   : > { %v1077_v0 = vmul.bf16 %v3213_v52, %v333_v40  ;;  %v1078_v1 = vmul.bf16 %v3213_v52, %v334_v45  ;;  %v1079_v2 = vmul.bf16 %v3213_v52, %v335_v46  ;;  %v1125_v3 = vmul.bf16 %v3229_v55, %v381_v47 }
  0x45   : > { %v1126_v6 = vmul.bf16 %v3229_v55, %v382_v53  ;;  %v1127_v7 = vmul.bf16 %v3229_v55, %v383_v54  ;;  %v3230_v8 = vcombine.low %v850_v56, %v850_v56  ;;  %v3214_v9 = vcombine.low %v738_v57, %v738_v57 }
  0x46   : > { %v3744_v16 = vcombine.low %v1077_v0, %v1078_v1  ;;  %v3277_v17 = vcombine.low %v1079_v2, %v1079_v2  ;;  %v1131_v18 = vmul.bf16 %v3732_v60, %v3727_v58  ;;  %v1132_v19 = vmul.bf16 %v3732_v60, %v3730_v59 }
  0x47   : > { %v3750_v20 = vcombine.low %v1125_v3, %v1126_v6  ;;  %v3293_v21 = vcombine.low %v1127_v7, %v1127_v7  ;;  %v1128_v22 = vmul.bf16 %v3230_v8, %v384_v4  ;;  %v1129_v23 = vmul.bf16 %v3230_v8, %v385_v5  ;;  %v339_v5 = vld [vmem:[%s3536_s25 + $0x18] sm:$0xf] }
  0x48   : > { %v1879_v24 = vrot.slane %v3744_v16, 1  ;;  %v1880_v25 = vrot.slane %v3277_v17, 1  ;;  %v1431_v26 = vshrl.u32 %v3744_v16, 16  ;;  %v1433_v27 = vshll.u32 %v3744_v16, 16 }
  0x49   : > { %v1438_v29 = vshll.u32 %v3277_v17, 16  ;;  %v1927_v30 = vrot.slane %v3750_v20, 1  ;;  %v1928_v31 = vrot.slane %v3293_v21, 1  ;;  %v1623_v32 = vshrl.u32 %v3750_v20, 16  ;;  %v340_v17 = vld [vmem:[%s3536_s25 + $0x1c] sm:$0xf] }
  0x4a   : > { %v1881_v34 = vsel %vm1878_vm1, %v1879_v24, %v1880_v25  ;;  %v1435_v35 = vrot.slane %v1433_v27, 1  ;;  %v1625_v36 = vshll.u32 %v3750_v20, 16  ;;  %v1630_v37 = vshll.u32 %v3293_v21, 16  ;;  %v341_v25 = vld [vmem:[%s3536_s25 + $0x20] sm:$0x1] }
  0x4b   : > { %1975 = vrot.lane.b32.xlu1 %v1881_v34, %s3479_s7  ;;  %v1440_v39 = vrot.slane %v1438_v29, 1  ;;  %v1929_v40 = vsel %vm1878_vm1, %v1927_v30, %v1928_v31  ;;  %v1130_v41 = vmul.bf16 %v3230_v8, %v386_v28  ;;  %v3764_v42 = vcombine.low %v1128_v22, %v1129_v23 }
  0x4c   : > { %v1436_v44 = vor.u32 %v1435_v35, %v1431_v26  ;;  %v1627_v45 = vrot.slane %v1625_v36, 1  ;;  %v1632_v46 = vrot.slane %v1630_v37, 1  ;;  %v1080_v47 = vmul.bf16 %v3214_v9, %v336_v33  ;;  %v390_v35 = vld [vmem:[%s3536_s25 + $0xe4] sm:$0xf] }
  0x4d   : > { %v3294_v49 = vcombine.low %v1130_v41, %v1130_v41  ;;  %v1635_v50 = vshrl.u32 %v3764_v42, 16  ;;  %v1637_v51 = vshll.u32 %v3764_v42, 16  ;;  %v1081_v52 = vmul.bf16 %v3214_v9, %v337_v38 }
  0x4e   : > { %v1441_v53 = vsel %vm1429_vm2, %v1436_v44, %v1440_v39  ;;  %v1628_v54 = vor.u32 %v1627_v45, %v1623_v32  ;;  %v1082_v55 = vmul.bf16 %v3214_v9, %v338_v43  ;;  %v1930_v56 = vrot.slane %v3764_v42, 1 }
  0x4f   : > { %1814 = vrot.lane.b32.xlu0 %v1441_v53, %s3480_s8  ;;  %2007 = vrot.lane.b32.xlu1 %v1929_v40, %s3479_s7  ;;  %v1639_v57 = vrot.slane %v1637_v51, 1  ;;  %v1642_v58 = vshll.u32 %v3294_v49, 16  ;;  %v3774_v59 = vcombine.low %v1080_v47, %v1081_v52  ;;  %v1931_v0 = vrot.slane %v3294_v49, 1  ;;  %v3414_v40 = vld [vmem:[%s3541_s28] sm:$0xff]   ;;  %v344_v51 = vld [vmem:[%s3536_s25 + $0x2c] sm:$0x1] }
  0x50   : > { %v1633_v1 = vsel %vm1429_vm2, %v1628_v54, %v1632_v46  ;;  %v3278_v2 = vcombine.low %v1082_v55, %v1082_v55  ;;  %v1133_v3 = vmul.bf16 %v3732_v60, %v389_v48  ;;  %v3778_v4 = vcombine.low %v1131_v18, %v1132_v19  ;;  %v391_v46 = vld [vmem:[%s3536_s25 + $0xe8] sm:$0xf] }
  0x51   : > { %v1640_v6 = vor.u32 %v1639_v57, %v1635_v50  ;;  %v1644_v7 = vrot.slane %v1642_v58, 1  ;;  %v1443_v8 = vshrl.u32 %v3774_v59, 16  ;;  %v1445_v9 = vshll.u32 %v3774_v59, 16  ;;  %v342_v50 = vld [vmem:[%s3536_s25 + $0x24] sm:$0xf] }
  0x52   : > { %v1450_v21 = vshll.u32 %v3278_v2, 16  ;;  %v1932_v22 = vsel %vm1878_vm1, %v1930_v56, %v1931_v0  ;;  %v1882_v23 = vrot.slane %v3774_v59, 1  ;;  %v1883_v24 = vrot.slane %v3278_v2, 1  ;;  %v3415_v2 = vld [vmem:[%s3541_s28 + $0x8] sm:$0xff]  }
  0x53   : > { %1846 = vrot.lane.b32.xlu0 %v1633_v1, %s3480_s8  ;;  %v1645_v60 = vsel %vm1429_vm2, %v1640_v6, %v1644_v7  ;;  %v1447_v18 = vrot.slane %v1445_v9, 1  ;;  %v3295_v19 = vcombine.low %v1133_v3, %v1133_v3  ;;  %v1647_v26 = vshrl.u32 %v3778_v4, 16 }
  0x54   : > { %1848 = vrot.lane.b32.xlu1 %v1645_v60, %s3480_s8  ;;  %v1452_v27 = vrot.slane %v1450_v21, 1  ;;  %v1884_v28 = vsel %vm1878_vm1, %v1882_v23, %v1883_v24  ;;  %v1649_v29 = vshll.u32 %v3778_v4, 16  ;;  %v1083_v30 = vmul.bf16 %v3734_v61, %v339_v5  ;;  %v3416_v24 = vld [vmem:[%s3541_s28 + $0x10] sm:$0xff]  }
  0x55   : > { %v1448_v31 = vor.u32 %v1447_v18, %v1443_v8  ;;  %v1654_v32 = vshll.u32 %v3295_v19, 16  ;;  %v1084_v33 = vmul.bf16 %v3734_v61, %v340_v17  ;;  %v1085_v34 = vmul.bf16 %v3734_v61, %v341_v25  ;;  %v392_v61 = vld [vmem:[%s3536_s25 + $0xec] sm:$0x1] }
  0x56   : > { %v1651_v36 = vrot.slane %v1649_v29, 1  ;;  %v1933_v37 = vrot.slane %v3778_v4, 1  ;;  %v1934_v38 = vrot.slane %v3295_v19, 1  ;;  %v3232_v39 = vcombine.low %v3737_v62, %v3737_v62  ;;  %v343_v62 = vld [vmem:[%s3536_s25 + $0x28] sm:$0xf] }
  0x57   : > { %v1453_v41 = vsel %vm1429_vm2, %v1448_v31, %v1452_v27  ;;  %v1656_v43 = vrot.slane %v1654_v32, 1  ;;  %v3802_v44 = vcombine.low %v1083_v30, %v1084_v33  ;;  %v3279_v45 = vcombine.low %v1085_v34, %v1085_v34 }
  0x58   : > { %1816 = vrot.lane.b32.xlu0 %v1453_v41, %s3480_s8  ;;  %2009 = vrot.lane.b32.xlu1 %v1932_v22, %s3479_s7  ;;  %v1652_v47 = vor.u32 %v1651_v36, %v1647_v26  ;;  %v1935_v48 = vsel %vm1878_vm1, %v1933_v37, %v1934_v38  ;;  %v1134_v49 = vmul.bf16 %v3232_v39, %v390_v35  ;;  %v3481_v56 = vmov 0   ;;  %v3849_v37 = vld.sshfl [vmem:[%s4710_s3 + $0xc] sm:$0x33 pattern:$0x75316420] }
  0x59   : > { %v1455_v52 = vshrl.u32 %v3802_v44, 16  ;;  %v1457_v53 = vshll.u32 %v3802_v44, 16  ;;  %v1462_v54 = vshll.u32 %v3279_v45, 16  ;;  %v1885_v55 = vrot.slane %v3802_v44, 1  ;;  %2402 = vmatprep.subr.bf16.mxu0 %v3481_v56  ;;  %3356 = vmatprep.subr.bf16.mxu1 %v3481_v56 }
  0x5a   : > { %v1657_v57 = vsel %vm1429_vm2, %v1652_v47, %v1656_v43  ;;  %v1886_v58 = vrot.slane %v3279_v45, 1  ;;  %v1135_v0 = vmul.bf16 %v3232_v39, %v391_v46  ;;  %v1136_v1 = vmul.bf16 %v3232_v39, %v392_v61  ;;  %2403 = vmatpush1.bf16.msra.mxu0 %v3414_v40  ;;  %3365 = vmatpush1.bf16.msra.mxu1 %v3414_v40 }
  0x5b   : > { %v1459_v3 = vrot.slane %v1457_v53, 1  ;;  %v1464_v5 = vrot.slane %v1462_v54, 1  ;;  %v3216_v6 = vcombine.low %v3740_v63, %v3740_v63  ;;  %v507_v7 = vcombine.high %v3686_v13, %v3686_v13  ;;  %2404 = vmatprep.subr.bf16.mxu0 %v3481_v56  ;;  %3357 = vmatprep.subr.bf16.mxu1 %v3481_v56 }
  0x5c   : > { %1977 = vrot.lane.b32.xlu0 %v1884_v28, %s3479_s7  ;;  %1850 = vrot.lane.b32.xlu1 %v1657_v57, %s3480_s8  ;;  %v1887_v8 = vsel %vm1878_vm1, %v1885_v55, %v1886_v58  ;;  %v3828_v9 = vcombine.low %v1134_v49, %v1135_v0  ;;  %v3296_v17 = vcombine.low %v1136_v1, %v1136_v1  ;;  %v3418_v0 = vld [vmem:[%s3541_s28 + $0x20] sm:$0xff]  }
  0x5d   : > { %v1460_v21 = vor.u32 %v1459_v3, %v1455_v52  ;;  %v1086_v22 = vmul.bf16 %v3216_v6, %v342_v50  ;;  %v1087_v23 = vmul.bf16 %v3216_v6, %v343_v62  ;;  %v1088_v63 = vmul.bf16 %v3216_v6, %v344_v51  ;;  %v394_v3 = vld [vmem:[%s3536_s25 + $0xf4] sm:$0xf] }
  0x5e   : > { %v1659_v13 = vshrl.u32 %v3828_v9, 16  ;;  %v1661_v25 = vshll.u32 %v3828_v9, 16  ;;  %v1666_v60 = vshll.u32 %v3296_v17, 16  ;;  %v1936_v18 = vrot.slane %v3828_v9, 1  ;;  %2405 = vmatpush1.bf16.msra.mxu0 %v3415_v2  ;;  %3366 = vmatpush1.bf16.msra.mxu1 %v3415_v2  ;;  %v393_v2 = vld [vmem:[%s3536_s25 + $0xf0] sm:$0xf] }
  0x5f   : > { %v1465_v19 = vsel %vm1429_vm2, %v1460_v21, %v1464_v5  ;;  %v3835_v26 = vcombine.low %v1086_v22, %v1087_v23  ;;  %v3280_v27 = vcombine.low %v1088_v63, %v1088_v63  ;;  %v1937_v28 = vrot.slane %v3296_v17, 1  ;;  %2406 = vmatprep.subr.bf16.mxu0 %v3481_v56  ;;  %3358 = vmatprep.subr.bf16.mxu1 %v3481_v56  ;;  %v395_v5 = vld [vmem:[%s3536_s25 + $0xf8] sm:$0x1]  ;;  %v345_v22 = vld [vmem:[%s3536_s25 + $0x30] sm:$0xf] }
  0x60   : > { %1818 = vrot.lane.b32.xlu0 %v1465_v19, %s3480_s8  ;;  %2011 = vrot.lane.b32.xlu1 %v1935_v48, %s3479_s7  ;;  %v1663_v29 = vrot.slane %v1661_v25, 1  ;;  %v1668_v30 = vrot.slane %v1666_v60, 1  ;;  %v3207_v31 = vpack.i.b16 %v507_v7, %v507_v7  ;;  %v459_v32 = vcombine.high %v3683_v12, %v3683_v12  ;;  %v3417_v12 = vld [vmem:[%s3541_s28 + $0x18] sm:$0xff]   ;;  %v346_v19 = vld [vmem:[%s3536_s25 + $0x34] sm:$0xf] }
  0x61   : > { %v1467_v33 = vshrl.u32 %v3835_v26, 16  ;;  %v1469_v34 = vshll.u32 %v3835_v26, 16  ;;  %v1474_v35 = vshll.u32 %v3280_v27, 16  ;;  %v1938_v36 = vsel %vm1878_vm1, %v1936_v18, %v1937_v28 }
  0x62   : > { %v1664_v38 = vor.u32 %v1663_v29, %v1659_v13  ;;  %v1888_v39 = vrot.slane %v3835_v26, 1  ;;  %v1889_v40 = vrot.slane %v3280_v27, 1  ;;  %v680_v41 = vrot.slane %v3207_v31, %v3680_v11  ;;  %2407 = vmatpush1.bf16.msra.mxu0 %v3416_v24  ;;  %3367 = vmatpush1.bf16.msra.mxu1 %v3416_v24  ;;  %v347_v27 = vld [vmem:[%s3536_s25 + $0x38] sm:$0x1]  ;;  %v3419_v29 = vld [vmem:[%s3541_s28 + $0x28] sm:$0xff]  }
  0x63   : > { %v1471_v43 = vrot.slane %v1469_v34, 1  ;;  %v1476_v45 = vrot.slane %v1474_v35, 1  ;;  %v3199_v46 = vpack.i.b16 %v459_v32, %v459_v32  ;;  %v554_v61 = vunpack.i.h.s16 %v507_v7  ;;  %2408 = vmatprep.subr.bf16.mxu0 %v3481_v56  ;;  %3359 = vmatprep.subr.bf16.mxu1 %v3481_v56 }
  0x64   : > { %1979 = vrot.lane.b32.xlu0 %v1887_v8, %s3479_s7  ;;  %v1669_v47 = vsel %vm1429_vm2, %v1664_v38, %v1668_v30  ;;  %v1890_v48 = vsel %vm1878_vm1, %v1888_v39, %v1889_v40  ;;  %v866_v49 = vpack.i.b16 %v680_v41, %v680_v41  ;;  %v538_v50 = vunpack.i.h.s16 %v459_v32 }
  0x65   : > { %1852 = vrot.lane.b32.xlu1 %v1669_v47, %s3480_s8  ;;  %v1472_v62 = vor.u32 %v1471_v43, %v1467_v33  ;;  %v616_v51 = vrot.slane %v3199_v46, %v3680_v11  ;;  %v586_v52 = vpack.i.b16 %v554_v61, %v554_v61  ;;  %v508_v53 = vcombine.high %v3689_v14, %v3689_v14  ;;  %v397_v43 = vld [vmem:[%s3536_s25 + $0x100] sm:$0xf] }
  0x66   : > { %v871_v54 = vrot.slane %v866_v49, %v3680_v11  ;;  %v570_v55 = vpack.i.b16 %v538_v50, %v538_v50  ;;  %v3866_v57 = vcombine.high %v3692_v15, %v3692_v15  ;;  %v3870_v58 = vrot.slane %v3849_v37, %v3678_v10  ;;  %2409 = vmatpush1.bf16.msra.mxu0 %v3417_v12  ;;  %v3420_v50 = vld [vmem:[%s3541_s28 + $0x30] sm:$0xff]  }
  0x67   : > { %v1477_v1 = vsel %vm1429_vm2, %v1472_v62, %v1476_v45  ;;  %v754_v14 = vpack.i.b16 %v616_v51, %v616_v51  ;;  %v684_v6 = vrot.slane %v586_v52, %v3680_v11  ;;  %v3208_v7 = vpack.i.b16 %v508_v53, %v508_v53  ;;  %2410 = vmatprep.subr.bf16.mxu0 %v3481_v56  ;;  %v398_v45 = vld [vmem:[%s3536_s25 + $0x104] sm:$0x1] }
  0x68   : > { %1820 = vrot.lane.b32.xlu0 %v1477_v1, %s3480_s8  ;;  %v3233_v15 = vcombine.low %v871_v54, %v871_v54  ;;  %v620_v8 = vrot.slane %v570_v55, %v3680_v11  ;;  %v3200_v17 = vpack.i.b16 %v3866_v57, %v3866_v57  ;;  %v556_v21 = vunpack.i.h.s16 %v508_v53  ;;  %3368 = vmatpush1.bf16.msra.mxu1 %v3417_v12 }
  0x69   : > { %2013 = vrot.lane.b32.xlu1 %v1938_v36, %s3479_s7  ;;  %v759_v23 = vrot.slane %v754_v14, %v3680_v11  ;;  %v873_v63 = vpack.i.b16 %v684_v6, %v684_v6  ;;  %v3887_v24 = vrot.slane %v3208_v7, %v3680_v11  ;;  %v540_v13 = vunpack.i.h.s16 %v3866_v57  ;;  %3360 = vmatprep.subr.bf16.mxu1 %v3481_v56  ;;  %v396_v36 = vld [vmem:[%s3536_s25 + $0xfc] sm:$0xf] }
  0x6a   : > { %v1137_v25 = vmul.bf16 %v3233_v15, %v393_v2  ;;  %v1138_v60 = vmul.bf16 %v3233_v15, %v394_v3  ;;  %v1139_v18 = vmul.bf16 %v3233_v15, %v395_v5  ;;  %v761_v28 = vpack.i.b16 %v620_v8, %v620_v8  ;;  %2411 = vmatpush1.bf16.msra.mxu0 %v3418_v0  ;;  %v348_v6 = vld [vmem:[%s3536_s25 + $0x3c] sm:$0xf] }
  0x6b   : > { %v3217_v30 = vcombine.low %v759_v23, %v759_v23  ;;  %v878_v31 = vrot.slane %v873_v63, %v3680_v11  ;;  %v880_v32 = vpack.i.b16 %v3887_v24, %v3887_v24  ;;  %v3898_v33 = vrot.slane %v3200_v17, %v3680_v11  ;;  %2412 = vmatprep.subr.bf16.mxu0 %v3481_v56 }
  0x6c   : > { %1981 = vrot.lane.b32.xlu0 %v1890_v48, %s3479_s7  ;;  %v3902_v34 = vcombine.low %v1137_v25, %v1138_v60  ;;  %v3297_v35 = vcombine.low %v1139_v18, %v1139_v18  ;;  %v766_v38 = vrot.slane %v761_v28, %v3680_v11  ;;  %v3906_v39 = vpack.i.b16 %v556_v21, %v556_v21  ;;  %v349_v21 = vld [vmem:[%s3536_s25 + $0x40] sm:$0xf]  ;;  %v350_v60 = vld [vmem:[%s3536_s25 + $0x44] sm:$0x1] }
  0x6d   : > { %v1089_v40 = vmul.bf16 %v3217_v30, %v345_v22  ;;  %v1090_v41 = vmul.bf16 %v3217_v30, %v346_v19  ;;  %v1091_v12 = vmul.bf16 %v3217_v30, %v347_v27  ;;  %v3234_v46 = vcombine.low %v878_v31, %v878_v31  ;;  %3369 = vmatpush1.bf16.msra.mxu1 %v3418_v0  ;;  %v3421_v22 = vld [vmem:[%s3541_s28 + $0x38] sm:$0xff]  }
  0x6e   : > { %v1671_v61 = vshrl.u32 %v3902_v34, 16  ;;  %v1673_v47 = vshll.u32 %v3902_v34, 16  ;;  %v1678_v48 = vshll.u32 %v3297_v35, 16  ;;  %v1939_v49 = vrot.slane %v3902_v34, 1  ;;  %2413 = vmatpush1.bf16.msra.mxu0 %v3419_v29  ;;  %3361 = vmatprep.subr.bf16.mxu1 %v3481_v56 }
  0x6f   : > { %v3915_v62 = vcombine.low %v1089_v40, %v1090_v41  ;;  %v3281_v51 = vcombine.low %v1091_v12, %v1091_v12  ;;  %v1940_v52 = vrot.slane %v3297_v35, 1  ;;  %v1140_v53 = vmul.bf16 %v3234_v46, %v396_v36  ;;  %2414 = vmatprep.subr.bf16.mxu0 %v3481_v56 }
  0x70   : > { %v1675_v54 = vrot.slane %v1673_v47, 1  ;;  %v1680_v55 = vrot.slane %v1678_v48, 1  ;;  %v1141_v0 = vmul.bf16 %v3234_v46, %v397_v43  ;;  %v1142_v1 = vmul.bf16 %v3234_v46, %v398_v45  ;;  %v3422_v43 = vld [vmem:[%s3541_s28 + $0x40] sm:$0xff]  }
  0x71   : > { %v1479_v2 = vshrl.u32 %v3915_v62, 16  ;;  %v1481_v3 = vshll.u32 %v3915_v62, 16  ;;  %v1486_v5 = vshll.u32 %v3281_v51, 16  ;;  %v1941_v14 = vsel %vm1878_vm1, %v1939_v49, %v1940_v52  ;;  %3370 = vmatpush1.bf16.msra.mxu1 %v3419_v29  ;;  %v400_v52 = vld [vmem:[%s3536_s25 + $0x10c] sm:$0xf] }
  0x72   : > { %v1676_v7 = vor.u32 %v1675_v54, %v1671_v61  ;;  %v1891_v15 = vrot.slane %v3915_v62, 1  ;;  %v1892_v8 = vrot.slane %v3281_v51, 1  ;;  %v3923_v17 = vcombine.low %v1140_v53, %v1141_v0  ;;  %2415 = vmatpush1.bf16.msra.mxu0 %v3420_v50  ;;  %3362 = vmatprep.subr.bf16.mxu1 %v3481_v56  ;;  %v399_v51 = vld [vmem:[%s3536_s25 + $0x108] sm:$0xf]  ;;  %v401_v53 = vld [vmem:[%s3536_s25 + $0x110] sm:$0x1] }
  0x73   : > { %v1483_v23 = vrot.slane %v1481_v3, 1  ;;  %v1488_v63 = vrot.slane %v1486_v5, 1  ;;  %v3298_v25 = vcombine.low %v1142_v1, %v1142_v1  ;;  %v3218_v18 = vcombine.low %v766_v38, %v766_v38  ;;  %2416 = vmatprep.subr.bf16.mxu0 %v3481_v56  ;;  %v351_v5 = vld [vmem:[%s3536_s25 + $0x48] sm:$0xf] }
  0x74   : > { %v1681_v19 = vsel %vm1429_vm2, %v1676_v7, %v1680_v55  ;;  %v1893_v27 = vsel %vm1878_vm1, %v1891_v15, %v1892_v8  ;;  %v1683_v28 = vshrl.u32 %v3923_v17, 16  ;;  %v1685_v29 = vshll.u32 %v3923_v17, 16  ;;  %v352_v8 = vld [vmem:[%s3536_s25 + $0x4c] sm:$0xf] }
  0x75   : > { %1854 = vrot.lane.b32.xlu1 %v1681_v19, %s3480_s8  ;;  %v1484_v30 = vor.u32 %v1483_v23, %v1479_v2  ;;  %v1690_v31 = vshll.u32 %v3298_v25, 16  ;;  %v1092_v35 = vmul.bf16 %v3218_v18, %v348_v6  ;;  %v1093_v36 = vmul.bf16 %v3218_v18, %v349_v21  ;;  %3371 = vmatpush1.bf16.msra.mxu1 %v3420_v50  ;;  %v353_v21 = vld [vmem:[%s3536_s25 + $0x50] sm:$0x1] }
  0x76   : > { %v1687_v40 = vrot.slane %v1685_v29, 1  ;;  %v1094_v38 = vmul.bf16 %v3218_v18, %v350_v60  ;;  %v1942_v41 = vrot.slane %v3923_v17, 1  ;;  %v1943_v12 = vrot.slane %v3298_v25, 1  ;;  %2417 = vmatpush1.bf16.msra.mxu0 %v3421_v22  ;;  %3363 = vmatprep.subr.bf16.mxu1 %v3481_v56 }
  0x77   : > { %v1489_v45 = vsel %vm1429_vm2, %v1484_v30, %v1488_v63  ;;  %v1692_v46 = vrot.slane %v1690_v31, 1  ;;  %v3939_v61 = vcombine.low %v1092_v35, %v1093_v36  ;;  %v885_v47 = vrot.slane %v880_v32, %v3680_v11  ;;  %2418 = vmatprep.subr.bf16.mxu0 %v3481_v56 }
  0x78   : > { %1822 = vrot.lane.b32.xlu0 %v1489_v45, %s3480_s8  ;;  %v1688_v48 = vor.u32 %v1687_v40, %v1683_v28  ;;  %v3282_v49 = vcombine.low %v1094_v38, %v1094_v38  ;;  %v1944_v50 = vsel %vm1878_vm1, %v1942_v41, %v1943_v12  ;;  %v768_v54 = vpack.i.b16 %v3898_v33, %v3898_v33 }
  0x79   : > { %2015 = vrot.lane.b32.xlu1 %v1941_v14, %s3479_s7  ;;  %v1491_v24 = vshrl.u32 %v3939_v61, 16  ;;  %v1493_v32 = vshll.u32 %v3939_v61, 16  ;;  %v1894_v55 = vrot.slane %v3939_v61, 1  ;;  %v3235_v0 = vcombine.low %v885_v47, %v885_v47  ;;  %3372 = vmatpush1.bf16.msra.mxu1 %v3421_v22 }
  0x7a   : > { %v1693_v1 = vsel %vm1429_vm2, %v1688_v48, %v1692_v46  ;;  %v1498_v2 = vshll.u32 %v3282_v49, 16  ;;  %v1895_v3 = vrot.slane %v3282_v49, 1  ;;  %v773_v6 = vrot.slane %v768_v54, %v3680_v11  ;;  %2419 = vmatpush1.bf16.msra.mxu0 %v3422_v43  ;;  %3364 = vmatprep.subr.bf16.mxu1 %v3481_v56 }
  0x7b   : > { %v1495_v33 = vrot.slane %v1493_v32, 1  ;;  %v1143_v14 = vmul.bf16 %v3235_v0, %v399_v51  ;;  %v1144_v7 = vmul.bf16 %v3235_v0, %v400_v52  ;;  %v1145_v15 = vmul.bf16 %v3235_v0, %v401_v53  ;;  %v403_v52 = vld [vmem:[%s3536_s25 + $0x118] sm:$0xf] }
  0x7c   : > { %1983 = vrot.lane.b32.xlu0 %v1893_v27, %s3479_s7  ;;  %v1500_v23 = vrot.slane %v1498_v2, 1  ;;  %v1896_v22 = vsel %vm1878_vm1, %v1894_v55, %v1895_v3  ;;  %v3219_v63 = vcombine.low %v773_v6, %v773_v6  ;;  %v692_v25 = vrot.slane %v3906_v39, %v3680_v11  ;;  %v3996_v3 = vld.sshfl [vmem:[%s4710_s3 + $0x4] sm:$0x33 pattern:$0x75316420] }
  0x7d   : > { %1856 = vrot.lane.b32.xlu1 %v1693_v1, %s3480_s8  ;;  %v1496_v60 = vor.u32 %v1495_v33, %v1491_v24  ;;  %v3968_v18 = vcombine.low %v1143_v14, %v1144_v7  ;;  %v3299_v56 = vcombine.low %v1145_v15, %v1145_v15  ;;  %v572_v19 = vpack.i.b16 %v540_v13, %v540_v13 }
  0x7e   : > { %v1095_v28 = vmul.bf16 %v3219_v63, %v351_v5  ;;  %v1096_v29 = vmul.bf16 %v3219_v63, %v352_v8  ;;  %v1097_v27 = vmul.bf16 %v3219_v63, %v353_v21  ;;  %v887_v30 = vpack.i.b16 %v692_v25, %v692_v25  ;;  %3373 = vmatpush1.bf16.msra.mxu1 %v3422_v43  ;;  %v402_v43 = vld [vmem:[%s3536_s25 + $0x114] sm:$0xf]  ;;  %v355_v63 = vld [vmem:[%s3536_s25 + $0x58] sm:$0xf]  ;;  %v356_v25 = vld [vmem:[%s3536_s25 + $0x5c] sm:$0x1] }
  0x7f   : > { %v1501_v31 = vsel %vm1429_vm2, %v1496_v60, %v1500_v23  ;;  %v1695_v39 = vshrl.u32 %v3968_v18, 16  ;;  %v1697_v35 = vshll.u32 %v3968_v18, 16  ;;  %v1702_v36 = vshll.u32 %v3299_v56, 16 }
  0x80   : > { %1824 = vrot.lane.b32.xlu0 %v1501_v31, %s3480_s8  ;;  %v3977_v40 = vcombine.low %v1095_v28, %v1096_v29  ;;  %v3283_v57 = vcombine.low %v1097_v27, %v1097_v27  ;;  %v1945_v13 = vrot.slane %v3968_v18, 1  ;;  %v1946_v38 = vrot.slane %v3299_v56, 1 }
  0x81   : > { %2017 = vrot.lane.b32.xlu1 %v1944_v50, %s3479_s7  ;;  %v1699_v41 = vrot.slane %v1697_v35, 1  ;;  %v1704_v12 = vrot.slane %v1702_v36, 1  ;;  %v892_v45 = vrot.slane %v887_v30, %v3680_v11  ;;  %v628_v46 = vrot.slane %v572_v19, %v3680_v11  ;;  %v404_v50 = vld [vmem:[%s3536_s25 + $0x11c] sm:$0x1] }
  0x82   : > { %v1503_v47 = vshrl.u32 %v3977_v40, 16  ;;  %v1505_v48 = vshll.u32 %v3977_v40, 16  ;;  %v1510_v49 = vshll.u32 %v3283_v57, 16  ;;  %v1947_v51 = vsel %vm1878_vm1, %v1945_v13, %v1946_v38 }
  0x83   : > { %v1700_v53 = vor.u32 %v1699_v41, %v1695_v39  ;;  %v1897_v54 = vrot.slane %v3977_v40, 1  ;;  %v1898_v24 = vrot.slane %v3283_v57, 1  ;;  %v3236_v32 = vcombine.low %v892_v45, %v892_v45 }
  0x84   : > { %1985 = vrot.lane.b32.xlu0 %v1896_v22, %s3479_s7  ;;  %v1507_v55 = vrot.slane %v1505_v48, 1  ;;  %v1512_v0 = vrot.slane %v1510_v49, 1  ;;  %v775_v1 = vpack.i.b16 %v628_v46, %v628_v46  ;;  %v3209_v2 = vpack.i.b16 %v3870_v58, %v3870_v58  ;;  %v354_v22 = vld [vmem:[%s3536_s25 + $0x54] sm:$0xf]  ;;  %v405_v49 = vld [vmem:[%s3536_s25 + $0x120] sm:$0xf] }
  0x85   : > { %v1705_v5 = vsel %vm1429_vm2, %v1700_v53, %v1704_v12  ;;  %v1899_v6 = vsel %vm1878_vm1, %v1897_v54, %v1898_v24  ;;  %v1146_v33 = vmul.bf16 %v3236_v32, %v402_v43  ;;  %v1147_v14 = vmul.bf16 %v3236_v32, %v403_v52  ;;  %v406_v52 = vld [vmem:[%s3536_s25 + $0x124] sm:$0xf]  ;;  %v407_v24 = vld [vmem:[%s3536_s25 + $0x128] sm:$0x1] }
  0x86   : > { %1858 = vrot.lane.b32.xlu1 %v1705_v5, %s3480_s8  ;;  %v1508_v7 = vor.u32 %v1507_v55, %v1503_v47  ;;  %v1148_v15 = vmul.bf16 %v3236_v32, %v404_v50  ;;  %v780_v8 = vrot.slane %v775_v1, %v3680_v11  ;;  %v696_v21 = vrot.slane %v3209_v2, %v3680_v11 }
  0x87   : > { %v4003_v23 = vcombine.low %v1146_v33, %v1147_v14  ;;  %v4010_v60 = vrot.slane %v3996_v3, %v3678_v10  ;;  %v558_v56 = vunpack.i.h.s16 %v3870_v58  ;;  %v516_v19 = vcombine.high %v3849_v37, %v3849_v37 }
  0x88   : > { %v1513_v28 = vsel %vm1429_vm2, %v1508_v7, %v1512_v0  ;;  %v3300_v29 = vcombine.low %v1148_v15, %v1148_v15  ;;  %v3220_v27 = vcombine.low %v780_v8, %v780_v8  ;;  %v894_v30 = vpack.i.b16 %v696_v21, %v696_v21 }
  0x89   : > { %1826 = vrot.lane.b32.xlu0 %v1513_v28, %s3480_s8  ;;  %v1707_v31 = vshrl.u32 %v4003_v23, 16  ;;  %v1709_v39 = vshll.u32 %v4003_v23, 16  ;;  %v1948_v35 = vrot.slane %v4003_v23, 1  ;;  %v3201_v36 = vpack.i.b16 %v4010_v60, %v4010_v60 }
  0x8a   : > { %2019 = vrot.lane.b32.xlu1 %v1947_v51, %s3479_s7  ;;  %v1714_v37 = vshll.u32 %v3300_v29, 16  ;;  %v1098_v57 = vmul.bf16 %v3220_v27, %v354_v22  ;;  %v1099_v13 = vmul.bf16 %v3220_v27, %v355_v63  ;;  %v1100_v38 = vmul.bf16 %v3220_v27, %v356_v25  ;;  %v357_v25 = vld [vmem:[%s3536_s25 + $0x60] sm:$0xf] }
  0x8b   : > { %v1711_v41 = vrot.slane %v1709_v39, 1  ;;  %v1949_v12 = vrot.slane %v3300_v29, 1  ;;  %v899_v43 = vrot.slane %v894_v30, %v3680_v11  ;;  %v632_v45 = vrot.slane %v3201_v36, %v3680_v11 }
  0x8c   : > { %v1716_v46 = vrot.slane %v1714_v37, 1  ;;  %v4025_v47 = vcombine.low %v1098_v57, %v1099_v13  ;;  %v3284_v48 = vcombine.low %v1100_v38, %v1100_v38  ;;  %v590_v53 = vpack.i.b16 %v558_v56, %v558_v56  ;;  %v358_v56 = vld [vmem:[%s3536_s25 + $0x64] sm:$0xf] }
  0x8d   : > { %1987 = vrot.lane.b32.xlu0 %v1899_v6, %s3479_s7  ;;  %v1712_v51 = vor.u32 %v1711_v41, %v1707_v31  ;;  %v1950_v54 = vsel %vm1878_vm1, %v1948_v35, %v1949_v12  ;;  %v3237_v50 = vcombine.low %v899_v43, %v899_v43  ;;  %v782_v32 = vpack.i.b16 %v632_v45, %v632_v45  ;;  %v359_v31 = vld [vmem:[%s3536_s25 + $0x68] sm:$0x1] }
  0x8e   : > { %v1515_v55 = vshrl.u32 %v4025_v47, 16  ;;  %v1517_v0 = vshll.u32 %v4025_v47, 16  ;;  %v1522_v1 = vshll.u32 %v3284_v48, 16  ;;  %v1900_v2 = vrot.slane %v4025_v47, 1 }
  0x8f   : > { %v1717_v5 = vsel %vm1429_vm2, %v1712_v51, %v1716_v46  ;;  %v1901_v33 = vrot.slane %v3284_v48, 1  ;;  %v1149_v6 = vmul.bf16 %v3237_v50, %v405_v49  ;;  %v1150_v14 = vmul.bf16 %v3237_v50, %v406_v52 }
  0x90   : > { %1860 = vrot.lane.b32.xlu1 %v1717_v5, %s3480_s8  ;;  %v1519_v7 = vrot.slane %v1517_v0, 1  ;;  %v1524_v15 = vrot.slane %v1522_v1, 1  ;;  %v1151_v8 = vmul.bf16 %v3237_v50, %v407_v24  ;;  %v787_v21 = vrot.slane %v782_v32, %v3680_v11  ;;  %v410_v0 = vld [vmem:[%s3536_s25 + $0x134] sm:$0x1] }
  0x91   : > { %v1902_v22 = vsel %vm1878_vm1, %v1900_v2, %v1901_v33  ;;  %v4039_v63 = vcombine.low %v1149_v6, %v1150_v14  ;;  %v700_v28 = vrot.slane %v590_v53, %v3680_v11  ;;  %v542_v29 = vunpack.i.h.s16 %v4010_v60  ;;  %v408_v53 = vld [vmem:[%s3536_s25 + $0x12c] sm:$0xf] }
  0x92   : > { %v1520_v27 = vor.u32 %v1519_v7, %v1515_v55  ;;  %v3301_v30 = vcombine.low %v1151_v8, %v1151_v8  ;;  %v3221_v39 = vcombine.low %v787_v21, %v787_v21  ;;  %v4047_v35 = vrot.slane %v516_v19, %v3678_v10  ;;  %v409_v55 = vld [vmem:[%s3536_s25 + $0x130] sm:$0xf] }
  0x93   : > { %v1719_v36 = vshrl.u32 %v4039_v63, 16  ;;  %v1721_v37 = vshll.u32 %v4039_v63, 16  ;;  %v1951_v57 = vrot.slane %v4039_v63, 1  ;;  %v901_v13 = vpack.i.b16 %v700_v28, %v700_v28 }
  0x94   : > { %v1525_v38 = vsel %vm1429_vm2, %v1520_v27, %v1524_v15  ;;  %2021 = vrot.lane.b32.xlu1 %v1950_v54, %s3479_s7  ;;  %v1726_v41 = vshll.u32 %v3301_v30, 16  ;;  %v1101_v12 = vmul.bf16 %v3221_v39, %v357_v25  ;;  %v1102_v43 = vmul.bf16 %v3221_v39, %v358_v56 }
  0x95   : > { %1828 = vrot.lane.b32.xlu0 %v1525_v38, %s3480_s8  ;;  %v1723_v19 = vrot.slane %v1721_v37, 1  ;;  %v1103_v45 = vmul.bf16 %v3221_v39, %v359_v31  ;;  %v1952_v46 = vrot.slane %v3301_v30, 1  ;;  %v906_v48 = vrot.slane %v901_v13, %v3680_v11  ;;  %v361_v13 = vld [vmem:[%s3536_s25 + $0x70] sm:$0xf] }
  0x96   : > { %v1728_v49 = vrot.slane %v1726_v41, 1  ;;  %v4056_v52 = vcombine.low %v1101_v12, %v1102_v43  ;;  %v574_v51 = vpack.i.b16 %v542_v29, %v542_v29  ;;  %v3210_v54 = vpack.i.b16 %v4047_v35, %v4047_v35 }
  0x97   : > { %v1724_v24 = vor.u32 %v1723_v19, %v1719_v36  ;;  %v3285_v50 = vcombine.low %v1103_v45, %v1103_v45  ;;  %v1953_v32 = vsel %vm1878_vm1, %v1951_v57, %v1952_v46  ;;  %v3238_v1 = vcombine.low %v906_v48, %v906_v48  ;;  %v360_v57 = vld [vmem:[%s3536_s25 + $0x6c] sm:$0xf]  ;;  %v362_v48 = vld [vmem:[%s3536_s25 + $0x74] sm:$0x1] }
  0x98   : > { %v1527_v2 = vshrl.u32 %v4056_v52, 16  ;;  %v1529_v5 = vshll.u32 %v4056_v52, 16  ;;  %v1903_v33 = vrot.slane %v4056_v52, 1  ;;  %v636_v6 = vrot.slane %v574_v51, %v3680_v11 }
  0x99   : > { %1989 = vrot.lane.b32.xlu0 %v1902_v22, %s3479_s7  ;;  %v1729_v14 = vsel %vm1429_vm2, %v1724_v24, %v1728_v49  ;;  %v1534_v7 = vshll.u32 %v3285_v50, 16  ;;  %v1904_v15 = vrot.slane %v3285_v50, 1  ;;  %v1152_v8 = vmul.bf16 %v3238_v1, %v408_v53 }
  0x9a   : > { %1862 = vrot.lane.b32.xlu1 %v1729_v14, %s3480_s8  ;;  %v1531_v21 = vrot.slane %v1529_v5, 1  ;;  %v1153_v25 = vmul.bf16 %v3238_v1, %v409_v55  ;;  %v1154_v56 = vmul.bf16 %v3238_v1, %v410_v0  ;;  %v789_v28 = vpack.i.b16 %v636_v6, %v636_v6  ;;  %v412_v5 = vld [vmem:[%s3536_s25 + $0x13c] sm:$0xf] }
  0x9b   : > { %v1536_v29 = vrot.slane %v1534_v7, 1  ;;  %v1905_v27 = vsel %vm1878_vm1, %v1903_v33, %v1904_v15  ;;  %v704_v30 = vrot.slane %v3210_v54, %v3680_v11  ;;  %v468_v22 = vcombine.high %v3996_v3, %v3996_v3  ;;  %v413_v33 = vld [vmem:[%s3536_s25 + $0x140] sm:$0x1] }
  0x9c   : > { %v1532_v31 = vor.u32 %v1531_v21, %v1527_v2  ;;  %v4075_v39 = vcombine.low %v1152_v8, %v1153_v25  ;;  %v3302_v36 = vcombine.low %v1154_v56, %v1154_v56  ;;  %v794_v37 = vrot.slane %v789_v28, %v3680_v11  ;;  %v411_v2 = vld [vmem:[%s3536_s25 + $0x138] sm:$0xf] }
  0x9d   : > { %v908_v38 = vpack.i.b16 %v704_v30, %v704_v30  ;;  %v4081_v41 = vrot.slane %v468_v22, %v3678_v10  ;;  %v560_v12 = vunpack.i.h.s16 %v4047_v35  ;;  %v4086_v43 = vcombine.high %v3870_v58, %v3870_v58 }
  0x9e   : > { %v1537_v3 = vsel %vm1429_vm2, %v1532_v31, %v1536_v29  ;;  %2023 = vrot.lane.b32.xlu1 %v1953_v32, %s3479_s7  ;;  %v1731_v19 = vshrl.u32 %v4075_v39, 16  ;;  %v1733_v45 = vshll.u32 %v4075_v39, 16  ;;  %v1738_v46 = vshll.u32 %v3302_v36, 16 }
  0x9f   : > { %1830 = vrot.lane.b32.xlu0 %v1537_v3, %s3480_s8  ;;  %v3222_v10 = vcombine.low %v794_v37, %v794_v37  ;;  %v1954_v49 = vrot.slane %v4075_v39, 1  ;;  %v1955_v58 = vrot.slane %v3302_v36, 1  ;;  %v913_v53 = vrot.slane %v908_v38, %v3680_v11 }
  0xa0   : > { %v1735_v51 = vrot.slane %v1733_v45, 1  ;;  %v1740_v54 = vrot.slane %v1738_v46, 1  ;;  %v3202_v24 = vpack.i.b16 %v4081_v41, %v4081_v41  ;;  %v592_v50 = vpack.i.b16 %v560_v12, %v560_v12 }
  0xa1   : > { %v1104_v32 = vmul.bf16 %v3222_v10, %v360_v57  ;;  %v1105_v55 = vmul.bf16 %v3222_v10, %v361_v13  ;;  %v1106_v0 = vmul.bf16 %v3222_v10, %v362_v48  ;;  %v1956_v1 = vsel %vm1878_vm1, %v1954_v49, %v1955_v58 }
  0xa2   : > { %v1736_v6 = vor.u32 %v1735_v51, %v1731_v19  ;;  %v3239_v14 = vcombine.low %v913_v53, %v913_v53  ;;  %v640_v7 = vrot.slane %v3202_v24, %v3680_v11  ;;  %v708_v15 = vrot.slane %v592_v50, %v3680_v11  ;;  %v363_v51 = vld [vmem:[%s3536_s25 + $0x78] sm:$0xf] }
  0xa3   : > { %1991 = vrot.lane.b32.xlu0 %v1905_v27, %s3479_s7  ;;  %v4105_v8 = vcombine.low %v1104_v32, %v1105_v55  ;;  %v3286_v21 = vcombine.low %v1106_v0, %v1106_v0  ;;  %v544_v25 = vunpack.i.h.s16 %v4081_v41  ;;  %v3211_v56 = vpack.i.b16 %v4086_v43, %v4086_v43  ;;  %v364_v0 = vld [vmem:[%s3536_s25 + $0x7c] sm:$0xf] }
  0xa4   : > { %v1741_v28 = vsel %vm1429_vm2, %v1736_v6, %v1740_v54  ;;  %v1155_v29 = vmul.bf16 %v3239_v14, %v411_v2  ;;  %v1156_v30 = vmul.bf16 %v3239_v14, %v412_v5  ;;  %v1157_v22 = vmul.bf16 %v3239_v14, %v413_v33  ;;  %v365_v2 = vld [vmem:[%s3536_s25 + $0x80] sm:$0x1] }
  0xa5   : > { %1864 = vrot.lane.b32.xlu1 %v1741_v28, %s3480_s8  ;;  %v1539_v31 = vshrl.u32 %v4105_v8, 16  ;;  %v1541_v36 = vshll.u32 %v4105_v8, 16  ;;  %v1546_v27 = vshll.u32 %v3286_v21, 16  ;;  %v1906_v37 = vrot.slane %v4105_v8, 1 }
  0xa6   : > { %v1907_v57 = vrot.slane %v3286_v21, 1  ;;  %v4115_v13 = vcombine.low %v1155_v29, %v1156_v30  ;;  %v3303_v38 = vcombine.low %v1157_v22, %v1157_v22  ;;  %v796_v12 = vpack.i.b16 %v640_v7, %v640_v7  ;;  %v414_v7 = vld [vmem:[%s3536_s25 + $0x144] sm:$0xf]  ;;  %v416_v21 = vld [vmem:[%s3536_s25 + $0x14c] sm:$0x1] }
  0xa7   : > { %v1543_v3 = vrot.slane %v1541_v36, 1  ;;  %v1548_v19 = vrot.slane %v1546_v27, 1  ;;  %v915_v45 = vpack.i.b16 %v708_v15, %v708_v15  ;;  %v576_v46 = vpack.i.b16 %v544_v25, %v544_v25  ;;  %v415_v15 = vld [vmem:[%s3536_s25 + $0x148] sm:$0xf] }
  0xa8   : > { %v1908_v48 = vsel %vm1878_vm1, %v1906_v37, %v1907_v57  ;;  %v1743_v10 = vshrl.u32 %v4115_v13, 16  ;;  %v1745_v49 = vshll.u32 %v4115_v13, 16  ;;  %v1750_v58 = vshll.u32 %v3303_v38, 16 }
  0xa9   : > { %v1544_v53 = vor.u32 %v1543_v3, %v1539_v31  ;;  %2025 = vrot.lane.b32.xlu1 %v1956_v1, %s3479_s7  ;;  %v801_v54 = vrot.slane %v796_v12, %v3680_v11  ;;  %v1957_v24 = vrot.slane %v4115_v13, 1  ;;  %v1958_v50 = vrot.slane %v3303_v38, 1 }
  0xaa   : > { %v1747_v32 = vrot.slane %v1745_v49, 1  ;;  %v1752_v55 = vrot.slane %v1750_v58, 1  ;;  %v920_v5 = vrot.slane %v915_v45, %v3680_v11  ;;  %v644_v33 = vrot.slane %v576_v46, %v3680_v11  ;;  %v366_v49 = vld [vmem:[%s3536_s25 + $0x84] sm:$0xf] }
  0xab   : > { %v1549_v6 = vsel %vm1429_vm2, %v1544_v53, %v1548_v19  ;;  %v3223_v14 = vcombine.low %v801_v54, %v801_v54  ;;  %v1959_v1 = vsel %vm1878_vm1, %v1957_v24, %v1958_v50  ;;  %v712_v25 = vrot.slane %v3211_v56, %v3680_v11 }
  0xac   : > { %1832 = vrot.lane.b32.xlu0 %v1549_v6, %s3480_s8  ;;  %v1748_v28 = vor.u32 %v1747_v32, %v1743_v10  ;;  %v3240_v29 = vcombine.low %v920_v5, %v920_v5  ;;  %v803_v30 = vpack.i.b16 %v644_v33, %v644_v33  ;;  %v4137_v22 = vcombine.high %v4010_v60, %v4010_v60  ;;  %v367_v32 = vld [vmem:[%s3536_s25 + $0x88] sm:$0xf]  ;;  %v368_v5 = vld [vmem:[%s3536_s25 + $0x8c] sm:$0x1] }
  0xad   : > { %v1107_v31 = vmul.bf16 %v3223_v14, %v363_v51  ;;  %v1108_v36 = vmul.bf16 %v3223_v14, %v364_v0  ;;  %v1109_v27 = vmul.bf16 %v3223_v14, %v365_v2  ;;  %v922_v37 = vpack.i.b16 %v712_v25, %v712_v25 }
  0xae   : > { %v1753_v57 = vsel %vm1429_vm2, %v1748_v28, %v1752_v55  ;;  %v1158_v38 = vmul.bf16 %v3240_v29, %v414_v7  ;;  %v1159_v12 = vmul.bf16 %v3240_v29, %v415_v15  ;;  %v1160_v3 = vmul.bf16 %v3240_v29, %v416_v21 }
  0xaf   : > { %1866 = vrot.lane.b32.xlu1 %v1753_v57, %s3480_s8  ;;  %v4141_v56 = vcombine.low %v1107_v31, %v1108_v36  ;;  %v3287_v19 = vcombine.low %v1109_v27, %v1109_v27  ;;  %v808_v45 = vrot.slane %v803_v30, %v3680_v11  ;;  %v927_v60 = vrot.slane %v922_v37, %v3680_v11  ;;  %v417_v36 = vld [vmem:[%s3536_s25 + $0x150] sm:$0xf]  ;;  %v418_v27 = vld [vmem:[%s3536_s25 + $0x154] sm:$0xf]  ;;  %v419_v37 = vld [vmem:[%s3536_s25 + $0x158] sm:$0x1] }
  0xb0   : > { %1993 = vrot.lane.b32.xlu0 %v1908_v48, %s3479_s7  ;;  %v4146_v46 = vcombine.low %v1158_v38, %v1159_v12  ;;  %v3304_v10 = vcombine.low %v1160_v3, %v1160_v3  ;;  %v3203_v58 = vpack.i.b16 %v4137_v22, %v4137_v22  ;;  %v562_v53 = vunpack.i.h.s16 %v4086_v43 }
  0xb1   : > { %v1551_v51 = vshrl.u32 %v4141_v56, 16  ;;  %v1553_v54 = vshll.u32 %v4141_v56, 16  ;;  %v1558_v24 = vshll.u32 %v3287_v19, 16  ;;  %v1909_v50 = vrot.slane %v4141_v56, 1 }
  0xb2   : > { %v1910_v55 = vrot.slane %v3287_v19, 1  ;;  %v1755_v48 = vshrl.u32 %v4146_v46, 16  ;;  %v1757_v0 = vshll.u32 %v4146_v46, 16  ;;  %v1762_v2 = vshll.u32 %v3304_v10, 16 }
  0xb3   : > { %v1555_v33 = vrot.slane %v1553_v54, 1  ;;  %v1560_v43 = vrot.slane %v1558_v24, 1  ;;  %2027 = vrot.lane.b32.xlu1 %v1959_v1, %s3479_s7  ;;  %v3224_v6 = vcombine.low %v808_v45, %v808_v45  ;;  %v1960_v14 = vrot.slane %v4146_v46, 1 }
  0xb4   : > { %v1911_v7 = vsel %vm1878_vm1, %v1909_v50, %v1910_v55  ;;  %v1759_v15 = vrot.slane %v1757_v0, 1  ;;  %v1764_v21 = vrot.slane %v1762_v2, 1  ;;  %v1961_v25 = vrot.slane %v3304_v10, 1 }
  0xb5   : > { %v1556_v28 = vor.u32 %v1555_v33, %v1551_v51  ;;  %v1110_v29 = vmul.bf16 %v3224_v6, %v366_v49  ;;  %v1111_v30 = vmul.bf16 %v3224_v6, %v367_v32  ;;  %v1112_v31 = vmul.bf16 %v3224_v6, %v368_v5 }
  0xb6   : > { %v1760_v57 = vor.u32 %v1759_v15, %v1755_v48  ;;  %v1962_v38 = vsel %vm1878_vm1, %v1960_v14, %v1961_v25  ;;  %v3241_v12 = vcombine.low %v927_v60, %v927_v60  ;;  %v648_v1 = vrot.slane %v3203_v58, %v3680_v11  ;;  %v369_v25 = vld [vmem:[%s3536_s25 + $0x90] sm:$0xf] }
  0xb7   : > { %v1561_v3 = vsel %vm1429_vm2, %v1556_v28, %v1560_v43  ;;  %v4168_v19 = vcombine.low %v1110_v29, %v1111_v30  ;;  %v3288_v45 = vcombine.low %v1112_v31, %v1112_v31  ;;  %v594_v54 = vpack.i.b16 %v562_v53, %v562_v53 }
  0xb8   : > { %1834 = vrot.lane.b32.xlu0 %v1561_v3, %s3480_s8  ;;  %v1765_v10 = vsel %vm1429_vm2, %v1760_v57, %v1764_v21  ;;  %v1161_v49 = vmul.bf16 %v3241_v12, %v417_v36  ;;  %v1162_v51 = vmul.bf16 %v3241_v12, %v418_v27  ;;  %v1163_v24 = vmul.bf16 %v3241_v12, %v419_v37  ;;  %v370_v27 = vld [vmem:[%s3536_s25 + $0x94] sm:$0xf] }
  0xb9   : > { %1868 = vrot.lane.b32.xlu1 %v1765_v10, %s3480_s8  ;;  %v1563_v50 = vshrl.u32 %v4168_v19, 16  ;;  %v1565_v60 = vshll.u32 %v4168_v19, 16  ;;  %v1570_v58 = vshll.u32 %v3288_v45, 16  ;;  %v1912_v32 = vrot.slane %v4168_v19, 1 }
  0xba   : > { %v1913_v55 = vrot.slane %v3288_v45, 1  ;;  %v4176_v48 = vcombine.low %v1161_v49, %v1162_v51  ;;  %v3305_v53 = vcombine.low %v1163_v24, %v1163_v24  ;;  %v810_v0 = vpack.i.b16 %v648_v1, %v648_v1 }
  0xbb   : > { %v1567_v2 = vrot.slane %v1565_v60, 1  ;;  %v1572_v5 = vrot.slane %v1570_v58, 1  ;;  %v716_v33 = vrot.slane %v594_v54, %v3680_v11  ;;  %v546_v43 = vunpack.i.h.s16 %v4137_v22  ;;  %v420_v60 = vld [vmem:[%s3536_s25 + $0x15c] sm:$0xf]  ;;  %v421_v58 = vld [vmem:[%s3536_s25 + $0x160] sm:$0xf] }
  0xbc   : > { %1995 = vrot.lane.b32.xlu0 %v1911_v7, %s3479_s7  ;;  %v1767_v6 = vshrl.u32 %v4176_v48, 16  ;;  %v1769_v14 = vshll.u32 %v4176_v48, 16  ;;  %v1774_v15 = vshll.u32 %v3305_v53, 16  ;;  %v815_v28 = vrot.slane %v810_v0, %v3680_v11  ;;  %v371_v7 = vld [vmem:[%s3536_s25 + $0x98] sm:$0x1] }
  0xbd   : > { %v1568_v21 = vor.u32 %v1567_v2, %v1563_v50  ;;  %2029 = vrot.lane.b32.xlu1 %v1962_v38, %s3479_s7  ;;  %v1963_v29 = vrot.slane %v4176_v48, 1  ;;  %v1964_v30 = vrot.slane %v3305_v53, 1  ;;  %v4187_v31 = vpop.permute.xlu1 %1975  ;;  %v929_v37 = vpack.i.b16 %v716_v33, %v716_v33 }
  0xbe   : > { %v1771_v36 = vrot.slane %v1769_v14, 1  ;;  %v1776_v22 = vrot.slane %v1774_v15, 1  ;;  %v578_v57 = vpack.i.b16 %v546_v43, %v546_v43  ;;  %v1914_v38 = vsel %vm1878_vm1, %v1912_v32, %v1913_v55  ;;  %v422_v32 = vld [vmem:[%s3536_s25 + $0x164] sm:$0x1]  ;;  %3318 = vmatprep.mubr.msk.bf16.mxu0 %vm2337_vm4, %v4187_v31 }
  0xbf   : > { %v1573_v12 = vsel %vm1429_vm2, %v1568_v21, %v1572_v5  ;;  %v3225_v1 = vcombine.low %v815_v28, %v815_v28  ;;  %v4195_v3 = vcombine.high %v4047_v35, %v4047_v35  ;;  %v934_v54 = vrot.slane %v929_v37, %v3680_v11 }
  0xc0   : > { %1836 = vrot.lane.b32.xlu0 %v1573_v12, %s3480_s8  ;;  %v1772_v45 = vor.u32 %v1771_v36, %v1767_v6  ;;  %v652_v10 = vrot.slane %v578_v57, %v3680_v11  ;;  %v4202_v49 = vcombine.high %v4081_v41, %v4081_v41  ;;  %v1965_v2 = vsel %vm1878_vm1, %v1963_v29, %v1964_v30  ;;  %v373_v12 = vld [vmem:[%s3536_s25 + $0xa0] sm:$0xf] }
  0xc1   : > { %v1113_v51 = vmul.bf16 %v3225_v1, %v369_v25  ;;  %v1114_v24 = vmul.bf16 %v3225_v1, %v370_v27  ;;  %v1115_v50 = vmul.bf16 %v3225_v1, %v371_v7  ;;  %v3212_v35 = vpack.i.b16 %v4195_v3, %v4195_v3  ;;  %v4209_v55 = vpop.permute.xlu0 %1814  ;;  %v4211_v53 = vpop.permute.xlu1 %2007 }
  0xc2   : > { %v1777_v0 = vsel %vm1429_vm2, %v1772_v45, %v1776_v22  ;;  %v3242_v41 = vcombine.low %v934_v54, %v934_v54  ;;  %v817_v5 = vpack.i.b16 %v652_v10, %v652_v10  ;;  %v3204_v14 = vpack.i.b16 %v4202_v49, %v4202_v49  ;;  %v372_v22 = vld [vmem:[%s3536_s25 + $0x9c] sm:$0xf]  ;;  %3334 = vmatprep.mubr.msk.bf16.mxu1 %vm2337_vm4, %v4211_v53 }
  0xc3   : > { %1870 = vrot.lane.b32.xlu1 %v1777_v0, %s3480_s8  ;;  %v4216_v33 = vcombine.low %v1113_v51, %v1114_v24  ;;  %v3289_v43 = vcombine.low %v1115_v50, %v1115_v50  ;;  %v720_v6 = vrot.slane %v3212_v35, %v3680_v11 }
  0xc4   : > { %1997 = vrot.lane.b32.xlu0 %v1914_v38, %s3479_s7  ;;  %v1164_v15 = vmul.bf16 %v3242_v41, %v420_v60  ;;  %v1165_v21 = vmul.bf16 %v3242_v41, %v421_v58  ;;  %v1166_v25 = vmul.bf16 %v3242_v41, %v422_v32  ;;  %v822_v28 = vrot.slane %v817_v5, %v3680_v11  ;;  %v374_v38 = vld [vmem:[%s3536_s25 + $0xa4] sm:$0x1] }
  0xc5   : > { %v1575_v29 = vshrl.u32 %v4216_v33, 16  ;;  %v1577_v30 = vshll.u32 %v4216_v33, 16  ;;  %v1582_v36 = vshll.u32 %v3289_v43, 16  ;;  %v4226_v27 = vpop.permute.xlu0 %1846  ;;  %v1915_v7 = vrot.slane %v4216_v33, 1 }
  0xc6   : > { %v4229_v37 = vcombine.low %v1164_v15, %v1165_v21  ;;  %v3306_v57 = vcombine.low %v1166_v25, %v1166_v25  ;;  %v3226_v1 = vcombine.low %v822_v28, %v822_v28  ;;  %v4233_v45 = vpop.permute.xlu1 %1848  ;;  %v1916_v51 = vrot.slane %v3289_v43, 1 }
  0xc7   : > { %v1579_v54 = vrot.slane %v1577_v30, 1  ;;  %v1584_v10 = vrot.slane %v1582_v36, 1  ;;  %2031 = vrot.lane.b32.xlu1 %v1965_v2, %s3479_s7  ;;  %v936_v24 = vpack.i.b16 %v720_v6, %v720_v6  ;;  %v656_v32 = vrot.slane %v3204_v14, %v3680_v11 }
  0xc8   : > { %v1779_v50 = vshrl.u32 %v4229_v37, 16  ;;  %v1781_v60 = vshll.u32 %v4229_v37, 16  ;;  %v1786_v58 = vshll.u32 %v3306_v57, 16  ;;  %v1116_v0 = vmul.bf16 %v3226_v1, %v372_v22 }
  0xc9   : > { %v1580_v35 = vor.u32 %v1579_v54, %v1575_v29  ;;  %v1117_v41 = vmul.bf16 %v3226_v1, %v373_v12  ;;  %v1118_v5 = vmul.bf16 %v3226_v1, %v374_v38  ;;  %v1966_v25 = vrot.slane %v4229_v37, 1  ;;  %v424_v38 = vld [vmem:[%s3536_s25 + $0x16c] sm:$0xf] }
  0xca   : > { %v1783_v15 = vrot.slane %v1781_v60, 1  ;;  %v1788_v21 = vrot.slane %v1786_v58, 1  ;;  %v1967_v2 = vrot.slane %v3306_v57, 1  ;;  %v4240_v43 = vpop.permute.xlu0 %1816  ;;  %v4242_v6 = vpop.permute.xlu1 %2009  ;;  %v941_v29 = vrot.slane %v936_v24, %v3680_v11  ;;  %v423_v57 = vld [vmem:[%s3536_s25 + $0x168] sm:$0xf] }
  0xcb   : > { %v1585_v28 = vsel %vm1429_vm2, %v1580_v35, %v1584_v10  ;;  %v4245_v30 = vcombine.low %v1116_v0, %v1117_v41  ;;  %v3290_v14 = vcombine.low %v1118_v5, %v1118_v5  ;;  %v1917_v36 = vsel %vm1878_vm1, %v1915_v7, %v1916_v51  ;;  %v425_v58 = vld [vmem:[%s3536_s25 + $0x170] sm:$0x1]  ;;  %v375_v5 = vld [vmem:[%s3536_s25 + $0xa8] sm:$0xf] }
  0xcc   : > { %1838 = vrot.lane.b32.xlu0 %v1585_v28, %s3480_s8  ;;  %v1784_v22 = vor.u32 %v1783_v15, %v1779_v50  ;;  %v1968_v12 = vsel %vm1878_vm1, %v1966_v25, %v1967_v2  ;;  %v824_v1 = vpack.i.b16 %v656_v32, %v656_v32  ;;  %v2041_v24 = vsel %vm2039_vm3, %v3744_v16, %v4209_v55  ;;  %v376_v2 = vld [vmem:[%s3536_s25 + $0xac] sm:$0xf]  ;;  %v377_v28 = vld [vmem:[%s3536_s25 + $0xb0] sm:$0x1] }
  0xcd   : > { %v1587_v54 = vshrl.u32 %v4245_v30, 16  ;;  %v1589_v10 = vshll.u32 %v4245_v30, 16  ;;  %v1594_v60 = vshll.u32 %v3290_v14, 16  ;;  %v1918_v7 = vrot.slane %v4245_v30, 1 }
  0xce   : > { %v1789_v35 = vsel %vm1429_vm2, %v1784_v22, %v1788_v21  ;;  %v3243_v51 = vcombine.low %v941_v29, %v941_v29  ;;  %v829_v50 = vrot.slane %v824_v1, %v3680_v11  ;;  %v4262_v32 = vpop.permute.xlu0 %1977  ;;  %v4266_v15 = vpop.permute.xlu1 %1850  ;;  %v1919_v16 = vrot.slane %v3290_v14, 1 }
  0xcf   : > { %1872 = vrot.lane.b32.xlu1 %v1789_v35, %s3480_s8  ;;  %v1591_v0 = vrot.slane %v1589_v10, 1  ;;  %v1596_v41 = vrot.slane %v1594_v60, 1  ;;  %v2106_v1 = vsel %vm2104_vm5, %v2041_v24, %v4187_v31  ;;  %v564_v10 = vunpack.i.h.s16 %v4195_v3 }
  0xd0   : > { %1999 = vrot.lane.b32.xlu0 %v1917_v36, %s3479_s7  ;;  %v1167_v55 = vmul.bf16 %v3243_v51, %v423_v57  ;;  %v1168_v21 = vmul.bf16 %v3243_v51, %v424_v38  ;;  %v1169_v25 = vmul.bf16 %v3243_v51, %v425_v58  ;;  %v3227_v22 = vcombine.low %v829_v50, %v829_v50 }
  0xd1   : > { %v1592_v29 = vor.u32 %v1591_v0, %v1587_v54  ;;  %2435 = vmatmul.mubr.bf16.vlgmr.msra.gmra.mrb[0].mxu0 %v2106_v1  ;;  %v2073_v57 = vsel %vm2039_vm3, %v3750_v20, %v4226_v27  ;;  %v1920_v20 = vsel %vm1878_vm1, %v1918_v7, %v1919_v16  ;;  %v596_v50 = vpack.i.b16 %v564_v10, %v564_v10 }
  0xd2   : > { %v4278_v36 = vcombine.low %v1167_v55, %v1168_v21  ;;  %v3307_v14 = vcombine.low %v1169_v25, %v1169_v25  ;;  %v4283_v38 = vpop.permute.xlu0 %1818  ;;  %v1119_v31 = vmul.bf16 %v3227_v22, %v375_v5  ;;  %v1120_v60 = vmul.bf16 %v3227_v22, %v376_v2  ;;  %3319 = vmatprep.mubr.msk.bf16.mxu0 %vm2337_vm4, %v4262_v32 }
  0xd3   : > { %v1597_v54 = vsel %vm1429_vm2, %v1592_v29, %v1596_v41  ;;  %2033 = vrot.lane.b32.xlu1 %v1968_v12, %s3479_s7  ;;  %v1121_v3 = vmul.bf16 %v3227_v22, %v377_v28  ;;  %v4295_v12 = vpop.permute.xlu1 %2011  ;;  %v548_v5 = vunpack.i.h.s16 %v4202_v49  ;;  %v2154_v55 = vsel %vm2104_vm5, %v2073_v57, %v4211_v53 }
  0xd4   : > { %1840 = vrot.lane.b32.xlu0 %v1597_v54, %s3480_s8  ;;  %v1791_v58 = vshrl.u32 %v4278_v36, 16  ;;  %v1793_v24 = vshll.u32 %v4278_v36, 16  ;;  %v1798_v35 = vshll.u32 %v3307_v14, 16  ;;  %v4293_v27 = vcombine.low %v1119_v31, %v1120_v60  ;;  %2563 = vmatmul.mubr.bf16.vlgmr.msra.gmra.mrb[0].mxu1 %v2154_v55 }
  0xd5   : > { %v3291_v51 = vcombine.low %v1121_v3, %v1121_v3  ;;  %v1969_v16 = vrot.slane %v4278_v36, 1  ;;  %v1970_v29 = vrot.slane %v3307_v14, 1  ;;  %v724_v22 = vrot.slane %v596_v50, %v3680_v11  ;;  %3335 = vmatprep.mubr.msk.bf16.mxu1 %vm2337_vm4, %v4242_v6 }
  0xd6   : > { %v1795_v0 = vrot.slane %v1793_v24, 1  ;;  %v1800_v41 = vrot.slane %v1798_v35, 1  ;;  %v1980_v21 = vpop.permute.xlu0 %1979  ;;  %v1599_v25 = vshrl.u32 %v4293_v27, 16  ;;  %v1601_v2 = vshll.u32 %v4293_v27, 16 }
  0xd7   : > { %v1606_v28 = vshll.u32 %v3291_v51, 16  ;;  %v2075_v1 = vsel %vm2039_vm3, %v3764_v42, %v4233_v45  ;;  %v580_v10 = vpack.i.b16 %v548_v5, %v548_v5  ;;  %v1921_v54 = vrot.slane %v4293_v27, 1  ;;  %v4319_v45 = vpop.permute.xlu1 %1852 }
  0xd8   : > { %2001 = vrot.lane.b32.xlu0 %v1920_v20, %s3479_s7  ;;  %v1796_v7 = vor.u32 %v1795_v0, %v1791_v58  ;;  %v1603_v49 = vrot.slane %v1601_v2, 1  ;;  %v943_v14 = vpack.i.b16 %v724_v22, %v724_v22  ;;  %v2043_v31 = vsel %vm2039_vm3, %v3774_v59, %v4240_v43  ;;  %v426_v59 = vld [vmem:[%s3536_s25 + $0x174] sm:$0xf]  ;;  %v427_v43 = vld [vmem:[%s3536_s25 + $0x178] sm:$0xf] }
  0xd9   : > { %v1608_v53 = vrot.slane %v1606_v28, 1  ;;  %v1922_v3 = vrot.slane %v3291_v51, 1  ;;  %v660_v58 = vrot.slane %v580_v10, %v3680_v11  ;;  %v2109_v42 = vsel %vm2104_vm5, %v2043_v31, %v4262_v32  ;;  %v428_v51 = vld [vmem:[%s3536_s25 + $0x17c] sm:$0x1] }
  0xda   : > { %v1801_v57 = vsel %vm1429_vm2, %v1796_v7, %v1800_v41  ;;  %v1604_v60 = vor.u32 %v1603_v49, %v1599_v25  ;;  %v1971_v24 = vsel %vm1878_vm1, %v1969_v16, %v1970_v29  ;;  %v948_v35 = vrot.slane %v943_v14, %v3680_v11  ;;  %2443 = vmatmul.mubr.bf16.gmra.mrb[4].mxu0 %v2109_v42  ;;  %v1821_v20 = vpop.permute.xlu0 %1820  ;;  %v378_v7 = vld [vmem:[%s3536_s25 + $0xb4] sm:$0xf]  ;;  %v379_v16 = vld [vmem:[%s3536_s25 + $0xb8] sm:$0xf]  ;;  %v380_v29 = vld [vmem:[%s3536_s25 + $0xbc] sm:$0x1] }
  0xdb   : > { %1874 = vrot.lane.b32.xlu1 %v1801_v57, %s3480_s8  ;;  %v831_v0 = vpack.i.b16 %v660_v58, %v660_v58  ;;  %3320 = vmatprep.mubr.msk.bf16.mxu0 %vm2337_vm4, %v1980_v21  ;;  %v2157_v41 = vsel %vm2104_vm5, %v2075_v1, %v4242_v6  ;;  %v1923_v5 = vsel %vm1878_vm1, %v1921_v54, %v1922_v3 }
  0xdc   : > { %v1609_v50 = vsel %vm1429_vm2, %v1604_v60, %v1608_v53  ;;  %v3244_v32 = vcombine.low %v948_v35, %v948_v35  ;;  %2571 = vmatmul.mubr.bf16.gmra.mrb[4].mxu1 %v2157_v41  ;;  %v2045_v22 = vsel %vm2039_vm3, %v3802_v44, %v4283_v38  ;;  %v2014_v53 = vpop.permute.xlu1 %2013  ;;  %v2077_v44 = vsel %vm2039_vm3, %v3778_v4, %v4266_v15 }
  0xdd   : > { %1842 = vrot.lane.b32.xlu0 %v1609_v50, %s3480_s8  ;;  %v836_v55 = vrot.slane %v831_v0, %v3680_v11  ;;  %3336 = vmatprep.mubr.msk.bf16.mxu1 %vm2337_vm4, %v4295_v12  ;;  %v2112_v49 = vsel %vm2104_vm5, %v2045_v22, %v1980_v21  ;;  %v2047_v0 = vsel %vm2039_vm3, %v3835_v26, %v1821_v20 }
  0xde   : > { %v1170_v25 = vmul.bf16 %v3244_v32, %v426_v59  ;;  %v1171_v2 = vmul.bf16 %v3244_v32, %v427_v43  ;;  %v1172_v28 = vmul.bf16 %v3244_v32, %v428_v51  ;;  %v1982_v10 = vpop.permute.xlu0 %1981 }
  0xdf   : > { %2035 = vrot.lane.b32.xlu1 %v1971_v24, %s3479_s7  ;;  %v3228_v6 = vcombine.low %v836_v55, %v836_v55  ;;  %v2160_v24 = vsel %vm2104_vm5, %v2077_v44, %v4295_v12  ;;  %v2115_v12 = vsel %vm2104_vm5, %v2047_v0, %v1982_v10 }
  0xe0   : > { %v4344_v11 = vcombine.low %v1170_v25, %v1171_v2  ;;  %v3308_v1 = vcombine.low %v1172_v28, %v1172_v28 }
  0xe1   : > { %2003 = vrot.lane.b32.xlu0 %v1923_v5, %s3479_s7  ;;  %v1122_v57 = vmul.bf16 %v3228_v6, %v378_v7  ;;  %v1123_v54 = vmul.bf16 %v3228_v6, %v379_v16  ;;  %v1124_v14 = vmul.bf16 %v3228_v6, %v380_v29  ;;  %v2079_v7 = vsel %vm2039_vm3, %v3828_v9, %v4319_v45 }
  0xe2   : > { %v1803_v38 = vshrl.u32 %v4344_v11, 16  ;;  %v1805_v31 = vshll.u32 %v4344_v11, 16  ;;  %v1810_v60 = vshll.u32 %v3308_v1, 16  ;;  %2451 = vmatmul.mubr.bf16.gmra.mrb[8].mxu0 %v2112_v49  ;;  %v1972_v43 = vrot.slane %v4344_v11, 1 }
  0xe3   : > { %v4351_v21 = vcombine.low %v1122_v57, %v1123_v54  ;;  %v3292_v3 = vcombine.low %v1124_v14, %v1124_v14  ;;  %3321 = vmatprep.mubr.msk.bf16.mxu0 %vm2337_vm4, %v1982_v10  ;;  %v1973_v51 = vrot.slane %v3308_v1, 1  ;;  %v2163_v29 = vsel %vm2104_vm5, %v2079_v7, %v2014_v53 }
  0xe4   : > { %v1807_v58 = vrot.slane %v1805_v31, 1  ;;  %v1812_v42 = vrot.slane %v1810_v60, 1  ;;  %2579 = vmatmul.mubr.bf16.gmra.mrb[8].mxu1 %v2160_v24 }
  0xe5   : > { %v1611_v35 = vshrl.u32 %v4351_v21, 16  ;;  %v1613_v4 = vshll.u32 %v4351_v21, 16  ;;  %v1618_v15 = vshll.u32 %v3292_v3, 16  ;;  %3337 = vmatprep.mubr.msk.bf16.mxu1 %vm2337_vm4, %v2014_v53  ;;  %v1924_v2 = vrot.slane %v4351_v21, 1 }
  0xe6   : > { %v1808_v59 = vor.u32 %v1807_v58, %v1803_v38  ;;  %v1925_v28 = vrot.slane %v3292_v3, 1  ;;  %v1974_v20 = vsel %vm1878_vm1, %v1972_v43, %v1973_v51 }
  0xe7   : > { %v1855_v50 = vpop.permute.xlu1 %1854  ;;  %v1615_v32 = vrot.slane %v1613_v4, 1  ;;  %v1620_v41 = vrot.slane %v1618_v15, 1 }
  0xe8   : > { %v1813_v5 = vsel %vm1429_vm2, %v1808_v59, %v1812_v42  ;;  %v1926_v6 = vsel %vm1878_vm1, %v1924_v2, %v1925_v28  ;;  %v2081_v53 = vsel %vm2039_vm3, %v3902_v34, %v1855_v50 }
  0xe9   : > { %1876 = vrot.lane.b32.xlu1 %v1813_v5, %s3480_s8  ;;  %v1616_v25 = vor.u32 %v1615_v32, %v1611_v35 }
  0xea   : > { %v1823_v55 = vpop.permute.xlu0 %1822  ;;  %2459 = vmatmul.mubr.bf16.gmra.mrb[12].mxu0 %v2115_v12 }
  0xeb   : > { %v2016_v26 = vpop.permute.xlu1 %2015  ;;  %v1621_v16 = vsel %vm1429_vm2, %v1616_v25, %v1620_v41  ;;  %v2049_v9 = vsel %vm2039_vm3, %v3915_v62, %v1823_v55 }
  0xec   : > { %1844 = vrot.lane.b32.xlu0 %v1621_v16, %s3480_s8  ;;  %2587 = vmatmul.mubr.bf16.gmra.mrb[12].mxu1 %v2163_v29  ;;  %v2166_v57 = vsel %vm2104_vm5, %v2081_v53, %v2016_v26 }
  0xed   : > { %2037 = vrot.lane.b32.xlu1 %v1974_v20, %s3479_s7  ;;  %3338 = vmatprep.mubr.msk.bf16.mxu1 %vm2337_vm4, %v2016_v26 }
  0xee   : > { %v1984_v22 = vpop.permute.xlu0 %1983 }
  0xef   : > { %v1857_v49 = vpop.permute.xlu1 %1856  ;;  %3322 = vmatprep.mubr.msk.bf16.mxu0 %vm2337_vm4, %v1984_v22  ;;  %v2118_v45 = vsel %vm2104_vm5, %v2049_v9, %v1984_v22 }
  0xf0   : > { %2005 = vrot.lane.b32.xlu0 %v1926_v6, %s3479_s7  ;;  %v2083_v38 = vsel %vm2039_vm3, %v3923_v17, %v1857_v49 }
  0xf2   : > { %v1825_v1 = vpop.permute.xlu0 %1824  ;;  %2467 = vmatmul.mubr.bf16.gmra.mrb[16].mxu0 %v2118_v45 }
  0xf3   : > { %v2018_v10 = vpop.permute.xlu1 %2017  ;;  %v2051_v62 = vsel %vm2039_vm3, %v3939_v61, %v1825_v1 }
  0xf4   : > { %2595 = vmatmul.mubr.bf16.gmra.mrb[16].mxu1 %v2166_v57  ;;  %v2169_v60 = vsel %vm2104_vm5, %v2083_v38, %v2018_v10 }
  0xf5   : > { %3339 = vmatprep.mubr.msk.bf16.mxu1 %vm2337_vm4, %v2018_v10 }
  0xf6   : > { %v1986_v54 = vpop.permute.xlu0 %1985 }
  0xf7   : > { %3323 = vmatprep.mubr.msk.bf16.mxu0 %vm2337_vm4, %v1986_v54  ;;  %v2121_v44 = vsel %vm2104_vm5, %v2051_v62, %v1986_v54 }
  0xf8   : > { %v1859_v14 = vpop.permute.xlu1 %1858 }
  0xf9   : > { %v2085_v17 = vsel %vm2039_vm3, %v3968_v18, %v1859_v14 }
  0xfa   : > { %2475 = vmatmul.mubr.bf16.gmra.mrb[20].mxu0 %v2121_v44 }
  0xfb   : > { %v1827_v34 = vpop.permute.xlu0 %1826 }
  0xfc   : > { %v2020_v31 = vpop.permute.xlu1 %2019  ;;  %2603 = vmatmul.mubr.bf16.gmra.mrb[20].mxu1 %v2169_v60  ;;  %v2053_v58 = vsel %vm2039_vm3, %v3977_v40, %v1827_v34 }
  0xfd   : > { %3340 = vmatprep.mubr.msk.bf16.mxu1 %vm2337_vm4, %v2020_v31  ;;  %v2172_v24 = vsel %vm2104_vm5, %v2085_v17, %v2020_v31 }
  0xff   : > { %v1988_v3 = vpop.permute.xlu0 %1987 }
 0x100   : > { %3324 = vmatprep.mubr.msk.bf16.mxu0 %vm2337_vm4, %v1988_v3  ;;  %v2124_v61 = vsel %vm2104_vm5, %v2053_v58, %v1988_v3 }
 0x102   : > { %v1861_v42 = vpop.permute.xlu1 %1860  ;;  %2483 = vmatmul.mubr.bf16.gmra.mrb[24].mxu0 %v2124_v61 }
 0x103   : > { %v2087_v40 = vsel %vm2039_vm3, %v4003_v23, %v1861_v42 }
 0x104   : > { %2611 = vmatmul.mubr.bf16.gmra.mrb[24].mxu1 %v2172_v24 }
 0x106   : > { %v2022_v35 = vpop.permute.xlu1 %2021 }
 0x107   : > { %v1829_v4 = vpop.permute.xlu0 %1828  ;;  %3341 = vmatprep.mubr.msk.bf16.mxu1 %vm2337_vm4, %v2022_v35  ;;  %v2175_v43 = vsel %vm2104_vm5, %v2087_v40, %v2022_v35 }
 0x108   : > { %v2055_v15 = vsel %vm2039_vm3, %v4025_v47, %v1829_v4 }
 0x10b   : > { %v1990_v50 = vpop.permute.xlu0 %1989 }
 0x10c   : > { %3325 = vmatprep.mubr.msk.bf16.mxu0 %vm2337_vm4, %v1990_v50  ;;  %v1863_v59 = vpop.permute.xlu1 %1862  ;;  %v2127_v18 = vsel %vm2104_vm5, %v2055_v15, %v1990_v50  ;;  %2619 = vmatmul.mubr.bf16.gmra.mrb[28].mxu1 %v2175_v43 }
 0x10d   : > { %2491 = vmatmul.mubr.bf16.gmra.mrb[28].mxu0 %v2127_v18  ;;  %v2089_v23 = vsel %vm2039_vm3, %v4039_v63, %v1863_v59 }
 0x110   : > { %v2024_v51 = vpop.permute.xlu1 %2023 }
 0x111   : > { %v1831_v0 = vpop.permute.xlu0 %1830  ;;  %3342 = vmatprep.mubr.msk.bf16.mxu1 %vm2337_vm4, %v2024_v51  ;;  %v2178_v12 = vsel %vm2104_vm5, %v2089_v23, %v2024_v51 }
 0x112   : > { %v2057_v47 = vsel %vm2039_vm3, %v4056_v52, %v1831_v0  ;;  %v2201_v0 = vld [vmem:[#allocation2] sm:$0xff] }
 0x114   : > { %2627 = vmatmul.mubr.bf16.gmra.mrb[32].mxu1 %v2178_v12 }
 0x115   : > { %v1992_v32 = vpop.permute.xlu0 %1991 }
 0x116   : > { %3326 = vmatprep.mubr.msk.bf16.mxu0 %vm2337_vm4, %v1992_v32  ;;  %v2130_v41 = vsel %vm2104_vm5, %v2057_v47, %v1992_v32 }
 0x117   : > { %v1865_v5 = vpop.permute.xlu1 %1864  ;;  %2499 = vmatmul.mubr.bf16.gmra.mrb[32].mxu0 %v2130_v41 }
 0x118   : > { %v2091_v55 = vsel %vm2039_vm3, %v4075_v39, %v1865_v5 }
 0x11b   : > { %v2026_v25 = vpop.permute.xlu1 %2025 }
 0x11c   : > { %3343 = vmatprep.mubr.msk.bf16.mxu1 %vm2337_vm4, %v2026_v25  ;;  %v2181_v2 = vsel %vm2104_vm5, %v2091_v55, %v2026_v25  ;;  %v2233_v55 = vld [vmem:[#allocation2 + $0x100] sm:$0xff]  ;;  %v2234_v25 = vld [vmem:[#allocation2 + $0x108] sm:$0xff] }
 0x11d   : > { %2635 = vmatmul.mubr.bf16.gmra.mrb[36].mxu1 %v2181_v2 }
 0x11e   : > { %v1833_v63 = vpop.permute.xlu0 %1832 }
 0x11f   : > { %v2059_v28 = vsel %vm2039_vm3, %v4105_v8, %v1833_v63 }
 0x121   : > { %v1867_v52 = vpop.permute.xlu1 %1866 }
 0x122   : > { %v1994_v7 = vpop.permute.xlu0 %1993  ;;  %v2093_v26 = vsel %vm2039_vm3, %v4115_v13, %v1867_v52 }
 0x123   : > { %3327 = vmatprep.mubr.msk.bf16.mxu0 %vm2337_vm4, %v1994_v7  ;;  %v2133_v20 = vsel %vm2104_vm5, %v2059_v28, %v1994_v7 }
 0x124   : > { %2507 = vmatmul.mubr.bf16.gmra.mrb[36].mxu0 %v2133_v20 }
 0x125   : > { %v2028_v39 = vpop.permute.xlu1 %2027 }
 0x126   : > { %3344 = vmatprep.mubr.msk.bf16.mxu1 %vm2337_vm4, %v2028_v39  ;;  %v2184_v16 = vsel %vm2104_vm5, %v2093_v26, %v2028_v39  ;;  %v2203_v26 = vld [vmem:[#allocation2 + $0x10] sm:$0xff]  ;;  %v2204_v39 = vld [vmem:[#allocation2 + $0x18] sm:$0xff] }
 0x127   : > { %2643 = vmatmul.mubr.bf16.gmra.mrb[40].mxu1 %v2184_v16 }
 0x12a   : > { %v1835_v29 = vpop.permute.xlu0 %1834 }
 0x12b   : > { %v1869_v22 = vpop.permute.xlu1 %1868  ;;  %v2061_v6 = vsel %vm2039_vm3, %v4141_v56, %v1835_v29 }
 0x12c   : > { %v2095_v8 = vsel %vm2039_vm3, %v4146_v46, %v1869_v22  ;;  %v2235_v22 = vld [vmem:[#allocation2 + $0x110] sm:$0xff] }
 0x12e   : > { %v1996_v49 = vpop.permute.xlu0 %1995 }
 0x12f   : > { %3328 = vmatprep.mubr.msk.bf16.mxu0 %vm2337_vm4, %v1996_v49  ;;  %v2136_v13 = vsel %vm2104_vm5, %v2061_v6, %v1996_v49  ;;  %v2030_v9 = vpop.permute.xlu1 %2029 }
 0x130   : > { %2515 = vmatmul.mubr.bf16.gmra.mrb[40].mxu0 %v2136_v13  ;;  %3345 = vmatprep.mubr.msk.bf16.mxu1 %vm2337_vm4, %v2030_v9  ;;  %v2187_v45 = vsel %vm2104_vm5, %v2095_v8, %v2030_v9  ;;  %v2236_v9 = vld [vmem:[#allocation2 + $0x118] sm:$0xff] }
 0x131   : > { %2651 = vmatmul.mubr.bf16.gmra.mrb[44].mxu1 %v2187_v45 }
 0x132   : > { %v1837_v1 = vpop.permute.xlu0 %1836 }
 0x133   : > { %v2063_v46 = vsel %vm2039_vm3, %v4168_v19, %v1837_v1 }
 0x135   : > { %v1871_v53 = vpop.permute.xlu1 %1870 }
 0x136   : > { %v1998_v10 = vpop.permute.xlu0 %1997  ;;  %v2097_v56 = vsel %vm2039_vm3, %v4176_v48, %v1871_v53 }
 0x137   : > { %3329 = vmatprep.mubr.msk.bf16.mxu0 %vm2337_vm4, %v1998_v10  ;;  %v2139_v57 = vsel %vm2104_vm5, %v2063_v46, %v1998_v10 }
 0x138   : > { %2523 = vmatmul.mubr.bf16.gmra.mrb[44].mxu0 %v2139_v57 }
 0x139   : > { %v2032_v54 = vpop.permute.xlu1 %2031 }
 0x13a   : > { %3346 = vmatprep.mubr.msk.bf16.mxu1 %vm2337_vm4, %v2032_v54  ;;  %v2190_v62 = vsel %vm2104_vm5, %v2097_v56, %v2032_v54  ;;  %v2205_v56 = vld [vmem:[#allocation2 + $0x20] sm:$0xff]  ;;  %v2206_v54 = vld [vmem:[#allocation2 + $0x28] sm:$0xff] }
 0x13b   : > { %2659 = vmatmul.mubr.bf16.gmra.mrb[48].mxu1 %v2190_v62 }
 0x13e   : > { %v1839_v14 = vpop.permute.xlu0 %1838 }
 0x13f   : > { %v2065_v19 = vsel %vm2039_vm3, %v4216_v33, %v1839_v14 }
 0x141   : > { %v1873_v44 = vpop.permute.xlu1 %1872 }
 0x142   : > { %v2000_v38 = vpop.permute.xlu0 %1999  ;;  %v2099_v48 = vsel %vm2039_vm3, %v4229_v37, %v1873_v44  ;;  %v2237_v44 = vld [vmem:[#allocation2 + $0x120] sm:$0xff] }
 0x143   : > { %3330 = vmatprep.mubr.msk.bf16.mxu0 %vm2337_vm4, %v2000_v38  ;;  %v2142_v34 = vsel %vm2104_vm5, %v2065_v19, %v2000_v38 }
 0x144   : > { %2531 = vmatmul.mubr.bf16.gmra.mrb[48].mxu0 %v2142_v34 }
 0x145   : > { %v2034_v31 = vpop.permute.xlu1 %2033 }
 0x146   : > { %v1841_v60 = vpop.permute.xlu0 %1840  ;;  %3347 = vmatprep.mubr.msk.bf16.mxu1 %vm2337_vm4, %v2034_v31  ;;  %v2193_v3 = vsel %vm2104_vm5, %v2099_v48, %v2034_v31  ;;  %v2238_v31 = vld [vmem:[#allocation2 + $0x128] sm:$0xff] }
 0x147   : > { %2667 = vmatmul.mubr.bf16.gmra.mrb[52].mxu1 %v2193_v3  ;;  %v2067_v58 = vsel %vm2039_vm3, %v4245_v30, %v1841_v60 }
 0x14a   : > { %v2002_v33 = vpop.permute.xlu0 %2001 }
 0x14b   : > { %3331 = vmatprep.mubr.msk.bf16.mxu0 %vm2337_vm4, %v2002_v33  ;;  %v2145_v61 = vsel %vm2104_vm5, %v2067_v58, %v2002_v33 }
 0x14c   : > { %2539 = vmatmul.mubr.bf16.gmra.mrb[52].mxu0 %v2145_v61 }
 0x14d   : > { %v1875_v37 = vpop.permute.xlu1 %1874 }
 0x14e   : > { %v2101_v42 = vsel %vm2039_vm3, %v4278_v36, %v1875_v37  ;;  %v2207_v37 = vld [vmem:[#allocation2 + $0x30] sm:$0xff] }
 0x14f   : > { %v1843_v17 = vpop.permute.xlu0 %1842 }
 0x150   : > { %v2069_v30 = vsel %vm2039_vm3, %v4293_v27, %v1843_v17  ;;  %v2208_v17 = vld [vmem:[#allocation2 + $0x38] sm:$0xff] }
 0x151   : > { %v2036_v24 = vpop.permute.xlu1 %2035 }
 0x152   : > { %3348 = vmatprep.mubr.msk.bf16.mxu1 %vm2337_vm4, %v2036_v24  ;;  %v2196_v35 = vsel %vm2104_vm5, %v2101_v42, %v2036_v24 }
 0x153   : > { %2675 = vmatmul.mubr.bf16.gmra.mrb[56].mxu1 %v2196_v35  ;;  %v2004_v4 = vpop.permute.xlu0 %2003 }
 0x154   : > { %3332 = vmatprep.mubr.msk.bf16.mxu0 %vm2337_vm4, %v2004_v4  ;;  %v2148_v40 = vsel %vm2104_vm5, %v2069_v30, %v2004_v4  ;;  %v2239_v30 = vld [vmem:[#allocation2 + $0x130] sm:$0xff] }
 0x155   : > { %2547 = vmatmul.mubr.bf16.gmra.mrb[56].mxu0 %v2148_v40 }
 0x15b   : > { %v1877_v15 = vpop.permute.xlu1 %1876 }
 0x15c   : > { %v2103_v36 = vsel %vm2039_vm3, %v4344_v11, %v1877_v15  ;;  %v2202_v11 = vld [vmem:[#allocation2 + $0x8] sm:$0xff] }
 0x15e   : > { %v1845_v50 = vpop.permute.xlu0 %1844 }
 0x15f   : > { %v2038_v59 = vpop.permute.xlu1 %2037  ;;  %v2071_v27 = vsel %vm2039_vm3, %v4351_v21, %v1845_v50  ;;  %v2240_v50 = vld [vmem:[#allocation2 + $0x138] sm:$0xff] }
 0x160   : > { %3349 = vmatprep.mubr.msk.bf16.mxu1 %vm2337_vm4, %v2038_v59  ;;  %v2199_v18 = vsel %vm2104_vm5, %v2103_v36, %v2038_v59 }
 0x161   : > { %2683 = vmatmul.mubr.bf16.gmra.mrb[60].mxu1 %v2199_v18 }
 0x162   : > { %v2006_v43 = vpop.permute.xlu0 %2005 }
 0x163   : > { %3333 = vmatprep.mubr.msk.bf16.mxu0 %vm2337_vm4, %v2006_v43  ;;  %v2151_v51 = vsel %vm2104_vm5, %v2071_v27, %v2006_v43 }
 0x164   : > { %2555 = vmatmul.mubr.bf16.gmra.mrb[60].mxu0 %v2151_v51 }
 0x1a4   : > { %v2436_v23 = vpop.f32.mrb[0].mxu0 }
 0x1a5   : > { %v2691_v47 = vadd.f32 %v2436_v23, %v2201_v0  ;;  %v2438_v32 = vpop.f32.mrb[1].mxu0  ;;  %v2209_v0 = vld [vmem:[#allocation2 + $0x40] sm:$0xff] }
 0x1a6   : > { %v2439_v41 = vpop.f32.mrb[2].mxu0 }
 0x1a7   : > { %2756 = vst.msk [vmem:[#allocation2] sm:$0xff] %vm2755_vm6, %v2691_v47  ;;  %v2692_v12 = vadd.f32 %v2439_v41, %v2202_v11  ;;  %v2441_v5 = vpop.f32.mrb[3].mxu0  ;;  %v2564_v21 = vpop.f32.mrb[0].mxu1  ;;  %v2210_v11 = vld [vmem:[#allocation2 + $0x48] sm:$0xff]  ;;  %v2241_v41 = vld [vmem:[#allocation2 + $0x140] sm:$0xff] }
 0x1a8   : > { %v2723_v63 = vadd.f32 %v2564_v21, %v2233_v55  ;;  %v2566_v2 = vpop.f32.mrb[1].mxu1 }
 0x1a9   : > { %2757 = vst.msk [vmem:[#allocation2 + $0x8] sm:$0xff] %vm2755_vm6, %v2692_v12  ;;  %v2567_v52 = vpop.f32.mrb[2].mxu1 }
 0x1aa   : > { %2788 = vst.msk [vmem:[#allocation2 + $0x100] sm:$0xff] %vm2755_vm6, %v2723_v63  ;;  %v2724_v28 = vadd.f32 %v2567_v52, %v2234_v25  ;;  %v2569_v7 = vpop.f32.mrb[3].mxu1  ;;  %v2242_v25 = vld [vmem:[#allocation2 + $0x148] sm:$0xff] }
 0x1ac   : > { %2789 = vst.msk [vmem:[#allocation2 + $0x108] sm:$0xff] %vm2755_vm6, %v2724_v28 }
 0x1ad   : > { %v2444_v20 = vpop.f32.mrb[4].mxu0 }
 0x1ae   : > { %v2693_v16 = vadd.f32 %v2444_v20, %v2203_v26  ;;  %v2446_v29 = vpop.f32.mrb[5].mxu0  ;;  %v2211_v26 = vld [vmem:[#allocation2 + $0x50] sm:$0xff] }
 0x1af   : > { %v2447_v8 = vpop.f32.mrb[6].mxu0  ;;  %v2572_v6 = vpop.f32.mrb[4].mxu1 }
 0x1b0   : > { %2758 = vst.msk [vmem:[#allocation2 + $0x10] sm:$0xff] %vm2755_vm6, %v2693_v16  ;;  %v2694_v49 = vadd.f32 %v2447_v8, %v2204_v39  ;;  %v2449_v13 = vpop.f32.mrb[7].mxu0  ;;  %v2725_v45 = vadd.f32 %v2572_v6, %v2235_v22  ;;  %v2574_v1 = vpop.f32.mrb[5].mxu1  ;;  %v2212_v39 = vld [vmem:[#allocation2 + $0x58] sm:$0xff]  ;;  %v2243_v22 = vld [vmem:[#allocation2 + $0x150] sm:$0xff] }
 0x1b1   : > { %v2575_v53 = vpop.f32.mrb[6].mxu1 }
 0x1b2   : > { %2759 = vst.msk [vmem:[#allocation2 + $0x18] sm:$0xff] %vm2755_vm6, %v2694_v49  ;;  %2790 = vst.msk [vmem:[#allocation2 + $0x110] sm:$0xff] %vm2755_vm6, %v2725_v45  ;;  %v2726_v46 = vadd.f32 %v2575_v53, %v2236_v9  ;;  %v2577_v10 = vpop.f32.mrb[7].mxu1  ;;  %v2244_v9 = vld [vmem:[#allocation2 + $0x158] sm:$0xff] }
 0x1b4   : > { %2791 = vst.msk [vmem:[#allocation2 + $0x118] sm:$0xff] %vm2755_vm6, %v2726_v46 }
 0x1b5   : > { %v2452_v57 = vpop.f32.mrb[8].mxu0 }
 0x1b6   : > { %v2695_v62 = vadd.f32 %v2452_v57, %v2205_v56  ;;  %v2454_v14 = vpop.f32.mrb[9].mxu0  ;;  %v2213_v56 = vld [vmem:[#allocation2 + $0x60] sm:$0xff] }
 0x1b7   : > { %v2455_v19 = vpop.f32.mrb[10].mxu0  ;;  %v2580_v38 = vpop.f32.mrb[8].mxu1 }
 0x1b8   : > { %2760 = vst.msk [vmem:[#allocation2 + $0x20] sm:$0xff] %vm2755_vm6, %v2695_v62  ;;  %v2696_v48 = vadd.f32 %v2455_v19, %v2206_v54  ;;  %v2457_v34 = vpop.f32.mrb[11].mxu0  ;;  %v2727_v60 = vadd.f32 %v2580_v38, %v2237_v44  ;;  %v2582_v3 = vpop.f32.mrb[9].mxu1  ;;  %v2214_v54 = vld [vmem:[#allocation2 + $0x68] sm:$0xff]  ;;  %v2245_v44 = vld [vmem:[#allocation2 + $0x160] sm:$0xff] }
 0x1b9   : > { %v2583_v58 = vpop.f32.mrb[10].mxu1 }
 0x1ba   : > { %2761 = vst.msk [vmem:[#allocation2 + $0x28] sm:$0xff] %vm2755_vm6, %v2696_v48  ;;  %2792 = vst.msk [vmem:[#allocation2 + $0x120] sm:$0xff] %vm2755_vm6, %v2727_v60  ;;  %v2728_v33 = vadd.f32 %v2583_v58, %v2238_v31  ;;  %v2585_v61 = vpop.f32.mrb[11].mxu1  ;;  %v2246_v31 = vld [vmem:[#allocation2 + $0x168] sm:$0xff] }
 0x1bc   : > { %2793 = vst.msk [vmem:[#allocation2 + $0x128] sm:$0xff] %vm2755_vm6, %v2728_v33 }
 0x1bd   : > { %v2460_v42 = vpop.f32.mrb[12].mxu0 }
 0x1be   : > { %v2697_v24 = vadd.f32 %v2460_v42, %v2207_v37  ;;  %v2462_v35 = vpop.f32.mrb[13].mxu0  ;;  %v2215_v37 = vld [vmem:[#allocation2 + $0x70] sm:$0xff] }
 0x1bf   : > { %v2463_v4 = vpop.f32.mrb[14].mxu0  ;;  %v2588_v40 = vpop.f32.mrb[12].mxu1 }
 0x1c0   : > { %2762 = vst.msk [vmem:[#allocation2 + $0x30] sm:$0xff] %vm2755_vm6, %v2697_v24  ;;  %v2698_v15 = vadd.f32 %v2463_v4, %v2208_v17  ;;  %v2465_v36 = vpop.f32.mrb[15].mxu0  ;;  %v2729_v59 = vadd.f32 %v2588_v40, %v2239_v30  ;;  %v2590_v18 = vpop.f32.mrb[13].mxu1  ;;  %v2247_v17 = vld [vmem:[#allocation2 + $0x170] sm:$0xff]  ;;  %v2216_v24 = vld [vmem:[#allocation2 + $0x78] sm:$0xff] }
 0x1c1   : > { %v2591_v27 = vpop.f32.mrb[14].mxu1 }
 0x1c2   : > { %2763 = vst.msk [vmem:[#allocation2 + $0x38] sm:$0xff] %vm2755_vm6, %v2698_v15  ;;  %2794 = vst.msk [vmem:[#allocation2 + $0x130] sm:$0xff] %vm2755_vm6, %v2729_v59  ;;  %v2730_v43 = vadd.f32 %v2591_v27, %v2240_v50  ;;  %v2593_v51 = vpop.f32.mrb[15].mxu1  ;;  %v2248_v15 = vld [vmem:[#allocation2 + $0x178] sm:$0xff] }
 0x1c4   : > { %2795 = vst.msk [vmem:[#allocation2 + $0x138] sm:$0xff] %vm2755_vm6, %v2730_v43 }
 0x1c5   : > { %v2468_v23 = vpop.f32.mrb[16].mxu0 }
 0x1c6   : > { %v2699_v47 = vadd.f32 %v2468_v23, %v2209_v0  ;;  %v2470_v32 = vpop.f32.mrb[17].mxu0  ;;  %v2217_v0 = vld [vmem:[#allocation2 + $0x80] sm:$0xff] }
 0x1c7   : > { %v2471_v12 = vpop.f32.mrb[18].mxu0  ;;  %v2596_v5 = vpop.f32.mrb[16].mxu1  ;;  %v2249_v23 = vld [vmem:[#allocation2 + $0x180] sm:$0xff]  ;;  %v2218_v32 = vld [vmem:[#allocation2 + $0x88] sm:$0xff] }
 0x1c8   : > { %2764 = vst.msk [vmem:[#allocation2 + $0x40] sm:$0xff] %vm2755_vm6, %v2699_v47  ;;  %v2700_v55 = vadd.f32 %v2471_v12, %v2210_v11  ;;  %v2473_v21 = vpop.f32.mrb[19].mxu0  ;;  %v2731_v63 = vadd.f32 %v2596_v5, %v2241_v41  ;;  %v2598_v2 = vpop.f32.mrb[17].mxu1  ;;  %v2250_v41 = vld [vmem:[#allocation2 + $0x188] sm:$0xff] }
 0x1c9   : > { %v2599_v52 = vpop.f32.mrb[18].mxu1 }
 0x1ca   : > { %2765 = vst.msk [vmem:[#allocation2 + $0x48] sm:$0xff] %vm2755_vm6, %v2700_v55  ;;  %2796 = vst.msk [vmem:[#allocation2 + $0x140] sm:$0xff] %vm2755_vm6, %v2731_v63  ;;  %v2732_v28 = vadd.f32 %v2599_v52, %v2242_v25  ;;  %v2601_v7 = vpop.f32.mrb[19].mxu1 }
 0x1cc   : > { %2797 = vst.msk [vmem:[#allocation2 + $0x148] sm:$0xff] %vm2755_vm6, %v2732_v28 }
 0x1cd   : > { %v2476_v20 = vpop.f32.mrb[20].mxu0 }
 0x1ce   : > { %v2701_v16 = vadd.f32 %v2476_v20, %v2211_v26  ;;  %v2478_v29 = vpop.f32.mrb[21].mxu0  ;;  %v2251_v26 = vld [vmem:[#allocation2 + $0x190] sm:$0xff] }
 0x1cf   : > { %v2479_v8 = vpop.f32.mrb[22].mxu0  ;;  %v2604_v6 = vpop.f32.mrb[20].mxu1 }
 0x1d0   : > { %2766 = vst.msk [vmem:[#allocation2 + $0x50] sm:$0xff] %vm2755_vm6, %v2701_v16  ;;  %v2702_v49 = vadd.f32 %v2479_v8, %v2212_v39  ;;  %v2481_v13 = vpop.f32.mrb[23].mxu0  ;;  %v2733_v45 = vadd.f32 %v2604_v6, %v2243_v22  ;;  %v2606_v1 = vpop.f32.mrb[21].mxu1  ;;  %v2252_v39 = vld [vmem:[#allocation2 + $0x198] sm:$0xff]  ;;  %v2219_v8 = vld [vmem:[#allocation2 + $0x90] sm:$0xff] }
 0x1d1   : > { %v2607_v53 = vpop.f32.mrb[22].mxu1 }
 0x1d2   : > { %2767 = vst.msk [vmem:[#allocation2 + $0x58] sm:$0xff] %vm2755_vm6, %v2702_v49  ;;  %2798 = vst.msk [vmem:[#allocation2 + $0x150] sm:$0xff] %vm2755_vm6, %v2733_v45  ;;  %v2734_v46 = vadd.f32 %v2607_v53, %v2244_v9  ;;  %v2609_v10 = vpop.f32.mrb[23].mxu1  ;;  %v2220_v9 = vld [vmem:[#allocation2 + $0x98] sm:$0xff]  ;;  %v2253_v53 = vld [vmem:[#allocation2 + $0x1a0] sm:$0xff] }
 0x1d4   : > { %2799 = vst.msk [vmem:[#allocation2 + $0x158] sm:$0xff] %vm2755_vm6, %v2734_v46 }
 0x1d5   : > { %v2484_v57 = vpop.f32.mrb[24].mxu0 }
 0x1d6   : > { %v2703_v62 = vadd.f32 %v2484_v57, %v2213_v56  ;;  %v2486_v14 = vpop.f32.mrb[25].mxu0 }
 0x1d7   : > { %v2487_v19 = vpop.f32.mrb[26].mxu0  ;;  %v2612_v38 = vpop.f32.mrb[24].mxu1 }
 0x1d8   : > { %2768 = vst.msk [vmem:[#allocation2 + $0x60] sm:$0xff] %vm2755_vm6, %v2703_v62  ;;  %v2704_v48 = vadd.f32 %v2487_v19, %v2214_v54  ;;  %v2489_v34 = vpop.f32.mrb[27].mxu0  ;;  %v2735_v60 = vadd.f32 %v2612_v38, %v2245_v44  ;;  %v2614_v3 = vpop.f32.mrb[25].mxu1  ;;  %v2254_v54 = vld [vmem:[#allocation2 + $0x1a8] sm:$0xff] }
 0x1d9   : > { %v2615_v58 = vpop.f32.mrb[26].mxu1  ;;  %v2255_v34 = vld [vmem:[#allocation2 + $0x1b0] sm:$0xff] }
 0x1da   : > { %2769 = vst.msk [vmem:[#allocation2 + $0x68] sm:$0xff] %vm2755_vm6, %v2704_v48  ;;  %2800 = vst.msk [vmem:[#allocation2 + $0x160] sm:$0xff] %vm2755_vm6, %v2735_v60  ;;  %v2736_v33 = vadd.f32 %v2615_v58, %v2246_v31  ;;  %v2617_v61 = vpop.f32.mrb[27].mxu1  ;;  %v2221_v48 = vld [vmem:[#allocation2 + $0xa0] sm:$0xff]  ;;  %v2222_v60 = vld [vmem:[#allocation2 + $0xa8] sm:$0xff] }
 0x1db   : > { %v2256_v61 = vld [vmem:[#allocation2 + $0x1b8] sm:$0xff] }
 0x1dc   : > { %2801 = vst.msk [vmem:[#allocation2 + $0x168] sm:$0xff] %vm2755_vm6, %v2736_v33 }
 0x1df   : > { %v2620_v4 = vpop.f32.mrb[28].mxu1 }
 0x1e0   : > { %v2492_v42 = vpop.f32.mrb[28].mxu0  ;;  %v2737_v36 = vadd.f32 %v2620_v4, %v2247_v17  ;;  %v2622_v59 = vpop.f32.mrb[29].mxu1 }
 0x1e1   : > { %v2705_v35 = vadd.f32 %v2492_v42, %v2215_v37  ;;  %v2494_v30 = vpop.f32.mrb[29].mxu0  ;;  %v2623_v27 = vpop.f32.mrb[30].mxu1 }
 0x1e2   : > { %v2495_v40 = vpop.f32.mrb[30].mxu0  ;;  %2802 = vst.msk [vmem:[#allocation2 + $0x170] sm:$0xff] %vm2755_vm6, %v2737_v36  ;;  %v2738_v43 = vadd.f32 %v2623_v27, %v2248_v15  ;;  %v2625_v51 = vpop.f32.mrb[31].mxu1  ;;  %v2223_v15 = vld [vmem:[#allocation2 + $0xb0] sm:$0xff]  ;;  %v2257_v27 = vld [vmem:[#allocation2 + $0x1c0] sm:$0xff] }
 0x1e3   : > { %2770 = vst.msk [vmem:[#allocation2 + $0x70] sm:$0xff] %vm2755_vm6, %v2705_v35  ;;  %v2706_v50 = vadd.f32 %v2495_v40, %v2216_v24  ;;  %v2497_v18 = vpop.f32.mrb[31].mxu0 }
 0x1e4   : > { %2803 = vst.msk [vmem:[#allocation2 + $0x178] sm:$0xff] %vm2755_vm6, %v2738_v43 }
 0x1e5   : > { %2771 = vst.msk [vmem:[#allocation2 + $0x78] sm:$0xff] %vm2755_vm6, %v2706_v50  ;;  %v2224_v50 = vld [vmem:[#allocation2 + $0xb8] sm:$0xff] }
 0x1e7   : > { %v2628_v47 = vpop.f32.mrb[32].mxu1 }
 0x1e8   : > { %v2739_v55 = vadd.f32 %v2628_v47, %v2249_v23  ;;  %v2630_v21 = vpop.f32.mrb[33].mxu1 }
 0x1e9   : > { %v2631_v63 = vpop.f32.mrb[34].mxu1 }
 0x1ea   : > { %v2500_v11 = vpop.f32.mrb[32].mxu0  ;;  %2804 = vst.msk [vmem:[#allocation2 + $0x180] sm:$0xff] %vm2755_vm6, %v2739_v55  ;;  %v2740_v28 = vadd.f32 %v2631_v63, %v2250_v41  ;;  %v2633_v7 = vpop.f32.mrb[35].mxu1  ;;  %v2225_v55 = vld [vmem:[#allocation2 + $0xc0] sm:$0xff] }
 0x1eb   : > { %v2707_v12 = vadd.f32 %v2500_v11, %v2217_v0  ;;  %v2502_v5 = vpop.f32.mrb[33].mxu0  ;;  %v2258_v11 = vld [vmem:[#allocation2 + $0x1c8] sm:$0xff] }
 0x1ec   : > { %v2503_v25 = vpop.f32.mrb[34].mxu0  ;;  %2805 = vst.msk [vmem:[#allocation2 + $0x188] sm:$0xff] %vm2755_vm6, %v2740_v28 }
 0x1ed   : > { %2772 = vst.msk [vmem:[#allocation2 + $0x80] sm:$0xff] %vm2755_vm6, %v2707_v12  ;;  %v2708_v2 = vadd.f32 %v2503_v25, %v2218_v32  ;;  %v2505_v52 = vpop.f32.mrb[35].mxu0  ;;  %v2226_v25 = vld [vmem:[#allocation2 + $0xc8] sm:$0xff] }
 0x1ee   : > { %v2259_v52 = vld [vmem:[#allocation2 + $0x1d0] sm:$0xff] }
 0x1ef   : > { %2773 = vst.msk [vmem:[#allocation2 + $0x88] sm:$0xff] %vm2755_vm6, %v2708_v2 }
 0x1f0   : > { %v2636_v20 = vpop.f32.mrb[36].mxu1 }
 0x1f1   : > { %v2741_v16 = vadd.f32 %v2636_v20, %v2251_v26  ;;  %v2638_v29 = vpop.f32.mrb[37].mxu1 }
 0x1f2   : > { %v2639_v22 = vpop.f32.mrb[38].mxu1 }
 0x1f3   : > { %2806 = vst.msk [vmem:[#allocation2 + $0x190] sm:$0xff] %vm2755_vm6, %v2741_v16  ;;  %v2742_v6 = vadd.f32 %v2639_v22, %v2252_v39  ;;  %v2641_v49 = vpop.f32.mrb[39].mxu1  ;;  %v2260_v39 = vld [vmem:[#allocation2 + $0x1d8] sm:$0xff] }
 0x1f5   : > { %2807 = vst.msk [vmem:[#allocation2 + $0x198] sm:$0xff] %vm2755_vm6, %v2742_v6 }
 0x1f7   : > { %v2508_v13 = vpop.f32.mrb[36].mxu0 }
 0x1f8   : > { %v2709_v45 = vadd.f32 %v2508_v13, %v2219_v8  ;;  %v2510_v1 = vpop.f32.mrb[37].mxu0  ;;  %v2227_v8 = vld [vmem:[#allocation2 + $0xd0] sm:$0xff] }
 0x1f9   : > { %v2511_v46 = vpop.f32.mrb[38].mxu0 }
 0x1fa   : > { %2774 = vst.msk [vmem:[#allocation2 + $0x90] sm:$0xff] %vm2755_vm6, %v2709_v45  ;;  %v2710_v10 = vadd.f32 %v2511_v46, %v2220_v9  ;;  %v2513_v56 = vpop.f32.mrb[39].mxu0  ;;  %v2644_v57 = vpop.f32.mrb[40].mxu1  ;;  %v2228_v9 = vld [vmem:[#allocation2 + $0xd8] sm:$0xff] }
 0x1fb   : > { %v2743_v62 = vadd.f32 %v2644_v57, %v2253_v53  ;;  %v2646_v14 = vpop.f32.mrb[41].mxu1  ;;  %v2261_v56 = vld [vmem:[#allocation2 + $0x1e0] sm:$0xff] }
 0x1fc   : > { %2775 = vst.msk [vmem:[#allocation2 + $0x98] sm:$0xff] %vm2755_vm6, %v2710_v10  ;;  %v2647_v44 = vpop.f32.mrb[42].mxu1 }
 0x1fd   : > { %2808 = vst.msk [vmem:[#allocation2 + $0x1a0] sm:$0xff] %vm2755_vm6, %v2743_v62  ;;  %v2744_v19 = vadd.f32 %v2647_v44, %v2254_v54  ;;  %v2649_v38 = vpop.f32.mrb[43].mxu1  ;;  %v2262_v54 = vld [vmem:[#allocation2 + $0x1e8] sm:$0xff]  ;;  %v2229_v62 = vld [vmem:[#allocation2 + $0xe0] sm:$0xff] }
 0x1ff   : > { %2809 = vst.msk [vmem:[#allocation2 + $0x1a8] sm:$0xff] %vm2755_vm6, %v2744_v19 }
 0x203   : > { %v2516_v31 = vpop.f32.mrb[40].mxu0 }
 0x204   : > { %v2711_v3 = vadd.f32 %v2516_v31, %v2221_v48  ;;  %v2518_v58 = vpop.f32.mrb[41].mxu0  ;;  %v2652_v33 = vpop.f32.mrb[44].mxu1  ;;  %v2230_v48 = vld [vmem:[#allocation2 + $0xe8] sm:$0xff] }
 0x205   : > { %v2519_v37 = vpop.f32.mrb[42].mxu0  ;;  %v2745_v42 = vadd.f32 %v2652_v33, %v2255_v34  ;;  %v2654_v17 = vpop.f32.mrb[45].mxu1 }
 0x206   : > { %2776 = vst.msk [vmem:[#allocation2 + $0xa0] sm:$0xff] %vm2755_vm6, %v2711_v3  ;;  %v2712_v24 = vadd.f32 %v2519_v37, %v2222_v60  ;;  %v2521_v35 = vpop.f32.mrb[43].mxu0  ;;  %v2655_v30 = vpop.f32.mrb[46].mxu1  ;;  %v2263_v37 = vld [vmem:[#allocation2 + $0x1f0] sm:$0xff]  ;;  %v2264_v17 = vld [vmem:[#allocation2 + $0x1f8] sm:$0xff] }
 0x207   : > { %2810 = vst.msk [vmem:[#allocation2 + $0x1b0] sm:$0xff] %vm2755_vm6, %v2745_v42  ;;  %v2746_v4 = vadd.f32 %v2655_v30, %v2256_v61  ;;  %v2657_v40 = vpop.f32.mrb[47].mxu1 }
 0x208   : > { %2777 = vst.msk [vmem:[#allocation2 + $0xa8] sm:$0xff] %vm2755_vm6, %v2712_v24  ;;  %v2231_v24 = vld [vmem:[#allocation2 + $0xf0] sm:$0xff] }
 0x209   : > { %2811 = vst.msk [vmem:[#allocation2 + $0x1b8] sm:$0xff] %vm2755_vm6, %v2746_v4 }
 0x20b   : > { %v2524_v36 = vpop.f32.mrb[44].mxu0 }
 0x20c   : > { %v2713_v59 = vadd.f32 %v2524_v36, %v2223_v15  ;;  %v2526_v18 = vpop.f32.mrb[45].mxu0  ;;  %v2232_v15 = vld [vmem:[#allocation2 + $0xf8] sm:$0xff] }
 0x20d   : > { %v2527_v43 = vpop.f32.mrb[46].mxu0 }
 0x20e   : > { %2778 = vst.msk [vmem:[#allocation2 + $0xb0] sm:$0xff] %vm2755_vm6, %v2713_v59  ;;  %v2714_v51 = vadd.f32 %v2527_v43, %v2224_v50  ;;  %v2529_v0 = vpop.f32.mrb[47].mxu0  ;;  %v2660_v23 = vpop.f32.mrb[48].mxu1 }
 0x20f   : > { %v2747_v47 = vadd.f32 %v2660_v23, %v2257_v27  ;;  %v2662_v32 = vpop.f32.mrb[49].mxu1  ;;  %v2824_v0 = vld [vmem:[#allocation2] sm:$0xff] (!%p3350_p6) }
 0x210   : > { %2779 = vst.msk [vmem:[#allocation2 + $0xb8] sm:$0xff] %vm2755_vm6, %v2714_v51  ;;  %v2663_v41 = vpop.f32.mrb[50].mxu1  ;;  %v4540_v23 = vld [vmem:[%s4709_s2] ss:$0 sm:$0xff] (!%p3350_p6) }
 0x211   : > { %2812 = vst.msk [vmem:[#allocation2 + $0x1c0] sm:$0xff] %vm2755_vm6, %v2747_v47  ;;  %v2748_v12 = vadd.f32 %v2663_v41, %v2258_v11  ;;  %v2665_v5 = vpop.f32.mrb[51].mxu1  ;;  %v2825_v11 = vld [vmem:[#allocation2 + $0x8] sm:$0xff] (!%p3350_p6)  ;;  %v2895_v47 = vadd.f32 (!%p3350_p6), %v4540_v23, %v2824_v0  ;;  %v2826_v41 = vld [vmem:[#allocation2 + $0x10] sm:$0xff] (!%p3350_p6) }
 0x212   : > { %v2896_v32 = vadd.f32 (!%p3350_p6), %v4540_v23, %v2825_v11  ;;  %v2828_v5 = vld [vmem:[#allocation2 + $0x20] sm:$0xff] (!%p3350_p6) }
 0x213   : > { %2813 = vst.msk [vmem:[#allocation2 + $0x1c8] sm:$0xff] %vm2755_vm6, %v2748_v12  ;;  %v2827_v12 = vld [vmem:[#allocation2 + $0x18] sm:$0xff] (!%p3350_p6) }
 0x217   : > { %v2532_v21 = vpop.f32.mrb[48].mxu0 }
 0x218   : > { %v2715_v63 = vadd.f32 %v2532_v21, %v2225_v55  ;;  %v2534_v2 = vpop.f32.mrb[49].mxu0  ;;  %v2897_v55 = vadd.f32 (!%p3350_p6), %v4540_v23, %v2826_v41  ;;  %v2898_v21 = vadd.f32 (!%p3350_p6), %v4540_v23, %v2827_v12 }
 0x219   : > { %v2535_v28 = vpop.f32.mrb[50].mxu0  ;;  %v2830_v2 = vld [vmem:[#allocation2 + $0x30] sm:$0xff] (!%p3350_p6) }
 0x21a   : > { %2780 = vst.msk [vmem:[#allocation2 + $0xc0] sm:$0xff] %vm2755_vm6, %v2715_v63  ;;  %v2716_v7 = vadd.f32 %v2535_v28, %v2226_v25  ;;  %v2537_v26 = vpop.f32.mrb[51].mxu0  ;;  %v2668_v20 = vpop.f32.mrb[52].mxu1  ;;  %v2899_v25 = vadd.f32 (!%p3350_p6), %v4540_v23, %v2828_v5  ;;  %v2829_v63 = vld [vmem:[#allocation2 + $0x28] sm:$0xff] (!%p3350_p6)  ;;  %v2959_v28 = vmax.f32 (!%p3350_p6), %v2895_v47, 0.0 }
 0x21b   : > { %v2749_v16 = vadd.f32 %v2668_v20, %v2259_v52  ;;  %v2670_v29 = vpop.f32.mrb[53].mxu1  ;;  %v2831_v52 = vld [vmem:[#allocation2 + $0x38] sm:$0xff] (!%p3350_p6)  ;;  %v2900_v26 = vadd.f32 (!%p3350_p6), %v4540_v23, %v2829_v63  ;;  %v2901_v20 = vadd.f32 (!%p3350_p6), %v4540_v23, %v2830_v2 }
 0x21c   : > { %2781 = vst.msk [vmem:[#allocation2 + $0xc8] sm:$0xff] %vm2755_vm6, %v2716_v7  ;;  %v2671_v22 = vpop.f32.mrb[54].mxu1  ;;  %v2960_v7 = vmax.f32 (!%p3350_p6), %v2896_v32, 0.0  ;;  %v2834_v29 = vld [vmem:[#allocation2 + $0x50] sm:$0xff] (!%p3350_p6)  ;;  %3023 = vst.msk [vmem:[#allocation3] sm:$0xff] (!%p3350_p6), %vm2755_vm6, %v2959_v28 }
 0x21d   : > { %2814 = vst.msk [vmem:[#allocation2 + $0x1d0] sm:$0xff] %vm2755_vm6, %v2749_v16  ;;  %v2750_v6 = vadd.f32 %v2671_v22, %v2260_v39  ;;  %v2673_v49 = vpop.f32.mrb[55].mxu1  ;;  %v2832_v39 = vld [vmem:[#allocation2 + $0x40] sm:$0xff] (!%p3350_p6)  ;;  %v2833_v16 = vld [vmem:[#allocation2 + $0x48] sm:$0xff] (!%p3350_p6)  ;;  %v2961_v22 = vmax.f32 (!%p3350_p6), %v2897_v55, 0.0 }
 0x21e   : > { %v2902_v49 = vadd.f32 (!%p3350_p6), %v4540_v23, %v2831_v52  ;;  %3024 = vst.msk [vmem:[#allocation3 + $0x8] sm:$0xff] (!%p3350_p6), %vm2755_vm6, %v2960_v7 }
 0x21f   : > { %v2540_v13 = vpop.f32.mrb[52].mxu0  ;;  %2815 = vst.msk [vmem:[#allocation2 + $0x1d8] sm:$0xff] %vm2755_vm6, %v2750_v6  ;;  %v2963_v6 = vmax.f32 (!%p3350_p6), %v2899_v25, 0.0  ;;  %3025 = vst.msk [vmem:[#allocation3 + $0x10] sm:$0xff] (!%p3350_p6), %vm2755_vm6, %v2961_v22 }
 0x220   : > { %v2717_v45 = vadd.f32 %v2540_v13, %v2227_v8  ;;  %v2542_v1 = vpop.f32.mrb[53].mxu0  ;;  %v2962_v8 = vmax.f32 (!%p3350_p6), %v2898_v21, 0.0  ;;  %v2835_v13 = vld [vmem:[#allocation2 + $0x58] sm:$0xff] (!%p3350_p6) }
 0x221   : > { %v2543_v53 = vpop.f32.mrb[54].mxu0  ;;  %v2964_v1 = vmax.f32 (!%p3350_p6), %v2900_v26, 0.0  ;;  %3027 = vst.msk [vmem:[#allocation3 + $0x20] sm:$0xff] (!%p3350_p6), %vm2755_vm6, %v2963_v6  ;;  %v2856_v6 = vld [vmem:[#allocation2 + $0x100] sm:$0xff] (!%p3350_p6) }
 0x222   : > { %2782 = vst.msk [vmem:[#allocation2 + $0xd0] sm:$0xff] %vm2755_vm6, %v2717_v45  ;;  %v2718_v46 = vadd.f32 %v2543_v53, %v2228_v9  ;;  %v2545_v10 = vpop.f32.mrb[55].mxu0  ;;  %v2836_v9 = vld [vmem:[#allocation2 + $0x60] sm:$0xff] (!%p3350_p6)  ;;  %v2837_v45 = vld [vmem:[#allocation2 + $0x68] sm:$0xff] (!%p3350_p6)  ;;  %v2965_v53 = vmax.f32 (!%p3350_p6), %v2901_v20, 0.0  ;;  %3026 = vst.msk [vmem:[#allocation3 + $0x18] sm:$0xff] (!%p3350_p6), %vm2755_vm6, %v2962_v8 }
 0x223   : > { %v2904_v10 = vadd.f32 (!%p3350_p6), %v4540_v23, %v2833_v16  ;;  %3028 = vst.msk [vmem:[#allocation3 + $0x28] sm:$0xff] (!%p3350_p6), %vm2755_vm6, %v2964_v1 }
 0x224   : > { %2783 = vst.msk [vmem:[#allocation2 + $0xd8] sm:$0xff] %vm2755_vm6, %v2718_v46  ;;  %v2903_v46 = vadd.f32 (!%p3350_p6), %v4540_v23, %v2832_v39  ;;  %3029 = vst.msk [vmem:[#allocation3 + $0x30] sm:$0xff] (!%p3350_p6), %vm2755_vm6, %v2965_v53  ;;  %v2858_v53 = vld [vmem:[#allocation2 + $0x110] sm:$0xff] (!%p3350_p6) }
 0x226   : > { %v2676_v57 = vpop.f32.mrb[56].mxu1 }
 0x227   : > { %v2751_v14 = vadd.f32 %v2676_v57, %v2261_v56  ;;  %v2678_v44 = vpop.f32.mrb[57].mxu1  ;;  %v2838_v56 = vld [vmem:[#allocation2 + $0x70] sm:$0xff] (!%p3350_p6)  ;;  %v2839_v57 = vld [vmem:[#allocation2 + $0x78] sm:$0xff] (!%p3350_p6) }
 0x228   : > { %v2679_v19 = vpop.f32.mrb[58].mxu1  ;;  %v2548_v38 = vpop.f32.mrb[56].mxu0  ;;  %v2907_v44 = vadd.f32 (!%p3350_p6), %v4540_v23, %v2836_v9 }
 0x229   : > { %2816 = vst.msk [vmem:[#allocation2 + $0x1e0] sm:$0xff] %vm2755_vm6, %v2751_v14  ;;  %v2752_v34 = vadd.f32 %v2679_v19, %v2262_v54  ;;  %v2681_v31 = vpop.f32.mrb[59].mxu1  ;;  %v2719_v60 = vadd.f32 %v2548_v38, %v2229_v62  ;;  %v2550_v3 = vpop.f32.mrb[57].mxu0  ;;  %v2966_v54 = vmax.f32 (!%p3350_p6), %v2902_v49, 0.0  ;;  %v2905_v62 = vadd.f32 (!%p3350_p6), %v4540_v23, %v2834_v29  ;;  %v2840_v19 = vld [vmem:[#allocation2 + $0x80] sm:$0xff] (!%p3350_p6)  ;;  %v2841_v38 = vld [vmem:[#allocation2 + $0x88] sm:$0xff] (!%p3350_p6) }
 0x22a   : > { %v2551_v58 = vpop.f32.mrb[58].mxu0  ;;  %v2906_v14 = vadd.f32 (!%p3350_p6), %v4540_v23, %v2835_v13  ;;  %v2908_v31 = vadd.f32 (!%p3350_p6), %v4540_v23, %v2837_v45  ;;  %v2842_v3 = vld [vmem:[#allocation2 + $0x90] sm:$0xff] (!%p3350_p6)  ;;  %v2857_v49 = vld [vmem:[#allocation2 + $0x108] sm:$0xff] (!%p3350_p6) }
 0x22b   : > { %2817 = vst.msk [vmem:[#allocation2 + $0x1e8] sm:$0xff] %vm2755_vm6, %v2752_v34  ;;  %2784 = vst.msk [vmem:[#allocation2 + $0xe0] sm:$0xff] %vm2755_vm6, %v2719_v60  ;;  %v2720_v33 = vadd.f32 %v2551_v58, %v2230_v48  ;;  %v2553_v61 = vpop.f32.mrb[59].mxu0  ;;  %v2967_v48 = vmax.f32 (!%p3350_p6), %v2903_v46, 0.0  ;;  %v2968_v34 = vmax.f32 (!%p3350_p6), %v2904_v10, 0.0  ;;  %v2909_v60 = vadd.f32 (!%p3350_p6), %v4540_v23, %v2838_v56  ;;  %v2843_v58 = vld [vmem:[#allocation2 + $0x98] sm:$0xff] (!%p3350_p6) }
 0x22c   : > { %3030 = vst.msk [vmem:[#allocation3 + $0x38] sm:$0xff] (!%p3350_p6), %vm2755_vm6, %v2966_v54  ;;  %v2969_v61 = vmax.f32 (!%p3350_p6), %v2905_v62, 0.0  ;;  %v2850_v41 = vld [vmem:[#allocation2 + $0xd0] sm:$0xff] (!%p3350_p6)  ;;  %v2851_v12 = vld [vmem:[#allocation2 + $0xd8] sm:$0xff] (!%p3350_p6)  ;;  %v2860_v10 = vld [vmem:[#allocation2 + $0x120] sm:$0xff] (!%p3350_p6) }
 0x22d   : > { %2785 = vst.msk [vmem:[#allocation2 + $0xe8] sm:$0xff] %vm2755_vm6, %v2720_v33  ;;  %v2844_v33 = vld [vmem:[#allocation2 + $0xa0] sm:$0xff] (!%p3350_p6)  ;;  %3031 = vst.msk [vmem:[#allocation3 + $0x40] sm:$0xff] (!%p3350_p6), %vm2755_vm6, %v2967_v48  ;;  %v2921_v29 = vadd.f32 (!%p3350_p6), %v4540_v23, %v2850_v41  ;;  %v2922_v22 = vadd.f32 (!%p3350_p6), %v4540_v23, %v2851_v12  ;;  %v2859_v46 = vld [vmem:[#allocation2 + $0x118] sm:$0xff] (!%p3350_p6)  ;;  %v2927_v48 = vadd.f32 (!%p3350_p6), %v4540_v23, %v2856_v6 }
 0x22e   : > { %3032 = vst.msk [vmem:[#allocation3 + $0x48] sm:$0xff] (!%p3350_p6), %vm2755_vm6, %v2968_v34  ;;  %3033 = vst.msk [vmem:[#allocation3 + $0x50] sm:$0xff] (!%p3350_p6), %vm2755_vm6, %v2969_v61  ;;  %v2928_v34 = vadd.f32 (!%p3350_p6), %v4540_v23, %v2857_v49  ;;  %v2864_v61 = vld [vmem:[#allocation2 + $0x140] sm:$0xff] (!%p3350_p6) }
 0x22f   : > { %v2985_v56 = vmax.f32 (!%p3350_p6), %v2921_v29, 0.0 }
 0x231   : > { %3049 = vst.msk [vmem:[#allocation3 + $0xd0] sm:$0xff] (!%p3350_p6), %vm2755_vm6, %v2985_v56  ;;  %v2880_v56 = vld [vmem:[#allocation2 + $0x1c0] sm:$0xff] (!%p3350_p6) }
 0x232   : > { %v2852_v5 = vld [vmem:[#allocation2 + $0xe0] sm:$0xff] (!%p3350_p6) }
 0x233   : > { %v2923_v8 = vadd.f32 (!%p3350_p6), %v4540_v23, %v2852_v5 }
 0x234   : > { %v2684_v42 = vpop.f32.mrb[60].mxu1  ;;  %v2853_v2 = vld [vmem:[#allocation2 + $0xe8] sm:$0xff] (!%p3350_p6) }
 0x235   : > { %v2753_v35 = vadd.f32 %v2684_v42, %v2263_v37  ;;  %v2686_v30 = vpop.f32.mrb[61].mxu1  ;;  %v2970_v37 = vmax.f32 (!%p3350_p6), %v2906_v14, 0.0  ;;  %v2971_v42 = vmax.f32 (!%p3350_p6), %v2907_v44, 0.0  ;;  %v2924_v45 = vadd.f32 (!%p3350_p6), %v4540_v23, %v2853_v2  ;;  %v2861_v14 = vld [vmem:[#allocation2 + $0x128] sm:$0xff] (!%p3350_p6)  ;;  %v2862_v44 = vld [vmem:[#allocation2 + $0x130] sm:$0xff] (!%p3350_p6) }
 0x236   : > { %v2687_v4 = vpop.f32.mrb[62].mxu1  ;;  %2823 = sbr.rel (%p3350_p6) target bundleno = 596 (0x254), region = 44  ;;  %v2972_v30 = vmax.f32 (!%p3350_p6), %v2908_v31, 0.0  ;;  %v2987_v54 = vmax.f32 (!%p3350_p6), %v2923_v8, 0.0  ;;  %v2863_v31 = vld [vmem:[#allocation2 + $0x138] sm:$0xff] (!%p3350_p6)  ;;  %v2878_v8 = vld [vmem:[#allocation2 + $0x1b0] sm:$0xff] (!%p3350_p6) }
 0x237   : > { %v2556_v40 = vpop.f32.mrb[60].mxu0  ;;  %2818 = vst.msk [vmem:[#allocation2 + $0x1f0] sm:$0xff] %vm2755_vm6, %v2753_v35  ;;  %v2754_v36 = vadd.f32 %v2687_v4, %v2264_v17  ;;  %v2689_v50 = vpop.f32.mrb[63].mxu1  ;;  %v2910_v17 = vadd.f32 (!%p3350_p6), %v4540_v23, %v2839_v57  ;;  %v2846_v35 = vld [vmem:[#allocation2 + $0xb0] sm:$0xff] (!%p3350_p6)  ;;  %v2973_v4 = vmax.f32 (!%p3350_p6), %v2909_v60, 0.0  ;;  %3034 = vst.msk [vmem:[#allocation3 + $0x58] sm:$0xff] (!%p3350_p6), %vm2755_vm6, %v2970_v37 }
 0x238   : > { %v2721_v59 = vadd.f32 %v2556_v40, %v2231_v24  ;;  %v2558_v18 = vpop.f32.mrb[61].mxu0  ;;  %v2845_v24 = vld [vmem:[#allocation2 + $0xa8] sm:$0xff] (!%p3350_p6)  ;;  %v2911_v40 = vadd.f32 (!%p3350_p6), %v4540_v23, %v2840_v19  ;;  %3035 = vst.msk [vmem:[#allocation3 + $0x60] sm:$0xff] (!%p3350_p6), %vm2755_vm6, %v2971_v42  ;;  %3036 = vst.msk [vmem:[#allocation3 + $0x68] sm:$0xff] (!%p3350_p6), %vm2755_vm6, %v2972_v30  ;;  %v2917_v32 = vadd.f32 (!%p3350_p6), %v4540_v23, %v2846_v35  ;;  %v2986_v57 = vmax.f32 (!%p3350_p6), %v2922_v22, 0.0  ;;  %v2866_v30 = vld [vmem:[#allocation2 + $0x150] sm:$0xff] (!%p3350_p6) }
 0x239   : > { %v2559_v27 = vpop.f32.mrb[62].mxu0  ;;  %2819 = vst.msk [vmem:[#allocation2 + $0x1f8] sm:$0xff] %vm2755_vm6, %v2754_v36  ;;  %v2847_v36 = vld [vmem:[#allocation2 + $0xb8] sm:$0xff] (!%p3350_p6)  ;;  %v2974_v50 = vmax.f32 (!%p3350_p6), %v2910_v17, 0.0  ;;  %v2914_v18 = vadd.f32 (!%p3350_p6), %v4540_v23, %v2843_v58  ;;  %3037 = vst.msk [vmem:[#allocation3 + $0x70] sm:$0xff] (!%p3350_p6), %vm2755_vm6, %v2973_v4  ;;  %v2916_v47 = vadd.f32 (!%p3350_p6), %v4540_v23, %v2845_v24  ;;  %v2988_v19 = vmax.f32 (!%p3350_p6), %v2924_v45, 0.0 }
 0x23a   : > { %2786 = vst.msk [vmem:[#allocation2 + $0xf0] sm:$0xff] %vm2755_vm6, %v2721_v59  ;;  %v2722_v43 = vadd.f32 %v2559_v27, %v2232_v15  ;;  %v2561_v51 = vpop.f32.mrb[63].mxu0  ;;  %v2912_v15 = vadd.f32 (!%p3350_p6), %v4540_v23, %v2841_v38  ;;  %v2913_v59 = vadd.f32 (!%p3350_p6), %v4540_v23, %v2842_v3  ;;  %v2915_v27 = vadd.f32 (!%p3350_p6), %v4540_v23, %v2844_v33  ;;  %v2865_v37 = vld [vmem:[#allocation2 + $0x148] sm:$0xff] (!%p3350_p6)  ;;  %v2867_v4 = vld [vmem:[#allocation2 + $0x158] sm:$0xff] (!%p3350_p6) }
 0x23b   : > { %v2849_v51 = vld [vmem:[#allocation2 + $0xc8] sm:$0xff] (!%p3350_p6)  ;;  %v2975_v0 = vmax.f32 (!%p3350_p6), %v2911_v40, 0.0  ;;  %3038 = vst.msk [vmem:[#allocation3 + $0x78] sm:$0xff] (!%p3350_p6), %vm2755_vm6, %v2974_v50  ;;  %v2978_v21 = vmax.f32 (!%p3350_p6), %v2914_v18, 0.0  ;;  %v2918_v63 = vadd.f32 (!%p3350_p6), %v4540_v23, %v2847_v36  ;;  %v2980_v28 = vmax.f32 (!%p3350_p6), %v2916_v47, 0.0  ;;  %3050 = vst.msk [vmem:[#allocation3 + $0xd8] sm:$0xff] (!%p3350_p6), %vm2755_vm6, %v2986_v57 }
 0x23c   : > { %2787 = vst.msk [vmem:[#allocation2 + $0xf8] sm:$0xff] %vm2755_vm6, %v2722_v43  ;;  %v2848_v43 = vld [vmem:[#allocation2 + $0xc0] sm:$0xff] (!%p3350_p6)  ;;  %v2976_v11 = vmax.f32 (!%p3350_p6), %v2912_v15, 0.0  ;;  %v2977_v55 = vmax.f32 (!%p3350_p6), %v2913_v59, 0.0  ;;  %v2979_v25 = vmax.f32 (!%p3350_p6), %v2915_v27, 0.0  ;;  %v2981_v7 = vmax.f32 (!%p3350_p6), %v2917_v32, 0.0 }
 0x23d   : > { %3039 = vst.msk [vmem:[#allocation3 + $0x80] sm:$0xff] %vm2755_vm6, %v2975_v0  ;;  %v2919_v26 = vadd.f32 %v4540_v23, %v2848_v43  ;;  %v2920_v20 = vadd.f32 %v4540_v23, %v2849_v51  ;;  %3042 = vst.msk [vmem:[#allocation3 + $0x98] sm:$0xff] %vm2755_vm6, %v2978_v21  ;;  %v2982_v16 = vmax.f32 %v2918_v63, 0.0  ;;  %v2929_v3 = vadd.f32 %v4540_v23, %v2858_v53  ;;  %v2868_v40 = vld [vmem:[#allocation2 + $0x160] sm:$0xff]  ;;  %v2869_v18 = vld [vmem:[#allocation2 + $0x168] sm:$0xff] }
 0x23e   : > { %3040 = vst.msk [vmem:[#allocation3 + $0x88] sm:$0xff] %vm2755_vm6, %v2976_v11  ;;  %3041 = vst.msk [vmem:[#allocation3 + $0x90] sm:$0xff] %vm2755_vm6, %v2977_v55  ;;  %v2930_v58 = vadd.f32 %v4540_v23, %v2859_v46  ;;  %v2931_v33 = vadd.f32 %v4540_v23, %v2860_v10  ;;  %v2991_v42 = vmax.f32 %v2927_v48, 0.0  ;;  %v2992_v17 = vmax.f32 %v2928_v34, 0.0  ;;  %v2870_v27 = vld [vmem:[#allocation2 + $0x170] sm:$0xff]  ;;  %v2871_v47 = vld [vmem:[#allocation2 + $0x178] sm:$0xff] }
 0x23f   : > { %3043 = vst.msk [vmem:[#allocation3 + $0xa0] sm:$0xff] %vm2755_vm6, %v2979_v25  ;;  %3044 = vst.msk [vmem:[#allocation3 + $0xa8] sm:$0xff] %vm2755_vm6, %v2980_v28  ;;  %v2983_v13 = vmax.f32 %v2919_v26, 0.0  ;;  %v2984_v9 = vmax.f32 %v2920_v20, 0.0  ;;  %v2932_v24 = vadd.f32 %v4540_v23, %v2861_v14  ;;  %v2933_v35 = vadd.f32 %v4540_v23, %v2862_v44  ;;  %v2872_v55 = vld [vmem:[#allocation2 + $0x180] sm:$0xff]  ;;  %v2873_v21 = vld [vmem:[#allocation2 + $0x188] sm:$0xff] }
 0x240   : > { %3045 = vst.msk [vmem:[#allocation3 + $0xb0] sm:$0xff] %vm2755_vm6, %v2981_v7  ;;  %3046 = vst.msk [vmem:[#allocation3 + $0xb8] sm:$0xff] %vm2755_vm6, %v2982_v16  ;;  %v2993_v15 = vmax.f32 %v2929_v3, 0.0  ;;  %v2994_v36 = vmax.f32 %v2930_v58, 0.0  ;;  %v2995_v50 = vmax.f32 %v2931_v33, 0.0  ;;  %v2934_v59 = vadd.f32 %v4540_v23, %v2863_v31  ;;  %v2874_v28 = vld [vmem:[#allocation2 + $0x190] sm:$0xff] }
 0x241   : > { %v2854_v52 = vld [vmem:[#allocation2 + $0xf0] sm:$0xff]  ;;  %3047 = vst.msk [vmem:[#allocation3 + $0xc0] sm:$0xff] %vm2755_vm6, %v2983_v13  ;;  %3048 = vst.msk [vmem:[#allocation3 + $0xc8] sm:$0xff] %vm2755_vm6, %v2984_v9  ;;  %v2996_v43 = vmax.f32 %v2932_v24, 0.0  ;;  %v2997_v51 = vmax.f32 %v2933_v35, 0.0  ;;  %v2935_v0 = vadd.f32 %v4540_v23, %v2864_v61  ;;  %v2936_v11 = vadd.f32 %v4540_v23, %v2865_v37  ;;  %v2875_v7 = vld [vmem:[#allocation2 + $0x198] sm:$0xff] }
 0x242   : > { %v2925_v1 = vadd.f32 %v4540_v23, %v2854_v52  ;;  %3051 = vst.msk [vmem:[#allocation3 + $0xe0] sm:$0xff] %vm2755_vm6, %v2987_v54  ;;  %3052 = vst.msk [vmem:[#allocation3 + $0xe8] sm:$0xff] %vm2755_vm6, %v2988_v19  ;;  %v2998_v32 = vmax.f32 %v2934_v59, 0.0  ;;  %v2937_v41 = vadd.f32 %v4540_v23, %v2866_v30  ;;  %v2938_v12 = vadd.f32 %v4540_v23, %v2867_v4  ;;  %v2876_v26 = vld [vmem:[#allocation2 + $0x1a0] sm:$0xff]  ;;  %v2877_v22 = vld [vmem:[#allocation2 + $0x1a8] sm:$0xff] }
 0x243   : > { %v2855_v39 = vld [vmem:[#allocation2 + $0xf8] sm:$0xff]  ;;  %3055 = vst.msk [vmem:[#allocation3 + $0x100] sm:$0xff] %vm2755_vm6, %v2991_v42  ;;  %3056 = vst.msk [vmem:[#allocation3 + $0x108] sm:$0xff] %vm2755_vm6, %v2992_v17  ;;  %v2939_v5 = vadd.f32 %v4540_v23, %v2868_v40  ;;  %v2999_v25 = vmax.f32 %v2935_v0, 0.0  ;;  %v3000_v63 = vmax.f32 %v2936_v11, 0.0  ;;  %v2940_v2 = vadd.f32 %v4540_v23, %v2869_v18  ;;  %v2881_v57 = vld [vmem:[#allocation2 + $0x1c8] sm:$0xff] }
 0x244   : > { %v2926_v62 = vadd.f32 %v4540_v23, %v2855_v39  ;;  %v2989_v38 = vmax.f32 %v2925_v1, 0.0  ;;  %3057 = vst.msk [vmem:[#allocation3 + $0x110] sm:$0xff] %vm2755_vm6, %v2993_v15  ;;  %3058 = vst.msk [vmem:[#allocation3 + $0x118] sm:$0xff] %vm2755_vm6, %v2994_v36  ;;  %v2941_v52 = vadd.f32 %v4540_v23, %v2870_v27  ;;  %v3001_v20 = vmax.f32 %v2937_v41, 0.0  ;;  %v2879_v45 = vld [vmem:[#allocation2 + $0x1b8] sm:$0xff]  ;;  %v2882_v19 = vld [vmem:[#allocation2 + $0x1d0] sm:$0xff] }
 0x245   : > { %3059 = vst.msk [vmem:[#allocation3 + $0x120] sm:$0xff] %vm2755_vm6, %v2995_v50  ;;  %3060 = vst.msk [vmem:[#allocation3 + $0x128] sm:$0xff] %vm2755_vm6, %v2996_v43  ;;  %v3002_v39 = vmax.f32 %v2938_v12, 0.0  ;;  %v3003_v16 = vmax.f32 %v2939_v5, 0.0  ;;  %v2942_v29 = vadd.f32 %v4540_v23, %v2871_v47  ;;  %v3004_v6 = vmax.f32 %v2940_v2, 0.0  ;;  %v2884_v48 = vld [vmem:[#allocation2 + $0x1e0] sm:$0xff] }
 0x246   : > { %v2990_v60 = vmax.f32 %v2926_v62, 0.0  ;;  %3053 = vst.msk [vmem:[#allocation3 + $0xf0] sm:$0xff] %vm2755_vm6, %v2989_v38  ;;  %3061 = vst.msk [vmem:[#allocation3 + $0x130] sm:$0xff] %vm2755_vm6, %v2997_v51  ;;  %v3005_v49 = vmax.f32 %v2941_v52, 0.0  ;;  %v2943_v13 = vadd.f32 %v4540_v23, %v2872_v55  ;;  %v2944_v9 = vadd.f32 %v4540_v23, %v2873_v21  ;;  %v2883_v38 = vld [vmem:[#allocation2 + $0x1d8] sm:$0xff]  ;;  %v2885_v58 = vld [vmem:[#allocation2 + $0x1e8] sm:$0xff] }
 0x247   : > { %3062 = vst.msk [vmem:[#allocation3 + $0x138] sm:$0xff] %vm2755_vm6, %v2998_v32  ;;  %3063 = vst.msk [vmem:[#allocation3 + $0x140] sm:$0xff] %vm2755_vm6, %v2999_v25  ;;  %v3006_v1 = vmax.f32 %v2942_v29, 0.0  ;;  %v2945_v53 = vadd.f32 %v4540_v23, %v2874_v28  ;;  %v2946_v46 = vadd.f32 %v4540_v23, %v2875_v7  ;;  %v2947_v10 = vadd.f32 %v4540_v23, %v2876_v26  ;;  %v2886_v33 = vld [vmem:[#allocation2 + $0x1f0] sm:$0xff]  ;;  %v2887_v24 = vld [vmem:[#allocation2 + $0x1f8] sm:$0xff] }
 0x248   : > { %3054 = vst.msk [vmem:[#allocation3 + $0xf8] sm:$0xff] %vm2755_vm6, %v2990_v60  ;;  %3064 = vst.msk [vmem:[#allocation3 + $0x148] sm:$0xff] %vm2755_vm6, %v3000_v63  ;;  %v3007_v54 = vmax.f32 %v2943_v13, 0.0  ;;  %v3008_v62 = vmax.f32 %v2944_v9, 0.0  ;;  %v2948_v14 = vadd.f32 %v4540_v23, %v2877_v22  ;;  %v2949_v44 = vadd.f32 %v4540_v23, %v2878_v8 }
 0x249   : > { %3065 = vst.msk [vmem:[#allocation3 + $0x150] sm:$0xff] %vm2755_vm6, %v3001_v20  ;;  %3066 = vst.msk [vmem:[#allocation3 + $0x158] sm:$0xff] %vm2755_vm6, %v3002_v39  ;;  %v3009_v34 = vmax.f32 %v2945_v53, 0.0  ;;  %v3010_v31 = vmax.f32 %v2946_v46, 0.0  ;;  %v3011_v60 = vmax.f32 %v2947_v10, 0.0  ;;  %v2950_v3 = vadd.f32 %v4540_v23, %v2879_v45 }
 0x24a   : > { %3067 = vst.msk [vmem:[#allocation3 + $0x160] sm:$0xff] %vm2755_vm6, %v3003_v16  ;;  %3068 = vst.msk [vmem:[#allocation3 + $0x168] sm:$0xff] %vm2755_vm6, %v3004_v6  ;;  %v3012_v61 = vmax.f32 %v2948_v14, 0.0  ;;  %v3013_v37 = vmax.f32 %v2949_v44, 0.0  ;;  %v2951_v42 = vadd.f32 %v4540_v23, %v2880_v56  ;;  %v2952_v17 = vadd.f32 %v4540_v23, %v2881_v57 }
 0x24b   : > { %3069 = vst.msk [vmem:[#allocation3 + $0x170] sm:$0xff] %vm2755_vm6, %v3005_v49  ;;  %3070 = vst.msk [vmem:[#allocation3 + $0x178] sm:$0xff] %vm2755_vm6, %v3006_v1  ;;  %v3014_v35 = vmax.f32 %v2950_v3, 0.0  ;;  %v2953_v30 = vadd.f32 %v4540_v23, %v2882_v19  ;;  %v2954_v4 = vadd.f32 %v4540_v23, %v2883_v38  ;;  %v2955_v40 = vadd.f32 %v4540_v23, %v2884_v48 }
 0x24c   : > { %3071 = vst.msk [vmem:[#allocation3 + $0x180] sm:$0xff] %vm2755_vm6, %v3007_v54  ;;  %3072 = vst.msk [vmem:[#allocation3 + $0x188] sm:$0xff] %vm2755_vm6, %v3008_v62  ;;  %v3015_v15 = vmax.f32 %v2951_v42, 0.0  ;;  %v3016_v36 = vmax.f32 %v2952_v17, 0.0  ;;  %v2956_v50 = vadd.f32 %v4540_v23, %v2885_v58  ;;  %v2957_v59 = vadd.f32 %v4540_v23, %v2886_v33 }
 0x24d   : > { %3073 = vst.msk [vmem:[#allocation3 + $0x190] sm:$0xff] %vm2755_vm6, %v3009_v34  ;;  %3074 = vst.msk [vmem:[#allocation3 + $0x198] sm:$0xff] %vm2755_vm6, %v3010_v31  ;;  %v3017_v18 = vmax.f32 %v2953_v30, 0.0  ;;  %v3018_v27 = vmax.f32 %v2954_v4, 0.0  ;;  %v3019_v43 = vmax.f32 %v2955_v40, 0.0  ;;  %v2958_v51 = vadd.f32 %v4540_v23, %v2887_v24 }
 0x24e   : > { %3075 = vst.msk [vmem:[#allocation3 + $0x1a0] sm:$0xff] %vm2755_vm6, %v3011_v60  ;;  %3076 = vst.msk [vmem:[#allocation3 + $0x1a8] sm:$0xff] %vm2755_vm6, %v3012_v61  ;;  %v3020_v0 = vmax.f32 %v2956_v50, 0.0  ;;  %v3021_v11 = vmax.f32 %v2957_v59, 0.0 }
 0x24f   : > { %3077 = vst.msk [vmem:[#allocation3 + $0x1b0] sm:$0xff] %vm2755_vm6, %v3013_v37  ;;  %3078 = vst.msk [vmem:[#allocation3 + $0x1b8] sm:$0xff] %vm2755_vm6, %v3014_v35  ;;  %v3022_v47 = vmax.f32 %v2958_v51, 0.0 }
 0x250   : > { %3079 = vst.msk [vmem:[#allocation3 + $0x1c0] sm:$0xff] %vm2755_vm6, %v3015_v15  ;;  %3080 = vst.msk [vmem:[#allocation3 + $0x1c8] sm:$0xff] %vm2755_vm6, %v3016_v36 }
 0x251   : > { %3081 = vst.msk [vmem:[#allocation3 + $0x1d0] sm:$0xff] %vm2755_vm6, %v3017_v18  ;;  %3082 = vst.msk [vmem:[#allocation3 + $0x1d8] sm:$0xff] %vm2755_vm6, %v3018_v27 }
 0x252   : > { %3083 = vst.msk [vmem:[#allocation3 + $0x1e0] sm:$0xff] %vm2755_vm6, %v3019_v43  ;;  %3084 = vst.msk [vmem:[#allocation3 + $0x1e8] sm:$0xff] %vm2755_vm6, %v3020_v0 }
 0x253   : > { %3085 = vst.msk [vmem:[#allocation3 + $0x1f0] sm:$0xff] %vm2755_vm6, %v3021_v11  ;;  %3086 = vst.msk [vmem:[#allocation3 + $0x1f8] sm:$0xff] %vm2755_vm6, %v3022_v47 }
 0x254 PF: > { %p4672_p7 = scmp.eq.s32.totalorder %s3185_s18, 2  ;;  %s3482_s20 = smov [#allocation3]  }
 0x255   : > { %s3096_s21 = sshll.u32 %s3482_s20, 4  ;;  %s3097_s21 = int_to_ptr.vmem [resolvable:$true] %s3096_s21 }
 0x256   : > { %s3423_s22 = scalar_lea.vmem %s3097_s21, 8192  ;;  %p3430_p11 = scmp.lt.s32.totalorder %s3097_s21, %s3097_s21 }
 0x257   : > { %p3424_p8 = scmp.ne.s32.totalorder %s3097_s21, %s3423_s22  ;;  %p3431_p12 = scmp.lt.s32.totalorder %s3423_s22, %s3423_s22 }
 0x259   : > { %p3425_p9 = pnand %p3424_p8, %p4672_p7  ;;  %p3432_p13 = por %p3431_p12, %p3430_p11 }
 0x25b   : > { %p3426_p10 = pneg %p3425_p9 }
 0x25d   : > { %p3433_p0 = pnand %p3432_p13, %p3426_p10 }
 0x25f   : > { %3436 = shalt.err (!%p3433_p0)
}
 0x260   : > { %s3437_s18 = scalar_lea.hbm %s4711_s4, 8192 }
 0x261   : > { %p3438_p1 = scmp.ne.s32.totalorder %s4711_s4, %s3437_s18  ;;  %p3443_p4 = scmp.lt.u32.totalorder %s3437_s18, %s4711_s4 }
 0x263   : > { %p3439_p2 = pnand %p3438_p1, %p4672_p7 }
 0x265   : > { %p3440_p3 = pneg %p3439_p2 }
 0x267   : > { %p3445_p5 = pnand %p3443_p4, %p3440_p3 }
 0x269   : > { %3448 = shalt.err (!%p3445_p5)
}
 0x26a   : > { %s3483_s29 = smov 128   ;;  %s3484_s30 = smov 8  }
 0x26b   : > { %3377 = dma.vmem_to_hbm [thread:$0]  (%p4672_p7), %s3097_s21, 8192, %s4711_s4, [#allocation4], %s3483_s29, %s3483_s29, %s3484_s30  }
 0x26c   : > { %3462 = dma.done.wait (%p4672_p7), [#allocation4], 8192  }
 0x26d   : > { %3464 = vsyncadd (%p4672_p7), [#allocation4], 4294959104 }
 0x26e PF: > { %s15_s17 = sadd.s32 1, %s3475_s17   ;;  %s4713_s15 = smov %s3471_s16 }
 0x26f   : > { %p12_p6 = scmp.ge.s32.totalorder %s15_s17, 5   ;;  %s4714_s16 = smov %s4716_s19 }
 0x271   :  { %14 = sbr.rel (!%p12_p6) target bundleno = 2 (0x2), region = 78 }
 0x278   :  { %3112 = vsyncpa [#allocation4], 1 }
 0x279   :  { %3114 = vsyncpa [#allocation4 + $0x1], 1 }

</bundles_post_ra>
